<compile_context>
chip_gen: v7x
topology: tpu7x:2x2x1
jax: 0.10.0
libtpu: 0.0.40
codegen_flags: <defaults>
</compile_context>

<pallas_src>
import functools

import jax
import jax.numpy as jnp
from jax import lax
from jax.experimental import pallas as pl
from jax.experimental.pallas import tpu as pltpu


def _bottleneck_kernel(x_ref, w1_ref, b1_ref, w2_ref, b2_ref, w3_ref, b3_ref,
                       o_ref, pad_ref, *, H, W, planes, dilation):
    """One batch element: x_ref (1, H*W, Cin) -> o_ref (1, H*W, Cout)."""
    d = dilation
    hw = H * W

    x = x_ref[0]  # (HW, Cin) float32

    # ---- conv1 (1x1) [+ folded bn1] + relu:  (HW, Cin) @ (Cin, P) ----
    h1 = jnp.dot(x, w1_ref[...], preferred_element_type=jnp.float32,
                 precision=lax.Precision.HIGHEST)
    h1 = jnp.maximum(h1 + b1_ref[...], 0.0)

    # ---- conv2 (3x3, padding=dilation, dilation=dilation) [+ folded bn2] + relu
    # Zero-padded activation image lives in VMEM scratch; the conv becomes
    # 9 shifted (HW, P) @ (P, P) MXU matmuls.
    pad_ref[...] = jnp.zeros(pad_ref.shape, pad_ref.dtype)
    pad_ref[d:d + H, d:d + W, :] = h1.reshape(H, W, planes)

    acc = jnp.zeros((hw, planes), jnp.float32)
    for ky in range(3):
        for kx in range(3):
            win = pad_ref[ky * d:ky * d + H, kx * d:kx * d + W, :]  # (H, W, P)
            acc = acc + jnp.dot(win.reshape(hw, planes), w2_ref[ky * 3 + kx],
                                preferred_element_type=jnp.float32,
                                precision=lax.Precision.HIGHEST)
    h2 = jnp.maximum(acc + b2_ref[...], 0.0)

    # ---- conv3 (1x1) [+ folded bn3]:  (HW, P) @ (P, Cout) ----
    h3 = jnp.dot(h2, w3_ref[...], preferred_element_type=jnp.float32,
                 precision=lax.Precision.HIGHEST)
    h3 = h3 + b3_ref[...]

    # ---- residual add (identity = x since downsample is None) + relu ----
    o_ref[0] = jnp.maximum(h3 + x, 0.0).astype(o_ref.dtype)


def bottleneck_forward(x, params, stride=1, dilation=1, eps=1e-5):
    """Bottleneck forward.  x: (N, Cin, H, W) NCHW, PyTorch-layout params."""
    # TODO(synk): stride > 1 (and the downsample projection) not implemented.
    assert stride == 1, "only stride=1 / downsample=None is implemented"

    N, cin, H, W = x.shape
    w1 = params["conv1_w"]          # (P, Cin, 1, 1)
    w2 = params["conv2_w"]          # (P, P, 3, 3)
    w3 = params["conv3_w"]          # (4P, P, 1, 1)
    planes = w1.shape[0]
    cout = w3.shape[0]
    assert cout == cin, "downsample=None requires inplanes == planes * expansion"

    # Re-layout weights so the channel contraction is a lane-dense matmul,
    # then fold the inference-mode BatchNorm scale into the weight and keep a
    # per-channel bias:  bn(conv(x, W)) == conv(x, W * s) + (beta - mean * s).
    def fold_bn(w_mat, gamma, beta, mean, var):
        s = (gamma / jnp.sqrt(var + eps)).astype(jnp.float32)
        b = (beta - mean * s).reshape(1, -1).astype(jnp.float32)
        return w_mat * s, b                      # scale output-channel columns

    w1_mat = jnp.transpose(w1[:, :, 0, 0], (1, 0)).astype(jnp.float32)   # (Cin, P)
    w2_mat = jnp.transpose(w2, (2, 3, 1, 0)).astype(jnp.float32)         # (3,3,P,P)
    w3_mat = jnp.transpose(w3[:, :, 0, 0], (1, 0)).astype(jnp.float32)   # (P, Cout)

    w1_mat, b1 = fold_bn(w1_mat, *params["bn1"])
    w2_mat, b2 = fold_bn(w2_mat, *params["bn2"])
    w3_mat, b3 = fold_bn(w3_mat, *params["bn3"])
    w2_flat = w2_mat.reshape(9, planes, planes)                          # (9, P, P)

    # NCHW -> (N, H*W, C): channels on the lane axis.
    hw = H * W
    x_flat = jnp.transpose(x, (0, 2, 3, 1)).reshape(N, hw, cin).astype(jnp.float32)

    kernel = functools.partial(_bottleneck_kernel, H=H, W=W, planes=planes,
                               dilation=dilation)

    const2 = lambda shape: pl.BlockSpec(shape, lambda n: (0, 0))
    out_flat = pl.pallas_call(
        kernel,
        out_shape=jax.ShapeDtypeStruct((N, hw, cout), x.dtype),
        grid_spec=pltpu.PrefetchScalarGridSpec(
            num_scalar_prefetch=0,
            grid=(N,),
            in_specs=[
                pl.BlockSpec((1, hw, cin), lambda n: (n, 0, 0)),
                const2((cin, planes)),                                   # w1
                const2((1, planes)),                                     # b1
                pl.BlockSpec((9, planes, planes), lambda n: (0, 0, 0)),  # w2
                const2((1, planes)),                                     # b2
                const2((planes, cout)),                                  # w3
                const2((1, cout)),                                       # b3
            ],
            out_specs=pl.BlockSpec((1, hw, cout), lambda n: (n, 0, 0)),
            scratch_shapes=[
                pltpu.VMEM((H + 2 * dilation, W + 2 * dilation, planes),
                           jnp.float32),
            ],
        ),
        compiler_params=pltpu.CompilerParams(
            dimension_semantics=("parallel",),
            vmem_limit_bytes=32 * 1024 * 1024),
    )(x_flat, w1_mat, b1, w2_flat, b2, w3_mat, b3)

    return jnp.transpose(out_flat.reshape(N, H, W, cout), (0, 3, 1, 2))


def _reference_bottleneck(x, params, dilation=1, eps=1e-5):
    """Pure-JAX reference (lax convs, inference BN) for correctness check."""
    def conv(x, w, padding=0, dil=1):
        return lax.conv_general_dilated(
            x, w, window_strides=(1, 1),
            padding=((padding, padding), (padding, padding)),
            rhs_dilation=(dil, dil),
            dimension_numbers=("NCHW", "OIHW", "NCHW"),
            precision=lax.Precision.HIGHEST)

    def bn(x, gamma, beta, mean, var):
        s = gamma / jnp.sqrt(var + eps)
        return (x * s[None, :, None, None]
                + (beta - mean * s)[None, :, None, None])

    out = jax.nn.relu(bn(conv(x, params["conv1_w"]), *params["bn1"]))
    out = jax.nn.relu(bn(conv(out, params["conv2_w"], padding=dilation,
                              dil=dilation), *params["bn2"]))
    out = bn(conv(out, params["conv3_w"]), *params["bn3"])
    return jax.nn.relu(out + x)


if __name__ == "__main__":
    key = jax.random.PRNGKey(0)
    N, planes, H, W = 2, 16, 16, 16
    inplanes = planes * 4  # expansion = 4; downsample=None requires this.

    keys = jax.random.split(key, 8)
    x = jax.random.normal(keys[0], (N, inplanes, H, W), dtype=jnp.float32)

    def bn_params(k, c):
        k1, k2, k3, k4 = jax.random.split(k, 4)
        gamma = 1.0 + 0.1 * jax.random.normal(k1, (c,), jnp.float32)
        beta = 0.1 * jax.random.normal(k2, (c,), jnp.float32)
        mean = 0.1 * jax.random.normal(k3, (c,), jnp.float32)
        var = jnp.abs(1.0 + 0.1 * jax.random.normal(k4, (c,), jnp.float32))
        return (gamma, beta, mean, var)

    params = {
        "conv1_w": jax.random.normal(keys[1], (planes, inplanes, 1, 1),
                                     jnp.float32) / jnp.sqrt(inplanes),
        "bn1": bn_params(keys[2], planes),
        "conv2_w": jax.random.normal(keys[3], (planes, planes, 3, 3),
                                     jnp.float32) / jnp.sqrt(planes * 9.0),
        "bn2": bn_params(keys[4], planes),
        "conv3_w": jax.random.normal(keys[5], (planes * 4, planes, 1, 1),
                                     jnp.float32) / jnp.sqrt(planes),
        "bn3": bn_params(keys[6], planes * 4),
    }

    out = bottleneck_forward(x, params, stride=1, dilation=1)
    out = jax.block_until_ready(out)

    ref = _reference_bottleneck(x, params, dilation=1)
    assert out.shape == (N, inplanes, H, W), out.shape
    max_err = float(jnp.max(jnp.abs(out - ref)))
    assert jnp.allclose(out, ref, atol=2e-3, rtol=2e-3), f"mismatch {max_err}"

    print("KERNEL_OK")
</pallas_src>

<mosaic_0001>
module attributes {stable_mosaic.version = 11 : i64} {
  func.func @_bottleneck_kernel(%arg0: i32, %arg1: memref<1x256x64xf32, #tpu.memory_space<vmem>>, %arg2: memref<64x16xf32, #tpu.memory_space<vmem>>, %arg3: memref<1x16xf32, #tpu.memory_space<vmem>>, %arg4: memref<9x16x16xf32, #tpu.memory_space<vmem>>, %arg5: memref<1x16xf32, #tpu.memory_space<vmem>>, %arg6: memref<16x64xf32, #tpu.memory_space<vmem>>, %arg7: memref<1x64xf32, #tpu.memory_space<vmem>>, %arg8: memref<1x256x64xf32, #tpu.memory_space<vmem>>, %arg9: memref<18x18x16xf32, #tpu.memory_space<vmem>>) attributes {dimension_semantics = [#tpu.dimension_semantics<parallel>], iteration_bounds = array<i64: 2>, scalar_prefetch = 0 : i64, scratch_operands = 1 : i64, tpu.core_type = #tpu.core_type<tc>, window_params = [{transform_indices = @transform_0, window_bounds = array<i64: 1, 256, 64>}, {pipeline_mode = #tpu.pipeline_mode<synchronous>, transform_indices = @transform_1, window_bounds = array<i64: 64, 16>}, {pipeline_mode = #tpu.pipeline_mode<synchronous>, transform_indices = @transform_2, window_bounds = array<i64: 1, 16>}, {pipeline_mode = #tpu.pipeline_mode<synchronous>, transform_indices = @transform_3, window_bounds = array<i64: 9, 16, 16>}, {pipeline_mode = #tpu.pipeline_mode<synchronous>, transform_indices = @transform_4, window_bounds = array<i64: 1, 16>}, {pipeline_mode = #tpu.pipeline_mode<synchronous>, transform_indices = @transform_5, window_bounds = array<i64: 16, 64>}, {pipeline_mode = #tpu.pipeline_mode<synchronous>, transform_indices = @transform_6, window_bounds = array<i64: 1, 64>}, {transform_indices = @transform_7, window_bounds = array<i64: 1, 256, 64>}]} {
    %c0 = arith.constant 0 : index
    %c0_0 = arith.constant 0 : index
    %c0_1 = arith.constant 0 : index
    %0 = vector.load %arg1[%c0, %c0_0, %c0_1] : memref<1x256x64xf32, #tpu.memory_space<vmem>>, vector<1x256x64xf32>
    %1 = vector.shape_cast %0 : vector<1x256x64xf32> to vector<256x64xf32>
    %c0_2 = arith.constant 0 : index
    %c0_3 = arith.constant 0 : index
    %2 = vector.load %arg2[%c0_2, %c0_3] : memref<64x16xf32, #tpu.memory_space<vmem>>, vector<64x16xf32>
    %cst = arith.constant dense<0.000000e+00> : vector<256x16xf32>
    %3 = tpu.matmul %1, %2, %cst {dimension_numbers = #tpu.dot_dimension_numbers<[1], [0], [0], [1], [0, 0, 1, 1], [], []>, precision = #tpu.contract_precision<fp32>} : vector<256x64xf32>, vector<64x16xf32>, vector<256x16xf32> -> vector<256x16xf32>
    %c0_4 = arith.constant 0 : index
    %c0_5 = arith.constant 0 : index
    %4 = vector.load %arg3[%c0_4, %c0_5] : memref<1x16xf32, #tpu.memory_space<vmem>>, vector<1x16xf32>
    %5 = vector.broadcast %4 : vector<1x16xf32> to vector<256x16xf32>
    %6 = arith.addf %3, %5 : vector<256x16xf32>
    %cst_6 = arith.constant 0.000000e+00 : f32
    %7 = vector.broadcast %cst_6 : f32 to vector<256x16xf32>
    %8 = arith.maximumf %6, %7 : vector<256x16xf32>
    %cst_7 = arith.constant 0.000000e+00 : f32
    %9 = vector.broadcast %cst_7 : f32 to vector<18x18x16xf32>
    %c0_8 = arith.constant 0 : index
    %c0_9 = arith.constant 0 : index
    %c0_10 = arith.constant 0 : index
    %10 = vector.load %arg9[%c0_8, %c0_9, %c0_10] : memref<18x18x16xf32, #tpu.memory_space<vmem>>, vector<18x18x16xf32>
    tpu.vector_store %arg9[%c0_8, %c0_9, %c0_10], %9 {strides = array<i32>} : memref<18x18x16xf32, #tpu.memory_space<vmem>>, vector<18x18x16xf32>,
    %11 = vector.shape_cast %8 : vector<256x16xf32> to vector<16x16x16xf32>
    %c1 = arith.constant 1 : index
    %c1_11 = arith.constant 1 : index
    %c0_12 = arith.constant 0 : index
    %12 = vector.load %arg9[%c1, %c1_11, %c0_12] : memref<18x18x16xf32, #tpu.memory_space<vmem>>, vector<16x16x16xf32>
    tpu.vector_store %arg9[%c1, %c1_11, %c0_12], %11 {strides = array<i32>} : memref<18x18x16xf32, #tpu.memory_space<vmem>>, vector<16x16x16xf32>,
    %cst_13 = arith.constant 0.000000e+00 : f32
    %13 = vector.broadcast %cst_13 : f32 to vector<256x16xf32>
    %c0_14 = arith.constant 0 : index
    %c0_15 = arith.constant 0 : index
    %c0_16 = arith.constant 0 : index
    %14 = vector.load %arg9[%c0_14, %c0_15, %c0_16] : memref<18x18x16xf32, #tpu.memory_space<vmem>>, vector<16x16x16xf32>
    %15 = vector.shape_cast %14 : vector<16x16x16xf32> to vector<256x16xf32>
    %c0_17 = arith.constant 0 : index
    %c0_18 = arith.constant 0 : index
    %c0_19 = arith.constant 0 : index
    %16 = vector.load %arg4[%c0_17, %c0_18, %c0_19] : memref<9x16x16xf32, #tpu.memory_space<vmem>>, vector<1x16x16xf32>
    %17 = vector.shape_cast %16 : vector<1x16x16xf32> to vector<16x16xf32>
    %cst_20 = arith.constant dense<0.000000e+00> : vector<256x16xf32>
    %18 = tpu.matmul %15, %17, %cst_20 {dimension_numbers = #tpu.dot_dimension_numbers<[1], [0], [0], [1], [0, 0, 1, 1], [], []>, precision = #tpu.contract_precision<fp32>} : vector<256x16xf32>, vector<16x16xf32>, vector<256x16xf32> -> vector<256x16xf32>
    %19 = arith.addf %13, %18 : vector<256x16xf32>
    %c0_21 = arith.constant 0 : index
    %c1_22 = arith.constant 1 : index
    %c0_23 = arith.constant 0 : index
    %20 = vector.load %arg9[%c0_21, %c1_22, %c0_23] : memref<18x18x16xf32, #tpu.memory_space<vmem>>, vector<16x16x16xf32>
    %21 = vector.shape_cast %20 : vector<16x16x16xf32> to vector<256x16xf32>
    %c1_24 = arith.constant 1 : index
    %c0_25 = arith.constant 0 : index
    %c0_26 = arith.constant 0 : index
    %22 = vector.load %arg4[%c1_24, %c0_25, %c0_26] : memref<9x16x16xf32, #tpu.memory_space<vmem>>, vector<1x16x16xf32>
    %23 = vector.shape_cast %22 : vector<1x16x16xf32> to vector<16x16xf32>
    %cst_27 = arith.constant dense<0.000000e+00> : vector<256x16xf32>
    %24 = tpu.matmul %21, %23, %cst_27 {dimension_numbers = #tpu.dot_dimension_numbers<[1], [0], [0], [1], [0, 0, 1, 1], [], []>, precision = #tpu.contract_precision<fp32>} : vector<256x16xf32>, vector<16x16xf32>, vector<256x16xf32> -> vector<256x16xf32>
    %25 = arith.addf %19, %24 : vector<256x16xf32>
    %c0_28 = arith.constant 0 : index
    %c2 = arith.constant 2 : index
    %c0_29 = arith.constant 0 : index
    %26 = vector.load %arg9[%c0_28, %c2, %c0_29] : memref<18x18x16xf32, #tpu.memory_space<vmem>>, vector<16x16x16xf32>
    %27 = vector.shape_cast %26 : vector<16x16x16xf32> to vector<256x16xf32>
    %c2_30 = arith.constant 2 : index
    %c0_31 = arith.constant 0 : index
    %c0_32 = arith.constant 0 : index
    %28 = vector.load %arg4[%c2_30, %c0_31, %c0_32] : memref<9x16x16xf32, #tpu.memory_space<vmem>>, vector<1x16x16xf32>
    %29 = vector.shape_cast %28 : vector<1x16x16xf32> to vector<16x16xf32>
    %cst_33 = arith.constant dense<0.000000e+00> : vector<256x16xf32>
    %30 = tpu.matmul %27, %29, %cst_33 {dimension_numbers = #tpu.dot_dimension_numbers<[1], [0], [0], [1], [0, 0, 1, 1], [], []>, precision = #tpu.contract_precision<fp32>} : vector<256x16xf32>, vector<16x16xf32>, vector<256x16xf32> -> vector<256x16xf32>
    %31 = arith.addf %25, %30 : vector<256x16xf32>
    %c1_34 = arith.constant 1 : index
    %c0_35 = arith.constant 0 : index
    %c0_36 = arith.constant 0 : index
    %32 = vector.load %arg9[%c1_34, %c0_35, %c0_36] : memref<18x18x16xf32, #tpu.memory_space<vmem>>, vector<16x16x16xf32>
    %33 = vector.shape_cast %32 : vector<16x16x16xf32> to vector<256x16xf32>
    %c3 = arith.constant 3 : index
    %c0_37 = arith.constant 0 : index
    %c0_38 = arith.constant 0 : index
    %34 = vector.load %arg4[%c3, %c0_37, %c0_38] : memref<9x16x16xf32, #tpu.memory_space<vmem>>, vector<1x16x16xf32>
    %35 = vector.shape_cast %34 : vector<1x16x16xf32> to vector<16x16xf32>
    %cst_39 = arith.constant dense<0.000000e+00> : vector<256x16xf32>
    %36 = tpu.matmul %33, %35, %cst_39 {dimension_numbers = #tpu.dot_dimension_numbers<[1], [0], [0], [1], [0, 0, 1, 1], [], []>, precision = #tpu.contract_precision<fp32>} : vector<256x16xf32>, vector<16x16xf32>, vector<256x16xf32> -> vector<256x16xf32>
    %37 = arith.addf %31, %36 : vector<256x16xf32>
    %c1_40 = arith.constant 1 : index
    %c1_41 = arith.constant 1 : index
    %c0_42 = arith.constant 0 : index
    %38 = vector.load %arg9[%c1_40, %c1_41, %c0_42] : memref<18x18x16xf32, #tpu.memory_space<vmem>>, vector<16x16x16xf32>
    %39 = vector.shape_cast %38 : vector<16x16x16xf32> to vector<256x16xf32>
    %c4 = arith.constant 4 : index
    %c0_43 = arith.constant 0 : index
    %c0_44 = arith.constant 0 : index
    %40 = vector.load %arg4[%c4, %c0_43, %c0_44] : memref<9x16x16xf32, #tpu.memory_space<vmem>>, vector<1x16x16xf32>
    %41 = vector.shape_cast %40 : vector<1x16x16xf32> to vector<16x16xf32>
    %cst_45 = arith.constant dense<0.000000e+00> : vector<256x16xf32>
    %42 = tpu.matmul %39, %41, %cst_45 {dimension_numbers = #tpu.dot_dimension_numbers<[1], [0], [0], [1], [0, 0, 1, 1], [], []>, precision = #tpu.contract_precision<fp32>} : vector<256x16xf32>, vector<16x16xf32>, vector<256x16xf32> -> vector<256x16xf32>
    %43 = arith.addf %37, %42 : vector<256x16xf32>
    %c1_46 = arith.constant 1 : index
    %c2_47 = arith.constant 2 : index
    %c0_48 = arith.constant 0 : index
    %44 = vector.load %arg9[%c1_46, %c2_47, %c0_48] : memref<18x18x16xf32, #tpu.memory_space<vmem>>, vector<16x16x16xf32>
    %45 = vector.shape_cast %44 : vector<16x16x16xf32> to vector<256x16xf32>
    %c5 = arith.constant 5 : index
    %c0_49 = arith.constant 0 : index
    %c0_50 = arith.constant 0 : index
    %46 = vector.load %arg4[%c5, %c0_49, %c0_50] : memref<9x16x16xf32, #tpu.memory_space<vmem>>, vector<1x16x16xf32>
    %47 = vector.shape_cast %46 : vector<1x16x16xf32> to vector<16x16xf32>
    %cst_51 = arith.constant dense<0.000000e+00> : vector<256x16xf32>
    %48 = tpu.matmul %45, %47, %cst_51 {dimension_numbers = #tpu.dot_dimension_numbers<[1], [0], [0], [1], [0, 0, 1, 1], [], []>, precision = #tpu.contract_precision<fp32>} : vector<256x16xf32>, vector<16x16xf32>, vector<256x16xf32> -> vector<256x16xf32>
    %49 = arith.addf %43, %48 : vector<256x16xf32>
    %c2_52 = arith.constant 2 : index
    %c0_53 = arith.constant 0 : index
    %c0_54 = arith.constant 0 : index
    %50 = vector.load %arg9[%c2_52, %c0_53, %c0_54] : memref<18x18x16xf32, #tpu.memory_space<vmem>>, vector<16x16x16xf32>
    %51 = vector.shape_cast %50 : vector<16x16x16xf32> to vector<256x16xf32>
    %c6 = arith.constant 6 : index
    %c0_55 = arith.constant 0 : index
    %c0_56 = arith.constant 0 : index
    %52 = vector.load %arg4[%c6, %c0_55, %c0_56] : memref<9x16x16xf32, #tpu.memory_space<vmem>>, vector<1x16x16xf32>
    %53 = vector.shape_cast %52 : vector<1x16x16xf32> to vector<16x16xf32>
    %cst_57 = arith.constant dense<0.000000e+00> : vector<256x16xf32>
    %54 = tpu.matmul %51, %53, %cst_57 {dimension_numbers = #tpu.dot_dimension_numbers<[1], [0], [0], [1], [0, 0, 1, 1], [], []>, precision = #tpu.contract_precision<fp32>} : vector<256x16xf32>, vector<16x16xf32>, vector<256x16xf32> -> vector<256x16xf32>
    %55 = arith.addf %49, %54 : vector<256x16xf32>
    %c2_58 = arith.constant 2 : index
    %c1_59 = arith.constant 1 : index
    %c0_60 = arith.constant 0 : index
    %56 = vector.load %arg9[%c2_58, %c1_59, %c0_60] : memref<18x18x16xf32, #tpu.memory_space<vmem>>, vector<16x16x16xf32>
    %57 = vector.shape_cast %56 : vector<16x16x16xf32> to vector<256x16xf32>
    %c7 = arith.constant 7 : index
    %c0_61 = arith.constant 0 : index
    %c0_62 = arith.constant 0 : index
    %58 = vector.load %arg4[%c7, %c0_61, %c0_62] : memref<9x16x16xf32, #tpu.memory_space<vmem>>, vector<1x16x16xf32>
    %59 = vector.shape_cast %58 : vector<1x16x16xf32> to vector<16x16xf32>
    %cst_63 = arith.constant dense<0.000000e+00> : vector<256x16xf32>
    %60 = tpu.matmul %57, %59, %cst_63 {dimension_numbers = #tpu.dot_dimension_numbers<[1], [0], [0], [1], [0, 0, 1, 1], [], []>, precision = #tpu.contract_precision<fp32>} : vector<256x16xf32>, vector<16x16xf32>, vector<256x16xf32> -> vector<256x16xf32>
    %61 = arith.addf %55, %60 : vector<256x16xf32>
    %c2_64 = arith.constant 2 : index
    %c2_65 = arith.constant 2 : index
    %c0_66 = arith.constant 0 : index
    %62 = vector.load %arg9[%c2_64, %c2_65, %c0_66] : memref<18x18x16xf32, #tpu.memory_space<vmem>>, vector<16x16x16xf32>
    %63 = vector.shape_cast %62 : vector<16x16x16xf32> to vector<256x16xf32>
    %c8 = arith.constant 8 : index
    %c0_67 = arith.constant 0 : index
    %c0_68 = arith.constant 0 : index
    %64 = vector.load %arg4[%c8, %c0_67, %c0_68] : memref<9x16x16xf32, #tpu.memory_space<vmem>>, vector<1x16x16xf32>
    %65 = vector.shape_cast %64 : vector<1x16x16xf32> to vector<16x16xf32>
    %cst_69 = arith.constant dense<0.000000e+00> : vector<256x16xf32>
    %66 = tpu.matmul %63, %65, %cst_69 {dimension_numbers = #tpu.dot_dimension_numbers<[1], [0], [0], [1], [0, 0, 1, 1], [], []>, precision = #tpu.contract_precision<fp32>} : vector<256x16xf32>, vector<16x16xf32>, vector<256x16xf32> -> vector<256x16xf32>
    %67 = arith.addf %61, %66 : vector<256x16xf32>
    %c0_70 = arith.constant 0 : index
    %c0_71 = arith.constant 0 : index
    %68 = vector.load %arg5[%c0_70, %c0_71] : memref<1x16xf32, #tpu.memory_space<vmem>>, vector<1x16xf32>
    %69 = vector.broadcast %68 : vector<1x16xf32> to vector<256x16xf32>
    %70 = arith.addf %67, %69 : vector<256x16xf32>
    %cst_72 = arith.constant 0.000000e+00 : f32
    %71 = vector.broadcast %cst_72 : f32 to vector<256x16xf32>
    %72 = arith.maximumf %70, %71 : vector<256x16xf32>
    %c0_73 = arith.constant 0 : index
    %c0_74 = arith.constant 0 : index
    %73 = vector.load %arg6[%c0_73, %c0_74] : memref<16x64xf32, #tpu.memory_space<vmem>>, vector<16x64xf32>
    %cst_75 = arith.constant dense<0.000000e+00> : vector<256x64xf32>
    %74 = tpu.matmul %72, %73, %cst_75 {dimension_numbers = #tpu.dot_dimension_numbers<[1], [0], [0], [1], [0, 0, 1, 1], [], []>, precision = #tpu.contract_precision<fp32>} : vector<256x16xf32>, vector<16x64xf32>, vector<256x64xf32> -> vector<256x64xf32>
    %c0_76 = arith.constant 0 : index
    %c0_77 = arith.constant 0 : index
    %75 = vector.load %arg7[%c0_76, %c0_77] : memref<1x64xf32, #tpu.memory_space<vmem>>, vector<1x64xf32>
    %76 = vector.broadcast %75 : vector<1x64xf32> to vector<256x64xf32>
    %77 = arith.addf %74, %76 : vector<256x64xf32>
    %78 = arith.addf %77, %1 : vector<256x64xf32>
    %cst_78 = arith.constant 0.000000e+00 : f32
    %79 = vector.broadcast %cst_78 : f32 to vector<256x64xf32>
    %80 = arith.maximumf %78, %79 : vector<256x64xf32>
    %c0_79 = arith.constant 0 : index
    %c0_80 = arith.constant 0 : index
    %c0_81 = arith.constant 0 : index
    %81 = vector.load %arg8[%c0_79, %c0_80, %c0_81] : memref<1x256x64xf32, #tpu.memory_space<vmem>>, vector<1x256x64xf32>
    %82 = vector.shape_cast %81 : vector<1x256x64xf32> to vector<256x64xf32>
    %83 = vector.shape_cast %80 : vector<256x64xf32> to vector<1x256x64xf32>
    tpu.vector_store %arg8[%c0_79, %c0_80, %c0_81], %83 {strides = array<i32>} : memref<1x256x64xf32, #tpu.memory_space<vmem>>, vector<1x256x64xf32>,
    return
  }
  func.func @transform_0(%arg0: i32) -> (i32, i32, i32) {
    %c0_i32 = arith.constant 0 : i32
    %c0_i32_0 = arith.constant 0 : i32
    %c0_i32_1 = arith.constant 0 : i32
    return %arg0, %c0_i32, %c0_i32_0 : i32, i32, i32
  }
  func.func @transform_1(%arg0: i32) -> (i32, i32) {
    %c0_i32 = arith.constant 0 : i32
    %c0_i32_0 = arith.constant 0 : i32
    %c0_i32_1 = arith.constant 0 : i32
    return %c0_i32, %c0_i32_0 : i32, i32
  }
  func.func @transform_2(%arg0: i32) -> (i32, i32) {
    %c0_i32 = arith.constant 0 : i32
    %c0_i32_0 = arith.constant 0 : i32
    %c0_i32_1 = arith.constant 0 : i32
    return %c0_i32, %c0_i32_0 : i32, i32
  }
  func.func @transform_3(%arg0: i32) -> (i32, i32, i32) {
    %c0_i32 = arith.constant 0 : i32
    %c0_i32_0 = arith.constant 0 : i32
    %c0_i32_1 = arith.constant 0 : i32
    %c0_i32_2 = arith.constant 0 : i32
    return %c0_i32, %c0_i32_0, %c0_i32_1 : i32, i32, i32
  }
  func.func @transform_4(%arg0: i32) -> (i32, i32) {
    %c0_i32 = arith.constant 0 : i32
    %c0_i32_0 = arith.constant 0 : i32
    %c0_i32_1 = arith.constant 0 : i32
    return %c0_i32, %c0_i32_0 : i32, i32
  }
  func.func @transform_5(%arg0: i32) -> (i32, i32) {
    %c0_i32 = arith.constant 0 : i32
    %c0_i32_0 = arith.constant 0 : i32
    %c0_i32_1 = arith.constant 0 : i32
    return %c0_i32, %c0_i32_0 : i32, i32
  }
  func.func @transform_6(%arg0: i32) -> (i32, i32) {
    %c0_i32 = arith.constant 0 : i32
    %c0_i32_0 = arith.constant 0 : i32
    %c0_i32_1 = arith.constant 0 : i32
    return %c0_i32, %c0_i32_0 : i32, i32
  }
  func.func @transform_7(%arg0: i32) -> (i32, i32, i32) {
    %c0_i32 = arith.constant 0 : i32
    %c0_i32_0 = arith.constant 0 : i32
    %c0_i32_1 = arith.constant 0 : i32
    return %arg0, %c0_i32, %c0_i32_0 : i32, i32, i32
  }
}

</mosaic_0001>

<bundles_post_ra>
// kernel: tpu_custom_call.1
= control target key start
LH: loop header
LB: loop body
LE: loop exit
PB: predicated region body
PF: predicated region fallthrough
CT: control target
= control target key end

     0   :  { %s30388_s24 = smov 0   ;;  %s36909_s0 = inlined_call_operand.vmem [shape: f32[2,256,64], index: 0, kind: input, shape index: {}]   ;;  %s36910_s1 = inlined_call_operand.vmem [shape: f32[64,16], index: 1, kind: input, shape index: {}]   ;;  %s36911_s2 = inlined_call_operand.vmem [shape: f32[1,16], index: 2, kind: input, shape index: {}]   ;;  %s36912_s3 = inlined_call_operand.vmem [shape: f32[9,16,16], index: 3, kind: input, shape index: {}]   ;;  %s36913_s4 = inlined_call_operand.vmem [shape: f32[1,16], index: 4, kind: input, shape index: {}]   ;;  %s36914_s5 = inlined_call_operand.vmem [shape: f32[16,64], index: 5, kind: input, shape index: {}]   ;;  %s36915_s6 = inlined_call_operand.vmem [shape: f32[1,64], index: 6, kind: input, shape index: {}]   ;;  %s36916_s7 = inlined_call_operand.vmem [shape: f32[2,256,64], index: 7, kind: output, shape index: {}]  }
   0x1 LB: > { %s22064_s25 = sadd.s32 4294967295, %s30345_s24   ;;  %p22068_p0 = scmp.ge.s32.totalorder %s30345_s24, 1  ;;  %s30345_s24 = sphi %s30388_s24, %s17_s24  }
   0x2   : > { %p237_p1 = scmp.lt.s32.totalorder %s30345_s24, 3 }
   0x4   : > { %p238_p2 = pnand %p22068_p0, %p237_p1 }
   0x6   : > { %241 = sbr.rel (%p238_p2) target bundleno = 3542 (0xdd6), region = 48 }
   0xd   : > { %v311_v0 = vld [vmem:[%s36910_s1] sm:$0xff]  ;;  %v312_v1 = vld [vmem:[%s36910_s1 + $0x8] sm:$0xff]  ;;  %v313_v2 = vld [vmem:[%s36910_s1 + $0x10] sm:$0xff]  ;;  %p269_p3 = scmp.lt.s32.totalorder %s22064_s25, 1  ;;  %vm326_vm0 = vcmask 523264   ;;  %vm2325_vm1 = vcmask 130048  }
   0xe   : > { %v424_v3 = vand.u32 4294901760, %v311_v0  ;;  %v427_v4 = vand.u32 4294901760, %v312_v1  ;;  %v314_v5 = vld [vmem:[%s36910_s1 + $0x18] sm:$0xff]  ;;  %v430_v6 = vand.u32 4294901760, %v313_v2  ;;  %v30411_v7 = vld [vmem:[%s36910_s1 + $0x20] sm:$0xff]  ;;  %v30416_v8 = vld [vmem:[%s36910_s1 + $0x28] sm:$0xff] }
   0xf   : > { %v433_v9 = vand.u32 4294901760, %v314_v5  ;;  %v436_v10 = vand.u32 4294901760, %v30411_v7  ;;  %v439_v11 = vand.u32 4294901760, %v30416_v8  ;;  %v30423_v12 = vld [vmem:[%s36910_s1 + $0x30] sm:$0xff]  ;;  %v30428_v13 = vld [vmem:[%s36910_s1 + $0x38] sm:$0xff]  ;;  %s39917_s25 = smov (!%p269_p3, %s22064_s25), 1 }
  0x10   : > { %v30432_v14 = vpack.c.bf16 %v427_v4, %v424_v3  ;;  %v36934_v15 = vand.u32 4294901760, %v30423_v12  ;;  %v36933_v16 = vand.u32 4294901760, %v30428_v13  ;;  %v30436_v17 = vsub.f32 %v311_v0, %v424_v3  ;;  %s22094_s19 = sshll.u32 %s39917_s25, 8 }
  0x11   : > { %v30438_v18 = vpack.c.bf16 %v433_v9, %v430_v6  ;;  %v30441_v19 = vsub.f32 %v312_v1, %v427_v4  ;;  %v30443_v20 = vsub.f32 %v313_v2, %v430_v6  ;;  %v30450_v21 = vpack.c.bf16 %v439_v11, %v436_v10  ;;  %s30457_s22 = scalar_lea.vmem %s36909_s0, %s22094_s19  ;;  %s36779_s12 = scalar_lea.vmem %s36916_s7, %s22094_s19 }
  0x12   : > { %27881 = vmatprep.subr.bf16.mxu0 %v30432_v14  ;;  %v36931_v22 = vand.u32 4294901760, %v30436_v17  ;;  %v30465_v23 = vpack.c.bf16 %v36933_v16, %v36934_v15  ;;  %v279_v24 = vld [vmem:[%s30457_s22] sm:$0xff]  ;;  %v280_v25 = vld [vmem:[%s30457_s22 + $0x8] sm:$0xff]  ;;  %v281_v27 = vld [vmem:[%s30457_s22 + $0x10] sm:$0xff]  ;;  %v30472_v29 = vsub.f32 %v314_v5, %v433_v9  ;;  %vm2328_vm2 = vcmask 123904  }
  0x13   : > { %38181 = vst [vmem:[#allocation3_spill] sm:$0xff] %v30438_v18  ;;  %38182 = vst [vmem:[#allocation4_spill] sm:$0xff] %v30443_v20  ;;  %27883 = vmatpush3.bf16.msra.mxu0 %v30432_v14  ;;  %v36930_v26 = vand.u32 4294901760, %v30441_v19  ;;  %v36925_v28 = vand.u32 4294901760, %v30443_v20  ;;  %v328_v30 = vsel %vm326_vm0, %v279_v24, 0  ;;  %v331_v31 = vsel %vm326_vm0, %v280_v25, 0 }
  0x14   : > { %38183 = vst [vmem:[#allocation5_spill] sm:$0xff] %v30450_v21  ;;  %38184 = vst [vmem:[#allocation6_spill] sm:$0xff] %v30465_v23  ;;  %27885 = vmatprep.subr.bf16.mxu0 %v30438_v18  ;;  %v820_v32 = vsub.f32 %v30436_v17, %v36931_v22  ;;  %v334_v33 = vsel %vm326_vm0, %v281_v27, 0  ;;  %v282_v34 = vld [vmem:[%s30457_s22 + $0x18] sm:$0xff]  ;;  %v283_v35 = vld [vmem:[%s30457_s22 + $0x20] sm:$0xff]  ;;  %v30484_v37 = vand.u32 4294901760, %v328_v30 }
  0x15   : > { %38185 = vst [vmem:[#allocation7_spill] sm:$0xff] %v30472_v29  ;;  %v284_v36 = vld [vmem:[%s30457_s22 + $0x28] sm:$0xff]  ;;  %v30486_v38 = vand.u32 4294901760, %v331_v31  ;;  %v827_v39 = vsub.f32 %v30441_v19, %v36930_v26  ;;  %v30491_v40 = vand.u32 4294901760, %v334_v33  ;;  %v285_v41 = vld [vmem:[%s30457_s22 + $0x30] sm:$0xff]  ;;  %v337_v43 = vsel %vm326_vm0, %v282_v34, 0 }
  0x16   : > { %v821_v42 = vand.u32 4294901760, %v820_v32  ;;  %v340_v44 = vsel %vm326_vm0, %v283_v35, 0  ;;  %v343_v45 = vsel %vm326_vm0, %v284_v36, 0  ;;  %v30499_v46 = vsub.f32 %v328_v30, %v30484_v37  ;;  %v286_v54 = vld [vmem:[%s30457_s22 + $0x38] sm:$0xff]  ;;  %v287_v9 = vld [vmem:[%s30457_s22 + $0x40] sm:$0xff]  ;;  %v288_v24 = vld [vmem:[%s30457_s22 + $0x48] sm:$0xff] }
  0x17   : > { %27887 = vmatpush3.bf16.msra.mxu0 %v30438_v18  ;;  %v30502_v47 = vsub.f32 %v331_v31, %v30486_v38  ;;  %v828_v48 = vand.u32 4294901760, %v827_v39  ;;  %v30505_v49 = vsub.f32 %v334_v33, %v30491_v40  ;;  %v30508_v50 = vand.u32 4294901760, %v337_v43  ;;  %v297_v26 = vld [vmem:[%s30457_s22 + $0x90] sm:$0xff]  ;;  %v298_v22 = vld [vmem:[%s30457_s22 + $0x98] sm:$0xff] }
  0x18   : > { %38186 = vst [vmem:[#allocation8_spill] sm:$0xff] %v30499_v46  ;;  %27889 = vmatprep.subr.bf16.mxu0 %v30450_v21  ;;  %v30510_v51 = vand.u32 4294901760, %v340_v44  ;;  %v30512_v52 = vand.u32 4294901760, %v343_v45  ;;  %v346_v53 = vsel %vm326_vm0, %v285_v41, 0  ;;  %v36927_v55 = vand.u32 4294901760, %v30499_v46 }
  0x19   : > { %38187 = vst [vmem:[#allocation9_spill] sm:$0xff] %v30502_v47  ;;  %38188 = vst [vmem:[#allocation10_spill] sm:$0xff] %v30505_v49  ;;  %v36923_v56 = vand.u32 4294901760, %v30502_v47  ;;  %v27896_v57 = vpack.c.bf16 %v828_v48, %v821_v42  ;;  %v36921_v58 = vand.u32 4294901760, %v30505_v49  ;;  %v30520_v59 = vsub.f32 %v337_v43, %v30508_v50  ;;  %v289_v43 = vld [vmem:[%s30457_s22 + $0x50] sm:$0xff] }
  0x1a   : > { %v30523_v60 = vsub.f32 %v340_v44, %v30510_v51  ;;  %v30526_v61 = vsub.f32 %v343_v45, %v30512_v52  ;;  %v30528_v62 = vand.u32 4294901760, %v346_v53  ;;  %v499_v63 = vsub.f32 %v30499_v46, %v36927_v55  ;;  %v290_v44 = vld [vmem:[%s30457_s22 + $0x58] sm:$0xff] }
  0x1b   : > { %38189 = vst [vmem:[#allocation11_spill] sm:$0xff] %v30520_v59  ;;  %27891 = vmatpush3.bf16.msra.mxu0 %v30450_v21  ;;  %v509_v0 = vsub.f32 %v30502_v47, %v36923_v56  ;;  %v519_v1 = vsub.f32 %v30505_v49, %v36921_v58  ;;  %v349_v2 = vsel %vm326_vm0, %v286_v54, 0  ;;  %v36920_v3 = vand.u32 4294901760, %v30520_v59 }
  0x1c   : > { %38190 = vst [vmem:[#allocation12_spill] sm:$0xff] %v30523_v60  ;;  %38191 = vst [vmem:[#allocation13_spill] sm:$0xff] %v30526_v61  ;;  %27893 = vmatprep.subr.bf16.mxu0 %v30465_v23  ;;  %v36919_v4 = vand.u32 4294901760, %v30523_v60  ;;  %v36918_v5 = vand.u32 4294901760, %v30526_v61  ;;  %v30546_v6 = vsub.f32 %v346_v53, %v30528_v62  ;;  %v500_v25 = vand.u32 4294901760, %v499_v63 }
  0x1d   : > { %v510_v27 = vand.u32 4294901760, %v509_v0  ;;  %v520_v30 = vand.u32 4294901760, %v519_v1  ;;  %v30550_v31 = vand.u32 4294901760, %v349_v2  ;;  %v529_v32 = vsub.f32 %v30520_v59, %v36920_v3 }
  0x1e   : > { %38192 = vst [vmem:[#allocation14_spill] sm:$0xff] %v30546_v6  ;;  %v539_v33 = vsub.f32 %v30523_v60, %v36919_v4  ;;  %v549_v34 = vsub.f32 %v30526_v61, %v36918_v5  ;;  %v36917_v35 = vand.u32 4294901760, %v30546_v6  ;;  %24392 = vmatprep.mubr.f32.mxu0 %v500_v25  ;;  %v352_v39 = vsel %vm326_vm0, %v287_v9, 0  ;;  %v292_v9 = vld [vmem:[%s30457_s22 + $0x68] sm:$0xff] }
  0x1f   : > { %27895 = vmatpush3.bf16.msra.mxu0 %v30465_v23  ;;  %v30564_v36 = vsub.f32 %v349_v2, %v30550_v31  ;;  %v355_v41 = vsel %vm326_vm0, %v288_v24, 0  ;;  %v834_v42 = vsub.f32 %v30443_v20, %v36925_v28  ;;  %v530_v45 = vand.u32 4294901760, %v529_v32  ;;  %v291_v2 = vld [vmem:[%s30457_s22 + $0x60] sm:$0xff] }
  0x20   : > { %27897 = vmatprep.subr.bf16.mxu0 %v27896_v57  ;;  %v540_v48 = vand.u32 4294901760, %v539_v33  ;;  %v30576_v53 = vsub.f32 %v30411_v7, %v436_v10  ;;  %v550_v54 = vand.u32 4294901760, %v549_v34  ;;  %v30579_v0 = vand.u32 4294901760, %v352_v39 }
  0x21   : > { %38193 = vst [vmem:[#allocation15_spill] sm:$0xff] %v30564_v36  ;;  %v36922_v63 = vand.u32 4294901760, %v30564_v36  ;;  %v30581_v1 = vand.u32 4294901760, %v355_v41  ;;  %v559_v24 = vsub.f32 %v30546_v6, %v36917_v35  ;;  %v36924_v25 = vand.u32 4294901760, %v30472_v29 }
  0x22   : > { %24393 = vmatmul.mubr.f32.vlgmr.msra.gmra.mrb[0].mxu0 %v510_v27  ;;  %v358_v7 = vsel %vm326_vm0, %v289_v43, 0  ;;  %v361_v10 = vsel %vm326_vm0, %v290_v44, 0  ;;  %v30592_v32 = vsub.f32 %v352_v39, %v30579_v0  ;;  %v835_v34 = vand.u32 4294901760, %v834_v42 }
  0x23   : > { %27899 = vmatpush3.bf16.msra.mxu0 %v27896_v57  ;;  %24395 = vmatprep.mubr.f32.mxu0 %v520_v30  ;;  %v30595_v33 = vsub.f32 %v355_v41, %v30581_v1  ;;  %v30597_v27 = vand.u32 4294901760, %v358_v7  ;;  %v841_v35 = vsub.f32 %v30472_v29, %v36924_v25  ;;  %v30602_v5 = vand.u32 4294901760, %v361_v10  ;;  %v293_v30 = vld [vmem:[%s30457_s22 + $0x70] sm:$0xff]  ;;  %v294_v25 = vld [vmem:[%s30457_s22 + $0x78] sm:$0xff] }
  0x24   : > { %38194 = vst [vmem:[#allocation16_spill] sm:$0xff] %v30592_v32  ;;  %v364_v43 = vsel %vm326_vm0, %v291_v2, 0  ;;  %v367_v57 = vsel %vm326_vm0, %v292_v9, 0  ;;  %v569_v39 = vsub.f32 %v30564_v36, %v36922_v63  ;;  %v36926_v41 = vand.u32 4294901760, %v30592_v32  ;;  %v303_v36 = vld [vmem:[%s30457_s22 + $0xc0] sm:$0xff] }
  0x25   : > { %38195 = vst [vmem:[#allocation17_spill] sm:$0xff] %v30595_v33  ;;  %v36928_v42 = vand.u32 4294901760, %v30595_v33  ;;  %v30613_v44 = vsub.f32 %v358_v7, %v30597_v27  ;;  %v842_v4 = vand.u32 4294901760, %v841_v35  ;;  %v30616_v2 = vsub.f32 %v361_v10, %v30602_v5 }
  0x26   : > { %24396 = vmatmul.mubr.f32.gmra.mrb[2].mxu0 %v530_v45  ;;  %v30618_v9 = vand.u32 4294901760, %v364_v43  ;;  %v30620_v3 = vand.u32 4294901760, %v367_v57  ;;  %v560_v58 = vand.u32 4294901760, %v559_v24  ;;  %v579_v63 = vsub.f32 %v30592_v32, %v36926_v41 }
  0x27   : > { %38196 = vst [vmem:[#allocation18_spill] sm:$0xff] %v30613_v44  ;;  %38197 = vst [vmem:[#allocation19_spill] sm:$0xff] %v30616_v2  ;;  %24398 = vmatprep.mubr.f32.mxu0 %v540_v48  ;;  %v36929_v56 = vand.u32 4294901760, %v30613_v44  ;;  %v370_v7 = vsel %vm326_vm0, %v293_v30, 0  ;;  %v27900_v35 = vpack.c.bf16 %v842_v4, %v835_v34  ;;  %v36932_v45 = vand.u32 4294901760, %v30616_v2  ;;  %v295_v48 = vld [vmem:[%s30457_s22 + $0x80] sm:$0xff] }
  0x28   : > { %38198 = vst [vmem:[#allocation20_spill] sm:$0xff] %v30618_v9  ;;  %38199 = vst [vmem:[#allocation21_spill] sm:$0xff] %v30620_v3  ;;  %v30630_v10 = vsub.f32 %v364_v43, %v30618_v9  ;;  %v30633_v28 = vsub.f32 %v367_v57, %v30620_v3  ;;  %v570_v24 = vand.u32 4294901760, %v569_v39  ;;  %v589_v41 = vsub.f32 %v30595_v33, %v36928_v42  ;;  %v296_v39 = vld [vmem:[%s30457_s22 + $0x88] sm:$0xff] }
  0x29   : > { %v30639_v55 = vand.u32 4294901760, %v370_v7  ;;  %v30644_v4 = vsub.f32 %v30416_v8, %v439_v11  ;;  %v580_v34 = vand.u32 4294901760, %v579_v63  ;;  %27901 = vmatprep.subr.bf16.mxu0 %v27900_v35  ;;  %v599_v43 = vsub.f32 %v30613_v44, %v36929_v56 }
  0x2a   : > { %38200 = vst [vmem:[#allocation22_spill] sm:$0xff] %v30630_v10  ;;  %38201 = vst [vmem:[#allocation23_spill] sm:$0xff] %v30633_v28  ;;  %24399 = vmatmul.mubr.f32.gmra.mrb[4].mxu0 %v550_v54  ;;  %v36935_v57 = vand.u32 4294901760, %v30630_v10  ;;  %v373_v30 = vsel %vm326_vm0, %v294_v25, 0  ;;  %v36938_v42 = vand.u32 4294901760, %v30633_v28  ;;  %v376_v54 = vsel %vm326_vm0, %v295_v48, 0 }
  0x2b   : > { %38202 = vst [vmem:[#allocation24_spill] sm:$0xff] %v30639_v55  ;;  %24401 = vmatprep.mubr.f32.mxu0 %v560_v58  ;;  %27903 = vmatpush3.bf16.msra.mxu0 %v27900_v35  ;;  %v30654_v8 = vsub.f32 %v370_v7, %v30639_v55  ;;  %v30656_v11 = vand.u32 4294901760, %v373_v30  ;;  %v609_v63 = vsub.f32 %v30616_v2, %v36932_v45  ;;  %v30662_v56 = vand.u32 4294901760, %v376_v54 }
  0x2c   : > { %v619_v58 = vsub.f32 %v30630_v10, %v36935_v57  ;;  %v379_v35 = vsel %vm326_vm0, %v296_v39, 0  ;;  %v36945_v7 = vand.u32 4294901760, %v30576_v53  ;;  %v590_v48 = vand.u32 4294901760, %v589_v41  ;;  %v299_v10 = vld [vmem:[%s30457_s22 + $0xa0] sm:$0xff] }
  0x2d   : > { %38203 = vst [vmem:[#allocation25_spill] sm:$0xff] %v30654_v8  ;;  %38204 = vst [vmem:[#allocation26_spill] sm:$0xff] %v30656_v11  ;;  %v30673_v45 = vsub.f32 %v373_v30, %v30656_v11  ;;  %v30676_v16 = vsub.f32 %v376_v54, %v30662_v56  ;;  %v30678_v15 = vand.u32 4294901760, %v379_v35  ;;  %v600_v57 = vand.u32 4294901760, %v599_v43 }
  0x2e   : > { %38205 = vst [vmem:[#allocation27_spill] sm:$0xff] %v30662_v56  ;;  %24402 = vmatmul.mubr.f32.gmra.mrb[6].mxu0 %v570_v24  ;;  %v629_v39 = vsub.f32 %v30633_v28, %v36938_v42  ;;  %v848_v25 = vsub.f32 %v30576_v53, %v36945_v7  ;;  %v36950_v41 = vand.u32 4294901760, %v30644_v4  ;;  %v38209_v24 = vand.u32 4294901760, %v30654_v8  ;;  %v300_v42 = vld [vmem:[%s30457_s22 + $0xa8] sm:$0xff] }
  0x2f   : > { %38206 = vst [vmem:[#allocation28_spill] sm:$0xff] %v30673_v45  ;;  %38207 = vst [vmem:[#allocation29_spill] sm:$0xff] %v30676_v16  ;;  %24404 = vmatprep.mubr.f32.mxu0 %v580_v34  ;;  %v30691_v54 = vsub.f32 %v379_v35, %v30678_v15  ;;  %v382_v34 = vsel %vm326_vm0, %v297_v26, 0  ;;  %v385_v43 = vsel %vm326_vm0, %v298_v22, 0  ;;  %v610_v28 = vand.u32 4294901760, %v609_v63  ;;  %v301_v22 = vld [vmem:[%s30457_s22 + $0xb0] sm:$0xff] }
  0x30   : > { %38208 = vst [vmem:[#allocation30_spill] sm:$0xff] %v30678_v15  ;;  %v639_v30 = vsub.f32 %v30654_v8, %v38209_v24  ;;  %v620_v2 = vand.u32 4294901760, %v619_v58  ;;  %v849_v44 = vand.u32 4294901760, %v848_v25  ;;  %v855_v7 = vsub.f32 %v30644_v4, %v36950_v41  ;;  %v302_v24 = vld [vmem:[%s30457_s22 + $0xb8] sm:$0xff] }
  0x31   : > { %38210 = vst [vmem:[#allocation31_spill] sm:$0xff] %v30691_v54  ;;  %v30702_v8 = vand.u32 4294901760, %v382_v34  ;;  %v30704_v26 = vand.u32 4294901760, %v385_v43  ;;  %v630_v63 = vand.u32 4294901760, %v629_v39  ;;  %v388_v25 = vsel %vm326_vm0, %v299_v10, 0 }
  0x32   : > { %24405 = vmatmul.mubr.f32.gmra.mrb[8].mxu0 %v590_v48  ;;  %v856_v58 = vand.u32 4294901760, %v855_v7  ;;  %v391_v33 = vsel %vm326_vm0, %v300_v42, 0  ;;  %v640_v41 = vand.u32 4294901760, %v639_v30  ;;  %v30718_v6 = vand.u32 4294901760, %v388_v25 }
  0x33   : > { %38211 = vst [vmem:[#allocation32_spill] sm:$0xff] %v30702_v8  ;;  %38212 = vst [vmem:[#allocation33_spill] sm:$0xff] %v30704_v26  ;;  %24407 = vmatprep.mubr.f32.mxu0 %v600_v57  ;;  %v30711_v32 = vsub.f32 %v382_v34, %v30702_v8  ;;  %v30714_v35 = vsub.f32 %v385_v43, %v30704_v26  ;;  %v30720_v57 = vand.u32 4294901760, %v391_v33  ;;  %v394_v10 = vsel %vm326_vm0, %v301_v22, 0 }
  0x34   : > { %v27904_v23 = vpack.c.bf16 %v856_v58, %v849_v44  ;;  %38215 = vst [vmem:[#allocation36_spill] sm:$0xff] %v30718_v6  ;;  %v38217_v42 = vand.u32 4294901760, %v30673_v45  ;;  %v38218_v39 = vand.u32 4294901760, %v30676_v16  ;;  %v30730_v43 = vand.u32 4294901760, %v394_v10 }
  0x35   : > { %38213 = vst [vmem:[#allocation34_spill] sm:$0xff] %v30711_v32  ;;  %38214 = vst [vmem:[#allocation35_spill] sm:$0xff] %v30714_v35  ;;  %v30734_v58 = vsub.f32 %v388_v25, %v30718_v6  ;;  %v400_v22 = vsel %vm326_vm0, %v303_v36, 0  ;;  %v38222_v34 = vand.u32 4294901760, %v30423_v12  ;;  %v38227_v44 = vand.u32 4294901760, %v30711_v32 }
  0x36   : > { %38216 = vst [vmem:[#allocation37_spill] sm:$0xff] %v30720_v57  ;;  %24408 = vmatmul.mubr.f32.gmra.mrb[10].mxu0 %v610_v28  ;;  %v649_v7 = vsub.f32 %v30673_v45, %v38217_v42  ;;  %v659_v30 = vsub.f32 %v30676_v16, %v38218_v39  ;;  %38219 = vst [vmem:[#allocation38_spill] sm:$0xff] %v30730_v43  ;;  %27905 = vmatprep.subr.bf16.mxu0 %v27904_v23  ;;  %v397_v28 = vsel %vm326_vm0, %v302_v24, 0  ;;  %v304_v39 = vld [vmem:[%s30457_s22 + $0xc8] sm:$0xff] }
  0x37   : > { %24410 = vmatprep.mubr.f32.mxu0 %v620_v2  ;;  %38220 = vst [vmem:[#allocation39_spill] sm:$0xff] %v30734_v58  ;;  %27907 = vmatpush3.bf16.msra.mxu0 %v27904_v23  ;;  %v30739_v42 = vsub.f32 %v391_v33, %v30720_v57  ;;  %v30745_v48 = vsub.f32 %v30423_v12, %v38222_v34  ;;  %v38223_v2 = vand.u32 4294901760, %v30691_v54  ;;  %v30753_v36 = vand.u32 4294901760, %v397_v28 }
  0x38   : > { %v30751_v24 = vsub.f32 %v394_v10, %v30730_v43  ;;  %v30755_v23 = vand.u32 4294901760, %v400_v22  ;;  %v650_v33 = vand.u32 4294901760, %v649_v7  ;;  %v679_v12 = vsub.f32 %v30711_v32, %v38227_v44 }
  0x39   : > { %38221 = vst [vmem:[#allocation40_spill] sm:$0xff] %v30739_v42  ;;  %v669_v25 = vsub.f32 %v30691_v54, %v38223_v2  ;;  %38225 = vst [vmem:[#allocation42_spill] sm:$0xff] %v30753_v36  ;;  %v660_v34 = vand.u32 4294901760, %v659_v30  ;;  %v38228_v16 = vand.u32 4294901760, %v30714_v35  ;;  %v403_v10 = vsel %vm326_vm0, %v304_v39, 0  ;;  %v306_v30 = vld [vmem:[%s30457_s22 + $0xd8] sm:$0xff] }
  0x3a   : > { %38224 = vst [vmem:[#allocation41_spill] sm:$0xff] %v30751_v24  ;;  %38226 = vst [vmem:[#allocation43_spill] sm:$0xff] %v30755_v23  ;;  %24411 = vmatmul.mubr.f32.gmra.mrb[12].mxu0 %v630_v63  ;;  %v36975_v63 = vand.u32 4294901760, %v30745_v48  ;;  %v38229_v7 = vand.u32 4294901760, %v30428_v13  ;;  %v30779_v54 = vsub.f32 %v400_v22, %v30755_v23  ;;  %v680_v39 = vand.u32 4294901760, %v679_v12 }
  0x3b   : > { %24413 = vmatprep.mubr.f32.mxu0 %v640_v41  ;;  %v689_v2 = vsub.f32 %v30714_v35, %v38228_v16  ;;  %v305_v41 = vld [vmem:[%s30457_s22 + $0xd0] sm:$0xff]  ;;  %v670_v44 = vand.u32 4294901760, %v669_v25  ;;  %v30776_v16 = vsub.f32 %v397_v28, %v30753_v36  ;;  %v30781_v45 = vand.u32 4294901760, %v403_v10  ;;  %v307_v25 = vld [vmem:[%s30457_s22 + $0xe0] sm:$0xff] }
  0x3c   : > { %v30770_v61 = vsub.f32 %v30428_v13, %v38229_v7  ;;  %v862_v13 = vsub.f32 %v30745_v48, %v36975_v63  ;;  %v38231_v28 = vand.u32 4294901760, %v30734_v58  ;;  %v406_v35 = vsel %vm326_vm0, %v305_v41, 0 }
  0x3d   : > { %38230 = vst [vmem:[#allocation44_spill] sm:$0xff] %v30781_v45  ;;  %v690_v32 = vand.u32 4294901760, %v689_v2  ;;  %v38232_v12 = vand.u32 4294901760, %v30739_v42  ;;  %v30799_v59 = vand.u32 4294901760, %v406_v35  ;;  %v38234_v2 = vand.u32 4294901760, %v30751_v24 }
  0x3e   : > { %24414 = vmatmul.mubr.f32.gmra.mrb[14].mxu0 %v650_v33  ;;  %v36980_v7 = vand.u32 4294901760, %v30770_v61  ;;  %v699_v22 = vsub.f32 %v30734_v58, %v38231_v28  ;;  %v409_v33 = vsel %vm326_vm0, %v306_v30, 0  ;;  %v863_v60 = vand.u32 4294901760, %v862_v13 }
  0x3f   : > { %24416 = vmatprep.mubr.f32.mxu0 %v660_v34  ;;  %v709_v21 = vsub.f32 %v30739_v42, %v38232_v12  ;;  %38233 = vst [vmem:[#allocation45_spill] sm:$0xff] %v30799_v59  ;;  %v308_v34 = vld [vmem:[%s30457_s22 + $0xe8] sm:$0xff]  ;;  %v719_v28 = vsub.f32 %v30751_v24, %v38234_v2  ;;  %v412_v58 = vsel %vm326_vm0, %v307_v25, 0  ;;  %v309_v12 = vld [vmem:[%s30457_s22 + $0xf0] sm:$0xff]  ;;  %v30810_v13 = vsub.f32 %v403_v10, %v30781_v45 }
  0x40   : > { %v869_v63 = vsub.f32 %v30770_v61, %v36980_v7  ;;  %v30813_v42 = vsub.f32 %v406_v35, %v30799_v59  ;;  %v30815_v18 = vand.u32 4294901760, %v409_v33  ;;  %v700_v2 = vand.u32 4294901760, %v699_v22 }
  0x41   : > { %v30817_v24 = vand.u32 4294901760, %v412_v58  ;;  %v415_v41 = vsel %vm326_vm0, %v308_v34, 0  ;;  %v710_v30 = vand.u32 4294901760, %v709_v21  ;;  %v418_v25 = vsel %vm326_vm0, %v309_v12, 0 }
  0x42   : > { %24417 = vmatmul.mubr.f32.gmra.mrb[16].mxu0 %v670_v44  ;;  %v870_v7 = vand.u32 4294901760, %v869_v63  ;;  %38235 = vst [vmem:[#allocation46_spill] sm:$0xff] %v30815_v18  ;;  %v310_v44 = vld [vmem:[%s30457_s22 + $0xf8] sm:$0xff]  ;;  %v720_v47 = vand.u32 4294901760, %v719_v28  ;;  %v38237_v10 = vand.u32 4294901760, %v30776_v16  ;;  %v38238_v35 = vand.u32 4294901760, %v30779_v54 }
  0x43   : > { %24419 = vmatprep.mubr.f32.mxu0 %v680_v39  ;;  %38236 = vst [vmem:[#allocation47_spill] sm:$0xff] %v30817_v24  ;;  %v27912_v39 = vpack.c.bf16 %v30441_v19, %v30436_v17  ;;  %v36993_v22 = vand.u32 4294901760, %v30810_v13  ;;  %v36995_v21 = vand.u32 4294901760, %v30813_v42  ;;  %v30838_v34 = vsub.f32 %v412_v58, %v30817_v24 }
  0x44   : > { %v27908_v49 = vpack.c.bf16 %v870_v7, %v863_v60  ;;  %v729_v63 = vsub.f32 %v30776_v16, %v38237_v10  ;;  %v739_v46 = vsub.f32 %v30779_v54, %v38238_v35  ;;  %v30833_v60 = vsub.f32 %v409_v33, %v30815_v18 }
  0x45   : > { %v30835_v7 = vand.u32 4294901760, %v415_v41  ;;  %v30840_v28 = vand.u32 4294901760, %v418_v25  ;;  %v421_v12 = vsel %vm326_vm0, %v310_v44, 0  ;;  %v749_v33 = vsub.f32 %v30810_v13, %v36993_v22 }
  0x46   : > { %24420 = vmatmul.mubr.f32.gmra.mrb[18].mxu0 %v690_v32  ;;  %27909 = vmatprep.subr.bf16.mxu0 %v27908_v49  ;;  %v27916_v32 = vpack.c.bf16 %v30472_v29, %v30443_v20  ;;  %v730_v10 = vand.u32 4294901760, %v729_v63  ;;  %v30852_v58 = vand.u32 4294901760, %v421_v12  ;;  %v740_v35 = vand.u32 4294901760, %v739_v46 }
  0x47   : > { %38239 = vst [vmem:[#allocation48_spill] sm:$0xff] %v30835_v7  ;;  %24422 = vmatprep.mubr.f32.mxu0 %v700_v2  ;;  %27911 = vmatpush3.bf16.msra.mxu0 %v27908_v49  ;;  %38240 = vst [vmem:[#allocation49_spill] sm:$0xff] %v30840_v28  ;;  %v36996_v2 = vand.u32 4294901760, %v30833_v60  ;;  %v30850_v49 = vsub.f32 %v415_v41, %v30835_v7  ;;  %v759_v44 = vsub.f32 %v30813_v42, %v36995_v21 }
  0x48   : > { %27913 = vmatprep.subr.bf16.mxu0 %v27912_v39  ;;  %38241 = vst [vmem:[#allocation50_spill] sm:$0xff] %v30852_v58  ;;  %v37001_v63 = vand.u32 4294901760, %v30838_v34  ;;  %v750_v22 = vand.u32 4294901760, %v749_v33 }
  0x49   : > { %v769_v41 = vsub.f32 %v30833_v60, %v36996_v2  ;;  %v37000_v29 = vand.u32 4294901760, %v30850_v49  ;;  %v760_v46 = vand.u32 4294901760, %v759_v44 }
  0x4a   : > { %24423 = vmatmul.mubr.f32.gmra.mrb[20].mxu0 %v710_v30  ;;  %v30859_v30 = vsub.f32 %v418_v25, %v30840_v28  ;;  %v779_v21 = vsub.f32 %v30838_v34, %v37001_v63  ;;  %v38256_v63 = vld [vmem:[#allocation17_spill] sm:$0xff] }
  0x4b   : > { %24425 = vmatprep.mubr.f32.mxu0 %v720_v47  ;;  %v30866_v47 = vsub.f32 %v421_v12, %v30852_v58  ;;  %v789_v33 = vsub.f32 %v30850_v49, %v37000_v29  ;;  %v38255_v29 = vld [vmem:[#allocation16_spill] sm:$0xff] }
  0x4c   : > { %v36999_v25 = vand.u32 4294901760, %v30859_v30  ;;  %v780_v20 = vand.u32 4294901760, %v779_v21  ;;  %v27920_v21 = vpack.c.bf16 %v30644_v4, %v30576_v53 }
  0x4d   : > { %v36998_v2 = vand.u32 4294901760, %v30866_v47 }
  0x4e   : > { %24426 = vmatmul.mubr.f32.gmra.mrb[22].mxu0 %v730_v10  ;;  %v770_v10 = vand.u32 4294901760, %v769_v41  ;;  %v799_v12 = vsub.f32 %v30859_v30, %v36999_v25  ;;  %v38254_v25 = vld [vmem:[#allocation15_spill] sm:$0xff] }
  0x4f   : > { %24428 = vmatprep.mubr.f32.mxu0 %v740_v35  ;;  %v790_v35 = vand.u32 4294901760, %v789_v33  ;;  %v809_v44 = vsub.f32 %v30866_v47, %v36998_v2  ;;  %v38246_v33 = vld [vmem:[#allocation11_spill] sm:$0xff] }
  0x51   : > { %v810_v41 = vand.u32 4294901760, %v809_v44  ;;  %v38249_v44 = vld [vmem:[#allocation13_spill] sm:$0xff] }
  0x52   : > { %24429 = vmatmul.mubr.f32.gmra.mrb[24].mxu0 %v750_v22  ;;  %v800_v22 = vand.u32 4294901760, %v799_v12  ;;  %v38247_v12 = vld [vmem:[#allocation12_spill] sm:$0xff] }
  0x53   : > { %24431 = vmatprep.mubr.f32.mxu0 %v760_v46  ;;  %v38244_v46 = vld [vmem:[#allocation10_spill] sm:$0xff] }
  0x56   : > { %24432 = vmatmul.mubr.f32.gmra.mrb[26].mxu0 %v770_v10  ;;  %v38245_v10 = vld [vmem:[#allocation3_spill] sm:$0xff] }
  0x57   : > { %24434 = vmatprep.mubr.f32.mxu0 %v780_v20  ;;  %v27924_v20 = vpack.c.bf16 %v30770_v61, %v30745_v48 }
  0x5a   : > { %24435 = vmatmul.mubr.f32.gmra.mrb[28].mxu0 %v790_v35  ;;  %v38248_v35 = vld [vmem:[#allocation5_spill] sm:$0xff] }
  0x5b   : > { %24437 = vmatprep.mubr.f32.mxu0 %v800_v22  ;;  %v38250_v22 = vld [vmem:[#allocation14_spill] sm:$0xff] }
  0x5e   : > { %24438 = vmatmul.mubr.f32.gmra.mrb[30].mxu0 %v810_v41  ;;  %v38251_v41 = vld [vmem:[#allocation6_spill] sm:$0xff] }
  0x5f   : > { %24456 = vmatprep.mubr.f32.mxu0 %v30484_v37 }
  0x62   : > { %24457 = vmatmul.mubr.f32.vlgmr.msra.gmra.mrb[0].mxu0 %v30486_v38 }
  0x63   : > { %27915 = vmatpush3.bf16.msra.mxu0 %v27912_v39  ;;  %24459 = vmatprep.mubr.f32.mxu0 %v30491_v40  ;;  %v38242_v39 = vld [vmem:[#allocation8_spill] sm:$0xff] }
  0x64   : > { %27917 = vmatprep.subr.bf16.mxu0 %v27916_v32 }
  0x66   : > { %24460 = vmatmul.mubr.f32.gmra.mrb[2].mxu0 %v30508_v50 }
  0x67   : > { %24462 = vmatprep.mubr.f32.mxu0 %v30510_v51  ;;  %27919 = vmatpush3.bf16.msra.mxu0 %v27916_v32  ;;  %v38243_v32 = vld [vmem:[#allocation9_spill] sm:$0xff] }
  0x68   : > { %27921 = vmatprep.subr.bf16.mxu0 %v27920_v21 }
  0x6a   : > { %24463 = vmatmul.mubr.f32.gmra.mrb[4].mxu0 %v30512_v52 }
  0x6b   : > { %24465 = vmatprep.mubr.f32.mxu0 %v30528_v62  ;;  %27923 = vmatpush3.bf16.msra.mxu0 %v27920_v21  ;;  %v38252_v21 = vand.u32 4294901760, %v30436_v17  ;;  %v38261_v17 = vld [vmem:[#allocation25_spill] sm:$0xff] }
  0x6c   : > { %27925 = vmatprep.subr.bf16.mxu0 %v27924_v20 }
  0x6e   : > { %24466 = vmatmul.mubr.f32.gmra.mrb[6].mxu0 %v30550_v31 }
  0x6f   : > { %24468 = vmatprep.mubr.f32.mxu0 %v30579_v0  ;;  %27927 = vmatpush3.bf16.msra.mxu0 %v27924_v20  ;;  %v38253_v20 = vand.u32 4294901760, %v30441_v19  ;;  %v38262_v19 = vld [vmem:[#allocation28_spill] sm:$0xff] }
  0x70   : > { %27929 = vmatprep.subr.bf16.mxu0 %v30432_v14 }
  0x71   : > { %v27944_v2 = vpack.c.bf16 %v38253_v20, %v38252_v21  ;;  %v38263_v21 = vld [vmem:[#allocation29_spill] sm:$0xff]  ;;  %v38264_v20 = vld [vmem:[#allocation31_spill] sm:$0xff] }
  0x72   : > { %24469 = vmatmul.mubr.f32.gmra.mrb[8].mxu0 %v30581_v1 }
  0x73   : > { %24471 = vmatprep.mubr.f32.mxu0 %v30597_v27 }
  0x76   : > { %24472 = vmatmul.mubr.f32.gmra.mrb[10].mxu0 %v30602_v5 }
  0x77   : > { %24474 = vmatprep.mubr.f32.mxu0 %v30618_v9 }
  0x7a   : > { %24475 = vmatmul.mubr.f32.gmra.mrb[12].mxu0 %v30620_v3  ;;  %v38278_v3 = vand.u32 4294901760, %v30644_v4 }
  0x7b   : > { %24477 = vmatprep.mubr.f32.mxu0 %v30639_v55  ;;  %v38277_v55 = vand.u32 4294901760, %v30576_v53  ;;  %v38284_v53 = vand.u32 4294901760, %v38250_v22 }
  0x7d   : > { %v27952_v9 = vpack.c.bf16 %v38278_v3, %v38277_v55  ;;  %v38285_v55 = vand.u32 4294901760, %v38254_v25  ;;  %v38286_v3 = vand.u32 4294901760, %v38255_v29 }
  0x7e   : > { %24478 = vmatmul.mubr.f32.gmra.mrb[14].mxu0 %v30656_v11  ;;  %v38276_v11 = vand.u32 4294901760, %v38244_v46 }
  0x7f   : > { %24480 = vmatprep.mubr.f32.mxu0 %v30662_v56  ;;  %v38275_v56 = vand.u32 4294901760, %v38243_v32 }
  0x82   : > { %24481 = vmatmul.mubr.f32.gmra.mrb[16].mxu0 %v30678_v15 }
  0x83   : > { %24483 = vmatprep.mubr.f32.mxu0 %v30702_v8 }
  0x86   : > { %24484 = vmatmul.mubr.f32.gmra.mrb[18].mxu0 %v30704_v26  ;;  %v38273_v26 = vld [vmem:[#allocation7_spill] sm:$0xff] }
  0x87   : > { %24486 = vmatprep.mubr.f32.mxu0 %v30718_v6  ;;  %v38274_v8 = vand.u32 4294901760, %v38273_v26 }
  0x8a   : > { %24487 = vmatmul.mubr.f32.gmra.mrb[20].mxu0 %v30720_v57  ;;  %v38271_v57 = vld [vmem:[#allocation4_spill] sm:$0xff] }
  0x8b   : > { %24489 = vmatprep.mubr.f32.mxu0 %v30730_v43  ;;  %v38270_v43 = vand.u32 4294901760, %v38242_v39  ;;  %v38272_v6 = vand.u32 4294901760, %v38271_v57  ;;  %v38280_v57 = vand.u32 4294901760, %v38247_v12 }
  0x8d   : > { %v27948_v15 = vpack.c.bf16 %v38274_v8, %v38272_v6  ;;  %v38282_v6 = vand.u32 4294901760, %v30770_v61 }
  0x8e   : > { %24490 = vmatmul.mubr.f32.gmra.mrb[22].mxu0 %v30753_v36  ;;  %v38269_v36 = vld [vmem:[#allocation41_spill] sm:$0xff] }
  0x8f   : > { %24492 = vmatprep.mubr.f32.mxu0 %v30755_v23  ;;  %v38268_v23 = vld [vmem:[#allocation40_spill] sm:$0xff] }
  0x92   : > { %24493 = vmatmul.mubr.f32.gmra.mrb[24].mxu0 %v30781_v45  ;;  %v38267_v45 = vld [vmem:[#allocation39_spill] sm:$0xff] }
  0x93   : > { %24495 = vmatprep.mubr.f32.mxu0 %v30799_v59  ;;  %v38266_v59 = vld [vmem:[#allocation35_spill] sm:$0xff] }
  0x96   : > { %24496 = vmatmul.mubr.f32.gmra.mrb[26].mxu0 %v30815_v18  ;;  %v38265_v18 = vld [vmem:[#allocation34_spill] sm:$0xff] }
  0x97   : > { %24498 = vmatprep.mubr.f32.mxu0 %v30817_v24  ;;  %v38260_v24 = vld [vmem:[#allocation23_spill] sm:$0xff] }
  0x98   : > { %v38291_v26 = vand.u32 4294901760, %v38260_v24 }
  0x9a   : > { %24499 = vmatmul.mubr.f32.gmra.mrb[28].mxu0 %v30835_v7  ;;  %v38259_v7 = vld [vmem:[#allocation22_spill] sm:$0xff] }
  0x9b   : > { %24501 = vmatprep.mubr.f32.mxu0 %v30840_v28  ;;  %v38258_v28 = vld [vmem:[#allocation19_spill] sm:$0xff] }
  0x9c   : > { %v38289_v4 = vand.u32 4294901760, %v38258_v28 }
  0x9e   : > { %24502 = vmatmul.mubr.f32.gmra.mrb[30].mxu0 %v30852_v58  ;;  %v38257_v58 = vld [vmem:[#allocation18_spill] sm:$0xff] }
  0x9f   : > { %24520 = vmatprep.mubr.f32.mxu0 %v38242_v39  ;;  %v38288_v61 = vand.u32 4294901760, %v38257_v58  ;;  %v38301_v39 = vand.u32 4294901760, %v30776_v16 }
  0xa2   : > { %24521 = vmatmul.mubr.f32.vlgmr.msra.gmra.mrb[0].mxu0 %v38243_v32  ;;  %v38302_v32 = vand.u32 4294901760, %v30779_v54 }
  0xa3   : > { %27931 = vmatpush3.bf16.msra.mxu0 %v30432_v14  ;;  %24523 = vmatprep.mubr.f32.mxu0 %v38244_v46  ;;  %v38318_v46 = vld [vmem:[#allocation36_spill] sm:$0xff] }
  0xa4   : > { %27933 = vmatprep.subr.bf16.mxu0 %v38245_v10 }
  0xa6   : > { %24524 = vmatmul.mubr.f32.gmra.mrb[2].mxu0 %v38246_v33 }
  0xa7   : > { %24526 = vmatprep.mubr.f32.mxu0 %v38247_v12  ;;  %27935 = vmatpush3.bf16.msra.mxu0 %v38245_v10  ;;  %v38321_v12 = vld [vmem:[#allocation42_spill] sm:$0xff] }
  0xa8   : > { %27937 = vmatprep.subr.bf16.mxu0 %v38248_v35 }
  0xaa   : > { %24527 = vmatmul.mubr.f32.gmra.mrb[4].mxu0 %v38249_v44 }
  0xab   : > { %24529 = vmatprep.mubr.f32.mxu0 %v38250_v22  ;;  %27939 = vmatpush3.bf16.msra.mxu0 %v38248_v35  ;;  %v38324_v22 = vld [vmem:[#allocation45_spill] sm:$0xff] }
  0xac   : > { %27941 = vmatprep.subr.bf16.mxu0 %v38251_v41 }
  0xae   : > { %24530 = vmatmul.mubr.f32.gmra.mrb[6].mxu0 %v38254_v25  ;;  %v38300_v25 = vand.u32 4294901760, %v38269_v36 }
  0xaf   : > { %24532 = vmatprep.mubr.f32.mxu0 %v38255_v29  ;;  %27943 = vmatpush3.bf16.msra.mxu0 %v38251_v41  ;;  %v38292_v29 = vand.u32 4294901760, %v38261_v17 }
  0xb0   : > { %27945 = vmatprep.subr.bf16.mxu0 %v27944_v2 }
  0xb2   : > { %24533 = vmatmul.mubr.f32.gmra.mrb[8].mxu0 %v38256_v63 }
  0xb3   : > { %24535 = vmatprep.mubr.f32.mxu0 %v38257_v58  ;;  %v38295_v58 = vand.u32 4294901760, %v38264_v20 }
  0xb6   : > { %24536 = vmatmul.mubr.f32.gmra.mrb[10].mxu0 %v38258_v28  ;;  %v38296_v28 = vand.u32 4294901760, %v38265_v18 }
  0xb7   : > { %24538 = vmatprep.mubr.f32.mxu0 %v38259_v7 }
  0xba   : > { %24539 = vmatmul.mubr.f32.gmra.mrb[12].mxu0 %v38260_v24  ;;  %v38298_v24 = vand.u32 4294901760, %v38267_v45 }
  0xbb   : > { %24541 = vmatprep.mubr.f32.mxu0 %v38261_v17  ;;  %v38326_v17 = vld [vmem:[#allocation47_spill] sm:$0xff] }
  0xbe   : > { %24542 = vmatmul.mubr.f32.gmra.mrb[14].mxu0 %v38262_v19 }
  0xbf   : > { %24544 = vmatprep.mubr.f32.mxu0 %v38263_v21 }
  0xc2   : > { %24545 = vmatmul.mubr.f32.gmra.mrb[16].mxu0 %v38264_v20  ;;  %v38329_v20 = vld [vmem:[#allocation50_spill] sm:$0xff] }
  0xc3   : > { %24547 = vmatprep.mubr.f32.mxu0 %v38265_v18  ;;  %v38303_v18 = vand.u32 4294901760, %v30810_v13 }
  0xc6   : > { %24548 = vmatmul.mubr.f32.gmra.mrb[18].mxu0 %v38266_v59 }
  0xc7   : > { %24550 = vmatprep.mubr.f32.mxu0 %v38267_v45  ;;  %v38305_v45 = vand.u32 4294901760, %v30833_v60 }
  0xca   : > { %24551 = vmatmul.mubr.f32.gmra.mrb[20].mxu0 %v38268_v23 }
  0xcb   : > { %24553 = vmatprep.mubr.f32.mxu0 %v38269_v36  ;;  %v38307_v36 = vand.u32 4294901760, %v30850_v49 }
  0xce   : > { %24554 = vmatmul.mubr.f32.gmra.mrb[22].mxu0 %v30776_v16  ;;  %v38308_v16 = vand.u32 4294901760, %v30859_v30 }
  0xcf   : > { %24556 = vmatprep.mubr.f32.mxu0 %v30779_v54  ;;  %v38309_v54 = vand.u32 4294901760, %v30866_v47 }
  0xd2   : > { %24557 = vmatmul.mubr.f32.gmra.mrb[24].mxu0 %v30810_v13  ;;  %v38312_v13 = vld [vmem:[#allocation24_spill] sm:$0xff] }
  0xd3   : > { %24559 = vmatprep.mubr.f32.mxu0 %v30813_v42 }
  0xd6   : > { %24560 = vmatmul.mubr.f32.gmra.mrb[26].mxu0 %v30833_v60  ;;  %v38313_v60 = vld [vmem:[#allocation26_spill] sm:$0xff] }
  0xd7   : > { %24562 = vmatprep.mubr.f32.mxu0 %v30838_v34 }
  0xda   : > { %24563 = vmatmul.mubr.f32.gmra.mrb[28].mxu0 %v30850_v49  ;;  %v38315_v49 = vld [vmem:[#allocation30_spill] sm:$0xff] }
  0xdb   : > { %24565 = vmatprep.mubr.f32.mxu0 %v30859_v30  ;;  %v38316_v30 = vld [vmem:[#allocation32_spill] sm:$0xff] }
  0xde   : > { %24566 = vmatmul.mubr.f32.gmra.mrb[30].mxu0 %v30866_v47  ;;  %v38317_v47 = vld [vmem:[#allocation33_spill] sm:$0xff] }
  0xdf   : > { %24584 = vmatprep.mubr.f32.mxu0 %v38270_v43  ;;  %v38279_v43 = vand.u32 4294901760, %v38246_v33  ;;  %v38320_v33 = vld [vmem:[#allocation38_spill] sm:$0xff] }
  0xe2   : > { %24585 = vmatmul.mubr.f32.vlgmr.msra.gmra.mrb[0].mxu0 %v38275_v56  ;;  %v38281_v56 = vand.u32 4294901760, %v30745_v48  ;;  %v38293_v48 = vand.u32 4294901760, %v38262_v19  ;;  %v38327_v19 = vld [vmem:[#allocation48_spill] sm:$0xff] }
  0xe3   : > { %27947 = vmatpush3.bf16.msra.mxu0 %v27944_v2  ;;  %24587 = vmatprep.mubr.f32.mxu0 %v38276_v11  ;;  %v38283_v11 = vand.u32 4294901760, %v38249_v44  ;;  %v38294_v2 = vand.u32 4294901760, %v38263_v21  ;;  %v38323_v44 = vld [vmem:[#allocation44_spill] sm:$0xff]  ;;  %v38328_v21 = vld [vmem:[#allocation49_spill] sm:$0xff] }
  0xe4   : > { %27949 = vmatprep.subr.bf16.mxu0 %v27948_v15  ;;  %v27956_v8 = vpack.c.bf16 %v38282_v6, %v38281_v56 }
  0xe6   : > { %24588 = vmatmul.mubr.f32.gmra.mrb[2].mxu0 %v38279_v43 }
  0xe7   : > { %24590 = vmatprep.mubr.f32.mxu0 %v38280_v57  ;;  %27951 = vmatpush3.bf16.msra.mxu0 %v27948_v15  ;;  %v38287_v15 = vand.u32 4294901760, %v38256_v63  ;;  %v38299_v63 = vand.u32 4294901760, %v38268_v23  ;;  %v38306_v23 = vand.u32 4294901760, %v30838_v34  ;;  %v38314_v34 = vld [vmem:[#allocation27_spill] sm:$0xff] }
  0xe8   : > { %27953 = vmatprep.subr.bf16.mxu0 %v27952_v9 }
  0xea   : > { %24591 = vmatmul.mubr.f32.gmra.mrb[4].mxu0 %v38283_v11 }
  0xeb   : > { %24593 = vmatprep.mubr.f32.mxu0 %v38284_v53  ;;  %27955 = vmatpush3.bf16.msra.mxu0 %v27952_v9  ;;  %v38290_v9 = vand.u32 4294901760, %v38259_v7  ;;  %v38297_v7 = vand.u32 4294901760, %v38266_v59  ;;  %v38304_v59 = vand.u32 4294901760, %v30813_v42  ;;  %v38311_v42 = vld [vmem:[#allocation21_spill] sm:$0xff] }
  0xec   : > { %27957 = vmatprep.subr.bf16.mxu0 %v27956_v8 }
  0xee   : > { %24594 = vmatmul.mubr.f32.gmra.mrb[6].mxu0 %v38285_v55 }
  0xef   : > { %24596 = vmatprep.mubr.f32.mxu0 %v38286_v3  ;;  %27959 = vmatpush3.bf16.msra.mxu0 %v27956_v8  ;;  %v22078_v3 = vld [vmem:[%s36912_s3 + $0x30] sm:$0xff] }
  0xf0   : > { %27961 = vmatprep.subr.bf16.mxu0 %v30432_v14 }
  0xf2   : > { %24597 = vmatmul.mubr.f32.gmra.mrb[8].mxu0 %v38287_v15  ;;  %v22079_v15 = vld [vmem:[%s36912_s3 + $0x38] sm:$0xff] }
  0xf3   : > { %24599 = vmatprep.mubr.f32.mxu0 %v38288_v61  ;;  %v8346_v61 = vand.u32 4294901760, %v22078_v3 }
  0xf6   : > { %24600 = vmatmul.mubr.f32.gmra.mrb[10].mxu0 %v38289_v4  ;;  %v8349_v4 = vand.u32 4294901760, %v22079_v15 }
  0xf7   : > { %24602 = vmatprep.mubr.f32.mxu0 %v38290_v9  ;;  %v31200_v9 = vsub.f32 %v22078_v3, %v8346_v61 }
  0xf9   : > { %38334 = vst [vmem:[#allocation11_spill] sm:$0xff] %v31200_v9 }
  0xfa   : > { %24603 = vmatmul.mubr.f32.gmra.mrb[12].mxu0 %v38291_v26  ;;  %v31202_v26 = vsub.f32 %v22079_v15, %v8349_v4 }
  0xfb   : > { %24605 = vmatprep.mubr.f32.mxu0 %v38292_v29 }
  0xfc   : > { %38335 = vst [vmem:[#allocation12_spill] sm:$0xff] %v31202_v26 }
  0xfe   : > { %24606 = vmatmul.mubr.f32.gmra.mrb[14].mxu0 %v38293_v48 }
  0xff   : > { %24608 = vmatprep.mubr.f32.mxu0 %v38294_v2  ;;  %v31208_v2 = vpack.c.bf16 %v8349_v4, %v8346_v61 }
 0x101   : > { %38336 = vst [vmem:[#allocation5_spill] sm:$0xff] %v31208_v2 }
 0x102   : > { %24609 = vmatmul.mubr.f32.gmra.mrb[16].mxu0 %v38295_v58  ;;  %v31212_v58 = vpack.c.bf16 %v31202_v26, %v31200_v9 }
 0x103   : > { %24611 = vmatprep.mubr.f32.mxu0 %v38296_v28 }
 0x104   : > { %38337 = vst [vmem:[#allocation13_spill] sm:$0xff] %v31212_v58  ;;  %28216 = vmatprep.subr.bf16.mxu1 %v31212_v58 }
 0x105   : > { %28217 = vmatpush3.bf16.msra.mxu1 %v31212_v58 }
 0x106   : > { %24612 = vmatmul.mubr.f32.gmra.mrb[18].mxu0 %v38297_v7  ;;  %28061 = vmatprep.subr.bf16.mxu1 %v31208_v2 }
 0x107   : > { %24614 = vmatprep.mubr.f32.mxu0 %v38298_v24 }
 0x10a   : > { %24615 = vmatmul.mubr.f32.gmra.mrb[20].mxu0 %v38299_v63 }
 0x10b   : > { %24617 = vmatprep.mubr.f32.mxu0 %v38300_v25 }
 0x10e   : > { %24618 = vmatmul.mubr.f32.gmra.mrb[22].mxu0 %v38301_v39 }
 0x10f   : > { %24620 = vmatprep.mubr.f32.mxu0 %v38302_v32 }
 0x112   : > { %24621 = vmatmul.mubr.f32.gmra.mrb[24].mxu0 %v38303_v18  ;;  %v31228_v18 = vld [vmem:[%s36911_s2] ss:$0 sm:$0xff] }
 0x113   : > { %24623 = vmatprep.mubr.f32.mxu0 %v38304_v59 }
 0x116   : > { %24624 = vmatmul.mubr.f32.gmra.mrb[26].mxu0 %v38305_v45 }
 0x117   : > { %24626 = vmatprep.mubr.f32.mxu0 %v38306_v23 }
 0x11a   : > { %24627 = vmatmul.mubr.f32.gmra.mrb[28].mxu0 %v38307_v36 }
 0x11b   : > { %24629 = vmatprep.mubr.f32.mxu0 %v38308_v16 }
 0x11e   : > { %24630 = vmatmul.mubr.f32.gmra.mrb[30].mxu0 %v38309_v54 }
 0x11f   : > { %24648 = vmatprep.mubr.f32.mxu0 %v30484_v37 }
 0x122   : > { %24649 = vmatmul.mubr.f32.vlgmr.msra.gmra.mrb[0].mxu0 %v30486_v38 }
 0x123   : > { %27963 = vmatpush3.bf16.msra.mxu0 %v30432_v14  ;;  %24651 = vmatprep.mubr.f32.mxu0 %v30491_v40  ;;  %v38310_v14 = vld [vmem:[#allocation20_spill] sm:$0xff] }
 0x124   : > { %27965 = vmatprep.subr.bf16.mxu0 %v38245_v10 }
 0x126   : > { %24652 = vmatmul.mubr.f32.gmra.mrb[2].mxu0 %v30508_v50 }
 0x127   : > { %24654 = vmatprep.mubr.f32.mxu0 %v30510_v51  ;;  %27967 = vmatpush3.bf16.msra.mxu0 %v38245_v10  ;;  %v38319_v10 = vld [vmem:[#allocation37_spill] sm:$0xff] }
 0x128   : > { %27969 = vmatprep.subr.bf16.mxu0 %v38248_v35 }
 0x12a   : > { %24655 = vmatmul.mubr.f32.gmra.mrb[4].mxu0 %v30512_v52 }
 0x12b   : > { %24657 = vmatprep.mubr.f32.mxu0 %v30528_v62  ;;  %27971 = vmatpush3.bf16.msra.mxu0 %v38248_v35  ;;  %v38322_v35 = vld [vmem:[#allocation43_spill] sm:$0xff] }
 0x12c   : > { %27973 = vmatprep.subr.bf16.mxu0 %v38251_v41 }
 0x12e   : > { %24658 = vmatmul.mubr.f32.gmra.mrb[6].mxu0 %v30550_v31 }
 0x12f   : > { %24660 = vmatprep.mubr.f32.mxu0 %v30579_v0  ;;  %27975 = vmatpush3.bf16.msra.mxu0 %v38251_v41  ;;  %v38325_v41 = vld [vmem:[#allocation46_spill] sm:$0xff] }
 0x132   : > { %24661 = vmatmul.mubr.f32.gmra.mrb[8].mxu0 %v30581_v1 }
 0x133   : > { %24663 = vmatprep.mubr.f32.mxu0 %v30597_v27 }
 0x136   : > { %24664 = vmatmul.mubr.f32.gmra.mrb[10].mxu0 %v30602_v5 }
 0x137   : > { %24666 = vmatprep.mubr.f32.mxu0 %v38310_v14 }
 0x13a   : > { %24667 = vmatmul.mubr.f32.gmra.mrb[12].mxu0 %v38311_v42 }
 0x13b   : > { %24669 = vmatprep.mubr.f32.mxu0 %v38312_v13 }
 0x13e   : > { %24670 = vmatmul.mubr.f32.gmra.mrb[14].mxu0 %v38313_v60 }
 0x13f   : > { %24672 = vmatprep.mubr.f32.mxu0 %v38314_v34 }
 0x142   : > { %24673 = vmatmul.mubr.f32.gmra.mrb[16].mxu0 %v38315_v49 }
 0x143   : > { %24675 = vmatprep.mubr.f32.mxu0 %v38316_v30 }
 0x146   : > { %24676 = vmatmul.mubr.f32.gmra.mrb[18].mxu0 %v38317_v47 }
 0x147   : > { %24678 = vmatprep.mubr.f32.mxu0 %v38318_v46 }
 0x14a   : > { %24679 = vmatmul.mubr.f32.gmra.mrb[20].mxu0 %v38319_v10 }
 0x14b   : > { %24681 = vmatprep.mubr.f32.mxu0 %v38320_v33 }
 0x14e   : > { %24682 = vmatmul.mubr.f32.gmra.mrb[22].mxu0 %v38321_v12 }
 0x14f   : > { %24684 = vmatprep.mubr.f32.mxu0 %v38322_v35 }
 0x152   : > { %24685 = vmatmul.mubr.f32.gmra.mrb[24].mxu0 %v38323_v44 }
 0x153   : > { %24687 = vmatprep.mubr.f32.mxu0 %v38324_v22 }
 0x156   : > { %24688 = vmatmul.mubr.f32.gmra.mrb[26].mxu0 %v38325_v41 }
 0x157   : > { %24690 = vmatprep.mubr.f32.mxu0 %v38326_v17 }
 0x15a   : > { %24691 = vmatmul.mubr.f32.gmra.mrb[28].mxu0 %v38327_v19 }
 0x15b   : > { %24693 = vmatprep.mubr.f32.mxu0 %v38328_v21 }
 0x15e   : > { %24694 = vmatmul.mubr.f32.gmra.mrb[30].mxu0 %v38329_v20 }
 0x15f   : > { %24712 = vmatprep.mubr.f32.mxu0 %v30484_v37  ;;  %v30347_v37 = vmov 0.0  }
 0x160   : > { %2331 = vst.msk [vmem:[#allocation2 + $0x20] sm:$0xff] %vm2325_vm1, %v30347_v37  ;;  %2326 = vst.msk [vmem:[#allocation2] sm:$0xff] %vm2325_vm1, %v30347_v37 }
 0x161   : > { %2327 = vst.msk [vmem:[#allocation2 + $0x8] sm:$0xff] %vm2325_vm1, %v30347_v37  ;;  %2330 = vst.msk [vmem:[#allocation2 + $0x18] sm:$0xff] %vm2325_vm1, %v30347_v37 }
 0x162   : > { %24713 = vmatmul.mubr.f32.vlgmr.msra.gmra.mrb[0].mxu0 %v30486_v38  ;;  %2333 = vst.msk [vmem:[#allocation2 + $0x30] sm:$0xff] %vm2325_vm1, %v30347_v37  ;;  %2334 = vst.msk [vmem:[#allocation2 + $0x38] sm:$0xff] %vm2325_vm1, %v30347_v37 }
 0x163   : > { %24715 = vmatprep.mubr.f32.mxu0 %v30491_v40  ;;  %2336 = vst.msk [vmem:[#allocation2 + $0x48] sm:$0xff] %vm2325_vm1, %v30347_v37  ;;  %2337 = vst.msk [vmem:[#allocation2 + $0x50] sm:$0xff] %vm2325_vm1, %v30347_v37 }
 0x164   : > { %2339 = vst.msk [vmem:[#allocation2 + $0x60] sm:$0xff] %vm2325_vm1, %v30347_v37  ;;  %2340 = vst.msk [vmem:[#allocation2 + $0x68] sm:$0xff] %vm2325_vm1, %v30347_v37 }
 0x165   : > { %2342 = vst.msk [vmem:[#allocation2 + $0x78] sm:$0xff] %vm2325_vm1, %v30347_v37  ;;  %2343 = vst.msk [vmem:[#allocation2 + $0x80] sm:$0xff] %vm2325_vm1, %v30347_v37 }
 0x166   : > { %24716 = vmatmul.mubr.f32.gmra.mrb[2].mxu0 %v30508_v50  ;;  %2345 = vst.msk [vmem:[#allocation2 + $0x90] sm:$0xff] %vm2325_vm1, %v30347_v37  ;;  %2346 = vst.msk [vmem:[#allocation2 + $0x98] sm:$0xff] %vm2325_vm1, %v30347_v37 }
 0x167   : > { %24718 = vmatprep.mubr.f32.mxu0 %v30510_v51  ;;  %2348 = vst.msk [vmem:[#allocation2 + $0xa8] sm:$0xff] %vm2325_vm1, %v30347_v37  ;;  %2349 = vst.msk [vmem:[#allocation2 + $0xb0] sm:$0xff] %vm2325_vm1, %v30347_v37 }
 0x168   : > { %2351 = vst.msk [vmem:[#allocation2 + $0xc0] sm:$0xff] %vm2325_vm1, %v30347_v37  ;;  %2352 = vst.msk [vmem:[#allocation2 + $0xc8] sm:$0xff] %vm2325_vm1, %v30347_v37  ;;  %v2448_v38 = vld [vmem:[#allocation2 + $0x1] sm:$0xff] }
 0x169   : > { %2354 = vst.msk [vmem:[#allocation2 + $0xd8] sm:$0xff] %vm2325_vm1, %v30347_v37  ;;  %2355 = vst.msk [vmem:[#allocation2 + $0xe0] sm:$0xff] %vm2325_vm1, %v30347_v37  ;;  %v2484_v40 = vsel %vm2325_vm1, %v2448_v38, 0 }
 0x16a   : > { %24719 = vmatmul.mubr.f32.gmra.mrb[4].mxu0 %v30512_v52  ;;  %2357 = vst.msk [vmem:[#allocation2 + $0xf0] sm:$0xff] %vm2325_vm1, %v30347_v37  ;;  %2358 = vst.msk [vmem:[#allocation2 + $0xf8] sm:$0xff] %vm2325_vm1, %v30347_v37  ;;  %v31165_v51 = vand.u32 4294901760, %v2484_v40 }
 0x16b   : > { %24721 = vmatprep.mubr.f32.mxu0 %v30528_v62  ;;  %2360 = vst.msk [vmem:[#allocation2 + $0x108] sm:$0xff] %vm2325_vm1, %v30347_v37  ;;  %2361 = vst.msk [vmem:[#allocation2 + $0x110] sm:$0xff] %vm2325_vm1, %v30347_v37 }
 0x16c   : > { %2363 = vst.msk [vmem:[#allocation2 + $0x120] sm:$0xff] %vm2325_vm1, %v30347_v37  ;;  %2364 = vst.msk [vmem:[#allocation2 + $0x128] sm:$0xff] %vm2325_vm1, %v30347_v37 }
 0x16d   : > { %2366 = vst.msk [vmem:[#allocation2 + $0x138] sm:$0xff] %vm2325_vm1, %v30347_v37  ;;  %2367 = vst.msk [vmem:[#allocation2 + $0x140] sm:$0xff] %vm2325_vm1, %v30347_v37 }
 0x16e   : > { %24722 = vmatmul.mubr.f32.gmra.mrb[6].mxu0 %v30550_v31  ;;  %2369 = vst.msk [vmem:[#allocation2 + $0x150] sm:$0xff] %vm2325_vm1, %v30347_v37  ;;  %2370 = vst.msk [vmem:[#allocation2 + $0x158] sm:$0xff] %vm2325_vm1, %v30347_v37  ;;  %v22075_v31 = vld [vmem:[%s36912_s3 + $0x18] sm:$0xff] }
 0x16f   : > { %24724 = vmatprep.mubr.f32.mxu0 %v30579_v0  ;;  %2372 = vst.msk [vmem:[#allocation2 + $0x168] sm:$0xff] %vm2325_vm1, %v30347_v37  ;;  %2373 = vst.msk [vmem:[#allocation2 + $0x170] sm:$0xff] %vm2325_vm1, %v30347_v37  ;;  %v31177_v0 = vsub.f32 %v2484_v40, %v31165_v51 }
 0x170   : > { %2375 = vst.msk [vmem:[#allocation2 + $0x180] sm:$0xff] %vm2325_vm1, %v30347_v37  ;;  %2376 = vst.msk [vmem:[#allocation2 + $0x188] sm:$0xff] %vm2325_vm1, %v30347_v37 }
 0x171   : > { %2378 = vst.msk [vmem:[#allocation2 + $0x198] sm:$0xff] %vm2325_vm1, %v30347_v37  ;;  %2379 = vst.msk [vmem:[#allocation2 + $0x1a0] sm:$0xff] %vm2325_vm1, %v30347_v37  ;;  %v37056_v57 = vand.u32 4294901760, %v31177_v0 }
 0x172   : > { %24725 = vmatmul.mubr.f32.gmra.mrb[8].mxu0 %v30581_v1  ;;  %2332 = vst.msk [vmem:[#allocation2 + $0x28] sm:$0x3] %vm2328_vm2, %v30347_v37  ;;  %2329 = vst.msk [vmem:[#allocation2 + $0x10] sm:$0x3] %vm2328_vm2, %v30347_v37 }
 0x173   : > { %24727 = vmatprep.mubr.f32.mxu0 %v30597_v27  ;;  %2335 = vst.msk [vmem:[#allocation2 + $0x40] sm:$0x3] %vm2328_vm2, %v30347_v37  ;;  %2338 = vst.msk [vmem:[#allocation2 + $0x58] sm:$0x3] %vm2328_vm2, %v30347_v37  ;;  %v2583_v27 = vand.u32 4294901760, %v22075_v31  ;;  %v2649_v8 = vsub.f32 %v31177_v0, %v37056_v57 }
 0x174   : > { %2341 = vst.msk [vmem:[#allocation2 + $0x70] sm:$0x3] %vm2328_vm2, %v30347_v37  ;;  %2344 = vst.msk [vmem:[#allocation2 + $0x88] sm:$0x3] %vm2328_vm2, %v30347_v37 }
 0x175   : > { %2347 = vst.msk [vmem:[#allocation2 + $0xa0] sm:$0x3] %vm2328_vm2, %v30347_v37  ;;  %2350 = vst.msk [vmem:[#allocation2 + $0xb8] sm:$0x3] %vm2328_vm2, %v30347_v37  ;;  %v2650_v53 = vand.u32 4294901760, %v2649_v8  ;;  %v31206_v48 = vsub.f32 %v22075_v31, %v2583_v27 }
 0x176   : > { %24728 = vmatmul.mubr.f32.gmra.mrb[10].mxu0 %v30602_v5  ;;  %2353 = vst.msk [vmem:[#allocation2 + $0xd0] sm:$0x3] %vm2328_vm2, %v30347_v37  ;;  %2356 = vst.msk [vmem:[#allocation2 + $0xe8] sm:$0x3] %vm2328_vm2, %v30347_v37  ;;  %v22074_v5 = vld [vmem:[%s36912_s3 + $0x10] sm:$0xff] }
 0x177   : > { %24730 = vmatprep.mubr.f32.mxu0 %v38310_v14  ;;  %2359 = vst.msk [vmem:[#allocation2 + $0x100] sm:$0x3] %vm2328_vm2, %v30347_v37  ;;  %2362 = vst.msk [vmem:[#allocation2 + $0x118] sm:$0x3] %vm2328_vm2, %v30347_v37  ;;  %v2580_v1 = vand.u32 4294901760, %v22074_v5  ;;  %v37057_v7 = vand.u32 4294901760, %v31206_v48 }
 0x178   : > { %2365 = vst.msk [vmem:[#allocation2 + $0x130] sm:$0x3] %vm2328_vm2, %v30347_v37  ;;  %2368 = vst.msk [vmem:[#allocation2 + $0x148] sm:$0x3] %vm2328_vm2, %v30347_v37 }
 0x179   : > { %2371 = vst.msk [vmem:[#allocation2 + $0x160] sm:$0x3] %vm2328_vm2, %v30347_v37  ;;  %2374 = vst.msk [vmem:[#allocation2 + $0x178] sm:$0x3] %vm2328_vm2, %v30347_v37  ;;  %v2449_v50 = vld [vmem:[#allocation2 + $0x9] sm:$0xff]  ;;  %v31183_v56 = vpack.c.bf16 %v2583_v27, %v2580_v1  ;;  %v31204_v29 = vsub.f32 %v22074_v5, %v2580_v1  ;;  %v2977_v63 = vsub.f32 %v31206_v48, %v37057_v7 }
 0x17a   : > { %24731 = vmatmul.mubr.f32.gmra.mrb[12].mxu0 %v38311_v42  ;;  %2377 = vst.msk [vmem:[#allocation2 + $0x190] sm:$0x3] %vm2328_vm2, %v30347_v37  ;;  %2380 = vst.msk [vmem:[#allocation2 + $0x1a8] sm:$0x3] %vm2328_vm2, %v30347_v37  ;;  %v2487_v52 = vsel %vm2325_vm1, %v2449_v50, 0 }
 0x17b   : > { %24733 = vmatprep.mubr.f32.mxu0 %v38312_v13  ;;  %38330 = vst [vmem:[#allocation8_spill] sm:$0xff] %v31165_v51  ;;  %v31168_v62 = vand.u32 4294901760, %v2487_v52  ;;  %38332 = vst [vmem:[#allocation10_spill] sm:$0xff] %v31177_v0  ;;  %27977 = vmatprep.subr.bf16.mxu0 %v31183_v56  ;;  %v37060_v28 = vand.u32 4294901760, %v31204_v29  ;;  %v2978_v39 = vand.u32 4294901760, %v2977_v63 }
 0x17c   : > { %27979 = vmatpush3.bf16.msra.mxu0 %v31183_v56 }
 0x17d   : > { %38331 = vst [vmem:[#allocation9_spill] sm:$0xff] %v31168_v62  ;;  %v31180_v43 = vsub.f32 %v2487_v52, %v31168_v62  ;;  %v2970_v24 = vsub.f32 %v31204_v29, %v37060_v28 }
 0x17e   : > { %24734 = vmatmul.mubr.f32.gmra.mrb[14].mxu0 %v38313_v60 }
 0x17f   : > { %24736 = vmatprep.mubr.f32.mxu0 %v38314_v34  ;;  %38333 = vst [vmem:[#allocation3_spill] sm:$0xff] %v31180_v43  ;;  %v37055_v6 = vand.u32 4294901760, %v31180_v43  ;;  %v2971_v25 = vand.u32 4294901760, %v2970_v24 }
 0x181   : > { %v2659_v11 = vsub.f32 %v31180_v43, %v37055_v6  ;;  %v27980_v32 = vpack.c.bf16 %v2978_v39, %v2971_v25 }
 0x182   : > { %24737 = vmatmul.mubr.f32.gmra.mrb[16].mxu0 %v38315_v49 }
 0x183   : > { %24739 = vmatprep.mubr.f32.mxu0 %v38316_v30  ;;  %v2660_v55 = vand.u32 4294901760, %v2659_v11  ;;  %27981 = vmatprep.subr.bf16.mxu0 %v27980_v32 }
 0x186   : > { %24740 = vmatmul.mubr.f32.gmra.mrb[18].mxu0 %v38317_v47 }
 0x187   : > { %24742 = vmatprep.mubr.f32.mxu0 %v38318_v46 }
 0x18a   : > { %24743 = vmatmul.mubr.f32.gmra.mrb[20].mxu0 %v38319_v10 }
 0x18b   : > { %24745 = vmatprep.mubr.f32.mxu0 %v38320_v33 }
 0x18e   : > { %24746 = vmatmul.mubr.f32.gmra.mrb[22].mxu0 %v38321_v12 }
 0x18f   : > { %24748 = vmatprep.mubr.f32.mxu0 %v38322_v35 }
 0x192   : > { %24749 = vmatmul.mubr.f32.gmra.mrb[24].mxu0 %v38323_v44 }
 0x193   : > { %24751 = vmatprep.mubr.f32.mxu0 %v38324_v22 }
 0x196   : > { %24752 = vmatmul.mubr.f32.gmra.mrb[26].mxu0 %v38325_v41 }
 0x197   : > { %24754 = vmatprep.mubr.f32.mxu0 %v38326_v17 }
 0x19a   : > { %24755 = vmatmul.mubr.f32.gmra.mrb[28].mxu0 %v38327_v19 }
 0x19b   : > { %24757 = vmatprep.mubr.f32.mxu0 %v38328_v21 }
 0x19e   : > { %24758 = vmatmul.mubr.f32.gmra.mrb[30].mxu0 %v38329_v20 }
 0x19f   : > { %24764 = vmatprep.mubr.f32.mxu0 %v2650_v53 }
 0x1a2   : > { %24765 = vmatmul.mubr.f32.vlgmr.msra.gmra.mrb[32].mxu0 %v2660_v55 }
 0x1a3   : > { %27983 = vmatpush3.bf16.msra.mxu0 %v27980_v32 }
 0x235   : > { %v24714_v59 = vpop.f32.mrb[0].mxu0 }
 0x236   : > { %v28218_v45 = vadd.f32 %v24714_v59, %v31228_v18  ;;  %v2103_v23 = vpop.f32.mrb[1].mxu0 }
 0x237   : > { %v28219_v36 = vadd.f32 %v31228_v18, %v2103_v23 }
 0x238   : > { %v2294_v16 = vmax.f32 %v28218_v45, 0.0 }
 0x239   : > { %v2293_v54 = vmax.f32 %v28219_v36, 0.0  ;;  %v24717_v14 = vpop.f32.mrb[2].mxu0 }
 0x23a   : > { %2383 = vst.msk [vmem:[#allocation2 + $0x21] sm:$0xff] %vm2325_vm1, %v2294_v16  ;;  %v28220_v42 = vadd.f32 %v24717_v14, %v31228_v18  ;;  %v2115_v13 = vpop.f32.mrb[3].mxu0 }
 0x23b   : > { %2382 = vst.msk [vmem:[#allocation2 + $0x19] sm:$0xff] %vm2325_vm1, %v2293_v54  ;;  %v28221_v60 = vadd.f32 %v31228_v18, %v2115_v13 }
 0x23c   : > { %v2296_v34 = vmax.f32 %v28220_v42, 0.0 }
 0x23d   : > { %v2295_v49 = vmax.f32 %v28221_v60, 0.0  ;;  %v24720_v30 = vpop.f32.mrb[4].mxu0 }
 0x23e   : > { %2385 = vst.msk [vmem:[#allocation2 + $0x39] sm:$0xff] %vm2325_vm1, %v2296_v34  ;;  %v28222_v47 = vadd.f32 %v24720_v30, %v31228_v18  ;;  %v2127_v46 = vpop.f32.mrb[5].mxu0 }
 0x23f   : > { %2384 = vst.msk [vmem:[#allocation2 + $0x31] sm:$0xff] %vm2325_vm1, %v2295_v49  ;;  %v28223_v10 = vadd.f32 %v31228_v18, %v2127_v46 }
 0x240   : > { %v2298_v33 = vmax.f32 %v28222_v47, 0.0 }
 0x241   : > { %v2297_v12 = vmax.f32 %v28223_v10, 0.0  ;;  %v24723_v35 = vpop.f32.mrb[6].mxu0  ;;  %v2451_v44 = vld [vmem:[#allocation2 + $0x21] sm:$0xff] }
 0x242   : > { %2387 = vst.msk [vmem:[#allocation2 + $0x51] sm:$0xff] %vm2325_vm1, %v2298_v33  ;;  %v28224_v22 = vadd.f32 %v24723_v35, %v31228_v18  ;;  %v2139_v41 = vpop.f32.mrb[7].mxu0  ;;  %v2450_v17 = vld [vmem:[#allocation2 + $0x19] sm:$0xff]  ;;  %v2493_v19 = vsel %vm2325_vm1, %v2451_v44, 0 }
 0x243   : > { %2386 = vst.msk [vmem:[#allocation2 + $0x49] sm:$0xff] %vm2325_vm1, %v2297_v12  ;;  %v28225_v21 = vadd.f32 %v31228_v18, %v2139_v41  ;;  %v2490_v20 = vsel %vm2325_vm1, %v2450_v17, 0  ;;  %v31246_v37 = vand.u32 4294901760, %v2493_v19 }
 0x244   : > { %v2300_v38 = vmax.f32 %v28224_v22, 0.0  ;;  %v31248_v40 = vand.u32 4294901760, %v2490_v20 }
 0x245   : > { %38338 = vst [vmem:[#allocation14_spill] sm:$0xff] %v31246_v37  ;;  %v2299_v50 = vmax.f32 %v28225_v21, 0.0  ;;  %v24726_v52 = vpop.f32.mrb[8].mxu0  ;;  %v31251_v5 = vsub.f32 %v2493_v19, %v31246_v37  ;;  %v2453_v31 = vld [vmem:[#allocation2 + $0x39] sm:$0xff] }
 0x246   : > { %38339 = vst [vmem:[#allocation6_spill] sm:$0xff] %v31248_v40  ;;  %2389 = vst.msk [vmem:[#allocation2 + $0x69] sm:$0xff] %vm2325_vm1, %v2300_v38  ;;  %v28226_v1 = vadd.f32 %v24726_v52, %v31228_v18  ;;  %v2151_v27 = vpop.f32.mrb[9].mxu0  ;;  %v31256_v8 = vsub.f32 %v2490_v20, %v31248_v40  ;;  %v2452_v11 = vld [vmem:[#allocation2 + $0x31] sm:$0xff]  ;;  %v2499_v53 = vsel %vm2325_vm1, %v2453_v31, 0 }
 0x247   : > { %38340 = vst [vmem:[#allocation15_spill] sm:$0xff] %v31251_v5  ;;  %2388 = vst.msk [vmem:[#allocation2 + $0x61] sm:$0xff] %vm2325_vm1, %v2299_v50  ;;  %v28227_v55 = vadd.f32 %v31228_v18, %v2151_v27  ;;  %v37051_v3 = vand.u32 4294901760, %v31251_v5  ;;  %v2496_v15 = vsel %vm2325_vm1, %v2452_v11, 0  ;;  %v31263_v61 = vand.u32 4294901760, %v2499_v53 }
 0x248   : > { %38341 = vst [vmem:[#allocation16_spill] sm:$0xff] %v31256_v8  ;;  %v2302_v4 = vmax.f32 %v28226_v1, 0.0  ;;  %v37054_v24 = vand.u32 4294901760, %v31256_v8  ;;  %v31266_v63 = vand.u32 4294901760, %v2496_v15 }
 0x249   : > { %38342 = vst [vmem:[#allocation17_spill] sm:$0xff] %v31263_v61  ;;  %v2301_v25 = vmax.f32 %v28227_v55, 0.0  ;;  %v24729_v39 = vpop.f32.mrb[10].mxu0  ;;  %v2679_v32 = vsub.f32 %v31251_v5, %v37051_v3  ;;  %v31272_v59 = vsub.f32 %v2499_v53, %v31263_v61  ;;  %v2455_v45 = vld [vmem:[#allocation2 + $0x51] sm:$0xff] }
 0x24a   : > { %38343 = vst [vmem:[#allocation18_spill] sm:$0xff] %v31266_v63  ;;  %2391 = vst.msk [vmem:[#allocation2 + $0x81] sm:$0xff] %vm2325_vm1, %v2302_v4  ;;  %v28228_v23 = vadd.f32 %v24729_v39, %v31228_v18  ;;  %v2163_v36 = vpop.f32.mrb[11].mxu0  ;;  %v2669_v16 = vsub.f32 %v31256_v8, %v37054_v24  ;;  %v31280_v54 = vsub.f32 %v2496_v15, %v31266_v63  ;;  %v2454_v14 = vld [vmem:[#allocation2 + $0x49] sm:$0xff]  ;;  %v2505_v42 = vsel %vm2325_vm1, %v2455_v45, 0 }
 0x24b   : > { %38344 = vst [vmem:[#allocation19_spill] sm:$0xff] %v31272_v59  ;;  %2390 = vst.msk [vmem:[#allocation2 + $0x79] sm:$0xff] %vm2325_vm1, %v2301_v25  ;;  %v28229_v13 = vadd.f32 %v31228_v18, %v2163_v36  ;;  %v37049_v60 = vand.u32 4294901760, %v31272_v59  ;;  %v2502_v34 = vsel %vm2325_vm1, %v2454_v14, 0  ;;  %v2680_v12 = vand.u32 4294901760, %v2679_v32 }
 0x24c   : > { %38345 = vst [vmem:[#allocation22_spill] sm:$0xff] %v31280_v54  ;;  %v2304_v49 = vmax.f32 %v28228_v23, 0.0  ;;  %v2670_v30 = vand.u32 4294901760, %v2669_v16  ;;  %v37050_v47 = vand.u32 4294901760, %v31280_v54  ;;  %v31288_v46 = vand.u32 4294901760, %v2502_v34 }
 0x24d   : > { %v2303_v10 = vmax.f32 %v28229_v13, 0.0  ;;  %v24732_v33 = vpop.f32.mrb[12].mxu0  ;;  %v2699_v35 = vsub.f32 %v31272_v59, %v37049_v60  ;;  %v31293_v44 = vand.u32 4294901760, %v2505_v42  ;;  %v2457_v22 = vld [vmem:[#allocation2 + $0x69] sm:$0xff] }
 0x24e   : > { %38346 = vst [vmem:[#allocation23_spill] sm:$0xff] %v31288_v46  ;;  %2393 = vst.msk [vmem:[#allocation2 + $0x99] sm:$0xff] %vm2325_vm1, %v2304_v49  ;;  %v28230_v41 = vadd.f32 %v24732_v33, %v31228_v18  ;;  %v2175_v17 = vpop.f32.mrb[13].mxu0  ;;  %24767 = vmatprep.mubr.f32.mxu0 %v2670_v30  ;;  %v2689_v19 = vsub.f32 %v31280_v54, %v37050_v47  ;;  %v31301_v21 = vsub.f32 %v2502_v34, %v31288_v46  ;;  %v2456_v20 = vld [vmem:[#allocation2 + $0x61] sm:$0xff] }
 0x24f   : > { %38347 = vst [vmem:[#allocation25_spill] sm:$0xff] %v31293_v44  ;;  %v2511_v38 = vsel %vm2325_vm1, %v2457_v22, 0  ;;  %2392 = vst.msk [vmem:[#allocation2 + $0x91] sm:$0xff] %vm2325_vm1, %v2303_v10  ;;  %v28231_v50 = vadd.f32 %v31228_v18, %v2175_v17  ;;  %24768 = vmatmul.mubr.f32.gmra.mrb[34].mxu0 %v2680_v12  ;;  %v31307_v52 = vsub.f32 %v2505_v42, %v31293_v44  ;;  %v2508_v31 = vsel %vm2325_vm1, %v2456_v20, 0 }
 0x250   : > { %38348 = vst [vmem:[#allocation28_spill] sm:$0xff] %v31301_v21  ;;  %v2306_v1 = vmax.f32 %v28230_v41, 0.0  ;;  %v2690_v27 = vand.u32 4294901760, %v2689_v19  ;;  %v37048_v11 = vand.u32 4294901760, %v31301_v21  ;;  %v31311_v53 = vand.u32 4294901760, %v2508_v31 }
 0x251   : > { %38349 = vst [vmem:[#allocation29_spill] sm:$0xff] %v31307_v52  ;;  %v2305_v55 = vmax.f32 %v28231_v50, 0.0  ;;  %v24735_v15 = vpop.f32.mrb[14].mxu0  ;;  %v2700_v4 = vand.u32 4294901760, %v2699_v35  ;;  %v37045_v25 = vand.u32 4294901760, %v31307_v52  ;;  %v31314_v39 = vand.u32 4294901760, %v2511_v38 }
 0x252   : > { %38350 = vst [vmem:[#allocation31_spill] sm:$0xff] %v31311_v53  ;;  %v2459_v32 = vld [vmem:[#allocation2 + $0x81] sm:$0xff]  ;;  %2395 = vst.msk [vmem:[#allocation2 + $0xb1] sm:$0xff] %vm2325_vm1, %v2306_v1  ;;  %v28232_v45 = vadd.f32 %v24735_v15, %v31228_v18  ;;  %v2187_v23 = vpop.f32.mrb[15].mxu0  ;;  %24770 = vmatprep.mubr.f32.mxu0 %v2690_v27  ;;  %v2709_v36 = vsub.f32 %v31301_v21, %v37048_v11  ;;  %v31322_v16 = vsub.f32 %v2508_v31, %v31311_v53  ;;  %v2458_v14 = vld [vmem:[#allocation2 + $0x79] sm:$0xff] }
 0x253   : > { %38351 = vst [vmem:[#allocation34_spill] sm:$0xff] %v31314_v39  ;;  %v2517_v42 = vsel %vm2325_vm1, %v2459_v32, 0  ;;  %2394 = vst.msk [vmem:[#allocation2 + $0xa9] sm:$0xff] %vm2325_vm1, %v2305_v55  ;;  %v28233_v13 = vadd.f32 %v31228_v18, %v2187_v23  ;;  %24771 = vmatmul.mubr.f32.gmra.mrb[36].mxu0 %v2700_v4  ;;  %v2719_v34 = vsub.f32 %v31307_v52, %v37045_v25  ;;  %v2514_v30 = vsel %vm2325_vm1, %v2458_v14, 0  ;;  %v8217_v52 = vld [vmem:[#allocation2 + $0x38] sm:$0xff] }
 0x254   : > { %38352 = vst [vmem:[#allocation35_spill] sm:$0xff] %v31322_v16  ;;  %v31331_v49 = vsub.f32 %v2511_v38, %v31314_v39  ;;  %v2308_v10 = vmax.f32 %v28232_v45, 0.0  ;;  %v2710_v33 = vand.u32 4294901760, %v2709_v36  ;;  %v37044_v12 = vand.u32 4294901760, %v31322_v16 }
 0x255   : > { %v31335_v35 = vand.u32 4294901760, %v2514_v30  ;;  %v2307_v22 = vmax.f32 %v28233_v13, 0.0  ;;  %v24738_v41 = vpop.f32.mrb[16].mxu0  ;;  %v2720_v17 = vand.u32 4294901760, %v2719_v34  ;;  %v31338_v20 = vand.u32 4294901760, %v2517_v42  ;;  %v2461_v50 = vld [vmem:[#allocation2 + $0x99] sm:$0xff] }
 0x256   : > { %38353 = vst [vmem:[#allocation39_spill] sm:$0xff] %v31331_v49  ;;  %v37043_v19 = vand.u32 4294901760, %v31331_v49  ;;  %2397 = vst.msk [vmem:[#allocation2 + $0xc9] sm:$0xff] %vm2325_vm1, %v2308_v10  ;;  %v28234_v38 = vadd.f32 %v24738_v41, %v31228_v18  ;;  %v2199_v31 = vpop.f32.mrb[17].mxu0  ;;  %24773 = vmatprep.mubr.f32.mxu0 %v2710_v33  ;;  %v2729_v1 = vsub.f32 %v31322_v16, %v37044_v12  ;;  %v2460_v55 = vld [vmem:[#allocation2 + $0x91] sm:$0xff]  ;;  %v2523_v15 = vsel %vm2325_vm1, %v2461_v50, 0 }
 0x257   : > { %38354 = vst [vmem:[#allocation40_spill] sm:$0xff] %v31335_v35  ;;  %38355 = vst [vmem:[#allocation41_spill] sm:$0xff] %v31338_v20  ;;  %v31346_v27 = vsub.f32 %v2514_v30, %v31335_v35  ;;  %v28235_v4 = vadd.f32 %v31228_v18, %v2199_v31  ;;  %24774 = vmatmul.mubr.f32.gmra.mrb[38].mxu0 %v2720_v17  ;;  %v31355_v45 = vsub.f32 %v2517_v42, %v31338_v20 }
 0x258   : > { %2396 = vst.msk [vmem:[#allocation2 + $0xc1] sm:$0xff] %vm2325_vm1, %v2307_v22  ;;  %v2739_v32 = vsub.f32 %v31331_v49, %v37043_v19  ;;  %v2520_v23 = vsel %vm2325_vm1, %v2460_v55, 0  ;;  %v2310_v36 = vmax.f32 %v28234_v38, 0.0  ;;  %v2730_v14 = vand.u32 4294901760, %v2729_v1 }
 0x259   : > { %38356 = vst [vmem:[#allocation4_spill] sm:$0xff] %v31346_v27  ;;  %38357 = vst [vmem:[#allocation7_spill] sm:$0xff] %v31355_v45  ;;  %v37042_v13 = vand.u32 4294901760, %v31346_v27  ;;  %v31359_v34 = vand.u32 4294901760, %v2520_v23  ;;  %v2309_v30 = vmax.f32 %v28235_v4, 0.0  ;;  %v24741_v10 = vpop.f32.mrb[18].mxu0 }
 0x25a   : > { %v2740_v33 = vand.u32 4294901760, %v2739_v32  ;;  %v37046_v22 = vand.u32 4294901760, %v31355_v45  ;;  %v31362_v41 = vand.u32 4294901760, %v2523_v15  ;;  %v2463_v17 = vld [vmem:[#allocation2 + $0xb1] sm:$0xff]  ;;  %2399 = vst.msk [vmem:[#allocation2 + $0xe1] sm:$0xff] %vm2325_vm1, %v2310_v36  ;;  %v28236_v42 = vadd.f32 %v24741_v10, %v31228_v18  ;;  %v2211_v50 = vpop.f32.mrb[19].mxu0  ;;  %24776 = vmatprep.mubr.f32.mxu0 %v2730_v14 }
 0x25b   : > { %38358 = vst [vmem:[#allocation20_spill] sm:$0xff] %v31359_v34  ;;  %v2749_v38 = vsub.f32 %v31346_v27, %v37042_v13  ;;  %v31370_v31 = vsub.f32 %v2520_v23, %v31359_v34  ;;  %v2462_v1 = vld [vmem:[#allocation2 + $0xa9] sm:$0xff]  ;;  %v2529_v55 = vsel %vm2325_vm1, %v2463_v17, 0  ;;  %2398 = vst.msk [vmem:[#allocation2 + $0xd9] sm:$0xff] %vm2325_vm1, %v2309_v30  ;;  %v28237_v4 = vadd.f32 %v31228_v18, %v2211_v50  ;;  %v8214_v27 = vld [vmem:[#allocation2 + $0x18] sm:$0xff] }
 0x25c   : > { %38359 = vst [vmem:[#allocation21_spill] sm:$0xff] %v31362_v41  ;;  %24777 = vmatmul.mubr.f32.gmra.mrb[40].mxu0 %v2740_v33  ;;  %v2759_v32 = vsub.f32 %v31355_v45, %v37046_v22  ;;  %v31379_v36 = vsub.f32 %v2523_v15, %v31362_v41  ;;  %v2526_v14 = vsel %vm2325_vm1, %v2462_v1, 0  ;;  %v2312_v10 = vmax.f32 %v28236_v42, 0.0 }
 0x25d   : > { %38360 = vst [vmem:[#allocation24_spill] sm:$0xff] %v31370_v31  ;;  %v2750_v23 = vand.u32 4294901760, %v2749_v38  ;;  %v37047_v13 = vand.u32 4294901760, %v31370_v31  ;;  %v31383_v19 = vand.u32 4294901760, %v2526_v14  ;;  %v2311_v17 = vmax.f32 %v28237_v4, 0.0  ;;  %v24744_v30 = vpop.f32.mrb[20].mxu0 }
 0x25e   : > { %38361 = vst [vmem:[#allocation26_spill] sm:$0xff] %v31379_v36  ;;  %v2760_v12 = vand.u32 4294901760, %v2759_v32  ;;  %v37052_v33 = vand.u32 4294901760, %v31379_v36  ;;  %v31386_v50 = vand.u32 4294901760, %v2529_v55  ;;  %v2465_v25 = vld [vmem:[#allocation2 + $0xc9] sm:$0xff]  ;;  %2401 = vst.msk [vmem:[#allocation2 + $0xf9] sm:$0xff] %vm2325_vm1, %v2312_v10  ;;  %v28238_v15 = vadd.f32 %v24744_v30, %v31228_v18 }
 0x25f   : > { %38362 = vst [vmem:[#allocation27_spill] sm:$0xff] %v31383_v19  ;;  %v2223_v22 = vpop.f32.mrb[21].mxu0  ;;  %24779 = vmatprep.mubr.f32.mxu0 %v2750_v23  ;;  %v2769_v42 = vsub.f32 %v31370_v31, %v37047_v13  ;;  %v31394_v38 = vsub.f32 %v2526_v14, %v31383_v19  ;;  %v2464_v1 = vld [vmem:[#allocation2 + $0xc1] sm:$0xff]  ;;  %v2535_v4 = vsel %vm2325_vm1, %v2465_v25, 0  ;;  %2400 = vst.msk [vmem:[#allocation2 + $0xf1] sm:$0xff] %vm2325_vm1, %v2311_v17  ;;  %v8259_v54 = vsel %vm2325_vm1, %v8217_v52, 0 }
 0x260   : > { %38363 = vst [vmem:[#allocation30_spill] sm:$0xff] %v31386_v50  ;;  %v28239_v32 = vadd.f32 %v31228_v18, %v2223_v22  ;;  %24780 = vmatmul.mubr.f32.gmra.mrb[42].mxu0 %v2760_v12  ;;  %v2779_v10 = vsub.f32 %v31379_v36, %v37052_v33  ;;  %v31403_v23 = vsub.f32 %v2529_v55, %v31386_v50  ;;  %v2532_v30 = vsel %vm2325_vm1, %v2464_v1, 0 }
 0x261   : > { %38364 = vst [vmem:[#allocation32_spill] sm:$0xff] %v31394_v38  ;;  %v2314_v13 = vmax.f32 %v28238_v15, 0.0  ;;  %v2770_v14 = vand.u32 4294901760, %v2769_v42  ;;  %v37053_v11 = vand.u32 4294901760, %v31394_v38  ;;  %v31407_v60 = vand.u32 4294901760, %v2532_v30  ;;  %v24747_v17 = vpop.f32.mrb[22].mxu0 }
 0x262   : > { %38365 = vst [vmem:[#allocation33_spill] sm:$0xff] %v31403_v23  ;;  %v2313_v25 = vmax.f32 %v28239_v32, 0.0  ;;  %v2780_v47 = vand.u32 4294901760, %v2779_v10  ;;  %v37058_v12 = vand.u32 4294901760, %v31403_v23  ;;  %v31410_v22 = vand.u32 4294901760, %v2535_v4  ;;  %v2467_v3 = vld [vmem:[#allocation2 + $0xe1] sm:$0xff] }
 0x263   : > { %38366 = vst [vmem:[#allocation36_spill] sm:$0xff] %v31407_v60  ;;  %2403 = vst.msk [vmem:[#allocation2 + $0x111] sm:$0xff] %vm2325_vm1, %v2314_v13  ;;  %v28240_v55 = vadd.f32 %v24747_v17, %v31228_v18  ;;  %v2235_v33 = vpop.f32.mrb[23].mxu0  ;;  %24782 = vmatprep.mubr.f32.mxu0 %v2770_v14  ;;  %v2789_v15 = vsub.f32 %v31394_v38, %v37053_v11  ;;  %v31418_v42 = vsub.f32 %v2532_v30, %v31407_v60  ;;  %v2466_v1 = vld [vmem:[#allocation2 + $0xd9] sm:$0xff] }
 0x264   : > { %38367 = vst [vmem:[#allocation37_spill] sm:$0xff] %v31410_v22  ;;  %v2541_v32 = vsel %vm2325_vm1, %v2467_v3, 0  ;;  %2402 = vst.msk [vmem:[#allocation2 + $0x109] sm:$0xff] %vm2325_vm1, %v2313_v25  ;;  %v28241_v10 = vadd.f32 %v31228_v18, %v2235_v33  ;;  %24783 = vmatmul.mubr.f32.gmra.mrb[44].mxu0 %v2780_v47  ;;  %v2799_v13 = vsub.f32 %v31403_v23, %v37058_v12  ;;  %v2538_v17 = vsel %vm2325_vm1, %v2466_v1, 0 }
 0x265   : > { %38368 = vst [vmem:[#allocation38_spill] sm:$0xff] %v31418_v42  ;;  %v31427_v14 = vsub.f32 %v2535_v4, %v31410_v22  ;;  %v2316_v11 = vmax.f32 %v28240_v55, 0.0  ;;  %v2790_v30 = vand.u32 4294901760, %v2789_v15  ;;  %v37059_v24 = vand.u32 4294901760, %v31418_v42  ;;  %v24750_v25 = vpop.f32.mrb[24].mxu0  ;;  %v2469_v7 = vld [vmem:[#allocation2 + $0xf9] sm:$0xff] }
 0x266   : > { %v31431_v6 = vand.u32 4294901760, %v2538_v17  ;;  %v2315_v3 = vmax.f32 %v28241_v10, 0.0  ;;  %v2800_v57 = vand.u32 4294901760, %v2799_v13  ;;  %v31434_v33 = vand.u32 4294901760, %v2541_v32  ;;  %v2247_v12 = vpop.f32.mrb[25].mxu0  ;;  %v2468_v1 = vld [vmem:[#allocation2 + $0xf1] sm:$0xff] }
 0x267   : > { %38369 = vst [vmem:[#allocation42_spill] sm:$0xff] %v31427_v14  ;;  %v37067_v47 = vand.u32 4294901760, %v31427_v14  ;;  %2405 = vst.msk [vmem:[#allocation2 + $0x129] sm:$0xff] %vm2325_vm1, %v2316_v11  ;;  %v28242_v4 = vadd.f32 %v24750_v25, %v31228_v18  ;;  %24785 = vmatprep.mubr.f32.mxu0 %v2790_v30  ;;  %v2809_v55 = vsub.f32 %v31418_v42, %v37059_v24  ;;  %v2547_v10 = vsel %vm2325_vm1, %v2469_v7, 0 }
 0x268   : > { %38370 = vst [vmem:[#allocation43_spill] sm:$0xff] %v31431_v6  ;;  %38371 = vst [vmem:[#allocation44_spill] sm:$0xff] %v31434_v33  ;;  %v31442_v15 = vsub.f32 %v2538_v17, %v31431_v6  ;;  %v28243_v13 = vadd.f32 %v31228_v18, %v2247_v12  ;;  %24786 = vmatmul.mubr.f32.gmra.mrb[46].mxu0 %v2800_v57  ;;  %v31451_v30 = vsub.f32 %v2541_v32, %v31434_v33 }
 0x269   : > { %2404 = vst.msk [vmem:[#allocation2 + $0x121] sm:$0xff] %vm2325_vm1, %v2315_v3  ;;  %v2819_v11 = vsub.f32 %v31427_v14, %v37067_v47  ;;  %v2544_v25 = vsel %vm2325_vm1, %v2468_v1, 0  ;;  %v2318_v24 = vmax.f32 %v28242_v4, 0.0  ;;  %v2810_v17 = vand.u32 4294901760, %v2809_v55  ;;  %v24753_v3 = vpop.f32.mrb[26].mxu0 }
 0x26a   : > { %38372 = vst [vmem:[#allocation45_spill] sm:$0xff] %v31442_v15  ;;  %38373 = vst [vmem:[#allocation46_spill] sm:$0xff] %v31451_v30  ;;  %v37068_v28 = vand.u32 4294901760, %v31442_v15  ;;  %v31455_v58 = vand.u32 4294901760, %v2544_v25  ;;  %v2317_v7 = vmax.f32 %v28243_v13, 0.0  ;;  %v37077_v57 = vand.u32 4294901760, %v31451_v30 }
 0x26b   : > { %v2820_v42 = vand.u32 4294901760, %v2819_v11  ;;  %v31458_v12 = vand.u32 4294901760, %v2547_v10  ;;  %v2471_v23 = vld [vmem:[#allocation2 + $0x111] sm:$0xff]  ;;  %2407 = vst.msk [vmem:[#allocation2 + $0x141] sm:$0xff] %vm2325_vm1, %v2318_v24  ;;  %v28244_v32 = vadd.f32 %v24753_v3, %v31228_v18  ;;  %v2259_v47 = vpop.f32.mrb[27].mxu0  ;;  %24788 = vmatprep.mubr.f32.mxu0 %v2810_v17  ;;  %v2470_v1 = vld [vmem:[#allocation2 + $0x109] sm:$0xff] }
 0x26c   : > { %38374 = vst [vmem:[#allocation47_spill] sm:$0xff] %v31455_v58  ;;  %v2829_v4 = vsub.f32 %v31442_v15, %v37068_v28  ;;  %v31466_v55 = vsub.f32 %v2544_v25, %v31455_v58  ;;  %v2553_v13 = vsel %vm2325_vm1, %v2471_v23, 0  ;;  %2406 = vst.msk [vmem:[#allocation2 + $0x139] sm:$0xff] %vm2325_vm1, %v2317_v7  ;;  %v28245_v11 = vadd.f32 %v31228_v18, %v2259_v47 }
 0x26d   : > { %38375 = vst [vmem:[#allocation48_spill] sm:$0xff] %v31458_v12  ;;  %24789 = vmatmul.mubr.f32.gmra.mrb[48].mxu0 %v2820_v42  ;;  %v2839_v24 = vsub.f32 %v31451_v30, %v37077_v57  ;;  %v31475_v17 = vsub.f32 %v2547_v10, %v31458_v12  ;;  %v2550_v3 = vsel %vm2325_vm1, %v2470_v1, 0  ;;  %v2320_v28 = vmax.f32 %v28244_v32, 0.0  ;;  %v24756_v7 = vpop.f32.mrb[28].mxu0 }
 0x26e   : > { %38376 = vst [vmem:[#allocation49_spill] sm:$0xff] %v31466_v55  ;;  %v2830_v25 = vand.u32 4294901760, %v2829_v4  ;;  %v37078_v15 = vand.u32 4294901760, %v31466_v55  ;;  %v31479_v14 = vand.u32 4294901760, %v2550_v3  ;;  %v2319_v23 = vmax.f32 %v28245_v11, 0.0  ;;  %v2473_v36 = vld [vmem:[#allocation2 + $0x129] sm:$0xff] }
 0x26f   : > { %38377 = vst [vmem:[#allocation50_spill] sm:$0xff] %v31475_v17  ;;  %v2840_v38 = vand.u32 4294901760, %v2839_v24  ;;  %v37087_v42 = vand.u32 4294901760, %v31475_v17  ;;  %v31482_v47 = vand.u32 4294901760, %v2553_v13  ;;  %2409 = vst.msk [vmem:[#allocation2 + $0x159] sm:$0xff] %vm2325_vm1, %v2320_v28  ;;  %v28246_v10 = vadd.f32 %v24756_v7, %v31228_v18  ;;  %v2271_v57 = vpop.f32.mrb[29].mxu0 }
 0x270   : > { %38378 = vst [vmem:[#allocation51_spill] sm:$0xff] %v31479_v14  ;;  %24791 = vmatprep.mubr.f32.mxu0 %v2830_v25  ;;  %v2849_v32 = vsub.f32 %v31466_v55, %v37078_v15  ;;  %v31490_v4 = vsub.f32 %v2550_v3, %v31479_v14  ;;  %v2472_v1 = vld [vmem:[#allocation2 + $0x121] sm:$0xff]  ;;  %v2559_v11 = vsel %vm2325_vm1, %v2473_v36, 0  ;;  %2408 = vst.msk [vmem:[#allocation2 + $0x151] sm:$0xff] %vm2325_vm1, %v2319_v23 }
 0x271   : > { %38379 = vst [vmem:[#allocation52_spill] sm:$0xff] %v31482_v47  ;;  %v28247_v24 = vadd.f32 %v31228_v18, %v2271_v57  ;;  %24792 = vmatmul.mubr.f32.gmra.mrb[50].mxu0 %v2840_v38  ;;  %v2859_v28 = vsub.f32 %v31475_v17, %v37087_v42  ;;  %v31499_v25 = vsub.f32 %v2553_v13, %v31482_v47  ;;  %v2556_v7 = vsel %vm2325_vm1, %v2472_v1, 0  ;;  %v24759_v23 = vpop.f32.mrb[30].mxu0 }
 0x272   : > { %38380 = vst [vmem:[#allocation53_spill] sm:$0xff] %v31490_v4  ;;  %v2322_v15 = vmax.f32 %v28246_v10, 0.0  ;;  %v2850_v3 = vand.u32 4294901760, %v2849_v32  ;;  %v37088_v55 = vand.u32 4294901760, %v31490_v4  ;;  %v31503_v30 = vand.u32 4294901760, %v2556_v7  ;;  %v2475_v45 = vld [vmem:[#allocation2 + $0x141] sm:$0xff] }
 0x273   : > { %38381 = vst [vmem:[#allocation54_spill] sm:$0xff] %v31499_v25  ;;  %v2321_v36 = vmax.f32 %v28247_v24, 0.0  ;;  %v2860_v31 = vand.u32 4294901760, %v2859_v28  ;;  %v37096_v38 = vand.u32 4294901760, %v31499_v25  ;;  %v31506_v57 = vand.u32 4294901760, %v2559_v11  ;;  %v2283_v42 = vpop.f32.mrb[31].mxu0 }
 0x274   : > { %38382 = vst [vmem:[#allocation55_spill] sm:$0xff] %v31503_v30  ;;  %2411 = vst.msk [vmem:[#allocation2 + $0x171] sm:$0xff] %vm2325_vm1, %v2322_v15  ;;  %v28248_v13 = vadd.f32 %v24759_v23, %v31228_v18  ;;  %24794 = vmatprep.mubr.f32.mxu0 %v2850_v3  ;;  %v2869_v10 = vsub.f32 %v31490_v4, %v37088_v55  ;;  %v31514_v32 = vsub.f32 %v2556_v7, %v31503_v30  ;;  %v2474_v1 = vld [vmem:[#allocation2 + $0x139] sm:$0xff] }
 0x275   : > { %38383 = vst [vmem:[#allocation56_spill] sm:$0xff] %v31506_v57  ;;  %v2565_v24 = vsel %vm2325_vm1, %v2475_v45, 0  ;;  %2410 = vst.msk [vmem:[#allocation2 + $0x169] sm:$0xff] %vm2325_vm1, %v2321_v36  ;;  %v28249_v28 = vadd.f32 %v31228_v18, %v2283_v42  ;;  %24795 = vmatmul.mubr.f32.gmra.mrb[52].mxu0 %v2860_v31  ;;  %v2879_v15 = vsub.f32 %v31499_v25, %v37096_v38  ;;  %v2562_v23 = vsel %vm2325_vm1, %v2474_v1, 0  ;;  %v8216_v38 = vld [vmem:[#allocation2 + $0x30] sm:$0xff] }
 0x276   : > { %38384 = vst [vmem:[#allocation57_spill] sm:$0xff] %v31514_v32  ;;  %v31523_v3 = vsub.f32 %v2559_v11, %v31506_v57  ;;  %v2324_v55 = vmax.f32 %v28248_v13, 0.0  ;;  %v2870_v7 = vand.u32 4294901760, %v2869_v10  ;;  %v37095_v4 = vand.u32 4294901760, %v31514_v32  ;;  %v2477_v42 = vld [vmem:[#allocation2 + $0x159] sm:$0xff] }
 0x277   : > { %v31527_v17 = vand.u32 4294901760, %v2562_v23  ;;  %v2323_v45 = vmax.f32 %v28249_v28, 0.0  ;;  %v2880_v36 = vand.u32 4294901760, %v2879_v15  ;;  %v31530_v31 = vand.u32 4294901760, %v2565_v24  ;;  %v2476_v10 = vld [vmem:[#allocation2 + $0x151] sm:$0xff]  ;;  %v8215_v28 = vld [vmem:[#allocation2 + $0x20] sm:$0xff] }
 0x278   : > { %38385 = vst [vmem:[#allocation58_spill] sm:$0xff] %v31523_v3  ;;  %v37101_v18 = vand.u32 4294901760, %v31523_v3  ;;  %2413 = vst.msk [vmem:[#allocation2 + $0x189] sm:$0xff] %vm2325_vm1, %v2324_v55  ;;  %24797 = vmatprep.mubr.f32.mxu0 %v2870_v7  ;;  %v2889_v11 = vsub.f32 %v31514_v32, %v37095_v4  ;;  %v2571_v1 = vsel %vm2325_vm1, %v2477_v42, 0  ;;  %v2568_v4 = vsel %vm2325_vm1, %v2476_v10, 0 }
 0x279   : > { %38386 = vst [vmem:[#allocation59_spill] sm:$0xff] %v31527_v17  ;;  %38387 = vst [vmem:[#allocation60_spill] sm:$0xff] %v31530_v31  ;;  %v31537_v13 = vsub.f32 %v2562_v23, %v31527_v17  ;;  %24798 = vmatmul.mubr.f32.gmra.mrb[54].mxu0 %v2880_v36  ;;  %v31546_v7 = vsub.f32 %v2565_v24, %v31530_v31  ;;  %v31549_v23 = vand.u32 4294901760, %v2571_v1  ;;  %v31552_v25 = vand.u32 4294901760, %v2568_v4 }
 0x27a   : > { %2412 = vst.msk [vmem:[#allocation2 + $0x181] sm:$0xff] %vm2325_vm1, %v2323_v45  ;;  %v2899_v55 = vsub.f32 %v31523_v3, %v37101_v18  ;;  %v2890_v32 = vand.u32 4294901760, %v2889_v11  ;;  %v8250_v45 = vsel %vm2325_vm1, %v8214_v27, 0  ;;  %v8253_v3 = vsel %vm2325_vm1, %v8215_v28, 0 }
 0x27b   : > { %38388 = vst [vmem:[#allocation61_spill] sm:$0xff] %v31537_v13  ;;  %38389 = vst [vmem:[#allocation62_spill] sm:$0xff] %v31546_v7  ;;  %v37108_v42 = vand.u32 4294901760, %v31537_v13  ;;  %v37113_v15 = vand.u32 4294901760, %v31546_v7  ;;  %v31557_v18 = vsub.f32 %v2571_v1, %v31549_v23  ;;  %v2479_v24 = vld [vmem:[#allocation2 + $0x171] sm:$0xff]  ;;  %v31564_v10 = vsub.f32 %v2568_v4, %v31552_v25 }
 0x27c   : > { %38390 = vst [vmem:[#allocation63_spill] sm:$0xff] %v31549_v23  ;;  %38391 = vst [vmem:[#allocation64_spill] sm:$0xff] %v31552_v25  ;;  %v2900_v36 = vand.u32 4294901760, %v2899_v55  ;;  %24800 = vmatprep.mubr.f32.mxu0 %v2890_v32  ;;  %v2478_v49 = vld [vmem:[#allocation2 + $0x169] sm:$0xff]  ;;  %v2577_v27 = vsel %vm2325_vm1, %v2479_v24, 0  ;;  %v8256_v55 = vsel %vm2325_vm1, %v8216_v38, 0 }
 0x27d   : > { %38392 = vst [vmem:[#allocation65_spill] sm:$0xff] %v31557_v18  ;;  %v2909_v11 = vsub.f32 %v31537_v13, %v37108_v42  ;;  %38393 = vst [vmem:[#allocation66_spill] sm:$0xff] %v31564_v10  ;;  %v2919_v1 = vsub.f32 %v31546_v7, %v37113_v15  ;;  %v37120_v28 = vand.u32 4294901760, %v31557_v18  ;;  %v2574_v32 = vsel %vm2325_vm1, %v2478_v49, 0 }
 0x27e   : > { %24801 = vmatmul.mubr.f32.gmra.mrb[56].mxu0 %v2900_v36  ;;  %v31573_v16 = vand.u32 4294901760, %v2577_v27  ;;  %v37125_v4 = vand.u32 4294901760, %v31564_v10  ;;  %v31576_v13 = vand.u32 4294901760, %v2574_v32  ;;  %v31582_v15 = vand.u32 4294901760, %v8250_v45 }
 0x27f   : > { %v2910_v42 = vand.u32 4294901760, %v2909_v11  ;;  %v2920_v38 = vand.u32 4294901760, %v2919_v1  ;;  %v2939_v36 = vsub.f32 %v31557_v18, %v37120_v28  ;;  %v31593_v1 = vand.u32 4294901760, %v8253_v3  ;;  %v8218_v28 = vld [vmem:[#allocation2 + $0x48] sm:$0xff] }
 0x280   : > { %38394 = vst [vmem:[#allocation67_spill] sm:$0xff] %v31573_v16  ;;  %38395 = vst [vmem:[#allocation68_spill] sm:$0xff] %v31576_v13  ;;  %v31585_v7 = vsub.f32 %v2577_v27, %v31573_v16  ;;  %v2929_v49 = vsub.f32 %v31564_v10, %v37125_v4  ;;  %v31591_v24 = vsub.f32 %v2574_v32, %v31576_v13  ;;  %v31595_v59 = vand.u32 4294901760, %v8256_v55 }
 0x281   : > { %38396 = vst [vmem:[#allocation69_spill] sm:$0xff] %v31582_v15  ;;  %24803 = vmatprep.mubr.f32.mxu0 %v2910_v42  ;;  %v8244_v11 = vld [vmem:[#allocation2 + $0x180] sm:$0xff]  ;;  %v8245_v21 = vld [vmem:[#allocation2 + $0x188] sm:$0xff]  ;;  %38398 = vst [vmem:[#allocation71_spill] sm:$0xff] %v31593_v1  ;;  %v2940_v8 = vand.u32 4294901760, %v2939_v36  ;;  %v31607_v43 = vsub.f32 %v8250_v45, %v31582_v15  ;;  %v31623_v0 = vsub.f32 %v8253_v3, %v31593_v1 }
 0x282   : > { %38397 = vst [vmem:[#allocation70_spill] sm:$0xff] %v31585_v7  ;;  %38399 = vst [vmem:[#allocation72_spill] sm:$0xff] %v31595_v59  ;;  %24804 = vmatmul.mubr.f32.gmra.mrb[58].mxu0 %v2920_v38  ;;  %v8340_v18 = vsel %vm2325_vm1, %v8244_v11, 0  ;;  %v8343_v27 = vsel %vm2325_vm1, %v8245_v21, 0  ;;  %v37136_v42 = vand.u32 4294901760, %v31585_v7  ;;  %v2930_v4 = vand.u32 4294901760, %v2929_v49 }
 0x283   : > { %v31601_v10 = vand.u32 4294901760, %v8340_v18  ;;  %v31603_v5 = vand.u32 4294901760, %v8343_v27  ;;  %v37141_v32 = vand.u32 4294901760, %v31591_v24  ;;  %38402 = vst [vmem:[#allocation75_spill] sm:$0xff] %v31607_v43  ;;  %v8262_v21 = vsel %vm2325_vm1, %v8218_v28, 0  ;;  %v8219_v11 = vld [vmem:[#allocation2 + $0x50] sm:$0xff] }
 0x284   : > { %v2959_v38 = vsub.f32 %v31585_v7, %v37136_v42  ;;  %24806 = vmatprep.mubr.f32.mxu0 %v2930_v4  ;;  %v8220_v45 = vld [vmem:[#allocation2 + $0x60] sm:$0xff]  ;;  %38405 = vst [vmem:[#allocation78_spill] sm:$0xff] %v31623_v0  ;;  %v38406_v42 = vand.u32 4294901760, %v31200_v9  ;;  %v38407_v28 = vand.u32 4294901760, %v31202_v26  ;;  %v31629_v7 = vand.u32 4294901760, %v8259_v54 }
 0x285   : > { %38400 = vst [vmem:[#allocation73_spill] sm:$0xff] %v31601_v10  ;;  %38401 = vst [vmem:[#allocation74_spill] sm:$0xff] %v31603_v5  ;;  %v31614_v52 = vsub.f32 %v8340_v18, %v31601_v10  ;;  %v31617_v49 = vsub.f32 %v8343_v27, %v31603_v5  ;;  %v2949_v36 = vsub.f32 %v31591_v24, %v37141_v32  ;;  %v31635_v5 = vand.u32 4294901760, %v8262_v21 }
 0x286   : > { %24807 = vmatmul.mubr.f32.gmra.mrb[60].mxu0 %v2940_v8  ;;  %v28064_v4 = vpack.c.bf16 %v38407_v28, %v38406_v42  ;;  %38408 = vst [vmem:[#allocation79_spill] sm:$0xff] %v31629_v7  ;;  %v31633_v27 = vsub.f32 %v8256_v55, %v31595_v59  ;;  %v8265_v8 = vsel %vm2325_vm1, %v8219_v11, 0  ;;  %v37144_v3 = vand.u32 4294901760, %v31607_v43  ;;  %v8221_v42 = vld [vmem:[#allocation2 + $0x68] sm:$0xff]  ;;  %v8222_v28 = vld [vmem:[#allocation2 + $0x78] sm:$0xff]  ;;  %v8224_v43 = vld [vmem:[#allocation2 + $0x90] sm:$0xff] }
 0x287   : > { %38403 = vst [vmem:[#allocation76_spill] sm:$0xff] %v31614_v52  ;;  %38404 = vst [vmem:[#allocation77_spill] sm:$0xff] %v31617_v49  ;;  %25849 = vmatprep.mubr.f32.mxu1 %v31614_v52  ;;  %v2950_v18 = vand.u32 4294901760, %v2949_v36  ;;  %v2960_v32 = vand.u32 4294901760, %v2959_v38  ;;  %v8268_v26 = vsel %vm2325_vm1, %v8220_v45, 0  ;;  %v37152_v55 = vand.u32 4294901760, %v31623_v0 }
 0x288   : > { %38409 = vst [vmem:[#allocation80_spill] sm:$0xff] %v31633_v27  ;;  %38410 = vst [vmem:[#allocation81_spill] sm:$0xff] %v31635_v5  ;;  %25850 = vmatmul.mubr.f32.vlgmr.msra.gmra.mrb[0].mxu1 %v31617_v49  ;;  %v31646_v11 = vsub.f32 %v8259_v54, %v31629_v7  ;;  %v31648_v36 = vand.u32 4294901760, %v8265_v8  ;;  %v37151_v38 = vand.u32 4294901760, %v31633_v27  ;;  %v31653_v45 = vsub.f32 %v8262_v21, %v31635_v5  ;;  %v8226_v27 = vld [vmem:[#allocation2 + $0xa8] sm:$0xff] }
 0x289   : > { %24809 = vmatprep.mubr.f32.mxu0 %v2950_v18  ;;  %28063 = vmatpush3.bf16.msra.mxu1 %v31208_v2  ;;  %v31655_v18 = vand.u32 4294901760, %v8268_v26  ;;  %v8274_v54 = vsel %vm2325_vm1, %v8222_v28, 0 }
 0x28a   : > { %25856 = vmatprep.mubr.f32.mxu1 %v37144_v3  ;;  %24810 = vmatmul.mubr.f32.gmra.mrb[62].mxu0 %v2960_v32  ;;  %38411 = vst [vmem:[#allocation82_spill] sm:$0xff] %v31646_v11  ;;  %38412 = vst [vmem:[#allocation83_spill] sm:$0xff] %v31648_v36  ;;  %v8271_v3 = vsel %vm2325_vm1, %v8221_v42, 0  ;;  %v8223_v32 = vld [vmem:[#allocation2 + $0x80] sm:$0xff]  ;;  %v37159_v21 = vand.u32 4294901760, %v31646_v11  ;;  %v31666_v9 = vsub.f32 %v8265_v8, %v31648_v36  ;;  %v37162_v42 = vand.u32 4294901760, %v31653_v45 }
 0x28b   : > { %28065 = vmatprep.subr.bf16.mxu1 %v28064_v4  ;;  %24816 = vmatprep.mubr.f32.mxu0 %v31165_v51  ;;  %38413 = vst [vmem:[#allocation84_spill] sm:$0xff] %v31653_v45  ;;  %38414 = vst [vmem:[#allocation85_spill] sm:$0xff] %v31655_v18  ;;  %v31668_v51 = vand.u32 4294901760, %v8271_v3  ;;  %v31674_v28 = vsub.f32 %v8268_v26, %v31655_v18  ;;  %v8280_v8 = vsel %vm2325_vm1, %v8224_v43, 0  ;;  %v8228_v11 = vld [vmem:[#allocation2 + $0xc0] sm:$0xff] }
 0x28c   : > { %25857 = vmatmul.mubr.f32.vlgmr.msra.gmra.mrb[2].mxu1 %v37152_v55  ;;  %38415 = vst [vmem:[#allocation86_spill] sm:$0xff] %v31666_v9  ;;  %v8225_v55 = vld [vmem:[#allocation2 + $0x98] sm:$0xff]  ;;  %v37169_v0 = vand.u32 4294901760, %v31666_v9  ;;  %v31697_v45 = vand.u32 4294901760, %v8280_v8 }
 0x28d   : > { %25859 = vmatprep.mubr.f32.mxu1 %v37151_v38  ;;  %28067 = vmatpush3.bf16.msra.mxu1 %v28064_v4  ;;  %38416 = vst [vmem:[#allocation87_spill] sm:$0xff] %v31668_v51  ;;  %38417 = vst [vmem:[#allocation88_spill] sm:$0xff] %v31674_v28  ;;  %v31676_v4 = vand.u32 4294901760, %v8274_v54  ;;  %v8277_v38 = vsel %vm2325_vm1, %v8223_v32, 0  ;;  %v31687_v26 = vsub.f32 %v8271_v3, %v31668_v51  ;;  %v8283_v32 = vsel %vm2325_vm1, %v8225_v55, 0  ;;  %v8227_v3 = vld [vmem:[#allocation2 + $0xb0] sm:$0xff] }
 0x28e   : > { %24817 = vmatmul.mubr.f32.vlgmr.msra.gmra.mrb[32].mxu0 %v31168_v62  ;;  %28069 = vmatprep.subr.bf16.mxu1 %v31208_v2  ;;  %38422 = vst [vmem:[#allocation93_spill] sm:$0xff] %v31697_v45  ;;  %v8230_v9 = vld [vmem:[#allocation2 + $0xd8] sm:$0xff] }
 0x28f   : > { %24819 = vmatprep.mubr.f32.mxu0 %v31248_v40  ;;  %38418 = vst [vmem:[#allocation89_spill] sm:$0xff] %v31676_v4  ;;  %38419 = vst [vmem:[#allocation90_spill] sm:$0xff] %v31687_v26  ;;  %v31689_v40 = vand.u32 4294901760, %v8277_v38  ;;  %v31695_v43 = vsub.f32 %v8274_v54, %v31676_v4  ;;  %v37179_v55 = vand.u32 4294901760, %v31687_v26  ;;  %v31709_v54 = vand.u32 4294901760, %v8283_v32 }
 0x290   : > { %25860 = vmatmul.mubr.f32.gmra.mrb[4].mxu1 %v37159_v21  ;;  %v37170_v21 = vand.u32 4294901760, %v31674_v28  ;;  %v8292_v28 = vsel %vm2325_vm1, %v8228_v11, 0 }
 0x291   : > { %25862 = vmatprep.mubr.f32.mxu1 %v37162_v42  ;;  %38420 = vst [vmem:[#allocation91_spill] sm:$0xff] %v31689_v40  ;;  %38421 = vst [vmem:[#allocation92_spill] sm:$0xff] %v31695_v43  ;;  %v8286_v42 = vsel %vm2325_vm1, %v8226_v27, 0  ;;  %v37180_v27 = vand.u32 4294901760, %v31695_v43  ;;  %v8298_v43 = vsel %vm2325_vm1, %v8230_v9, 0 }
 0x292   : > { %24820 = vmatmul.mubr.f32.gmra.mrb[34].mxu0 %v31246_v37  ;;  %38424 = vst [vmem:[#allocation95_spill] sm:$0xff] %v31709_v54  ;;  %v31711_v37 = vand.u32 4294901760, %v8286_v42 }
 0x293   : > { %24822 = vmatprep.mubr.f32.mxu0 %v31266_v63  ;;  %v31707_v63 = vsub.f32 %v8277_v38, %v31689_v40  ;;  %v8229_v38 = vld [vmem:[#allocation2 + $0xc8] sm:$0xff] }
 0x294   : > { %25863 = vmatmul.mubr.f32.gmra.mrb[6].mxu1 %v37169_v0  ;;  %38425 = vst [vmem:[#allocation96_spill] sm:$0xff] %v31711_v37  ;;  %v31716_v0 = vsub.f32 %v8280_v8, %v31697_v45  ;;  %v31730_v8 = vsub.f32 %v8286_v42, %v31711_v37  ;;  %v8232_v42 = vld [vmem:[#allocation2 + $0xf0] sm:$0xff] }
 0x295   : > { %25865 = vmatprep.mubr.f32.mxu1 %v37170_v21  ;;  %38423 = vst [vmem:[#allocation94_spill] sm:$0xff] %v31707_v63  ;;  %v8289_v21 = vsel %vm2325_vm1, %v8227_v3, 0 }
 0x296   : > { %24823 = vmatmul.mubr.f32.gmra.mrb[36].mxu0 %v31263_v61  ;;  %38426 = vst [vmem:[#allocation97_spill] sm:$0xff] %v31716_v0  ;;  %v31727_v61 = vsub.f32 %v8283_v32, %v31709_v54  ;;  %38428 = vst [vmem:[#allocation99_spill] sm:$0xff] %v31730_v8  ;;  %v31732_v3 = vand.u32 4294901760, %v8289_v21  ;;  %v37190_v11 = vand.u32 4294901760, %v31716_v0  ;;  %v8231_v32 = vld [vmem:[#allocation2 + $0xe0] sm:$0xff]  ;;  %v27984_v0 = vpack.c.bf16 %v31206_v48, %v31204_v29 }
 0x297   : > { %24825 = vmatprep.mubr.f32.mxu0 %v31288_v46  ;;  %v37189_v46 = vand.u32 4294901760, %v31707_v63  ;;  %v38435_v63 = vand.u32 4294901760, %v31730_v8 }
 0x298   : > { %25866 = vmatmul.mubr.f32.gmra.mrb[8].mxu1 %v37179_v55  ;;  %38427 = vst [vmem:[#allocation98_spill] sm:$0xff] %v31727_v61  ;;  %38429 = vst [vmem:[#allocation100_spill] sm:$0xff] %v31732_v3  ;;  %v31736_v55 = vand.u32 4294901760, %v8292_v28  ;;  %v37199_v26 = vand.u32 4294901760, %v31727_v61  ;;  %27985 = vmatprep.subr.bf16.mxu0 %v27984_v0  ;;  %v8235_v61 = vld [vmem:[#allocation2 + $0x110] sm:$0xff] }
 0x299   : > { %25868 = vmatprep.mubr.f32.mxu1 %v37180_v27  ;;  %v8295_v27 = vsel %vm2325_vm1, %v8229_v38, 0  ;;  %27987 = vmatpush3.bf16.msra.mxu0 %v27984_v0 }
 0x29a   : > { %24826 = vmatmul.mubr.f32.gmra.mrb[38].mxu0 %v31293_v44  ;;  %38430 = vst [vmem:[#allocation101_spill] sm:$0xff] %v31736_v55  ;;  %v31748_v44 = vsub.f32 %v8289_v21, %v31732_v3  ;;  %v31750_v38 = vand.u32 4294901760, %v8295_v27  ;;  %v31754_v9 = vsub.f32 %v8292_v28, %v31736_v55  ;;  %v8304_v21 = vsel %vm2325_vm1, %v8232_v42, 0  ;;  %27989 = vmatprep.subr.bf16.mxu0 %v31183_v56 }
 0x29b   : > { %24828 = vmatprep.mubr.f32.mxu0 %v31311_v53  ;;  %v8233_v53 = vld [vmem:[#allocation2 + $0xf8] sm:$0xff]  ;;  %v31778_v8 = vand.u32 4294901760, %v8304_v21 }
 0x29c   : > { %25869 = vmatmul.mubr.f32.gmra.mrb[10].mxu1 %v37189_v46  ;;  %38431 = vst [vmem:[#allocation102_spill] sm:$0xff] %v31748_v44  ;;  %38432 = vst [vmem:[#allocation103_spill] sm:$0xff] %v31750_v38  ;;  %v31756_v46 = vand.u32 4294901760, %v8298_v43  ;;  %v37208_v28 = vand.u32 4294901760, %v31748_v44  ;;  %v8238_v44 = vld [vmem:[#allocation2 + $0x138] sm:$0xff] }
 0x29d   : > { %25871 = vmatprep.mubr.f32.mxu1 %v37190_v11  ;;  %38433 = vst [vmem:[#allocation104_spill] sm:$0xff] %v31754_v9  ;;  %v8301_v11 = vsel %vm2325_vm1, %v8231_v32, 0  ;;  %v31769_v32 = vsub.f32 %v8295_v27, %v31750_v38  ;;  %38439 = vst [vmem:[#allocation109_spill] sm:$0xff] %v31778_v8 }
 0x29e   : > { %24829 = vmatmul.mubr.f32.gmra.mrb[40].mxu0 %v31314_v39  ;;  %38434 = vst [vmem:[#allocation105_spill] sm:$0xff] %v31756_v46  ;;  %v31771_v39 = vand.u32 4294901760, %v8301_v11  ;;  %v31776_v42 = vsub.f32 %v8298_v43, %v31756_v46 }
 0x29f   : > { %24831 = vmatprep.mubr.f32.mxu0 %v31335_v35  ;;  %v8234_v35 = vld [vmem:[#allocation2 + $0x108] sm:$0xff]  ;;  %38436 = vst [vmem:[#allocation106_spill] sm:$0xff] %v31769_v32  ;;  %v37218_v43 = vand.u32 4294901760, %v31769_v32  ;;  %v8240_v32 = vld [vmem:[#allocation2 + $0x150] sm:$0xff] }
 0x2a0   : > { %25872 = vmatmul.mubr.f32.gmra.mrb[12].mxu1 %v37199_v26  ;;  %38437 = vst [vmem:[#allocation107_spill] sm:$0xff] %v31771_v39  ;;  %v37209_v26 = vand.u32 4294901760, %v31754_v9  ;;  %38438 = vst [vmem:[#allocation108_spill] sm:$0xff] %v31776_v42  ;;  %v8310_v27 = vsel %vm2325_vm1, %v8234_v35, 0  ;;  %v31797_v35 = vsub.f32 %v8304_v21, %v31778_v8 }
 0x2a1   : > { %25874 = vmatprep.mubr.f32.mxu1 %v38435_v63  ;;  %v8307_v63 = vsel %vm2325_vm1, %v8233_v53, 0  ;;  %v37219_v53 = vand.u32 4294901760, %v31776_v42  ;;  %v8322_v42 = vsel %vm2325_vm1, %v8238_v44, 0 }
 0x2a2   : > { %24832 = vmatmul.mubr.f32.gmra.mrb[42].mxu0 %v31338_v20  ;;  %v31790_v20 = vsub.f32 %v8301_v11, %v31771_v39  ;;  %v31792_v0 = vand.u32 4294901760, %v8307_v63  ;;  %38442 = vst [vmem:[#allocation112_spill] sm:$0xff] %v31797_v35  ;;  %v8237_v11 = vld [vmem:[#allocation2 + $0x128] sm:$0xff] }
 0x2a3   : > { %24834 = vmatprep.mubr.f32.mxu0 %v31359_v34  ;;  %v8236_v34 = vld [vmem:[#allocation2 + $0x120] sm:$0xff] }
 0x2a4   : > { %25875 = vmatmul.mubr.f32.gmra.mrb[14].mxu1 %v37208_v28  ;;  %38440 = vst [vmem:[#allocation110_spill] sm:$0xff] %v31790_v20  ;;  %38441 = vst [vmem:[#allocation111_spill] sm:$0xff] %v31792_v0  ;;  %v31799_v28 = vand.u32 4294901760, %v8310_v27  ;;  %v8316_v9 = vsel %vm2325_vm1, %v8236_v34, 0  ;;  %v31810_v21 = vsub.f32 %v8307_v63, %v31792_v0  ;;  %v8239_v63 = vld [vmem:[#allocation2 + $0x140] sm:$0xff] }
 0x2a5   : > { %25877 = vmatprep.mubr.f32.mxu1 %v37209_v26  ;;  %v8313_v26 = vsel %vm2325_vm1, %v8235_v61, 0  ;;  %v37229_v61 = vand.u32 4294901760, %v31797_v35  ;;  %v8328_v35 = vsel %vm2325_vm1, %v8240_v32, 0 }
 0x2a6   : > { %24835 = vmatmul.mubr.f32.gmra.mrb[44].mxu0 %v31362_v41  ;;  %38443 = vst [vmem:[#allocation113_spill] sm:$0xff] %v31799_v28  ;;  %38444 = vst [vmem:[#allocation114_spill] sm:$0xff] %v31810_v21  ;;  %v31812_v41 = vand.u32 4294901760, %v8313_v26  ;;  %v31817_v34 = vsub.f32 %v8310_v27, %v31799_v28 }
 0x2a7   : > { %24837 = vmatprep.mubr.f32.mxu0 %v31383_v19  ;;  %v37228_v19 = vand.u32 4294901760, %v31790_v20  ;;  %v8242_v20 = vld [vmem:[#allocation2 + $0x168] sm:$0xff] }
 0x2a8   : > { %25878 = vmatmul.mubr.f32.gmra.mrb[16].mxu1 %v37218_v43  ;;  %38445 = vst [vmem:[#allocation115_spill] sm:$0xff] %v31812_v41  ;;  %38446 = vst [vmem:[#allocation116_spill] sm:$0xff] %v31817_v34  ;;  %v31819_v43 = vand.u32 4294901760, %v8316_v9  ;;  %v31830_v27 = vsub.f32 %v8313_v26, %v31812_v41  ;;  %v8241_v26 = vld [vmem:[#allocation2 + $0x158] sm:$0xff] }
 0x2a9   : > { %25880 = vmatprep.mubr.f32.mxu1 %v37219_v53  ;;  %v8319_v53 = vsel %vm2325_vm1, %v8237_v11, 0  ;;  %v37239_v11 = vand.u32 4294901760, %v31817_v34  ;;  %v8334_v34 = vsel %vm2325_vm1, %v8242_v20, 0 }
 0x2aa   : > { %24838 = vmatmul.mubr.f32.gmra.mrb[46].mxu0 %v31386_v50  ;;  %38447 = vst [vmem:[#allocation117_spill] sm:$0xff] %v31819_v43  ;;  %38448 = vst [vmem:[#allocation118_spill] sm:$0xff] %v31830_v27  ;;  %v31832_v50 = vand.u32 4294901760, %v8319_v53  ;;  %v31837_v44 = vsub.f32 %v8316_v9, %v31819_v43  ;;  %v31879_v20 = vand.u32 4294901760, %v8334_v34 }
 0x2ab   : > { %24840 = vmatprep.mubr.f32.mxu0 %v31407_v60  ;;  %v37238_v60 = vand.u32 4294901760, %v31810_v21 }
 0x2ac   : > { %25881 = vmatmul.mubr.f32.gmra.mrb[18].mxu1 %v37228_v19  ;;  %38449 = vst [vmem:[#allocation119_spill] sm:$0xff] %v31832_v50  ;;  %38450 = vst [vmem:[#allocation120_spill] sm:$0xff] %v31837_v44  ;;  %v31839_v19 = vand.u32 4294901760, %v8322_v42  ;;  %v31850_v9 = vsub.f32 %v8319_v53, %v31832_v50  ;;  %v8243_v53 = vld [vmem:[#allocation2 + $0x170] sm:$0xff] }
 0x2ad   : > { %25883 = vmatprep.mubr.f32.mxu1 %v37229_v61  ;;  %v8325_v61 = vsel %vm2325_vm1, %v8239_v63, 0  ;;  %v37247_v63 = vand.u32 4294901760, %v31837_v44  ;;  %38459 = vst [vmem:[#allocation129_spill] sm:$0xff] %v31879_v20 }
 0x2ae   : > { %24841 = vmatmul.mubr.f32.gmra.mrb[48].mxu0 %v31410_v22  ;;  %38451 = vst [vmem:[#allocation121_spill] sm:$0xff] %v31839_v19  ;;  %38452 = vst [vmem:[#allocation122_spill] sm:$0xff] %v31850_v9  ;;  %v31852_v22 = vand.u32 4294901760, %v8325_v61  ;;  %v31857_v32 = vsub.f32 %v8322_v42, %v31839_v19  ;;  %v37253_v21 = vand.u32 4294901760, %v31850_v9  ;;  %v38476_v9 = vld [vmem:[#allocation4_spill] sm:$0xff] }
 0x2af   : > { %24843 = vmatprep.mubr.f32.mxu0 %v31431_v6  ;;  %v37246_v6 = vand.u32 4294901760, %v31830_v27 }
 0x2b0   : > { %25884 = vmatmul.mubr.f32.gmra.mrb[20].mxu1 %v37238_v60  ;;  %38453 = vst [vmem:[#allocation123_spill] sm:$0xff] %v31852_v22  ;;  %38454 = vst [vmem:[#allocation124_spill] sm:$0xff] %v31857_v32  ;;  %v31859_v60 = vand.u32 4294901760, %v8328_v35  ;;  %v31870_v42 = vsub.f32 %v8325_v61, %v31852_v22 }
 0x2b1   : > { %25886 = vmatprep.mubr.f32.mxu1 %v37239_v11  ;;  %v8331_v11 = vsel %vm2325_vm1, %v8241_v26, 0  ;;  %v37252_v26 = vand.u32 4294901760, %v31857_v32  ;;  %v38475_v32 = vld [vmem:[#allocation39_spill] sm:$0xff] }
 0x2b2   : > { %24844 = vmatmul.mubr.f32.gmra.mrb[50].mxu0 %v31434_v33  ;;  %38455 = vst [vmem:[#allocation125_spill] sm:$0xff] %v31859_v60  ;;  %38456 = vst [vmem:[#allocation126_spill] sm:$0xff] %v31870_v42  ;;  %v37257_v61 = vand.u32 4294901760, %v31870_v42  ;;  %v38474_v42 = vld [vmem:[#allocation35_spill] sm:$0xff]  ;;  %v38489_v33 = vld [vmem:[#allocation54_spill] sm:$0xff] }
 0x2b3   : > { %24846 = vmatprep.mubr.f32.mxu0 %v31455_v58  ;;  %v31872_v58 = vand.u32 4294901760, %v8331_v11 }
 0x2b4   : > { %25887 = vmatmul.mubr.f32.gmra.mrb[22].mxu1 %v37246_v6  ;;  %v31877_v6 = vsub.f32 %v8328_v35, %v31859_v60 }
 0x2b5   : > { %25889 = vmatprep.mubr.f32.mxu1 %v37247_v63  ;;  %38457 = vst [vmem:[#allocation127_spill] sm:$0xff] %v31872_v58  ;;  %v8337_v63 = vsel %vm2325_vm1, %v8243_v53, 0  ;;  %v31889_v44 = vsub.f32 %v8331_v11, %v31872_v58  ;;  %v31896_v53 = vsub.f32 %v8334_v34, %v31879_v20 }
 0x2b6   : > { %24847 = vmatmul.mubr.f32.gmra.mrb[52].mxu0 %v31458_v12  ;;  %38458 = vst [vmem:[#allocation128_spill] sm:$0xff] %v31877_v6  ;;  %v31891_v27 = vand.u32 4294901760, %v8337_v63  ;;  %v37254_v35 = vand.u32 4294901760, %v31877_v6  ;;  %v38473_v6 = vld [vmem:[#allocation29_spill] sm:$0xff] }
 0x2b7   : > { %24849 = vmatprep.mubr.f32.mxu0 %v31479_v14  ;;  %38460 = vst [vmem:[#allocation130_spill] sm:$0xff] %v31889_v44  ;;  %38462 = vst [vmem:[#allocation132_spill] sm:$0xff] %v31896_v53  ;;  %v37255_v11 = vand.u32 4294901760, %v31889_v44  ;;  %v38487_v14 = vld [vmem:[#allocation50_spill] sm:$0xff]  ;;  %v38488_v12 = vld [vmem:[#allocation53_spill] sm:$0xff] }
 0x2b8   : > { %25890 = vmatmul.mubr.f32.gmra.mrb[24].mxu1 %v37253_v21  ;;  %38461 = vst [vmem:[#allocation131_spill] sm:$0xff] %v31891_v27  ;;  %v37256_v21 = vand.u32 4294901760, %v31896_v53 }
 0x2b9   : > { %25892 = vmatprep.mubr.f32.mxu1 %v37252_v26  ;;  %v31905_v26 = vsub.f32 %v8337_v63, %v31891_v27  ;;  %v31920_v63 = vld [vmem:[%s36912_s3 + $0x40] sm:$0xff] }
 0x2ba   : > { %24850 = vmatmul.mubr.f32.gmra.mrb[54].mxu0 %v31482_v47  ;;  %v38486_v47 = vld [vmem:[#allocation49_spill] sm:$0xff] }
 0x2bb   : > { %24852 = vmatprep.mubr.f32.mxu0 %v31503_v30  ;;  %38463 = vst [vmem:[#allocation133_spill] sm:$0xff] %v31905_v26  ;;  %v37260_v34 = vand.u32 4294901760, %v31905_v26  ;;  %v38466_v26 = vand.u32 4294901760, %v31206_v48  ;;  %v38470_v48 = vld [vmem:[#allocation22_spill] sm:$0xff] }
 0x2bc   : > { %25893 = vmatmul.mubr.f32.gmra.mrb[26].mxu1 %v37257_v61  ;;  %v10301_v61 = vand.u32 4294901760, %v31920_v63  ;;  %v38485_v30 = vld [vmem:[#allocation46_spill] sm:$0xff] }
 0x2bd   : > { %25895 = vmatprep.mubr.f32.mxu1 %v37254_v35  ;;  %v37261_v35 = vand.u32 4294901760, %v31614_v52  ;;  %v38465_v52 = vand.u32 4294901760, %v31204_v29  ;;  %v38469_v29 = vld [vmem:[#allocation15_spill] sm:$0xff] }
 0x2be   : > { %24853 = vmatmul.mubr.f32.gmra.mrb[56].mxu0 %v31506_v57  ;;  %v38484_v57 = vld [vmem:[#allocation45_spill] sm:$0xff]  ;;  %v32001_v62 = vsub.f32 %v31920_v63, %v10301_v61  ;;  %v38496_v63 = vld [vmem:[#allocation66_spill] sm:$0xff] }
 0x2bf   : > { %24855 = vmatprep.mubr.f32.mxu0 %v31527_v17  ;;  %v31948_v44 = vpack.c.bf16 %v38466_v26, %v38465_v52  ;;  %v38471_v52 = vld [vmem:[#allocation19_spill] sm:$0xff]  ;;  %v38472_v26 = vld [vmem:[#allocation28_spill] sm:$0xff]  ;;  %v38483_v17 = vld [vmem:[#allocation42_spill] sm:$0xff] }
 0x2c0   : > { %25896 = vmatmul.mubr.f32.gmra.mrb[28].mxu1 %v37255_v11  ;;  %v31925_v11 = vld [vmem:[%s36912_s3 + $0x48] sm:$0xff] }
 0x2c1   : > { %25898 = vmatprep.mubr.f32.mxu1 %v37256_v21  ;;  %v37268_v21 = vand.u32 4294901760, %v31617_v49  ;;  %v10304_v53 = vand.u32 4294901760, %v31925_v11  ;;  %v38468_v49 = vld [vmem:[#allocation16_spill] sm:$0xff] }
 0x2c2   : > { %24856 = vmatmul.mubr.f32.gmra.mrb[58].mxu0 %v31530_v31  ;;  %v38482_v31 = vld [vmem:[#allocation38_spill] sm:$0xff] }
 0x2c3   : > { %24858 = vmatprep.mubr.f32.mxu0 %v31552_v25  ;;  %v38481_v25 = vld [vmem:[#allocation33_spill] sm:$0xff] }
 0x2c4   : > { %25899 = vmatmul.mubr.f32.gmra.mrb[30].mxu1 %v37260_v34  ;;  %v31940_v34 = vpack.c.bf16 %v10304_v53, %v10301_v61  ;;  %v38495_v61 = vld [vmem:[#allocation62_spill] sm:$0xff] }
 0x2c5   : > { %25901 = vmatprep.mubr.f32.mxu1 %v37261_v35  ;;  %v38464_v35 = vld [vmem:[#allocation10_spill] sm:$0xff] }
 0x2c6   : > { %24859 = vmatmul.mubr.f32.gmra.mrb[60].mxu0 %v31549_v23  ;;  %v38480_v23 = vld [vmem:[#allocation32_spill] sm:$0xff]  ;;  %38490 = vst [vmem:[#allocation10_spill] sm:$0xff] %v32001_v62 }
 0x2c7   : > { %24861 = vmatprep.mubr.f32.mxu0 %v31576_v13  ;;  %v38479_v13 = vld [vmem:[#allocation26_spill] sm:$0xff] }
 0x2c8   : > { %25902 = vmatmul.mubr.f32.gmra.mrb[0].mxu1 %v37268_v21  ;;  %v38467_v21 = vld [vmem:[#allocation3_spill] sm:$0xff] }
 0x2c9   : > { %25908 = vmatprep.mubr.f32.mxu1 %v31582_v15 }
 0x2ca   : > { %24862 = vmatmul.mubr.f32.gmra.mrb[62].mxu0 %v31573_v16  ;;  %v38478_v16 = vld [vmem:[#allocation24_spill] sm:$0xff] }
 0x2cb   : > { %24868 = vmatprep.mubr.f32.mxu0 %v38464_v35 }
 0x2cc   : > { %25909 = vmatmul.mubr.f32.vlgmr.msra.gmra.mrb[2].mxu1 %v31593_v1 }
 0x2cd   : > { %25911 = vmatprep.mubr.f32.mxu1 %v31595_v59  ;;  %28071 = vmatpush3.bf16.msra.mxu1 %v31208_v2  ;;  %v38477_v2 = vld [vmem:[#allocation7_spill] sm:$0xff] }
 0x2ce   : > { %24869 = vmatmul.mubr.f32.vlgmr.msra.gmra.mrb[32].mxu0 %v38467_v21  ;;  %28073 = vmatprep.subr.bf16.mxu1 %v31940_v34 }
 0x2cf   : > { %24871 = vmatprep.mubr.f32.mxu0 %v38468_v49  ;;  %27991 = vmatpush3.bf16.msra.mxu0 %v31183_v56 }
 0x2d0   : > { %25912 = vmatmul.mubr.f32.gmra.mrb[4].mxu1 %v31629_v7  ;;  %27993 = vmatprep.subr.bf16.mxu0 %v31948_v44 }
 0x2d1   : > { %25914 = vmatprep.mubr.f32.mxu1 %v31635_v5 }
 0x2d2   : > { %24872 = vmatmul.mubr.f32.gmra.mrb[34].mxu0 %v38469_v29 }
 0x2d3   : > { %24874 = vmatprep.mubr.f32.mxu0 %v38470_v48 }
 0x2d4   : > { %25915 = vmatmul.mubr.f32.gmra.mrb[6].mxu1 %v31648_v36 }
 0x2d5   : > { %25917 = vmatprep.mubr.f32.mxu1 %v31655_v18 }
 0x2d6   : > { %24875 = vmatmul.mubr.f32.gmra.mrb[36].mxu0 %v38471_v52 }
 0x2d7   : > { %24877 = vmatprep.mubr.f32.mxu0 %v38472_v26 }
 0x2d8   : > { %25918 = vmatmul.mubr.f32.gmra.mrb[8].mxu1 %v31668_v51 }
 0x2d9   : > { %25920 = vmatprep.mubr.f32.mxu1 %v31676_v4 }
 0x2da   : > { %24878 = vmatmul.mubr.f32.gmra.mrb[38].mxu0 %v38473_v6 }
 0x2db   : > { %24880 = vmatprep.mubr.f32.mxu0 %v38474_v42 }
 0x2dc   : > { %25921 = vmatmul.mubr.f32.gmra.mrb[10].mxu1 %v31689_v40 }
 0x2dd   : > { %25923 = vmatprep.mubr.f32.mxu1 %v31697_v45 }
 0x2de   : > { %24881 = vmatmul.mubr.f32.gmra.mrb[40].mxu0 %v38475_v32 }
 0x2df   : > { %24883 = vmatprep.mubr.f32.mxu0 %v38476_v9 }
 0x2e0   : > { %25924 = vmatmul.mubr.f32.gmra.mrb[12].mxu1 %v31709_v54 }
 0x2e1   : > { %25926 = vmatprep.mubr.f32.mxu1 %v31711_v37 }
 0x2e2   : > { %24884 = vmatmul.mubr.f32.gmra.mrb[42].mxu0 %v38477_v2 }
 0x2e3   : > { %24886 = vmatprep.mubr.f32.mxu0 %v38478_v16 }
 0x2e4   : > { %25927 = vmatmul.mubr.f32.gmra.mrb[14].mxu1 %v31732_v3 }
 0x2e5   : > { %25929 = vmatprep.mubr.f32.mxu1 %v31736_v55 }
 0x2e6   : > { %24887 = vmatmul.mubr.f32.gmra.mrb[44].mxu0 %v38479_v13 }
 0x2e7   : > { %24889 = vmatprep.mubr.f32.mxu0 %v38480_v23 }
 0x2e8   : > { %25930 = vmatmul.mubr.f32.gmra.mrb[16].mxu1 %v31750_v38 }
 0x2e9   : > { %25932 = vmatprep.mubr.f32.mxu1 %v31756_v46 }
 0x2ea   : > { %24890 = vmatmul.mubr.f32.gmra.mrb[46].mxu0 %v38481_v25 }
 0x2eb   : > { %24892 = vmatprep.mubr.f32.mxu0 %v38482_v31 }
 0x2ec   : > { %25933 = vmatmul.mubr.f32.gmra.mrb[18].mxu1 %v31771_v39 }
 0x2ed   : > { %25935 = vmatprep.mubr.f32.mxu1 %v31778_v8 }
 0x2ee   : > { %24893 = vmatmul.mubr.f32.gmra.mrb[48].mxu0 %v38483_v17 }
 0x2ef   : > { %24895 = vmatprep.mubr.f32.mxu0 %v38484_v57 }
 0x2f0   : > { %25936 = vmatmul.mubr.f32.gmra.mrb[20].mxu1 %v31792_v0 }
 0x2f1   : > { %25938 = vmatprep.mubr.f32.mxu1 %v31799_v28 }
 0x2f2   : > { %24896 = vmatmul.mubr.f32.gmra.mrb[50].mxu0 %v38485_v30  ;;  %v32004_v30 = vsub.f32 %v31925_v11, %v10304_v53 }
 0x2f3   : > { %24898 = vmatprep.mubr.f32.mxu0 %v38486_v47  ;;  %v38492_v47 = vld [vmem:[#allocation57_spill] sm:$0xff] }
 0x2f4   : > { %25939 = vmatmul.mubr.f32.gmra.mrb[22].mxu1 %v31812_v41  ;;  %38491 = vst [vmem:[#allocation3_spill] sm:$0xff] %v32004_v30 }
 0x2f5   : > { %25941 = vmatprep.mubr.f32.mxu1 %v31819_v43 }
 0x2f6   : > { %24899 = vmatmul.mubr.f32.gmra.mrb[52].mxu0 %v38487_v14  ;;  %v38493_v14 = vld [vmem:[#allocation58_spill] sm:$0xff] }
 0x2f7   : > { %24901 = vmatprep.mubr.f32.mxu0 %v38488_v12  ;;  %v38494_v12 = vld [vmem:[#allocation61_spill] sm:$0xff] }
 0x2f8   : > { %25942 = vmatmul.mubr.f32.gmra.mrb[24].mxu1 %v31832_v50  ;;  %v37315_v50 = vand.u32 4294901760, %v32001_v62 }
 0x2f9   : > { %25944 = vmatprep.mubr.f32.mxu1 %v31839_v19  ;;  %v37316_v19 = vand.u32 4294901760, %v32004_v30 }
 0x2fa   : > { %24902 = vmatmul.mubr.f32.gmra.mrb[54].mxu0 %v38489_v33  ;;  %v10691_v53 = vsub.f32 %v32001_v62, %v37315_v50  ;;  %v38499_v50 = vld [vmem:[#allocation70_spill] sm:$0xff] }
 0x2fb   : > { %24904 = vmatprep.mubr.f32.mxu0 %v38492_v47  ;;  %v10698_v11 = vsub.f32 %v32004_v30, %v37316_v19  ;;  %v38500_v19 = vand.u32 4294901760, %v38464_v35  ;;  %v38508_v35 = vand.u32 4294901760, %v38474_v42  ;;  %v38512_v42 = vand.u32 4294901760, %v38478_v16 }
 0x2fc   : > { %25945 = vmatmul.mubr.f32.gmra.mrb[26].mxu1 %v31852_v22  ;;  %v38516_v16 = vand.u32 4294901760, %v38482_v31  ;;  %v38521_v31 = vld [vmem:[#allocation49_spill] sm:$0xff] }
 0x2fd   : > { %25947 = vmatprep.mubr.f32.mxu1 %v31859_v60 }
 0x2fe   : > { %24905 = vmatmul.mubr.f32.gmra.mrb[56].mxu0 %v38493_v14 }
 0x2ff   : > { %24907 = vmatprep.mubr.f32.mxu0 %v38494_v12  ;;  %v38497_v12 = vld [vmem:[#allocation65_spill] sm:$0xff] }
 0x300   : > { %25948 = vmatmul.mubr.f32.gmra.mrb[28].mxu1 %v31872_v58  ;;  %v10692_v58 = vand.u32 4294901760, %v10691_v53  ;;  %v38501_v53 = vand.u32 4294901760, %v38467_v21  ;;  %v38506_v21 = vand.u32 4294901760, %v38472_v26 }
 0x301   : > { %25950 = vmatprep.mubr.f32.mxu1 %v31879_v20  ;;  %v10699_v20 = vand.u32 4294901760, %v10698_v11  ;;  %v38522_v11 = vand.u32 4294901760, %v38521_v31 }
 0x302   : > { %24908 = vmatmul.mubr.f32.gmra.mrb[58].mxu0 %v38495_v61  ;;  %v38498_v61 = vld [vmem:[#allocation74_spill] sm:$0xff] }
 0x303   : > { %24910 = vmatprep.mubr.f32.mxu0 %v38496_v63  ;;  %v32030_v14 = vpack.c.bf16 %v10699_v20, %v10692_v58  ;;  %v38502_v58 = vand.u32 4294901760, %v38468_v49  ;;  %v38504_v20 = vand.u32 4294901760, %v38470_v48  ;;  %v38505_v49 = vand.u32 4294901760, %v38471_v52  ;;  %v10169_v52 = vld [vmem:[#allocation2 + $0x19] sm:$0xff] }
 0x304   : > { %25951 = vmatmul.mubr.f32.gmra.mrb[30].mxu1 %v31891_v27  ;;  %v38510_v48 = vand.u32 4294901760, %v38476_v9  ;;  %v38514_v9 = vand.u32 4294901760, %v38480_v23  ;;  %v38518_v23 = vand.u32 4294901760, %v38484_v57  ;;  %v38523_v57 = vld [vmem:[#allocation50_spill] sm:$0xff] }
 0x305   : > { %25953 = vmatprep.mubr.f32.mxu1 %v31601_v10 }
 0x306   : > { %24911 = vmatmul.mubr.f32.gmra.mrb[60].mxu0 %v38497_v12  ;;  %v32037_v12 = vpack.c.bf16 %v32004_v30, %v32001_v62  ;;  %v10195_v62 = vld [vmem:[#allocation2 + $0x151] sm:$0xff] }
 0x307   : > { %24913 = vmatprep.mubr.f32.mxu0 %v31591_v24 }
 0x308   : > { %25954 = vmatmul.mubr.f32.gmra.mrb[0].mxu1 %v38498_v61 }
 0x309   : > { %25960 = vmatprep.mubr.f32.mxu1 %v31582_v15  ;;  %v38595_v15 = vld [vmem:[#allocation25_spill] sm:$0xff] }
 0x30a   : > { %24914 = vmatmul.mubr.f32.gmra.mrb[62].mxu0 %v38499_v50 }
 0x30b   : > { %24920 = vmatprep.mubr.f32.mxu0 %v38500_v19  ;;  %v38503_v19 = vand.u32 4294901760, %v38469_v29  ;;  %v38509_v29 = vand.u32 4294901760, %v38475_v32  ;;  %v38513_v32 = vand.u32 4294901760, %v38479_v13  ;;  %v38517_v13 = vand.u32 4294901760, %v38483_v17  ;;  %v10171_v17 = vld [vmem:[#allocation2 + $0x31] sm:$0xff] }
 0x30c   : > { %25961 = vmatmul.mubr.f32.vlgmr.msra.gmra.mrb[2].mxu1 %v31593_v1 }
 0x30d   : > { %25963 = vmatprep.mubr.f32.mxu1 %v31595_v59  ;;  %28075 = vmatpush3.bf16.msra.mxu1 %v31940_v34 }
 0x30e   : > { %24921 = vmatmul.mubr.f32.vlgmr.msra.gmra.mrb[32].mxu0 %v38501_v53  ;;  %28077 = vmatprep.subr.bf16.mxu1 %v32030_v14  ;;  %v10205_v53 = vsel %vm2325_vm1, %v10169_v52, 0  ;;  %v10174_v52 = vld [vmem:[#allocation2 + $0x51] sm:$0xff] }
 0x30f   : > { %24923 = vmatprep.mubr.f32.mxu0 %v38502_v58  ;;  %27995 = vmatpush3.bf16.msra.mxu0 %v31948_v44  ;;  %v38507_v44 = vand.u32 4294901760, %v38473_v6  ;;  %v38511_v6 = vand.u32 4294901760, %v38477_v2  ;;  %v38515_v2 = vand.u32 4294901760, %v38481_v25  ;;  %v38519_v25 = vld [vmem:[#allocation46_spill] sm:$0xff] }
 0x310   : > { %25964 = vmatmul.mubr.f32.gmra.mrb[4].mxu1 %v31629_v7  ;;  %27997 = vmatprep.subr.bf16.mxu0 %v31183_v56  ;;  %v38520_v26 = vand.u32 4294901760, %v38519_v25  ;;  %v10170_v58 = vld [vmem:[#allocation2 + $0x21] sm:$0xff]  ;;  %v10188_v7 = vld [vmem:[#allocation2 + $0xf9] sm:$0xff] }
 0x311   : > { %25966 = vmatprep.mubr.f32.mxu1 %v31635_v5  ;;  %v10175_v25 = vld [vmem:[#allocation2 + $0x61] sm:$0xff] }
 0x312   : > { %24924 = vmatmul.mubr.f32.gmra.mrb[34].mxu0 %v38503_v19  ;;  %v38524_v19 = vand.u32 4294901760, %v38523_v57  ;;  %v10223_v57 = vsel %vm2325_vm1, %v10175_v25, 0  ;;  %v10177_v25 = vld [vmem:[#allocation2 + $0x79] sm:$0xff] }
 0x313   : > { %24926 = vmatprep.mubr.f32.mxu0 %v38504_v20  ;;  %v32107_v20 = vand.u32 4294901760, %v10205_v53 }
 0x314   : > { %25967 = vmatmul.mubr.f32.gmra.mrb[6].mxu1 %v31648_v36 }
 0x315   : > { %25969 = vmatprep.mubr.f32.mxu1 %v31655_v18  ;;  %38525 = vst [vmem:[#allocation16_spill] sm:$0xff] %v32107_v20  ;;  %v38591_v18 = vld [vmem:[#allocation23_spill] sm:$0xff] }
 0x316   : > { %24927 = vmatmul.mubr.f32.gmra.mrb[36].mxu0 %v38505_v49  ;;  %v10208_v49 = vsel %vm2325_vm1, %v10170_v58, 0 }
 0x317   : > { %24929 = vmatprep.mubr.f32.mxu0 %v38506_v21  ;;  %v10172_v21 = vld [vmem:[#allocation2 + $0x39] sm:$0xff] }
 0x318   : > { %25970 = vmatmul.mubr.f32.gmra.mrb[8].mxu1 %v31668_v51  ;;  %v10187_v51 = vld [vmem:[#allocation2 + $0xf1] sm:$0xff] }
 0x319   : > { %25972 = vmatprep.mubr.f32.mxu1 %v31676_v4 }
 0x31a   : > { %24930 = vmatmul.mubr.f32.gmra.mrb[38].mxu0 %v38507_v44  ;;  %v38526_v44 = vld [vmem:[#allocation53_spill] sm:$0xff] }
 0x31b   : > { %24932 = vmatprep.mubr.f32.mxu0 %v38508_v35  ;;  %v38527_v35 = vand.u32 4294901760, %v38526_v44 }
 0x31c   : > { %25973 = vmatmul.mubr.f32.gmra.mrb[10].mxu1 %v31689_v40 }
 0x31d   : > { %25975 = vmatprep.mubr.f32.mxu1 %v31697_v45 }
 0x31e   : > { %24933 = vmatmul.mubr.f32.gmra.mrb[40].mxu0 %v38509_v29  ;;  %v10211_v29 = vsel %vm2325_vm1, %v10171_v17, 0  ;;  %v10220_v17 = vsel %vm2325_vm1, %v10174_v52, 0  ;;  %v32155_v52 = vand.u32 4294901760, %v10223_v57 }
 0x31f   : > { %24935 = vmatprep.mubr.f32.mxu0 %v38510_v48  ;;  %v38528_v48 = vld [vmem:[#allocation119_spill] sm:$0xff] }
 0x320   : > { %25976 = vmatmul.mubr.f32.gmra.mrb[12].mxu1 %v31709_v54  ;;  %38547 = vst [vmem:[#allocation24_spill] sm:$0xff] %v32155_v52 }
 0x321   : > { %25978 = vmatprep.mubr.f32.mxu1 %v31711_v37 }
 0x322   : > { %24936 = vmatmul.mubr.f32.gmra.mrb[42].mxu0 %v38511_v6  ;;  %v38529_v6 = vld [vmem:[#allocation121_spill] sm:$0xff] }
 0x323   : > { %24938 = vmatprep.mubr.f32.mxu0 %v38512_v42  ;;  %v32115_v42 = vand.u32 4294901760, %v10208_v49 }
 0x324   : > { %25979 = vmatmul.mubr.f32.gmra.mrb[14].mxu1 %v31732_v3  ;;  %v38580_v3 = vld [vmem:[#allocation14_spill] sm:$0xff] }
 0x325   : > { %25981 = vmatprep.mubr.f32.mxu1 %v31736_v55  ;;  %38530 = vst [vmem:[#allocation15_spill] sm:$0xff] %v32115_v42  ;;  %v10184_v55 = vld [vmem:[#allocation2 + $0xc9] sm:$0xff] }
 0x326   : > { %24939 = vmatmul.mubr.f32.gmra.mrb[44].mxu0 %v38513_v32  ;;  %v10214_v32 = vsel %vm2325_vm1, %v10172_v21, 0 }
 0x327   : > { %24941 = vmatprep.mubr.f32.mxu0 %v38514_v9  ;;  %v10173_v9 = vld [vmem:[#allocation2 + $0x49] sm:$0xff] }
 0x328   : > { %25982 = vmatmul.mubr.f32.gmra.mrb[16].mxu1 %v31750_v38  ;;  %v10217_v31 = vsel %vm2325_vm1, %v10173_v9, 0 }
 0x329   : > { %25984 = vmatprep.mubr.f32.mxu1 %v31756_v46  ;;  %v32145_v44 = vand.u32 4294901760, %v10217_v31 }
 0x32a   : > { %24942 = vmatmul.mubr.f32.gmra.mrb[46].mxu0 %v38515_v2  ;;  %v38531_v2 = vand.u32 4294901760, %v38489_v33  ;;  %v32133_v33 = vsub.f32 %v10208_v49, %v32115_v42  ;;  %v38543_v49 = vld [vmem:[#allocation127_spill] sm:$0xff] }
 0x32b   : > { %24944 = vmatprep.mubr.f32.mxu0 %v38516_v16  ;;  %v32121_v16 = vsub.f32 %v10205_v53, %v32107_v20  ;;  %38542 = vst [vmem:[#allocation39_spill] sm:$0xff] %v32145_v44 }
 0x32c   : > { %25985 = vmatmul.mubr.f32.gmra.mrb[18].mxu1 %v31771_v39  ;;  %38536 = vst [vmem:[#allocation29_spill] sm:$0xff] %v32133_v33 }
 0x32d   : > { %25987 = vmatprep.mubr.f32.mxu1 %v31778_v8  ;;  %38532 = vst [vmem:[#allocation22_spill] sm:$0xff] %v32121_v16  ;;  %v37318_v58 = vand.u32 4294901760, %v32121_v16 }
 0x32e   : > { %24945 = vmatmul.mubr.f32.gmra.mrb[48].mxu0 %v38517_v13  ;;  %v32123_v13 = vand.u32 4294901760, %v10211_v29 }
 0x32f   : > { %24947 = vmatprep.mubr.f32.mxu0 %v38518_v23  ;;  %v38534_v23 = vand.u32 4294901760, %v38492_v47 }
 0x330   : > { %25988 = vmatmul.mubr.f32.gmra.mrb[20].mxu1 %v31792_v0  ;;  %38533 = vst [vmem:[#allocation19_spill] sm:$0xff] %v32123_v13  ;;  %v32139_v47 = vsub.f32 %v10211_v29, %v32123_v13  ;;  %v32167_v29 = vsub.f32 %v10217_v31, %v32145_v44  ;;  %v32180_v31 = vsub.f32 %v10223_v57, %v32155_v52 }
 0x331   : > { %25990 = vmatprep.mubr.f32.mxu1 %v31799_v28 }
 0x332   : > { %24948 = vmatmul.mubr.f32.gmra.mrb[50].mxu0 %v38520_v26  ;;  %v32128_v26 = vand.u32 4294901760, %v10214_v32  ;;  %38539 = vst [vmem:[#allocation35_spill] sm:$0xff] %v32139_v47  ;;  %38551 = vst [vmem:[#allocation26_spill] sm:$0xff] %v32167_v29 }
 0x333   : > { %24950 = vmatprep.mubr.f32.mxu0 %v38522_v11  ;;  %v38537_v11 = vld [vmem:[#allocation58_spill] sm:$0xff]  ;;  %38554 = vst [vmem:[#allocation33_spill] sm:$0xff] %v32180_v31 }
 0x334   : > { %25991 = vmatmul.mubr.f32.gmra.mrb[22].mxu1 %v31812_v41  ;;  %38535 = vst [vmem:[#allocation28_spill] sm:$0xff] %v32128_v26  ;;  %v38538_v53 = vand.u32 4294901760, %v38537_v11  ;;  %v32149_v9 = vsub.f32 %v10214_v32, %v32128_v26  ;;  %v38548_v11 = vld [vmem:[#allocation62_spill] sm:$0xff] }
 0x335   : > { %25993 = vmatprep.mubr.f32.mxu1 %v31819_v43 }
 0x336   : > { %24951 = vmatmul.mubr.f32.gmra.mrb[52].mxu0 %v38524_v19  ;;  %v38540_v19 = vld [vmem:[#allocation61_spill] sm:$0xff]  ;;  %38544 = vst [vmem:[#allocation4_spill] sm:$0xff] %v32149_v9 }
 0x337   : > { %24953 = vmatprep.mubr.f32.mxu0 %v38527_v35  ;;  %v38541_v21 = vand.u32 4294901760, %v38540_v19  ;;  %v10176_v35 = vld [vmem:[#allocation2 + $0x69] sm:$0xff]  ;;  %v10370_v19 = vsub.f32 %v32121_v16, %v37318_v58  ;;  %v38552_v58 = vand.u32 4294901760, %v32133_v33 }
 0x338   : > { %25994 = vmatmul.mubr.f32.gmra.mrb[24].mxu1 %v38528_v48  ;;  %v10226_v32 = vsel %vm2325_vm1, %v10176_v35, 0  ;;  %v10180_v48 = vld [vmem:[#allocation2 + $0x99] sm:$0xff] }
 0x339   : > { %25996 = vmatprep.mubr.f32.mxu1 %v38529_v6  ;;  %v10380_v35 = vsub.f32 %v32133_v33, %v38552_v58  ;;  %v10181_v58 = vld [vmem:[#allocation2 + $0xa9] sm:$0xff] }
 0x33a   : > { %24954 = vmatmul.mubr.f32.gmra.mrb[54].mxu0 %v38531_v2  ;;  %v38545_v2 = vld [vmem:[#allocation129_spill] sm:$0xff]  ;;  %v10241_v0 = vsel %vm2325_vm1, %v10181_v58, 0 }
 0x33b   : > { %24956 = vmatprep.mubr.f32.mxu0 %v38534_v23  ;;  %v32153_v23 = vand.u32 4294901760, %v10220_v17 }
 0x33c   : > { %25997 = vmatmul.mubr.f32.gmra.mrb[26].mxu1 %v31852_v22  ;;  %v38559_v22 = vand.u32 4294901760, %v31591_v24 }
 0x33d   : > { %25999 = vmatprep.mubr.f32.mxu1 %v31859_v60  ;;  %38546 = vst [vmem:[#allocation7_spill] sm:$0xff] %v32153_v23  ;;  %v10179_v60 = vld [vmem:[#allocation2 + $0x91] sm:$0xff] }
 0x33e   : > { %24957 = vmatmul.mubr.f32.gmra.mrb[56].mxu0 %v38538_v53  ;;  %v38549_v53 = vand.u32 4294901760, %v38548_v11  ;;  %v10229_v11 = vsel %vm2325_vm1, %v10177_v25, 0  ;;  %v10371_v25 = vand.u32 4294901760, %v10370_v19  ;;  %v10235_v6 = vsel %vm2325_vm1, %v10179_v60, 0 }
 0x33f   : > { %24959 = vmatprep.mubr.f32.mxu0 %v38541_v21  ;;  %v38556_v21 = vld [vmem:[#allocation65_spill] sm:$0xff] }
 0x340   : > { %26000 = vmatmul.mubr.f32.gmra.mrb[28].mxu1 %v38543_v49  ;;  %v38557_v49 = vand.u32 4294901760, %v38556_v21 }
 0x341   : > { %26002 = vmatprep.mubr.f32.mxu1 %v38545_v2  ;;  %v38550_v2 = vand.u32 4294901760, %v38496_v63  ;;  %v32177_v63 = vsub.f32 %v10220_v17, %v32153_v23  ;;  %v32192_v17 = vand.u32 4294901760, %v10229_v11 }
 0x342   : > { %24960 = vmatmul.mubr.f32.gmra.mrb[58].mxu0 %v38549_v53  ;;  %v10178_v53 = vld [vmem:[#allocation2 + $0x81] sm:$0xff] }
 0x343   : > { %24962 = vmatprep.mubr.f32.mxu0 %v38550_v2  ;;  %38553 = vst [vmem:[#allocation32_spill] sm:$0xff] %v32177_v63  ;;  %v32182_v2 = vand.u32 4294901760, %v10226_v32  ;;  %38560 = vst [vmem:[#allocation42_spill] sm:$0xff] %v32192_v17  ;;  %v10232_v57 = vsel %vm2325_vm1, %v10178_v53, 0  ;;  %v38563_v53 = vand.u32 4294901760, %v38499_v50  ;;  %v38567_v50 = vand.u32 4294901760, %v32167_v29 }
 0x344   : > { %26003 = vmatmul.mubr.f32.gmra.mrb[30].mxu1 %v31891_v27  ;;  %v38558_v27 = vand.u32 4294901760, %v32139_v47  ;;  %v32207_v43 = vand.u32 4294901760, %v10232_v57  ;;  %v38569_v8 = vand.u32 4294901760, %v32177_v63 }
 0x345   : > { %26005 = vmatprep.mubr.f32.mxu1 %v31601_v10  ;;  %38555 = vst [vmem:[#allocation38_spill] sm:$0xff] %v32182_v2  ;;  %v32203_v21 = vsub.f32 %v10226_v32, %v32182_v2  ;;  %v32220_v32 = vld [vmem:[%s36912_s3 + $0x8] sm:$0xff] }
 0x346   : > { %24963 = vmatmul.mubr.f32.gmra.mrb[60].mxu0 %v38557_v49  ;;  %v10390_v10 = vsub.f32 %v32139_v47, %v38558_v27  ;;  %v38561_v49 = vand.u32 4294901760, %v32149_v9  ;;  %v10381_v27 = vand.u32 4294901760, %v10380_v35  ;;  %38564 = vst [vmem:[#allocation54_spill] sm:$0xff] %v32207_v43  ;;  %v32215_v35 = vld [vmem:[%s36912_s3] sm:$0xff]  ;;  %v37330_v41 = vand.u32 4294901760, %v32220_v32 }
 0x347   : > { %24965 = vmatprep.mubr.f32.mxu0 %v38559_v22  ;;  %38562 = vst [vmem:[#allocation45_spill] sm:$0xff] %v32203_v21  ;;  %v10183_v22 = vld [vmem:[#allocation2 + $0xc1] sm:$0xff]  ;;  %v37331_v24 = vand.u32 4294901760, %v32215_v35  ;;  %v32247_v58 = vsub.f32 %v10232_v57, %v32207_v43  ;;  %v32260_v57 = vand.u32 4294901760, %v10241_v0  ;;  %v38581_v38 = vand.u32 4294901760, %v32203_v21 }
 0x348   : > { %26006 = vmatmul.mubr.f32.gmra.mrb[0].mxu1 %v38498_v61  ;;  %v10400_v19 = vsub.f32 %v32149_v9, %v38561_v49  ;;  %v10391_v60 = vand.u32 4294901760, %v10390_v10  ;;  %v32209_v61 = vand.u32 4294901760, %v10235_v6  ;;  %v10238_v49 = vsel %vm2325_vm1, %v10180_v48, 0  ;;  %v10182_v48 = vld [vmem:[#allocation2 + $0xb1] sm:$0xff] }
 0x349   : > { %26012 = vmatprep.mubr.f32.mxu1 %v10371_v25  ;;  %v38566_v25 = vld [vmem:[#allocation8_spill] sm:$0xff]  ;;  %v10410_v10 = vsub.f32 %v32167_v29, %v38567_v50  ;;  %v10420_v50 = vsub.f32 %v32177_v63, %v38569_v8  ;;  %v32237_v39 = vand.u32 4294901760, %v10238_v49  ;;  %v32243_v46 = vpack.c.bf16 %v37330_v41, %v37331_v24  ;;  %38572 = vst [vmem:[#allocation46_spill] sm:$0xff] %v32247_v58 }
 0x34a   : > { %24966 = vmatmul.mubr.f32.gmra.mrb[62].mxu0 %v38563_v53  ;;  %38565 = vst [vmem:[#allocation57_spill] sm:$0xff] %v32209_v61  ;;  %v32227_v53 = vsub.f32 %v10229_v11, %v32192_v17  ;;  %v10401_v28 = vand.u32 4294901760, %v10400_v19  ;;  %v38571_v19 = vld [vmem:[#allocation9_spill] sm:$0xff]  ;;  %v10244_v8 = vsel %vm2325_vm1, %v10182_v48, 0  ;;  %v38575_v41 = vand.u32 4294901760, %v32180_v31  ;;  %38576 = vst [vmem:[#allocation50_spill] sm:$0xff] %v32260_v57 }
 0x34b   : > { %24972 = vmatprep.mubr.f32.mxu0 %v38566_v25  ;;  %38570 = vst [vmem:[#allocation70_spill] sm:$0xff] %v32237_v39  ;;  %v10411_v11 = vand.u32 4294901760, %v10410_v10  ;;  %v32267_v10 = vand.u32 4294901760, %v10244_v8  ;;  %v10440_v37 = vsub.f32 %v32203_v21, %v38581_v38  ;;  %v32283_v40 = vsub.f32 %v10241_v0, %v32260_v57  ;;  %v10186_v38 = vld [vmem:[#allocation2 + $0xe1] sm:$0xff] }
 0x34c   : > { %38568 = vst [vmem:[#allocation66_spill] sm:$0xff] %v32227_v53  ;;  %26013 = vmatmul.mubr.f32.vlgmr.msra.gmra.mrb[2].mxu1 %v10381_v27  ;;  %v10247_v27 = vsel %vm2325_vm1, %v10183_v22, 0  ;;  %v10430_v24 = vsub.f32 %v32180_v31, %v38575_v41  ;;  %v32265_v22 = vsub.f32 %v10238_v49, %v32237_v39  ;;  %v10185_v41 = vld [vmem:[#allocation2 + $0xd9] sm:$0xff]  ;;  %v38583_v54 = vand.u32 4294901760, %v32227_v53  ;;  %v38603_v31 = vld [vmem:[#allocation34_spill] sm:$0xff] }
 0x34d   : > { %26015 = vmatprep.mubr.f32.mxu1 %v10391_v60  ;;  %28079 = vmatpush3.bf16.msra.mxu1 %v32030_v14  ;;  %v32250_v14 = vsub.f32 %v10235_v6, %v32209_v61  ;;  %v38574_v60 = vld [vmem:[#allocation6_spill] sm:$0xff]  ;;  %v10421_v6 = vand.u32 4294901760, %v10420_v50  ;;  %38578 = vst [vmem:[#allocation58_spill] sm:$0xff] %v32267_v10  ;;  %v32269_v48 = vand.u32 4294901760, %v10247_v27  ;;  %v10250_v50 = vsel %vm2325_vm1, %v10184_v55, 0  ;;  %38584 = vst [vmem:[#allocation62_spill] sm:$0xff] %v32283_v40 }
 0x34e   : > { %24973 = vmatmul.mubr.f32.vlgmr.msra.gmra.mrb[32].mxu0 %v38571_v19  ;;  %28081 = vmatprep.subr.bf16.mxu1 %v32037_v12  ;;  %38577 = vst [vmem:[#allocation53_spill] sm:$0xff] %v32265_v22  ;;  %v10431_v49 = vand.u32 4294901760, %v10430_v24  ;;  %v10450_v45 = vsub.f32 %v32227_v53, %v38583_v54  ;;  %v10253_v4 = vsel %vm2325_vm1, %v10185_v41, 0  ;;  %v32293_v24 = vand.u32 4294901760, %v10250_v50  ;;  %v38588_v54 = vld [vmem:[#allocation17_spill] sm:$0xff] }
 0x34f   : > { %38573 = vst [vmem:[#allocation49_spill] sm:$0xff] %v32250_v14  ;;  %24975 = vmatprep.mubr.f32.mxu0 %v38574_v60  ;;  %27999 = vmatpush3.bf16.msra.mxu0 %v31183_v56  ;;  %38579 = vst [vmem:[#allocation61_spill] sm:$0xff] %v32269_v48  ;;  %v32291_v55 = vsub.f32 %v10247_v27, %v32269_v48  ;;  %v10441_v0 = vand.u32 4294901760, %v10440_v37  ;;  %v32304_v36 = vand.u32 4294901760, %v10253_v4  ;;  %v10256_v5 = vsel %vm2325_vm1, %v10186_v38, 0  ;;  %v10189_v27 = vld [vmem:[#allocation2 + $0x109] sm:$0xff] }
 0x350   : > { %26016 = vmatmul.mubr.f32.gmra.mrb[4].mxu1 %v10401_v28  ;;  %28001 = vmatprep.subr.bf16.mxu0 %v32243_v46  ;;  %v32288_v28 = vsub.f32 %v10244_v8, %v32267_v10  ;;  %38587 = vst [vmem:[#allocation9_spill] sm:$0xff] %v32293_v24  ;;  %v10451_v8 = vand.u32 4294901760, %v10450_v45  ;;  %v10259_v37 = vsel %vm2325_vm1, %v10187_v51, 0  ;;  %v32314_v45 = vsub.f32 %v10250_v50, %v32293_v24  ;;  %v38597_v51 = vld [vmem:[#allocation31_spill] sm:$0xff] }
 0x351   : > { %26018 = vmatprep.mubr.f32.mxu1 %v10411_v11  ;;  %v38582_v11 = vld [vmem:[#allocation18_spill] sm:$0xff]  ;;  %38586 = vst [vmem:[#allocation8_spill] sm:$0xff] %v32291_v55  ;;  %38592 = vst [vmem:[#allocation6_spill] sm:$0xff] %v32304_v36  ;;  %v32326_v1 = vand.u32 4294901760, %v10259_v37  ;;  %v10262_v50 = vsel %vm2325_vm1, %v10188_v7, 0 }
 0x352   : > { %24976 = vmatmul.mubr.f32.gmra.mrb[34].mxu0 %v38580_v3  ;;  %38585 = vst [vmem:[#allocation65_spill] sm:$0xff] %v32288_v28  ;;  %38594 = vst [vmem:[#allocation14_spill] sm:$0xff] %v32314_v45  ;;  %v38601_v53 = vand.u32 4294901760, %v32288_v28 }
 0x353   : > { %24978 = vmatprep.mubr.f32.mxu0 %v38582_v11  ;;  %38600 = vst [vmem:[#allocation23_spill] sm:$0xff] %v32326_v1 }
 0x354   : > { %26019 = vmatmul.mubr.f32.gmra.mrb[6].mxu1 %v10421_v6  ;;  %v38589_v6 = vand.u32 4294901760, %v32247_v58  ;;  %v10500_v21 = vsub.f32 %v32288_v28, %v38601_v53 }
 0x355   : > { %26021 = vmatprep.mubr.f32.mxu1 %v10431_v49  ;;  %v38590_v49 = vand.u32 4294901760, %v32250_v14 }
 0x356   : > { %24979 = vmatmul.mubr.f32.gmra.mrb[36].mxu0 %v38588_v54  ;;  %v10460_v41 = vsub.f32 %v32247_v58, %v38589_v6  ;;  %v38593_v6 = vand.u32 4294901760, %v32265_v22  ;;  %v10191_v58 = vld [vmem:[#allocation2 + $0x121] sm:$0xff]  ;;  %v10501_v63 = vand.u32 4294901760, %v10500_v21 }
 0x357   : > { %v10470_v56 = vsub.f32 %v32250_v14, %v38590_v49  ;;  %24981 = vmatprep.mubr.f32.mxu0 %v38591_v18  ;;  %v32317_v14 = vand.u32 4294901760, %v10256_v5  ;;  %v32324_v49 = vsub.f32 %v10253_v4, %v32304_v36 }
 0x358   : > { %26022 = vmatmul.mubr.f32.gmra.mrb[8].mxu1 %v10441_v0  ;;  %v10480_v59 = vsub.f32 %v32265_v22, %v38593_v6  ;;  %v10461_v38 = vand.u32 4294901760, %v10460_v41  ;;  %v10190_v22 = vld [vmem:[#allocation2 + $0x111] sm:$0xff] }
 0x359   : > { %26024 = vmatprep.mubr.f32.mxu1 %v10451_v8  ;;  %v10471_v0 = vand.u32 4294901760, %v10470_v56  ;;  %38596 = vst [vmem:[#allocation18_spill] sm:$0xff] %v32317_v14  ;;  %v38598_v8 = vand.u32 4294901760, %v32283_v40  ;;  %38599 = vst [vmem:[#allocation17_spill] sm:$0xff] %v32324_v49  ;;  %v10265_v56 = vsel %vm2325_vm1, %v10189_v27, 0  ;;  %v32339_v7 = vsub.f32 %v10256_v5, %v32317_v14  ;;  %v10193_v5 = vld [vmem:[#allocation2 + $0x139] sm:$0xff] }
 0x35a   : > { %24982 = vmatmul.mubr.f32.gmra.mrb[38].mxu0 %v38595_v15  ;;  %v10481_v41 = vand.u32 4294901760, %v10480_v59  ;;  %v10268_v27 = vsel %vm2325_vm1, %v10190_v22, 0  ;;  %v10271_v59 = vsel %vm2325_vm1, %v10191_v58, 0  ;;  %v38611_v58 = vld [vmem:[#allocation41_spill] sm:$0xff]  ;;  %v38615_v21 = vand.u32 4294901760, %v32324_v49 }
 0x35b   : > { %24984 = vmatprep.mubr.f32.mxu0 %v38597_v51  ;;  %v10490_v6 = vsub.f32 %v32283_v40, %v38598_v8  ;;  %v38602_v8 = vand.u32 4294901760, %v32291_v55  ;;  %38604 = vst [vmem:[#allocation25_spill] sm:$0xff] %v32339_v7  ;;  %v32350_v40 = vand.u32 4294901760, %v10265_v56  ;;  %v32352_v9 = vand.u32 4294901760, %v10268_v27 }
 0x35c   : > { %26025 = vmatmul.mubr.f32.gmra.mrb[10].mxu1 %v10461_v38  ;;  %v32341_v38 = vand.u32 4294901760, %v10262_v50  ;;  %v32354_v22 = vand.u32 4294901760, %v10271_v59 }
 0x35d   : > { %26027 = vmatprep.mubr.f32.mxu1 %v10471_v0  ;;  %v10510_v4 = vsub.f32 %v32291_v55, %v38602_v8  ;;  %v38606_v0 = vld [vmem:[#allocation40_spill] sm:$0xff]  ;;  %v10491_v53 = vand.u32 4294901760, %v10490_v6  ;;  %v32348_v8 = vsub.f32 %v10259_v37, %v32326_v1  ;;  %v10192_v55 = vld [vmem:[#allocation2 + $0x129] sm:$0xff]  ;;  %38609 = vst [vmem:[#allocation134_spill] sm:$0xff] %v32352_v9  ;;  %v38612_v6 = vand.u32 4294901760, %v32314_v45  ;;  %v10194_v37 = vld [vmem:[#allocation2 + $0x141] sm:$0xff] }
 0x35e   : > { %24985 = vmatmul.mubr.f32.gmra.mrb[40].mxu0 %v38603_v31  ;;  %38605 = vst [vmem:[#allocation31_spill] sm:$0xff] %v32341_v38  ;;  %38608 = vst [vmem:[#allocation40_spill] sm:$0xff] %v32350_v40  ;;  %v32362_v47 = vsub.f32 %v10262_v50, %v32341_v38  ;;  %v32371_v30 = vsub.f32 %v10265_v56, %v32350_v40  ;;  %v32375_v50 = vsub.f32 %v10268_v27, %v32352_v9  ;;  %v10196_v40 = vld [vmem:[#allocation2 + $0x159] sm:$0xff]  ;;  %v38626_v38 = vld [vmem:[#allocation30_spill] sm:$0xff] }
 0x35f   : > { %24987 = vmatprep.mubr.f32.mxu0 %v38606_v0  ;;  %38607 = vst [vmem:[#allocation34_spill] sm:$0xff] %v32348_v8  ;;  %v10511_v29 = vand.u32 4294901760, %v10510_v4  ;;  %38610 = vst [vmem:[#allocation135_spill] sm:$0xff] %v32354_v22  ;;  %v10520_v28 = vsub.f32 %v32314_v45, %v38612_v6  ;;  %v10530_v4 = vsub.f32 %v32324_v49, %v38615_v21  ;;  %v10277_v6 = vsel %vm2325_vm1, %v10193_v5, 0  ;;  %v38620_v21 = vld [vmem:[#allocation21_spill] sm:$0xff] }
 0x360   : > { %26028 = vmatmul.mubr.f32.gmra.mrb[12].mxu1 %v10481_v41  ;;  %38613 = vst [vmem:[#allocation41_spill] sm:$0xff] %v32362_v47  ;;  %v10274_v41 = vsel %vm2325_vm1, %v10192_v55, 0  ;;  %38617 = vst [vmem:[#allocation136_spill] sm:$0xff] %v32375_v50  ;;  %v32378_v55 = vsub.f32 %v10271_v59, %v32354_v22  ;;  %v38621_v56 = vand.u32 4294901760, %v32339_v7  ;;  %v32387_v5 = vand.u32 4294901760, %v10277_v6 }
 0x361   : > { %26030 = vmatprep.mubr.f32.mxu1 %v10491_v53  ;;  %v38614_v53 = vld [vmem:[#allocation20_spill] sm:$0xff]  ;;  %v32380_v45 = vand.u32 4294901760, %v10274_v41  ;;  %v10521_v33 = vand.u32 4294901760, %v10520_v28  ;;  %v10531_v27 = vand.u32 4294901760, %v10530_v4  ;;  %v38624_v59 = vand.u32 4294901760, %v32348_v8  ;;  %v10197_v4 = vld [vmem:[#allocation2 + $0x169] sm:$0xff] }
 0x362   : > { %24988 = vmatmul.mubr.f32.gmra.mrb[42].mxu0 %v38611_v58  ;;  %38616 = vst [vmem:[#allocation20_spill] sm:$0xff] %v32371_v30  ;;  %38618 = vst [vmem:[#allocation137_spill] sm:$0xff] %v32378_v55  ;;  %v10540_v49 = vsub.f32 %v32339_v7, %v38621_v56  ;;  %v10280_v9 = vsel %vm2325_vm1, %v10194_v37, 0  ;;  %v10283_v28 = vsel %vm2325_vm1, %v10195_v62, 0  ;;  %v38627_v22 = vand.u32 4294901760, %v32362_v47 }
 0x363   : > { %24990 = vmatprep.mubr.f32.mxu0 %v38614_v53  ;;  %38619 = vst [vmem:[#allocation138_spill] sm:$0xff] %v32380_v45  ;;  %38622 = vst [vmem:[#allocation21_spill] sm:$0xff] %v32387_v5  ;;  %v10550_v16 = vsub.f32 %v32348_v8, %v38624_v59  ;;  %v32399_v7 = vsub.f32 %v10274_v41, %v32380_v45  ;;  %v32408_v62 = vand.u32 4294901760, %v10280_v9  ;;  %v32414_v8 = vand.u32 4294901760, %v10283_v28 }
 0x364   : > { %26031 = vmatmul.mubr.f32.gmra.mrb[14].mxu1 %v10501_v63  ;;  %v10541_v59 = vand.u32 4294901760, %v10540_v49  ;;  %v10560_v37 = vsub.f32 %v32362_v47, %v38627_v22  ;;  %v38631_v63 = vand.u32 4294901760, %v32371_v30  ;;  %v10286_v49 = vsel %vm2325_vm1, %v10196_v40, 0  ;;  %v10198_v22 = vld [vmem:[#allocation2 + $0x171] sm:$0xff] }
 0x365   : > { %26033 = vmatprep.mubr.f32.mxu1 %v10511_v29  ;;  %v38623_v29 = vld [vmem:[#allocation27_spill] sm:$0xff]  ;;  %38629 = vst [vmem:[#allocation139_spill] sm:$0xff] %v32408_v62  ;;  %v10551_v56 = vand.u32 4294901760, %v10550_v16  ;;  %v10289_v45 = vsel %vm2325_vm1, %v10197_v4, 0  ;;  %v32428_v4 = vsub.f32 %v10280_v9, %v32408_v62  ;;  %v10292_v1 = vsel %vm2325_vm1, %v10198_v22, 0 }
 0x366   : > { %24991 = vmatmul.mubr.f32.gmra.mrb[44].mxu0 %v38620_v21  ;;  %38625 = vst [vmem:[#allocation27_spill] sm:$0xff] %v32399_v7  ;;  %v10570_v41 = vsub.f32 %v32371_v30, %v38631_v63  ;;  %v10199_v63 = vld [vmem:[#allocation2 + $0x181] sm:$0xff]  ;;  %v10561_v14 = vand.u32 4294901760, %v10560_v37  ;;  %v38641_v62 = vand.u32 4294901760, %v32399_v7  ;;  %v32451_v22 = vand.u32 4294901760, %v10292_v1 }
 0x367   : > { %24993 = vmatprep.mubr.f32.mxu0 %v38623_v29  ;;  %v38635_v30 = vld [vmem:[#allocation37_spill] sm:$0xff]  ;;  %38636 = vst [vmem:[#allocation140_spill] sm:$0xff] %v32428_v4  ;;  %v10295_v37 = vsel %vm2325_vm1, %v10199_v63, 0  ;;  %v38646_v63 = vld [vmem:[#allocation47_spill] sm:$0xff] }
 0x368   : > { %26034 = vmatmul.mubr.f32.gmra.mrb[16].mxu1 %v10521_v33  ;;  %v32406_v33 = vsub.f32 %v10277_v6, %v32387_v5  ;;  %v38633_v6 = vand.u32 4294901760, %v32375_v50  ;;  %v38634_v5 = vand.u32 4294901760, %v32378_v55  ;;  %38645 = vst [vmem:[#allocation144_spill] sm:$0xff] %v32451_v22 }
 0x369   : > { %26036 = vmatprep.mubr.f32.mxu1 %v10531_v27  ;;  %v38630_v27 = vld [vmem:[#allocation36_spill] sm:$0xff] }
 0x36a   : > { %24994 = vmatmul.mubr.f32.gmra.mrb[46].mxu0 %v38626_v38  ;;  %38628 = vst [vmem:[#allocation30_spill] sm:$0xff] %v32406_v33  ;;  %38632 = vst [vmem:[#allocation36_spill] sm:$0xff] %v32414_v8  ;;  %v10580_v47 = vsub.f32 %v32375_v50, %v38633_v6  ;;  %v10590_v16 = vsub.f32 %v32378_v55, %v38634_v5  ;;  %v10571_v6 = vand.u32 4294901760, %v10570_v41  ;;  %v32436_v5 = vand.u32 4294901760, %v10289_v45  ;;  %v10200_v55 = vld [vmem:[#allocation2 + $0x189] sm:$0xff] }
 0x36b   : > { %24996 = vmatprep.mubr.f32.mxu0 %v38630_v27  ;;  %v32434_v50 = vsub.f32 %v10283_v28, %v32414_v8  ;;  %v38643_v28 = vand.u32 4294901760, %v32406_v33  ;;  %v38649_v8 = vld [vmem:[#allocation48_spill] sm:$0xff] }
 0x36c   : > { %26037 = vmatmul.mubr.f32.gmra.mrb[18].mxu1 %v10541_v59  ;;  %v38638_v59 = vld [vmem:[#allocation43_spill] sm:$0xff]  ;;  %38640 = vst [vmem:[#allocation143_spill] sm:$0xff] %v32436_v5  ;;  %v10581_v40 = vand.u32 4294901760, %v10580_v47  ;;  %v10591_v9 = vand.u32 4294901760, %v10590_v16  ;;  %v32456_v16 = vsub.f32 %v10289_v45, %v32436_v5  ;;  %v32467_v47 = vsub.f32 %v10292_v1, %v32451_v22 }
 0x36d   : > { %26039 = vmatprep.mubr.f32.mxu1 %v10551_v56  ;;  %v32430_v56 = vand.u32 4294901760, %v10286_v49  ;;  %38639 = vst [vmem:[#allocation142_spill] sm:$0xff] %v32434_v50  ;;  %v10610_v41 = vsub.f32 %v32406_v33, %v38643_v28  ;;  %v38653_v5 = vld [vmem:[#allocation51_spill] sm:$0xff] }
 0x36e   : > { %24997 = vmatmul.mubr.f32.gmra.mrb[48].mxu0 %v38635_v30  ;;  %v10600_v30 = vsub.f32 %v32399_v7, %v38641_v62  ;;  %38647 = vst [vmem:[#allocation47_spill] sm:$0xff] %v32456_v16  ;;  %v32458_v62 = vand.u32 4294901760, %v10295_v37  ;;  %38651 = vst [vmem:[#allocation48_spill] sm:$0xff] %v32467_v47 }
 0x36f   : > { %38637 = vst [vmem:[#allocation141_spill] sm:$0xff] %v32430_v56  ;;  %24999 = vmatprep.mubr.f32.mxu0 %v38638_v59  ;;  %v38642_v59 = vld [vmem:[#allocation44_spill] sm:$0xff] }
 0x370   : > { %26040 = vmatmul.mubr.f32.gmra.mrb[20].mxu1 %v10561_v14  ;;  %v32449_v14 = vsub.f32 %v10286_v49, %v32430_v56  ;;  %38648 = vst [vmem:[#allocation145_spill] sm:$0xff] %v32458_v62  ;;  %v10601_v28 = vand.u32 4294901760, %v10600_v30  ;;  %v38650_v49 = vand.u32 4294901760, %v32428_v4  ;;  %v10611_v56 = vand.u32 4294901760, %v10610_v41 }
 0x371   : > { %26042 = vmatprep.mubr.f32.mxu1 %v10571_v6  ;;  %v10298_v6 = vsel %vm2325_vm1, %v10200_v55, 0  ;;  %v38654_v55 = vand.u32 4294901760, %v32434_v50  ;;  %v37435_v41 = vand.u32 4294901760, %v32467_v47 }
 0x372   : > { %25000 = vmatmul.mubr.f32.gmra.mrb[50].mxu0 %v38642_v59  ;;  %38644 = vst [vmem:[#allocation44_spill] sm:$0xff] %v32449_v14  ;;  %v10620_v33 = vsub.f32 %v32428_v4, %v38650_v49  ;;  %v37430_v7 = vand.u32 4294901760, %v32449_v14  ;;  %v32469_v45 = vand.u32 4294901760, %v10298_v6  ;;  %v38655_v49 = vld [vmem:[#allocation52_spill] sm:$0xff] }
 0x373   : > { %25002 = vmatprep.mubr.f32.mxu0 %v38646_v63  ;;  %v10630_v30 = vsub.f32 %v32434_v50, %v38654_v55  ;;  %v38656_v55 = vld [vmem:[#allocation55_spill] sm:$0xff] }
 0x374   : > { %26043 = vmatmul.mubr.f32.gmra.mrb[22].mxu1 %v10581_v40  ;;  %38652 = vst [vmem:[#allocation146_spill] sm:$0xff] %v32469_v45  ;;  %v10621_v1 = vand.u32 4294901760, %v10620_v33  ;;  %v10640_v4 = vsub.f32 %v32449_v14, %v37430_v7  ;;  %v32485_v22 = vsub.f32 %v10298_v6, %v32469_v45  ;;  %v38658_v33 = vld [vmem:[#allocation56_spill] sm:$0xff]  ;;  %v10660_v7 = vsub.f32 %v32467_v47, %v37435_v41  ;;  %v38659_v14 = vld [vmem:[#allocation59_spill] sm:$0xff] }
 0x375   : > { %26045 = vmatprep.mubr.f32.mxu1 %v10591_v9  ;;  %v32477_v9 = vsub.f32 %v10295_v37, %v32458_v62  ;;  %v10631_v40 = vand.u32 4294901760, %v10630_v30  ;;  %v38657_v37 = vand.u32 4294901760, %v32456_v16  ;;  %v38662_v47 = vld [vmem:[#allocation63_spill] sm:$0xff]  ;;  %v38663_v45 = vld [vmem:[#allocation68_spill] sm:$0xff] }
 0x376   : > { %25003 = vmatmul.mubr.f32.gmra.mrb[52].mxu0 %v38649_v8  ;;  %v10641_v50 = vand.u32 4294901760, %v10640_v4  ;;  %v37440_v6 = vand.u32 4294901760, %v32485_v22 }
 0x377   : > { %25005 = vmatprep.mubr.f32.mxu0 %v38653_v5 }
 0x378   : > { %26046 = vmatmul.mubr.f32.gmra.mrb[24].mxu1 %v10601_v28  ;;  %v10650_v28 = vsub.f32 %v32456_v16, %v38657_v37  ;;  %v10680_v4 = vsub.f32 %v32485_v22, %v37440_v6  ;;  %v38661_v16 = vld [vmem:[#allocation64_spill] sm:$0xff]  ;;  %v38667_v6 = vand.u32 4294901760, %v32220_v32 }
 0x379   : > { %26048 = vmatprep.mubr.f32.mxu1 %v10611_v56  ;;  %v37443_v56 = vand.u32 4294901760, %v32477_v9 }
 0x37a   : > { %25006 = vmatmul.mubr.f32.gmra.mrb[54].mxu0 %v38655_v49  ;;  %v10651_v30 = vand.u32 4294901760, %v10650_v28  ;;  %v10681_v28 = vand.u32 4294901760, %v10680_v4 }
 0x37b   : > { %25008 = vmatprep.mubr.f32.mxu0 %v38656_v55  ;;  %v10670_v37 = vsub.f32 %v32477_v9, %v37443_v56 }
 0x37c   : > { %26049 = vmatmul.mubr.f32.gmra.mrb[26].mxu1 %v10621_v1  ;;  %v38660_v1 = vld [vmem:[#allocation60_spill] sm:$0xff] }
 0x37d   : > { %26051 = vmatprep.mubr.f32.mxu1 %v10631_v40  ;;  %v10661_v40 = vand.u32 4294901760, %v10660_v7  ;;  %v10671_v41 = vand.u32 4294901760, %v10670_v37  ;;  %v38665_v7 = vand.u32 4294901760, %v32215_v35  ;;  %v32518_v37 = vsub.f32 %v32220_v32, %v38667_v6  ;;  %v2417_v6 = vld [vmem:[#allocation2 + $0x20] sm:$0xff] }
 0x37e   : > { %25009 = vmatmul.mubr.f32.gmra.mrb[56].mxu0 %v38658_v33 }
 0x37f   : > { %25011 = vmatprep.mubr.f32.mxu0 %v38659_v14  ;;  %38668 = vst [vmem:[#allocation52_spill] sm:$0xff] %v32518_v37 }
 0x380   : > { %26052 = vmatmul.mubr.f32.gmra.mrb[28].mxu1 %v10641_v50  ;;  %v38664_v50 = vld [vmem:[#allocation67_spill] sm:$0xff] }
 0x381   : > { %26054 = vmatprep.mubr.f32.mxu1 %v10651_v30  ;;  %v32513_v30 = vsub.f32 %v32215_v35, %v38665_v7 }
 0x382   : > { %25012 = vmatmul.mubr.f32.gmra.mrb[58].mxu0 %v38660_v1 }
 0x383   : > { %25014 = vmatprep.mubr.f32.mxu0 %v38661_v16  ;;  %38666 = vst [vmem:[#allocation51_spill] sm:$0xff] %v32513_v30 }
 0x384   : > { %26055 = vmatmul.mubr.f32.gmra.mrb[30].mxu1 %v10661_v40  ;;  %v37441_v40 = vand.u32 4294901760, %v32518_v37 }
 0x385   : > { %26057 = vmatprep.mubr.f32.mxu1 %v10671_v41  ;;  %v37442_v41 = vand.u32 4294901760, %v32513_v30 }
 0x386   : > { %25015 = vmatmul.mubr.f32.gmra.mrb[60].mxu0 %v38662_v47  ;;  %v4865_v32 = vsub.f32 %v32518_v37, %v37441_v40 }
 0x387   : > { %25017 = vmatprep.mubr.f32.mxu0 %v38663_v45  ;;  %v4858_v35 = vsub.f32 %v32513_v30, %v37442_v41  ;;  %v38693_v41 = vld [vmem:[#allocation144_spill] sm:$0xff] }
 0x388   : > { %26058 = vmatmul.mubr.f32.gmra.mrb[0].mxu1 %v10681_v28  ;;  %v2418_v28 = vld [vmem:[#allocation2 + $0x30] sm:$0xff] }
 0x389   : > { %26064 = vmatprep.mubr.f32.mxu1 %v32107_v20 }
 0x38a   : > { %25018 = vmatmul.mubr.f32.gmra.mrb[62].mxu0 %v38664_v50 }
 0x38b   : > { %25024 = vmatprep.mubr.f32.mxu0 %v38566_v25  ;;  %v4859_v25 = vand.u32 4294901760, %v4858_v35  ;;  %v4381_v35 = vsel %vm2325_vm1, %v2417_v6, 0 }
 0x38c   : > { %26065 = vmatmul.mubr.f32.vlgmr.msra.gmra.mrb[2].mxu1 %v32115_v42 }
 0x38d   : > { %26067 = vmatprep.mubr.f32.mxu1 %v32123_v13  ;;  %28083 = vmatpush3.bf16.msra.mxu1 %v32037_v12  ;;  %v4866_v12 = vand.u32 4294901760, %v4865_v32  ;;  %v38684_v32 = vld [vmem:[#allocation36_spill] sm:$0xff]  ;;  %v38749_v13 = vld [vmem:[#allocation53_spill] sm:$0xff] }
 0x38e   : > { %25025 = vmatmul.mubr.f32.vlgmr.msra.gmra.mrb[32].mxu0 %v38571_v19  ;;  %28085 = vmatprep.subr.bf16.mxu1 %v31940_v34 }
 0x38f   : > { %25027 = vmatprep.mubr.f32.mxu0 %v38574_v60  ;;  %28003 = vmatpush3.bf16.msra.mxu0 %v32243_v46  ;;  %v32539_v19 = vpack.c.bf16 %v4866_v12, %v4859_v25  ;;  %v38673_v60 = vld [vmem:[#allocation31_spill] sm:$0xff]  ;;  %v4384_v25 = vsel %vm2325_vm1, %v2418_v28, 0  ;;  %v2419_v12 = vld [vmem:[#allocation2 + $0x38] sm:$0xff] }
 0x390   : > { %26068 = vmatmul.mubr.f32.gmra.mrb[4].mxu1 %v32128_v26  ;;  %v2436_v26 = vld [vmem:[#allocation2 + $0x108] sm:$0xff] }
 0x391   : > { %26070 = vmatprep.mubr.f32.mxu1 %v32145_v44  ;;  %28005 = vmatprep.subr.bf16.mxu0 %v32539_v19  ;;  %v38744_v44 = vld [vmem:[#allocation49_spill] sm:$0xff] }
 0x392   : > { %25028 = vmatmul.mubr.f32.gmra.mrb[34].mxu0 %v38580_v3  ;;  %v38671_v3 = vld [vmem:[#allocation37_spill] sm:$0xff] }
 0x393   : > { %25030 = vmatprep.mubr.f32.mxu0 %v38582_v11  ;;  %v38674_v11 = vld [vmem:[#allocation40_spill] sm:$0xff] }
 0x394   : > { %26071 = vmatmul.mubr.f32.gmra.mrb[6].mxu1 %v32153_v23 }
 0x395   : > { %26073 = vmatprep.mubr.f32.mxu1 %v32155_v52  ;;  %v38734_v52 = vld [vmem:[#allocation45_spill] sm:$0xff] }
 0x396   : > { %25031 = vmatmul.mubr.f32.gmra.mrb[36].mxu0 %v38588_v54  ;;  %v2414_v54 = vld [vmem:[#allocation2] sm:$0xff] }
 0x397   : > { %25033 = vmatprep.mubr.f32.mxu0 %v38591_v18  ;;  %v38670_v18 = vld [vmem:[#allocation23_spill] sm:$0xff] }
 0x398   : > { %26074 = vmatmul.mubr.f32.gmra.mrb[8].mxu1 %v32182_v2 }
 0x399   : > { %26076 = vmatprep.mubr.f32.mxu1 %v32192_v17 }
 0x39a   : > { %25034 = vmatmul.mubr.f32.gmra.mrb[38].mxu0 %v38595_v15  ;;  %v38669_v15 = vld [vmem:[#allocation18_spill] sm:$0xff] }
 0x39b   : > { %25036 = vmatprep.mubr.f32.mxu0 %v38597_v51  ;;  %v38675_v51 = vld [vmem:[#allocation134_spill] sm:$0xff] }
 0x39c   : > { %26077 = vmatmul.mubr.f32.gmra.mrb[10].mxu1 %v32207_v43  ;;  %v38726_v43 = vld [vmem:[#allocation32_spill] sm:$0xff] }
 0x39d   : > { %26079 = vmatprep.mubr.f32.mxu1 %v32209_v61 }
 0x39e   : > { %25037 = vmatmul.mubr.f32.gmra.mrb[40].mxu0 %v38603_v31  ;;  %v38672_v31 = vld [vmem:[#allocation43_spill] sm:$0xff] }
 0x39f   : > { %25039 = vmatprep.mubr.f32.mxu0 %v38606_v0  ;;  %v2415_v0 = vld [vmem:[#allocation2 + $0x8] sm:$0xff] }
 0x3a0   : > { %26080 = vmatmul.mubr.f32.gmra.mrb[12].mxu1 %v32237_v39 }
 0x3a1   : > { %26082 = vmatprep.mubr.f32.mxu1 %v32260_v57  ;;  %v2429_v57 = vld [vmem:[#allocation2 + $0xb0] sm:$0xff] }
 0x3a2   : > { %25040 = vmatmul.mubr.f32.gmra.mrb[42].mxu0 %v38611_v58  ;;  %v38676_v58 = vld [vmem:[#allocation135_spill] sm:$0xff] }
 0x3a3   : > { %25042 = vmatprep.mubr.f32.mxu0 %v38614_v53  ;;  %v2416_v53 = vld [vmem:[#allocation2 + $0x18] sm:$0xff] }
 0x3a4   : > { %26083 = vmatmul.mubr.f32.gmra.mrb[14].mxu1 %v32267_v10 }
 0x3a5   : > { %26085 = vmatprep.mubr.f32.mxu1 %v32269_v48 }
 0x3a6   : > { %25043 = vmatmul.mubr.f32.gmra.mrb[44].mxu0 %v38620_v21 }
 0x3a7   : > { %25045 = vmatprep.mubr.f32.mxu0 %v38623_v29  ;;  %v4375_v29 = vsel %vm2325_vm1, %v2415_v0, 0  ;;  %v32611_v0 = vand.u32 4294901760, %v4384_v25 }
 0x3a8   : > { %26086 = vmatmul.mubr.f32.gmra.mrb[16].mxu1 %v32293_v24  ;;  %v32587_v4 = vand.u32 4294901760, %v4375_v29 }
 0x3a9   : > { %26088 = vmatprep.mubr.f32.mxu1 %v32304_v36  ;;  %38689 = vst [vmem:[#allocation67_spill] sm:$0xff] %v32611_v0  ;;  %v32630_v56 = vsub.f32 %v4384_v25, %v32611_v0  ;;  %v2425_v25 = vld [vmem:[#allocation2 + $0x80] sm:$0xff] }
 0x3aa   : > { %25046 = vmatmul.mubr.f32.gmra.mrb[46].mxu0 %v38626_v38  ;;  %v4372_v38 = vsel %vm2325_vm1, %v2414_v54, 0  ;;  %38680 = vst [vmem:[#allocation56_spill] sm:$0xff] %v32587_v4  ;;  %v38687_v54 = vld [vmem:[#allocation141_spill] sm:$0xff] }
 0x3ab   : > { %25048 = vmatprep.mubr.f32.mxu0 %v38630_v27  ;;  %v32580_v21 = vand.u32 4294901760, %v4372_v38  ;;  %v38678_v27 = vld [vmem:[#allocation138_spill] sm:$0xff]  ;;  %38694 = vst [vmem:[#allocation147_spill] sm:$0xff] %v32630_v56 }
 0x3ac   : > { %26089 = vmatmul.mubr.f32.gmra.mrb[18].mxu1 %v38669_v15  ;;  %v2428_v15 = vld [vmem:[#allocation2 + $0xa8] sm:$0xff] }
 0x3ad   : > { %26091 = vmatprep.mubr.f32.mxu1 %v38670_v18  ;;  %38677 = vst [vmem:[#allocation55_spill] sm:$0xff] %v32580_v21  ;;  %v2427_v18 = vld [vmem:[#allocation2 + $0x98] sm:$0xff] }
 0x3ae   : > { %25049 = vmatmul.mubr.f32.gmra.mrb[48].mxu0 %v38671_v3  ;;  %v32605_v3 = vand.u32 4294901760, %v4381_v35 }
 0x3af   : > { %25051 = vmatprep.mubr.f32.mxu0 %v38672_v31  ;;  %v2420_v31 = vld [vmem:[#allocation2 + $0x48] sm:$0xff] }
 0x3b0   : > { %26092 = vmatmul.mubr.f32.gmra.mrb[20].mxu1 %v38673_v60  ;;  %38686 = vst [vmem:[#allocation63_spill] sm:$0xff] %v32605_v3  ;;  %v4390_v6 = vsel %vm2325_vm1, %v2420_v31, 0  ;;  %v32623_v28 = vsub.f32 %v4381_v35, %v32605_v3  ;;  %v38712_v60 = vld [vmem:[#allocation35_spill] sm:$0xff] }
 0x3b1   : > { %26094 = vmatprep.mubr.f32.mxu1 %v38674_v11 }
 0x3b2   : > { %25052 = vmatmul.mubr.f32.gmra.mrb[50].mxu0 %v38642_v59  ;;  %v38679_v59 = vld [vmem:[#allocation21_spill] sm:$0xff]  ;;  %38691 = vst [vmem:[#allocation37_spill] sm:$0xff] %v32623_v28 }
 0x3b3   : > { %25054 = vmatprep.mubr.f32.mxu0 %v38646_v63  ;;  %v4378_v63 = vsel %vm2325_vm1, %v2416_v53, 0  ;;  %v4387_v53 = vsel %vm2325_vm1, %v2419_v12, 0  ;;  %v2422_v12 = vld [vmem:[#allocation2 + $0x60] sm:$0xff] }
 0x3b4   : > { %26095 = vmatmul.mubr.f32.gmra.mrb[22].mxu1 %v38675_v51  ;;  %v32594_v7 = vand.u32 4294901760, %v4378_v63  ;;  %v32625_v40 = vand.u32 4294901760, %v4387_v53 }
 0x3b5   : > { %26097 = vmatprep.mubr.f32.mxu1 %v38676_v58  ;;  %v38705_v58 = vld [vmem:[#allocation3_spill] sm:$0xff] }
 0x3b6   : > { %25055 = vmatmul.mubr.f32.gmra.mrb[52].mxu0 %v38649_v8  ;;  %v32591_v8 = vsub.f32 %v4372_v38, %v32580_v21  ;;  %38683 = vst [vmem:[#allocation60_spill] sm:$0xff] %v32594_v7  ;;  %v32609_v38 = vsub.f32 %v4378_v63, %v32594_v7  ;;  %38692 = vst [vmem:[#allocation43_spill] sm:$0xff] %v32625_v40 }
 0x3b7   : > { %25057 = vmatprep.mubr.f32.mxu0 %v38653_v5  ;;  %v38682_v5 = vld [vmem:[#allocation139_spill] sm:$0xff] }
 0x3b8   : > { %26098 = vmatmul.mubr.f32.gmra.mrb[24].mxu1 %v38678_v27  ;;  %38681 = vst [vmem:[#allocation59_spill] sm:$0xff] %v32591_v8  ;;  %38688 = vst [vmem:[#allocation68_spill] sm:$0xff] %v32609_v38  ;;  %v38703_v27 = vld [vmem:[#allocation10_spill] sm:$0xff] }
 0x3b9   : > { %26100 = vmatprep.mubr.f32.mxu1 %v38679_v59  ;;  %v2426_v59 = vld [vmem:[#allocation2 + $0x90] sm:$0xff] }
 0x3ba   : > { %25058 = vmatmul.mubr.f32.gmra.mrb[54].mxu0 %v38655_v49  ;;  %v32601_v49 = vsub.f32 %v4375_v29, %v32587_v4  ;;  %v2421_v29 = vld [vmem:[#allocation2 + $0x50] sm:$0xff] }
 0x3bb   : > { %25060 = vmatprep.mubr.f32.mxu0 %v38656_v55  ;;  %v37444_v55 = vand.u32 4294901760, %v32591_v8  ;;  %v4393_v31 = vsel %vm2325_vm1, %v2421_v29, 0  ;;  %v32644_v29 = vsub.f32 %v4387_v53, %v32625_v40 }
 0x3bc   : > { %26101 = vmatmul.mubr.f32.gmra.mrb[26].mxu1 %v38682_v5  ;;  %38685 = vst [vmem:[#allocation64_spill] sm:$0xff] %v32601_v49 }
 0x3bd   : > { %26103 = vmatprep.mubr.f32.mxu1 %v38684_v32  ;;  %v4537_v63 = vsub.f32 %v32591_v8, %v37444_v55  ;;  %v4396_v55 = vsel %vm2325_vm1, %v2422_v12, 0  ;;  %38696 = vst [vmem:[#allocation149_spill] sm:$0xff] %v32644_v29  ;;  %v38700_v32 = vld [vmem:[#allocation22_spill] sm:$0xff]  ;;  %v38706_v12 = vand.u32 4294901760, %v38705_v58  ;;  %v38710_v58 = vand.u32 4294901760, %v32630_v56 }
 0x3be   : > { %25061 = vmatmul.mubr.f32.gmra.mrb[56].mxu0 %v38658_v33  ;;  %v38690_v33 = vld [vmem:[#allocation143_spill] sm:$0xff] }
 0x3bf   : > { %25063 = vmatprep.mubr.f32.mxu0 %v38659_v14  ;;  %v37447_v14 = vand.u32 4294901760, %v32601_v49 }
 0x3c0   : > { %26104 = vmatmul.mubr.f32.gmra.mrb[28].mxu1 %v38687_v54  ;;  %v38698_v54 = vld [vmem:[#allocation146_spill] sm:$0xff] }
 0x3c1   : > { %26106 = vmatprep.mubr.f32.mxu1 %v38690_v33  ;;  %v4547_v35 = vsub.f32 %v32601_v49, %v37447_v14  ;;  %v2424_v33 = vld [vmem:[#allocation2 + $0x78] sm:$0xff] }
 0x3c2   : > { %25064 = vmatmul.mubr.f32.gmra.mrb[58].mxu0 %v38660_v1  ;;  %v4538_v1 = vand.u32 4294901760, %v4537_v63  ;;  %v32657_v63 = vand.u32 4294901760, %v4396_v55 }
 0x3c3   : > { %25066 = vmatprep.mubr.f32.mxu0 %v38661_v16  ;;  %v32634_v16 = vand.u32 4294901760, %v4390_v6  ;;  %v4548_v5 = vand.u32 4294901760, %v4547_v35  ;;  %v38709_v35 = vld [vmem:[#allocation29_spill] sm:$0xff] }
 0x3c4   : > { %26107 = vmatmul.mubr.f32.gmra.mrb[30].mxu1 %v38693_v41  ;;  %v2423_v41 = vld [vmem:[#allocation2 + $0x68] sm:$0xff]  ;;  %38702 = vst [vmem:[#allocation151_spill] sm:$0xff] %v32657_v63 }
 0x3c5   : > { %26109 = vmatprep.mubr.f32.mxu1 %v32458_v62  ;;  %38695 = vst [vmem:[#allocation148_spill] sm:$0xff] %v32634_v16  ;;  %v32646_v62 = vand.u32 4294901760, %v4393_v31  ;;  %v4399_v53 = vsel %vm2325_vm1, %v2423_v41, 0  ;;  %v38707_v41 = vand.u32 4294901760, %v32623_v28 }
 0x3c6   : > { %25067 = vmatmul.mubr.f32.gmra.mrb[60].mxu0 %v38662_v47  ;;  %v38699_v47 = vand.u32 4294901760, %v32609_v38 }
 0x3c7   : > { %25069 = vmatprep.mubr.f32.mxu0 %v38663_v45  ;;  %38697 = vst [vmem:[#allocation150_spill] sm:$0xff] %v32646_v62  ;;  %v32655_v45 = vsub.f32 %v4390_v6, %v32634_v16  ;;  %v32670_v6 = vpack.c.bf16 %v32518_v37, %v32513_v30  ;;  %v4567_v11 = vsub.f32 %v32623_v28, %v38707_v41 }
 0x3c8   : > { %26110 = vmatmul.mubr.f32.gmra.mrb[0].mxu1 %v38698_v54  ;;  %v4557_v14 = vsub.f32 %v32609_v38, %v38699_v47  ;;  %v4402_v54 = vsel %vm2325_vm1, %v2424_v33, 0  ;;  %v38704_v47 = vand.u32 4294901760, %v38703_v27  ;;  %v32677_v33 = vsub.f32 %v4393_v31, %v32646_v62 }
 0x3c9   : > { %26116 = vmatprep.mubr.f32.mxu1 %v38700_v32  ;;  %38701 = vst [vmem:[#allocation22_spill] sm:$0xff] %v32655_v45  ;;  %v32690_v31 = vsub.f32 %v4396_v55, %v32657_v63  ;;  %v38717_v55 = vld [vmem:[#allocation4_spill] sm:$0xff]  ;;  %v38721_v48 = vand.u32 4294901760, %v32655_v45 }
 0x3ca   : > { %25070 = vmatmul.mubr.f32.gmra.mrb[62].mxu0 %v38664_v50  ;;  %v32666_v51 = vpack.c.bf16 %v38706_v12, %v38704_v47  ;;  %38708 = vst [vmem:[#allocation10_spill] sm:$0xff] %v32677_v33  ;;  %v4558_v27 = vand.u32 4294901760, %v4557_v14  ;;  %v4577_v12 = vsub.f32 %v32630_v56, %v38710_v58  ;;  %v32683_v47 = vand.u32 4294901760, %v4399_v53  ;;  %v2433_v56 = vld [vmem:[#allocation2 + $0xe0] sm:$0xff] }
 0x3cb   : > { %25076 = vmatprep.mubr.f32.mxu0 %v4538_v1  ;;  %v4405_v1 = vsel %vm2325_vm1, %v2425_v25, 0  ;;  %38713 = vst [vmem:[#allocation29_spill] sm:$0xff] %v32690_v31  ;;  %v32692_v50 = vand.u32 4294901760, %v4402_v54  ;;  %v4408_v14 = vsel %vm2325_vm1, %v2426_v59, 0  ;;  %v4568_v25 = vand.u32 4294901760, %v4567_v11 }
 0x3cc   : > { %26117 = vmatmul.mubr.f32.vlgmr.msra.gmra.mrb[2].mxu1 %v38709_v35  ;;  %38711 = vst [vmem:[#allocation3_spill] sm:$0xff] %v32683_v47  ;;  %v38715_v58 = vand.u32 4294901760, %v32644_v29  ;;  %v32700_v24 = vand.u32 4294901760, %v4405_v1  ;;  %v32705_v59 = vsub.f32 %v4399_v53, %v32683_v47  ;;  %v4414_v11 = vsel %vm2325_vm1, %v2428_v15, 0 }
 0x3cd   : > { %26119 = vmatprep.mubr.f32.mxu1 %v38712_v60  ;;  %28087 = vmatpush3.bf16.msra.mxu1 %v31940_v34  ;;  %38714 = vst [vmem:[#allocation35_spill] sm:$0xff] %v32692_v50  ;;  %v4578_v41 = vand.u32 4294901760, %v4577_v12  ;;  %v32718_v53 = vsub.f32 %v4402_v54, %v32692_v50  ;;  %v32725_v61 = vand.u32 4294901760, %v4414_v11  ;;  %v2430_v12 = vld [vmem:[#allocation2 + $0xc0] sm:$0xff]  ;;  %v38730_v17 = vand.u32 4294901760, %v32690_v31 }
 0x3ce   : > { %25077 = vmatmul.mubr.f32.vlgmr.msra.gmra.mrb[32].mxu0 %v4548_v5  ;;  %28089 = vmatprep.subr.bf16.mxu1 %v32666_v51  ;;  %v4587_v36 = vsub.f32 %v32644_v29, %v38715_v58  ;;  %38716 = vst [vmem:[#allocation152_spill] sm:$0xff] %v32700_v24  ;;  %38718 = vst [vmem:[#allocation4_spill] sm:$0xff] %v32705_v59  ;;  %v32707_v5 = vand.u32 4294901760, %v4408_v14  ;;  %v38720_v58 = vld [vmem:[#allocation26_spill] sm:$0xff]  ;;  %v32721_v15 = vsub.f32 %v4405_v1, %v32700_v24  ;;  %v38729_v1 = vld [vmem:[#allocation33_spill] sm:$0xff] }
 0x3cf   : > { %25079 = vmatprep.mubr.f32.mxu0 %v4558_v27  ;;  %28007 = vmatpush3.bf16.msra.mxu0 %v32539_v19  ;;  %v4411_v27 = vsel %vm2325_vm1, %v2427_v18, 0  ;;  %v4597_v19 = vsub.f32 %v32655_v45, %v38721_v48  ;;  %38722 = vst [vmem:[#allocation26_spill] sm:$0xff] %v32718_v53  ;;  %38725 = vst [vmem:[#allocation156_spill] sm:$0xff] %v32725_v61  ;;  %v38727_v48 = vand.u32 4294901760, %v32677_v33  ;;  %v4420_v29 = vsel %vm2325_vm1, %v2430_v12, 0  ;;  %v38736_v45 = vld [vmem:[#allocation66_spill] sm:$0xff] }
 0x3d0   : > { %26120 = vmatmul.mubr.f32.gmra.mrb[4].mxu1 %v38717_v55  ;;  %38719 = vst [vmem:[#allocation153_spill] sm:$0xff] %v32707_v5  ;;  %28009 = vmatprep.subr.bf16.mxu0 %v32670_v6  ;;  %v4588_v18 = vand.u32 4294901760, %v4587_v36  ;;  %38723 = vst [vmem:[#allocation154_spill] sm:$0xff] %v32721_v15  ;;  %v32723_v39 = vand.u32 4294901760, %v4411_v27  ;;  %v4417_v36 = vsel %vm2325_vm1, %v2429_v57, 0  ;;  %v4617_v2 = vsub.f32 %v32690_v31, %v38730_v17 }
 0x3d1   : > { %26122 = vmatprep.mubr.f32.mxu1 %v38720_v58  ;;  %v4607_v10 = vsub.f32 %v32677_v33, %v38727_v48  ;;  %v2431_v48 = vld [vmem:[#allocation2 + $0xc8] sm:$0xff]  ;;  %v32747_v57 = vsub.f32 %v4414_v11, %v32725_v61  ;;  %v2432_v33 = vld [vmem:[#allocation2 + $0xd8] sm:$0xff]  ;;  %v32760_v31 = vand.u32 4294901760, %v4420_v29 }
 0x3d2   : > { %25080 = vmatmul.mubr.f32.gmra.mrb[34].mxu0 %v4568_v25  ;;  %38724 = vst [vmem:[#allocation155_spill] sm:$0xff] %v32723_v39  ;;  %v32733_v25 = vsub.f32 %v4408_v14, %v32707_v5  ;;  %v32744_v14 = vsub.f32 %v4411_v27, %v32723_v39  ;;  %v4618_v54 = vand.u32 4294901760, %v4617_v2  ;;  %v38737_v27 = vand.u32 4294901760, %v32718_v53 }
 0x3d3   : > { %25082 = vmatprep.mubr.f32.mxu0 %v4578_v41  ;;  %v4598_v41 = vand.u32 4294901760, %v4597_v19  ;;  %38732 = vst [vmem:[#allocation157_spill] sm:$0xff] %v32747_v57  ;;  %v32749_v19 = vand.u32 4294901760, %v4417_v36  ;;  %v4608_v17 = vand.u32 4294901760, %v4607_v10  ;;  %38738 = vst [vmem:[#allocation45_spill] sm:$0xff] %v32760_v31  ;;  %v4423_v23 = vsel %vm2325_vm1, %v2431_v48, 0 }
 0x3d4   : > { %26123 = vmatmul.mubr.f32.gmra.mrb[6].mxu1 %v38726_v43  ;;  %38728 = vst [vmem:[#allocation32_spill] sm:$0xff] %v32733_v25  ;;  %38731 = vst [vmem:[#allocation33_spill] sm:$0xff] %v32744_v14  ;;  %v4637_v11 = vsub.f32 %v32718_v53, %v38737_v27  ;;  %v4426_v10 = vsel %vm2325_vm1, %v2432_v33, 0  ;;  %v2434_v27 = vld [vmem:[#allocation2 + $0xf0] sm:$0xff]  ;;  %v38741_v53 = vld [vmem:[#allocation46_spill] sm:$0xff] }
 0x3d5   : > { %26125 = vmatprep.mubr.f32.mxu1 %v38729_v1  ;;  %38733 = vst [vmem:[#allocation158_spill] sm:$0xff] %v32749_v19  ;;  %v32770_v28 = vsub.f32 %v4417_v36, %v32749_v19  ;;  %v32782_v2 = vand.u32 4294901760, %v4426_v10  ;;  %v4429_v36 = vsel %vm2325_vm1, %v2433_v56, 0 }
 0x3d6   : > { %25083 = vmatmul.mubr.f32.gmra.mrb[36].mxu0 %v4588_v18  ;;  %v38735_v18 = vand.u32 4294901760, %v32705_v59 }
 0x3d7   : > { %25085 = vmatprep.mubr.f32.mxu0 %v4598_v41  ;;  %38740 = vst [vmem:[#allocation66_spill] sm:$0xff] %v32770_v28  ;;  %38746 = vst [vmem:[#allocation159_spill] sm:$0xff] %v32782_v2  ;;  %v38755_v30 = vand.u32 4294901760, %v32770_v28 }
 0x3d8   : > { %26126 = vmatmul.mubr.f32.gmra.mrb[8].mxu1 %v38734_v52  ;;  %v4627_v12 = vsub.f32 %v32705_v59, %v38735_v18  ;;  %v38739_v18 = vand.u32 4294901760, %v32721_v15  ;;  %v32780_v59 = vsub.f32 %v4420_v29, %v32760_v31  ;;  %v38772_v31 = vld [vmem:[#allocation25_spill] sm:$0xff] }
 0x3d9   : > { %26128 = vmatprep.mubr.f32.mxu1 %v38736_v45 }
 0x3da   : > { %25086 = vmatmul.mubr.f32.gmra.mrb[38].mxu0 %v4608_v17  ;;  %v4647_v41 = vsub.f32 %v32721_v15, %v38739_v18  ;;  %v4628_v48 = vand.u32 4294901760, %v4627_v12  ;;  %v38742_v17 = vand.u32 4294901760, %v32733_v25  ;;  %v4638_v18 = vand.u32 4294901760, %v4637_v11  ;;  %38745 = vst [vmem:[#allocation49_spill] sm:$0xff] %v32780_v59  ;;  %v2435_v15 = vld [vmem:[#allocation2 + $0xf8] sm:$0xff] }
 0x3db   : > { %25088 = vmatprep.mubr.f32.mxu0 %v4618_v54  ;;  %v32776_v54 = vand.u32 4294901760, %v4423_v23  ;;  %v4432_v12 = vsel %vm2325_vm1, %v2434_v27, 0  ;;  %v38748_v11 = vand.u32 4294901760, %v32747_v57  ;;  %v4435_v27 = vsel %vm2325_vm1, %v2435_v15, 0 }
 0x3dc   : > { %26129 = vmatmul.mubr.f32.gmra.mrb[10].mxu1 %v38741_v53  ;;  %v4657_v33 = vsub.f32 %v32733_v25, %v38742_v17  ;;  %v4648_v38 = vand.u32 4294901760, %v4647_v41  ;;  %v38747_v17 = vand.u32 4294901760, %v32744_v14  ;;  %v4438_v41 = vsel %vm2325_vm1, %v2436_v26, 0 }
 0x3dd   : > { %38743 = vst [vmem:[#allocation46_spill] sm:$0xff] %v32776_v54  ;;  %26131 = vmatprep.mubr.f32.mxu1 %v38744_v44  ;;  %v4677_v29 = vsub.f32 %v32747_v57, %v38748_v11  ;;  %v32795_v56 = vsub.f32 %v4423_v23, %v32776_v54  ;;  %v32804_v11 = vsub.f32 %v4426_v10, %v32782_v2  ;;  %v32806_v49 = vand.u32 4294901760, %v4432_v12  ;;  %v2437_v57 = vld [vmem:[#allocation2 + $0x110] sm:$0xff]  ;;  %v2438_v23 = vld [vmem:[#allocation2 + $0x120] sm:$0xff]  ;;  %v2439_v10 = vld [vmem:[#allocation2 + $0x128] sm:$0xff] }
 0x3de   : > { %25089 = vmatmul.mubr.f32.gmra.mrb[40].mxu0 %v4628_v48  ;;  %v4667_v25 = vsub.f32 %v32744_v14, %v38747_v17  ;;  %v32797_v48 = vand.u32 4294901760, %v4429_v36  ;;  %v4658_v17 = vand.u32 4294901760, %v4657_v33  ;;  %v4687_v15 = vsub.f32 %v32770_v28, %v38755_v30  ;;  %v38758_v33 = vld [vmem:[#allocation65_spill] sm:$0xff]  ;;  %v2440_v2 = vld [vmem:[#allocation2 + $0x138] sm:$0xff] }
 0x3df   : > { %25091 = vmatprep.mubr.f32.mxu0 %v4638_v18  ;;  %38750 = vst [vmem:[#allocation53_spill] sm:$0xff] %v32795_v56  ;;  %v38752_v18 = vld [vmem:[#allocation62_spill] sm:$0xff]  ;;  %38754 = vst [vmem:[#allocation161_spill] sm:$0xff] %v32806_v49  ;;  %v32811_v26 = vand.u32 4294901760, %v4435_v27  ;;  %v32813_v42 = vand.u32 4294901760, %v4438_v41  ;;  %v4678_v14 = vand.u32 4294901760, %v4677_v29  ;;  %v32827_v20 = vsub.f32 %v4432_v12, %v32806_v49 }
 0x3e0   : > { %26132 = vmatmul.mubr.f32.gmra.mrb[12].mxu1 %v38749_v13  ;;  %38751 = vst [vmem:[#allocation160_spill] sm:$0xff] %v32797_v48  ;;  %38753 = vst [vmem:[#allocation62_spill] sm:$0xff] %v32804_v11  ;;  %v4668_v37 = vand.u32 4294901760, %v4667_v25  ;;  %v32818_v8 = vsub.f32 %v4429_v36, %v32797_v48  ;;  %v38761_v25 = vand.u32 4294901760, %v32780_v59  ;;  %v4444_v29 = vsel %vm2325_vm1, %v2438_v23, 0  ;;  %v2441_v54 = vld [vmem:[#allocation2 + $0x140] sm:$0xff] }
 0x3e1   : > { %26134 = vmatprep.mubr.f32.mxu1 %v38752_v18  ;;  %38756 = vst [vmem:[#allocation162_spill] sm:$0xff] %v32811_v26  ;;  %38757 = vst [vmem:[#allocation163_spill] sm:$0xff] %v32813_v42  ;;  %v32831_v36 = vsub.f32 %v4435_v27, %v32811_v26  ;;  %v4688_v28 = vand.u32 4294901760, %v4687_v15  ;;  %v38767_v12 = vand.u32 4294901760, %v32795_v56  ;;  %v32843_v23 = vand.u32 4294901760, %v4444_v29 }
 0x3e2   : > { %25092 = vmatmul.mubr.f32.gmra.mrb[42].mxu0 %v4648_v38  ;;  %38759 = vst [vmem:[#allocation65_spill] sm:$0xff] %v32818_v8  ;;  %v4441_v38 = vsel %vm2325_vm1, %v2437_v57, 0  ;;  %v4697_v30 = vsub.f32 %v32780_v59, %v38761_v25  ;;  %v32834_v57 = vsub.f32 %v4438_v41, %v32813_v42  ;;  %v38766_v25 = vld [vmem:[#allocation14_spill] sm:$0xff]  ;;  %v38770_v41 = vand.u32 4294901760, %v32804_v11 }
 0x3e3   : > { %25094 = vmatprep.mubr.f32.mxu0 %v4658_v17  ;;  %v38760_v17 = vld [vmem:[#allocation8_spill] sm:$0xff]  ;;  %38763 = vst [vmem:[#allocation164_spill] sm:$0xff] %v32831_v36  ;;  %v32836_v48 = vand.u32 4294901760, %v4441_v38  ;;  %v4707_v59 = vsub.f32 %v32795_v56, %v38767_v12  ;;  %38768 = vst [vmem:[#allocation14_spill] sm:$0xff] %v32843_v23  ;;  %v4447_v49 = vsel %vm2325_vm1, %v2439_v10, 0  ;;  %v4450_v15 = vsel %vm2325_vm1, %v2440_v2, 0 }
 0x3e4   : > { %26135 = vmatmul.mubr.f32.gmra.mrb[14].mxu1 %v38758_v33  ;;  %38762 = vst [vmem:[#allocation8_spill] sm:$0xff] %v32827_v20  ;;  %38764 = vst [vmem:[#allocation165_spill] sm:$0xff] %v32834_v57  ;;  %v4698_v27 = vand.u32 4294901760, %v4697_v30  ;;  %v4717_v42 = vsub.f32 %v32804_v11, %v38770_v41  ;;  %v2442_v30 = vld [vmem:[#allocation2 + $0x150] sm:$0xff]  ;;  %v38773_v26 = vand.u32 4294901760, %v32818_v8  ;;  %v32864_v2 = vand.u32 4294901760, %v4447_v49 }
 0x3e5   : > { %26137 = vmatprep.mubr.f32.mxu1 %v38760_v17  ;;  %38765 = vst [vmem:[#allocation166_spill] sm:$0xff] %v32836_v48  ;;  %v32855_v56 = vsub.f32 %v4441_v38, %v32836_v48  ;;  %v4708_v41 = vand.u32 4294901760, %v4707_v59  ;;  %v32870_v11 = vand.u32 4294901760, %v4450_v15  ;;  %v4453_v59 = vsel %vm2325_vm1, %v2441_v54, 0 }
 0x3e6   : > { %25095 = vmatmul.mubr.f32.gmra.mrb[44].mxu0 %v4668_v37  ;;  %v4727_v10 = vsub.f32 %v32818_v8, %v38773_v26  ;;  %38775 = vst [vmem:[#allocation168_spill] sm:$0xff] %v32864_v2  ;;  %v4718_v12 = vand.u32 4294901760, %v4717_v42  ;;  %v38777_v37 = vand.u32 4294901760, %v32827_v20  ;;  %v4456_v48 = vsel %vm2325_vm1, %v2442_v30, 0  ;;  %v2443_v26 = vld [vmem:[#allocation2 + $0x158] sm:$0xff] }
 0x3e7   : > { %25097 = vmatprep.mubr.f32.mxu0 %v4678_v14  ;;  %v38769_v14 = vld [vmem:[#allocation17_spill] sm:$0xff]  ;;  %38778 = vst [vmem:[#allocation169_spill] sm:$0xff] %v32870_v11  ;;  %v32884_v30 = vsub.f32 %v4447_v49, %v32864_v2  ;;  %v38787_v2 = vand.u32 4294901760, %v32855_v56 }
 0x3e8   : > { %26138 = vmatmul.mubr.f32.gmra.mrb[16].mxu1 %v38766_v25  ;;  %38771 = vst [vmem:[#allocation17_spill] sm:$0xff] %v32855_v56  ;;  %v4737_v38 = vsub.f32 %v32827_v20, %v38777_v37  ;;  %v2444_v37 = vld [vmem:[#allocation2 + $0x168] sm:$0xff]  ;;  %v38781_v20 = vld [vmem:[#allocation41_spill] sm:$0xff] }
 0x3e9   : > { %26140 = vmatprep.mubr.f32.mxu1 %v38769_v14  ;;  %38782 = vst [vmem:[#allocation170_spill] sm:$0xff] %v32884_v30 }
 0x3ea   : > { %25098 = vmatmul.mubr.f32.gmra.mrb[46].mxu0 %v4688_v28  ;;  %v32862_v28 = vsub.f32 %v4444_v29, %v32843_v23  ;;  %v38779_v29 = vand.u32 4294901760, %v32831_v36  ;;  %v38780_v23 = vand.u32 4294901760, %v32834_v57 }
 0x3eb   : > { %25100 = vmatprep.mubr.f32.mxu0 %v4698_v27  ;;  %v38776_v27 = vld [vmem:[#allocation34_spill] sm:$0xff] }
 0x3ec   : > { %26141 = vmatmul.mubr.f32.gmra.mrb[18].mxu1 %v38772_v31  ;;  %38774 = vst [vmem:[#allocation167_spill] sm:$0xff] %v32862_v28  ;;  %v4747_v8 = vsub.f32 %v32831_v36, %v38779_v29  ;;  %v4757_v42 = vsub.f32 %v32834_v57, %v38780_v23  ;;  %v4728_v31 = vand.u32 4294901760, %v4727_v10  ;;  %v4738_v29 = vand.u32 4294901760, %v4737_v38  ;;  %v2445_v57 = vld [vmem:[#allocation2 + $0x170] sm:$0xff] }
 0x3ed   : > { %26143 = vmatprep.mubr.f32.mxu1 %v38776_v27  ;;  %v32890_v36 = vsub.f32 %v4450_v15, %v32870_v11  ;;  %v32892_v23 = vand.u32 4294901760, %v4456_v48  ;;  %v4459_v27 = vsel %vm2325_vm1, %v2443_v26, 0  ;;  %v4462_v10 = vsel %vm2325_vm1, %v2444_v37, 0  ;;  %v38792_v37 = vld [vmem:[#allocation137_spill] sm:$0xff]  ;;  %v38794_v11 = vld [vmem:[#allocation27_spill] sm:$0xff] }
 0x3ee   : > { %25101 = vmatmul.mubr.f32.gmra.mrb[48].mxu0 %v4708_v41  ;;  %v38784_v41 = vld [vmem:[#allocation20_spill] sm:$0xff]  ;;  %v4748_v54 = vand.u32 4294901760, %v4747_v8  ;;  %v4758_v49 = vand.u32 4294901760, %v4757_v42  ;;  %v38789_v15 = vand.u32 4294901760, %v32862_v28  ;;  %v32907_v26 = vand.u32 4294901760, %v4459_v27 }
 0x3ef   : > { %25103 = vmatprep.mubr.f32.mxu0 %v4718_v12  ;;  %v32886_v12 = vand.u32 4294901760, %v4453_v59  ;;  %38785 = vst [vmem:[#allocation172_spill] sm:$0xff] %v32890_v36  ;;  %38786 = vst [vmem:[#allocation173_spill] sm:$0xff] %v32892_v23  ;;  %v32912_v42 = vsub.f32 %v4456_v48, %v32892_v23  ;;  %v38798_v23 = vld [vmem:[#allocation30_spill] sm:$0xff] }
 0x3f0   : > { %26144 = vmatmul.mubr.f32.gmra.mrb[20].mxu1 %v38781_v20  ;;  %v4767_v20 = vsub.f32 %v32855_v56, %v38787_v2  ;;  %v4777_v38 = vsub.f32 %v32862_v28, %v38789_v15  ;;  %38791 = vst [vmem:[#allocation174_spill] sm:$0xff] %v32907_v26  ;;  %v32914_v2 = vand.u32 4294901760, %v4462_v10  ;;  %v32923_v8 = vsub.f32 %v4459_v27, %v32907_v26 }
 0x3f1   : > { %38783 = vst [vmem:[#allocation171_spill] sm:$0xff] %v32886_v12  ;;  %26146 = vmatprep.mubr.f32.mxu1 %v38784_v41  ;;  %v38788_v41 = vld [vmem:[#allocation136_spill] sm:$0xff] }
 0x3f2   : > { %25104 = vmatmul.mubr.f32.gmra.mrb[50].mxu0 %v4728_v31  ;;  %v32905_v31 = vsub.f32 %v4453_v59, %v32886_v12  ;;  %38793 = vst [vmem:[#allocation137_spill] sm:$0xff] %v32914_v2  ;;  %v4768_v15 = vand.u32 4294901760, %v4767_v20  ;;  %v38795_v59 = vand.u32 4294901760, %v32884_v30  ;;  %38796 = vst [vmem:[#allocation27_spill] sm:$0xff] %v32923_v8  ;;  %v4778_v12 = vand.u32 4294901760, %v4777_v38 }
 0x3f3   : > { %25106 = vmatprep.mubr.f32.mxu0 %v4738_v29  ;;  %v4465_v29 = vsel %vm2325_vm1, %v2445_v57, 0  ;;  %v38799_v57 = vand.u32 4294901760, %v32890_v36  ;;  %v37569_v38 = vand.u32 4294901760, %v32923_v8 }
 0x3f4   : > { %26147 = vmatmul.mubr.f32.gmra.mrb[22].mxu1 %v38788_v41  ;;  %38790 = vst [vmem:[#allocation136_spill] sm:$0xff] %v32905_v31  ;;  %v4787_v28 = vsub.f32 %v32884_v30, %v38795_v59  ;;  %v37566_v56 = vand.u32 4294901760, %v32905_v31  ;;  %v32925_v48 = vand.u32 4294901760, %v4465_v29  ;;  %v38800_v59 = vld [vmem:[#allocation140_spill] sm:$0xff] }
 0x3f5   : > { %26149 = vmatprep.mubr.f32.mxu1 %v38792_v37  ;;  %v4797_v20 = vsub.f32 %v32890_v36, %v38799_v57  ;;  %v38801_v57 = vld [vmem:[#allocation142_spill] sm:$0xff] }
 0x3f6   : > { %25107 = vmatmul.mubr.f32.gmra.mrb[52].mxu0 %v4748_v54  ;;  %38797 = vst [vmem:[#allocation175_spill] sm:$0xff] %v32925_v48  ;;  %v4788_v27 = vand.u32 4294901760, %v4787_v28  ;;  %v4807_v30 = vsub.f32 %v32905_v31, %v37566_v56  ;;  %v32941_v26 = vsub.f32 %v4465_v29, %v32925_v48  ;;  %v38803_v28 = vld [vmem:[#allocation44_spill] sm:$0xff]  ;;  %v4827_v56 = vsub.f32 %v32923_v8, %v37569_v38  ;;  %v38804_v31 = vld [vmem:[#allocation47_spill] sm:$0xff] }
 0x3f7   : > { %25109 = vmatprep.mubr.f32.mxu0 %v4758_v49  ;;  %v32933_v49 = vsub.f32 %v4462_v10, %v32914_v2  ;;  %v4798_v54 = vand.u32 4294901760, %v4797_v20  ;;  %v38802_v10 = vand.u32 4294901760, %v32912_v42  ;;  %v38806_v8 = vand.u32 4294901760, %v38700_v32 }
 0x3f8   : > { %26150 = vmatmul.mubr.f32.gmra.mrb[24].mxu1 %v38794_v11  ;;  %v4808_v36 = vand.u32 4294901760, %v4807_v30  ;;  %v37572_v29 = vand.u32 4294901760, %v32941_v26  ;;  %v38809_v32 = vand.u32 4294901760, %v38717_v55  ;;  %v38814_v55 = vand.u32 4294901760, %v38736_v45 }
 0x3f9   : > { %26152 = vmatprep.mubr.f32.mxu1 %v38798_v23  ;;  %v38818_v45 = vand.u32 4294901760, %v38752_v18  ;;  %v38823_v18 = vld [vmem:[#allocation45_spill] sm:$0xff] }
 0x3fa   : > { %25110 = vmatmul.mubr.f32.gmra.mrb[54].mxu0 %v4768_v15  ;;  %v4817_v15 = vsub.f32 %v32912_v42, %v38802_v10  ;;  %v4847_v30 = vsub.f32 %v32941_v26, %v37572_v29  ;;  %v38880_v29 = vld [vmem:[#allocation4_spill] sm:$0xff] }
 0x3fb   : > { %25112 = vmatprep.mubr.f32.mxu0 %v4778_v12  ;;  %v37573_v12 = vand.u32 4294901760, %v32933_v49 }
 0x3fc   : > { %26153 = vmatmul.mubr.f32.gmra.mrb[26].mxu1 %v38800_v59  ;;  %v4818_v20 = vand.u32 4294901760, %v4817_v15  ;;  %v4848_v15 = vand.u32 4294901760, %v4847_v30  ;;  %v38832_v30 = vld [vmem:[#allocation20_spill] sm:$0xff] }
 0x3fd   : > { %26155 = vmatprep.mubr.f32.mxu1 %v38801_v57  ;;  %v4837_v10 = vsub.f32 %v32933_v49, %v37573_v12  ;;  %v38881_v12 = vld [vmem:[#allocation26_spill] sm:$0xff] }
 0x3fe   : > { %25113 = vmatmul.mubr.f32.gmra.mrb[56].mxu0 %v4788_v27  ;;  %v38805_v27 = vld [vmem:[#allocation48_spill] sm:$0xff] }
 0x3ff   : > { %25115 = vmatprep.mubr.f32.mxu0 %v4798_v54  ;;  %v4828_v54 = vand.u32 4294901760, %v4827_v56  ;;  %v4838_v38 = vand.u32 4294901760, %v4837_v10  ;;  %v38807_v56 = vand.u32 4294901760, %v38709_v35  ;;  %v38810_v35 = vand.u32 4294901760, %v38720_v58  ;;  %v38829_v10 = vld [vmem:[#allocation159_spill] sm:$0xff] }
 0x400   : > { %26156 = vmatmul.mubr.f32.gmra.mrb[28].mxu1 %v38803_v28  ;;  %v38816_v58 = vand.u32 4294901760, %v38744_v44  ;;  %v38820_v44 = vand.u32 4294901760, %v38760_v17 }
 0x401   : > { %26158 = vmatprep.mubr.f32.mxu1 %v38804_v31 }
 0x402   : > { %25116 = vmatmul.mubr.f32.gmra.mrb[58].mxu0 %v4808_v36  ;;  %v38808_v36 = vand.u32 4294901760, %v38712_v60  ;;  %v38811_v60 = vand.u32 4294901760, %v38726_v43  ;;  %v38815_v43 = vand.u32 4294901760, %v38741_v53  ;;  %v38819_v53 = vand.u32 4294901760, %v38758_v33 }
 0x403   : > { %25118 = vmatprep.mubr.f32.mxu0 %v4818_v20  ;;  %v38828_v20 = vld [vmem:[#allocation46_spill] sm:$0xff] }
 0x404   : > { %26159 = vmatmul.mubr.f32.gmra.mrb[30].mxu1 %v38805_v27 }
 0x405   : > { %26161 = vmatprep.mubr.f32.mxu1 %v32477_v9 }
 0x406   : > { %25119 = vmatmul.mubr.f32.gmra.mrb[60].mxu0 %v4828_v54  ;;  %v38830_v54 = vld [vmem:[#allocation41_spill] sm:$0xff] }
 0x407   : > { %25121 = vmatprep.mubr.f32.mxu0 %v4838_v38  ;;  %v38826_v38 = vld [vmem:[#allocation34_spill] sm:$0xff] }
 0x408   : > { %26162 = vmatmul.mubr.f32.gmra.mrb[0].mxu1 %v32485_v22  ;;  %v38827_v17 = vand.u32 4294901760, %v38826_v38  ;;  %v38857_v38 = vld [vmem:[#allocation59_spill] sm:$0xff] }
 0x409   : > { %26168 = vmatprep.mubr.f32.mxu1 %v38806_v8  ;;  %v38824_v8 = vld [vmem:[#allocation25_spill] sm:$0xff] }
 0x40a   : > { %25122 = vmatmul.mubr.f32.gmra.mrb[62].mxu0 %v4848_v15  ;;  %v38825_v33 = vand.u32 4294901760, %v38824_v8  ;;  %v38834_v15 = vld [vmem:[#allocation160_spill] sm:$0xff]  ;;  %v38855_v8 = vand.u32 4294901760, %v32485_v22 }
 0x40b   : > { %25128 = vmatprep.mubr.f32.mxu0 %v32580_v21  ;;  %v38864_v22 = vld [vmem:[#allocation64_spill] sm:$0xff] }
 0x40c   : > { %26169 = vmatmul.mubr.f32.vlgmr.msra.gmra.mrb[2].mxu1 %v38807_v56  ;;  %v38835_v56 = vld [vmem:[#allocation161_spill] sm:$0xff]  ;;  %v38913_v21 = vld [vmem:[#allocation36_spill] sm:$0xff] }
 0x40d   : > { %26171 = vmatprep.mubr.f32.mxu1 %v38808_v36  ;;  %28091 = vmatpush3.bf16.msra.mxu1 %v32666_v51  ;;  %v38812_v51 = vand.u32 4294901760, %v38729_v1  ;;  %v38822_v1 = vand.u32 4294901760, %v38769_v14  ;;  %v38833_v14 = vand.u32 4294901760, %v38832_v30  ;;  %v38836_v36 = vand.u32 4294901760, %v38788_v41 }
 0x40e   : > { %25129 = vmatmul.mubr.f32.vlgmr.msra.gmra.mrb[32].mxu0 %v32587_v4  ;;  %28093 = vmatprep.subr.bf16.mxu1 %v31940_v34  ;;  %v38844_v41 = vand.u32 4294901760, %v38800_v59  ;;  %v33057_v59 = vld [vmem:[%s36912_s3 + $0x50] sm:$0xff] }
 0x40f   : > { %25131 = vmatprep.mubr.f32.mxu0 %v32594_v7  ;;  %28011 = vmatpush3.bf16.msra.mxu0 %v32670_v6  ;;  %v38813_v6 = vand.u32 4294901760, %v38734_v52  ;;  %v38817_v52 = vand.u32 4294901760, %v38749_v13  ;;  %v38821_v13 = vand.u32 4294901760, %v38766_v25  ;;  %v38831_v25 = vand.u32 4294901760, %v38830_v54  ;;  %v38911_v7 = vld [vmem:[#allocation167_spill] sm:$0xff] }
 0x410   : > { %26172 = vmatmul.mubr.f32.gmra.mrb[4].mxu1 %v38809_v32  ;;  %28013 = vmatprep.subr.bf16.mxu0 %v32243_v46  ;;  %v38837_v32 = vand.u32 4294901760, %v38792_v37  ;;  %v38845_v37 = vand.u32 4294901760, %v38801_v57  ;;  %v33062_v57 = vld [vmem:[%s36912_s3 + $0x58] sm:$0xff]  ;;  %v38912_v4 = vld [vmem:[#allocation139_spill] sm:$0xff] }
 0x411   : > { %26174 = vmatprep.mubr.f32.mxu1 %v38810_v35  ;;  %v38838_v35 = vld [vmem:[#allocation162_spill] sm:$0xff] }
 0x412   : > { %25132 = vmatmul.mubr.f32.gmra.mrb[34].mxu0 %v32605_v3 }
 0x413   : > { %25134 = vmatprep.mubr.f32.mxu0 %v32611_v0 }
 0x414   : > { %26175 = vmatmul.mubr.f32.gmra.mrb[6].mxu1 %v38811_v60  ;;  %v38839_v60 = vld [vmem:[#allocation163_spill] sm:$0xff] }
 0x415   : > { %26177 = vmatprep.mubr.f32.mxu1 %v38812_v51  ;;  %v38840_v51 = vand.u32 4294901760, %v38794_v11  ;;  %v38848_v11 = vand.u32 4294901760, %v38803_v28  ;;  %v38852_v28 = vand.u32 4294901760, %v38805_v27 }
 0x416   : > { %25135 = vmatmul.mubr.f32.gmra.mrb[36].mxu0 %v32625_v40  ;;  %v38908_v40 = vld [vmem:[#allocation17_spill] sm:$0xff] }
 0x417   : > { %25137 = vmatprep.mubr.f32.mxu0 %v32634_v16  ;;  %v38907_v16 = vld [vmem:[#allocation21_spill] sm:$0xff] }
 0x418   : > { %26178 = vmatmul.mubr.f32.gmra.mrb[8].mxu1 %v38813_v6  ;;  %v38841_v6 = vand.u32 4294901760, %v38798_v23  ;;  %v38849_v23 = vand.u32 4294901760, %v38804_v31  ;;  %v38853_v31 = vand.u32 4294901760, %v32477_v9  ;;  %v38858_v9 = vld [vmem:[#allocation15_spill] sm:$0xff] }
 0x419   : > { %26180 = vmatprep.mubr.f32.mxu1 %v38814_v55  ;;  %v38842_v55 = vld [vmem:[#allocation166_spill] sm:$0xff] }
 0x41a   : > { %25138 = vmatmul.mubr.f32.gmra.mrb[38].mxu0 %v32646_v62  ;;  %v38906_v62 = vld [vmem:[#allocation138_spill] sm:$0xff] }
 0x41b   : > { %25140 = vmatprep.mubr.f32.mxu0 %v32657_v63  ;;  %v38905_v63 = vld [vmem:[#allocation165_spill] sm:$0xff] }
 0x41c   : > { %26181 = vmatmul.mubr.f32.gmra.mrb[10].mxu1 %v38815_v43  ;;  %v38843_v43 = vld [vmem:[#allocation14_spill] sm:$0xff] }
 0x41d   : > { %26183 = vmatprep.mubr.f32.mxu1 %v38816_v58  ;;  %v38846_v58 = vld [vmem:[#allocation168_spill] sm:$0xff] }
 0x41e   : > { %25141 = vmatmul.mubr.f32.gmra.mrb[40].mxu0 %v32683_v47  ;;  %v38904_v47 = vld [vmem:[#allocation164_spill] sm:$0xff] }
 0x41f   : > { %25143 = vmatprep.mubr.f32.mxu0 %v32692_v50  ;;  %v38903_v50 = vld [vmem:[#allocation135_spill] sm:$0xff] }
 0x420   : > { %26184 = vmatmul.mubr.f32.gmra.mrb[12].mxu1 %v38817_v52  ;;  %v38847_v52 = vld [vmem:[#allocation169_spill] sm:$0xff] }
 0x421   : > { %26186 = vmatprep.mubr.f32.mxu1 %v38818_v45  ;;  %v38850_v45 = vld [vmem:[#allocation171_spill] sm:$0xff] }
 0x422   : > { %25144 = vmatmul.mubr.f32.gmra.mrb[42].mxu0 %v32700_v24  ;;  %v38902_v24 = vld [vmem:[#allocation134_spill] sm:$0xff] }
 0x423   : > { %25146 = vmatprep.mubr.f32.mxu0 %v32707_v5  ;;  %v38901_v5 = vld [vmem:[#allocation8_spill] sm:$0xff] }
 0x424   : > { %26187 = vmatmul.mubr.f32.gmra.mrb[14].mxu1 %v38819_v53  ;;  %v38851_v53 = vld [vmem:[#allocation173_spill] sm:$0xff] }
 0x425   : > { %26189 = vmatprep.mubr.f32.mxu1 %v38820_v44  ;;  %v38854_v44 = vld [vmem:[#allocation174_spill] sm:$0xff] }
 0x426   : > { %25147 = vmatmul.mubr.f32.gmra.mrb[44].mxu0 %v32723_v39  ;;  %v38900_v39 = vld [vmem:[#allocation65_spill] sm:$0xff] }
 0x427   : > { %25149 = vmatprep.mubr.f32.mxu0 %v32725_v61  ;;  %v38899_v61 = vld [vmem:[#allocation40_spill] sm:$0xff] }
 0x428   : > { %26190 = vmatmul.mubr.f32.gmra.mrb[16].mxu1 %v38821_v13  ;;  %v12256_v13 = vand.u32 4294901760, %v33057_v59 }
 0x429   : > { %26192 = vmatprep.mubr.f32.mxu1 %v38822_v1  ;;  %v12259_v1 = vand.u32 4294901760, %v33062_v57 }
 0x42a   : > { %25150 = vmatmul.mubr.f32.gmra.mrb[46].mxu0 %v32749_v19  ;;  %v38898_v19 = vld [vmem:[#allocation31_spill] sm:$0xff]  ;;  %v33137_v0 = vsub.f32 %v33057_v59, %v12256_v13 }
 0x42b   : > { %25152 = vmatprep.mubr.f32.mxu0 %v38823_v18  ;;  %v33076_v27 = vpack.c.bf16 %v12259_v1, %v12256_v13  ;;  %v38897_v18 = vld [vmem:[#allocation62_spill] sm:$0xff]  ;;  %v33140_v3 = vsub.f32 %v33062_v57, %v12259_v1  ;;  %v38917_v59 = vld [vmem:[#allocation143_spill] sm:$0xff]  ;;  %v38918_v57 = vld [vmem:[#allocation136_spill] sm:$0xff] }
 0x42c   : > { %26193 = vmatmul.mubr.f32.gmra.mrb[18].mxu1 %v38825_v33  ;;  %v38856_v33 = vld [vmem:[#allocation16_spill] sm:$0xff]  ;;  %38909 = vst [vmem:[#allocation30_spill] sm:$0xff] %v33137_v0 }
 0x42d   : > { %26195 = vmatprep.mubr.f32.mxu1 %v38827_v17  ;;  %v38859_v17 = vld [vmem:[#allocation51_spill] sm:$0xff]  ;;  %38910 = vst [vmem:[#allocation140_spill] sm:$0xff] %v33140_v3 }
 0x42e   : > { %25153 = vmatmul.mubr.f32.gmra.mrb[48].mxu0 %v38828_v20  ;;  %v38860_v54 = vand.u32 4294901760, %v38859_v17  ;;  %v38876_v17 = vld [vmem:[#allocation10_spill] sm:$0xff]  ;;  %v38896_v20 = vld [vmem:[#allocation53_spill] sm:$0xff] }
 0x42f   : > { %25155 = vmatprep.mubr.f32.mxu0 %v38829_v10  ;;  %v38895_v10 = vld [vmem:[#allocation23_spill] sm:$0xff] }
 0x430   : > { %26196 = vmatmul.mubr.f32.gmra.mrb[20].mxu1 %v38831_v25  ;;  %v38861_v25 = vld [vmem:[#allocation52_spill] sm:$0xff] }
 0x431   : > { %26198 = vmatprep.mubr.f32.mxu1 %v38833_v14  ;;  %v38862_v30 = vand.u32 4294901760, %v38861_v25  ;;  %v38878_v25 = vld [vmem:[#allocation54_spill] sm:$0xff] }
 0x432   : > { %25156 = vmatmul.mubr.f32.gmra.mrb[50].mxu0 %v38834_v15  ;;  %v38894_v15 = vld [vmem:[#allocation18_spill] sm:$0xff] }
 0x433   : > { %25158 = vmatprep.mubr.f32.mxu0 %v38835_v56  ;;  %v33084_v14 = vpack.c.bf16 %v38862_v30, %v38860_v54  ;;  %v38877_v54 = vld [vmem:[#allocation29_spill] sm:$0xff] }
 0x434   : > { %26199 = vmatmul.mubr.f32.gmra.mrb[22].mxu1 %v38836_v36  ;;  %v38863_v36 = vld [vmem:[#allocation19_spill] sm:$0xff]  ;;  %v38879_v30 = vld [vmem:[#allocation57_spill] sm:$0xff] }
 0x435   : > { %26201 = vmatprep.mubr.f32.mxu1 %v38837_v32  ;;  %v38865_v32 = vld [vmem:[#allocation68_spill] sm:$0xff]  ;;  %v38893_v56 = vld [vmem:[#allocation49_spill] sm:$0xff] }
 0x436   : > { %25159 = vmatmul.mubr.f32.gmra.mrb[52].mxu0 %v38838_v35  ;;  %v38892_v35 = vld [vmem:[#allocation66_spill] sm:$0xff] }
 0x437   : > { %25161 = vmatprep.mubr.f32.mxu0 %v38839_v60  ;;  %v38891_v60 = vld [vmem:[#allocation6_spill] sm:$0xff] }
 0x438   : > { %26202 = vmatmul.mubr.f32.gmra.mrb[24].mxu1 %v38840_v51  ;;  %v38866_v51 = vld [vmem:[#allocation28_spill] sm:$0xff] }
 0x439   : > { %26204 = vmatprep.mubr.f32.mxu1 %v38841_v6  ;;  %v38867_v6 = vld [vmem:[#allocation39_spill] sm:$0xff] }
 0x43a   : > { %25162 = vmatmul.mubr.f32.gmra.mrb[54].mxu0 %v38842_v55  ;;  %v38890_v55 = vld [vmem:[#allocation9_spill] sm:$0xff] }
 0x43b   : > { %25164 = vmatprep.mubr.f32.mxu0 %v38843_v43  ;;  %v38889_v43 = vld [vmem:[#allocation157_spill] sm:$0xff] }
 0x43c   : > { %26205 = vmatmul.mubr.f32.gmra.mrb[26].mxu1 %v38844_v41  ;;  %v38868_v41 = vld [vmem:[#allocation37_spill] sm:$0xff] }
 0x43d   : > { %26207 = vmatprep.mubr.f32.mxu1 %v38845_v37  ;;  %v38869_v37 = vld [vmem:[#allocation147_spill] sm:$0xff] }
 0x43e   : > { %25165 = vmatmul.mubr.f32.gmra.mrb[56].mxu0 %v38846_v58  ;;  %v38888_v58 = vld [vmem:[#allocation33_spill] sm:$0xff] }
 0x43f   : > { %25167 = vmatprep.mubr.f32.mxu0 %v38847_v52  ;;  %v38887_v52 = vld [vmem:[#allocation61_spill] sm:$0xff] }
 0x440   : > { %26208 = vmatmul.mubr.f32.gmra.mrb[28].mxu1 %v38848_v11  ;;  %v38870_v11 = vld [vmem:[#allocation7_spill] sm:$0xff] }
 0x441   : > { %26210 = vmatprep.mubr.f32.mxu1 %v38849_v23  ;;  %v38872_v23 = vld [vmem:[#allocation149_spill] sm:$0xff] }
 0x442   : > { %25168 = vmatmul.mubr.f32.gmra.mrb[58].mxu0 %v38850_v45  ;;  %v38886_v45 = vld [vmem:[#allocation58_spill] sm:$0xff] }
 0x443   : > { %25170 = vmatprep.mubr.f32.mxu0 %v38851_v53  ;;  %v38885_v53 = vld [vmem:[#allocation32_spill] sm:$0xff] }
 0x444   : > { %26211 = vmatmul.mubr.f32.gmra.mrb[30].mxu1 %v38852_v28  ;;  %v38873_v28 = vld [vmem:[#allocation22_spill] sm:$0xff] }
 0x445   : > { %26213 = vmatprep.mubr.f32.mxu1 %v38853_v31  ;;  %v38874_v31 = vld [vmem:[#allocation38_spill] sm:$0xff] }
 0x446   : > { %25171 = vmatmul.mubr.f32.gmra.mrb[60].mxu0 %v38854_v44  ;;  %v38884_v44 = vld [vmem:[#allocation154_spill] sm:$0xff] }
 0x447   : > { %25173 = vmatprep.mubr.f32.mxu0 %v32914_v2  ;;  %v38883_v2 = vld [vmem:[#allocation50_spill] sm:$0xff] }
 0x448   : > { %26214 = vmatmul.mubr.f32.gmra.mrb[0].mxu1 %v38855_v8  ;;  %v38875_v8 = vld [vmem:[#allocation42_spill] sm:$0xff] }
 0x449   : > { %26220 = vmatprep.mubr.f32.mxu1 %v38856_v33 }
 0x44a   : > { %25174 = vmatmul.mubr.f32.gmra.mrb[62].mxu0 %v32925_v48  ;;  %v38882_v48 = vld [vmem:[#allocation70_spill] sm:$0xff] }
 0x44b   : > { %25180 = vmatprep.mubr.f32.mxu0 %v38857_v38 }
 0x44c   : > { %26221 = vmatmul.mubr.f32.vlgmr.msra.gmra.mrb[2].mxu1 %v38858_v9 }
 0x44d   : > { %26223 = vmatprep.mubr.f32.mxu1 %v38863_v36  ;;  %28095 = vmatpush3.bf16.msra.mxu1 %v31940_v34  ;;  %v38871_v34 = vld [vmem:[#allocation24_spill] sm:$0xff] }
 0x44e   : > { %25181 = vmatmul.mubr.f32.vlgmr.msra.gmra.mrb[32].mxu0 %v38864_v22  ;;  %28097 = vmatprep.subr.bf16.mxu1 %v33076_v27 }
 0x44f   : > { %25183 = vmatprep.mubr.f32.mxu0 %v38865_v32  ;;  %28015 = vmatpush3.bf16.msra.mxu0 %v32243_v46 }
 0x450   : > { %26224 = vmatmul.mubr.f32.gmra.mrb[4].mxu1 %v38866_v51  ;;  %28017 = vmatprep.subr.bf16.mxu0 %v33084_v14 }
 0x451   : > { %26226 = vmatprep.mubr.f32.mxu1 %v38867_v6 }
 0x452   : > { %25184 = vmatmul.mubr.f32.gmra.mrb[34].mxu0 %v38868_v41 }
 0x453   : > { %25186 = vmatprep.mubr.f32.mxu0 %v38869_v37 }
 0x454   : > { %26227 = vmatmul.mubr.f32.gmra.mrb[6].mxu1 %v38870_v11 }
 0x455   : > { %26229 = vmatprep.mubr.f32.mxu1 %v38871_v34 }
 0x456   : > { %25187 = vmatmul.mubr.f32.gmra.mrb[36].mxu0 %v38872_v23 }
 0x457   : > { %25189 = vmatprep.mubr.f32.mxu0 %v38873_v28 }
 0x458   : > { %26230 = vmatmul.mubr.f32.gmra.mrb[8].mxu1 %v38874_v31 }
 0x459   : > { %26232 = vmatprep.mubr.f32.mxu1 %v38875_v8 }
 0x45a   : > { %25190 = vmatmul.mubr.f32.gmra.mrb[38].mxu0 %v38876_v17 }
 0x45b   : > { %25192 = vmatprep.mubr.f32.mxu0 %v38877_v54 }
 0x45c   : > { %26233 = vmatmul.mubr.f32.gmra.mrb[10].mxu1 %v38878_v25 }
 0x45d   : > { %26235 = vmatprep.mubr.f32.mxu1 %v38879_v30 }
 0x45e   : > { %25193 = vmatmul.mubr.f32.gmra.mrb[40].mxu0 %v38880_v29 }
 0x45f   : > { %25195 = vmatprep.mubr.f32.mxu0 %v38881_v12 }
 0x460   : > { %26236 = vmatmul.mubr.f32.gmra.mrb[12].mxu1 %v38882_v48 }
 0x461   : > { %26238 = vmatprep.mubr.f32.mxu1 %v38883_v2 }
 0x462   : > { %25196 = vmatmul.mubr.f32.gmra.mrb[42].mxu0 %v38884_v44 }
 0x463   : > { %25198 = vmatprep.mubr.f32.mxu0 %v38885_v53 }
 0x464   : > { %26239 = vmatmul.mubr.f32.gmra.mrb[14].mxu1 %v38886_v45 }
 0x465   : > { %26241 = vmatprep.mubr.f32.mxu1 %v38887_v52 }
 0x466   : > { %25199 = vmatmul.mubr.f32.gmra.mrb[44].mxu0 %v38888_v58 }
 0x467   : > { %25201 = vmatprep.mubr.f32.mxu0 %v38889_v43 }
 0x468   : > { %26242 = vmatmul.mubr.f32.gmra.mrb[16].mxu1 %v38890_v55 }
 0x469   : > { %26244 = vmatprep.mubr.f32.mxu1 %v38891_v60 }
 0x46a   : > { %25202 = vmatmul.mubr.f32.gmra.mrb[46].mxu0 %v38892_v35 }
 0x46b   : > { %25204 = vmatprep.mubr.f32.mxu0 %v38893_v56 }
 0x46c   : > { %26245 = vmatmul.mubr.f32.gmra.mrb[18].mxu1 %v38894_v15 }
 0x46d   : > { %26247 = vmatprep.mubr.f32.mxu1 %v38895_v10 }
 0x46e   : > { %25205 = vmatmul.mubr.f32.gmra.mrb[48].mxu0 %v38896_v20 }
 0x46f   : > { %25207 = vmatprep.mubr.f32.mxu0 %v38897_v18 }
 0x470   : > { %26248 = vmatmul.mubr.f32.gmra.mrb[20].mxu1 %v38898_v19 }
 0x471   : > { %26250 = vmatprep.mubr.f32.mxu1 %v38899_v61 }
 0x472   : > { %25208 = vmatmul.mubr.f32.gmra.mrb[50].mxu0 %v38900_v39 }
 0x473   : > { %25210 = vmatprep.mubr.f32.mxu0 %v38901_v5 }
 0x474   : > { %26251 = vmatmul.mubr.f32.gmra.mrb[22].mxu1 %v38902_v24 }
 0x475   : > { %26253 = vmatprep.mubr.f32.mxu1 %v38903_v50 }
 0x476   : > { %25211 = vmatmul.mubr.f32.gmra.mrb[52].mxu0 %v38904_v47  ;;  %v38914_v47 = vld [vmem:[#allocation170_spill] sm:$0xff] }
 0x477   : > { %25213 = vmatprep.mubr.f32.mxu0 %v38905_v63  ;;  %v38915_v63 = vld [vmem:[#allocation172_spill] sm:$0xff] }
 0x478   : > { %26254 = vmatmul.mubr.f32.gmra.mrb[24].mxu1 %v38906_v62  ;;  %v37610_v62 = vand.u32 4294901760, %v33137_v0 }
 0x479   : > { %26256 = vmatprep.mubr.f32.mxu1 %v38907_v16  ;;  %v37611_v16 = vand.u32 4294901760, %v33140_v3 }
 0x47a   : > { %25214 = vmatmul.mubr.f32.gmra.mrb[54].mxu0 %v38908_v40  ;;  %v38916_v40 = vld [vmem:[#allocation141_spill] sm:$0xff]  ;;  %v12646_v13 = vsub.f32 %v33137_v0, %v37610_v62 }
 0x47b   : > { %25216 = vmatprep.mubr.f32.mxu0 %v38911_v7  ;;  %v12653_v1 = vsub.f32 %v33140_v3, %v37611_v16  ;;  %v38923_v16 = vand.u32 4294901760, %v38857_v38  ;;  %v38928_v38 = vand.u32 4294901760, %v38872_v23 }
 0x47c   : > { %26257 = vmatmul.mubr.f32.gmra.mrb[26].mxu1 %v38912_v4 }
 0x47d   : > { %26259 = vmatprep.mubr.f32.mxu1 %v38913_v21  ;;  %v38920_v21 = vld [vmem:[#allocation145_spill] sm:$0xff] }
 0x47e   : > { %25217 = vmatmul.mubr.f32.gmra.mrb[56].mxu0 %v38914_v47  ;;  %v38919_v47 = vld [vmem:[#allocation144_spill] sm:$0xff] }
 0x47f   : > { %25219 = vmatprep.mubr.f32.mxu0 %v38915_v63  ;;  %v38921_v63 = vld [vmem:[#allocation27_spill] sm:$0xff] }
 0x480   : > { %26260 = vmatmul.mubr.f32.gmra.mrb[28].mxu1 %v38916_v40  ;;  %v12647_v40 = vand.u32 4294901760, %v12646_v13  ;;  %v38924_v13 = vand.u32 4294901760, %v38864_v22  ;;  %v38932_v22 = vand.u32 4294901760, %v38880_v29  ;;  %v38936_v29 = vand.u32 4294901760, %v38888_v58 }
 0x481   : > { %26262 = vmatprep.mubr.f32.mxu1 %v38917_v59  ;;  %v12654_v59 = vand.u32 4294901760, %v12653_v1  ;;  %v38940_v58 = vand.u32 4294901760, %v38896_v20  ;;  %v38957_v1 = vld [vmem:[#allocation170_spill] sm:$0xff] }
 0x482   : > { %25220 = vmatmul.mubr.f32.gmra.mrb[58].mxu0 %v38918_v57  ;;  %v38922_v57 = vld [vmem:[#allocation146_spill] sm:$0xff] }
 0x483   : > { %25222 = vmatprep.mubr.f32.mxu0 %v32912_v42  ;;  %v33166_v62 = vpack.c.bf16 %v12654_v59, %v12647_v40  ;;  %v38925_v40 = vand.u32 4294901760, %v38865_v32  ;;  %v38933_v32 = vand.u32 4294901760, %v38881_v12  ;;  %v38937_v12 = vand.u32 4294901760, %v38889_v43  ;;  %v12130_v59 = vld [vmem:[#allocation2 + $0x62] sm:$0xff] }
 0x484   : > { %26263 = vmatmul.mubr.f32.gmra.mrb[30].mxu1 %v38919_v47  ;;  %v38941_v43 = vand.u32 4294901760, %v38897_v18  ;;  %v38944_v18 = vld [vmem:[#allocation164_spill] sm:$0xff] }
 0x485   : > { %26265 = vmatprep.mubr.f32.mxu1 %v38920_v21  ;;  %v38945_v20 = vand.u32 4294901760, %v38944_v18 }
 0x486   : > { %25223 = vmatmul.mubr.f32.gmra.mrb[60].mxu0 %v38921_v63  ;;  %v33173_v63 = vpack.c.bf16 %v33140_v3, %v33137_v0  ;;  %v12149_v3 = vld [vmem:[#allocation2 + $0x142] sm:$0xff]  ;;  %v39045_v0 = vld [vmem:[#allocation155_spill] sm:$0xff] }
 0x487   : > { %25225 = vmatprep.mubr.f32.mxu0 %v32933_v49 }
 0x488   : > { %26266 = vmatmul.mubr.f32.gmra.mrb[0].mxu1 %v38922_v57 }
 0x489   : > { %26272 = vmatprep.mubr.f32.mxu1 %v38856_v33  ;;  %v38927_v33 = vand.u32 4294901760, %v38869_v37 }
 0x48a   : > { %25226 = vmatmul.mubr.f32.gmra.mrb[62].mxu0 %v32941_v26 }
 0x48b   : > { %25232 = vmatprep.mubr.f32.mxu0 %v38923_v16  ;;  %v38926_v16 = vand.u32 4294901760, %v38868_v41  ;;  %v38949_v41 = vld [vmem:[#allocation21_spill] sm:$0xff] }
 0x48c   : > { %26273 = vmatmul.mubr.f32.vlgmr.msra.gmra.mrb[2].mxu1 %v38858_v9  ;;  %v38929_v9 = vand.u32 4294901760, %v38873_v28  ;;  %v38953_v28 = vand.u32 4294901760, %v38911_v7 }
 0x48d   : > { %26275 = vmatprep.mubr.f32.mxu1 %v38863_v36  ;;  %28099 = vmatpush3.bf16.msra.mxu1 %v33076_v27  ;;  %v38931_v36 = vand.u32 4294901760, %v38877_v54  ;;  %v38954_v54 = vld [vmem:[#allocation36_spill] sm:$0xff] }
 0x48e   : > { %25233 = vmatmul.mubr.f32.vlgmr.msra.gmra.mrb[32].mxu0 %v38924_v13  ;;  %28101 = vmatprep.subr.bf16.mxu1 %v33166_v62  ;;  %v38958_v13 = vand.u32 4294901760, %v38957_v1 }
 0x48f   : > { %25235 = vmatprep.mubr.f32.mxu0 %v38925_v40  ;;  %28019 = vmatpush3.bf16.msra.mxu0 %v33084_v14  ;;  %v38930_v14 = vand.u32 4294901760, %v38876_v17 }
 0x490   : > { %26276 = vmatmul.mubr.f32.gmra.mrb[4].mxu1 %v38866_v51  ;;  %28021 = vmatprep.subr.bf16.mxu0 %v32243_v46  ;;  %v38934_v51 = vand.u32 4294901760, %v38884_v44  ;;  %v12128_v44 = vld [vmem:[#allocation2 + $0x4a] sm:$0xff] }
 0x491   : > { %26278 = vmatprep.mubr.f32.mxu1 %v38867_v6  ;;  %v38935_v6 = vand.u32 4294901760, %v38885_v53  ;;  %v38948_v53 = vld [vmem:[#allocation138_spill] sm:$0xff] }
 0x492   : > { %25236 = vmatmul.mubr.f32.gmra.mrb[34].mxu0 %v38926_v16  ;;  %v38960_v16 = vld [vmem:[#allocation172_spill] sm:$0xff] }
 0x493   : > { %25238 = vmatprep.mubr.f32.mxu0 %v38927_v33  ;;  %v38961_v33 = vand.u32 4294901760, %v38960_v16  ;;  %v33372_v16 = vld [vmem:[%s36912_s3 + $0x28] sm:$0xff] }
 0x494   : > { %26279 = vmatmul.mubr.f32.gmra.mrb[6].mxu1 %v38870_v11  ;;  %v38950_v11 = vld [vmem:[#allocation17_spill] sm:$0xff] }
 0x495   : > { %26281 = vmatprep.mubr.f32.mxu1 %v38871_v34  ;;  %v38951_v34 = vand.u32 4294901760, %v38950_v11 }
 0x496   : > { %25239 = vmatmul.mubr.f32.gmra.mrb[36].mxu0 %v38928_v38  ;;  %v12131_v38 = vld [vmem:[#allocation2 + $0x6a] sm:$0xff] }
 0x497   : > { %25241 = vmatprep.mubr.f32.mxu0 %v38929_v9  ;;  %v38962_v9 = vld [vmem:[#allocation141_spill] sm:$0xff] }
 0x498   : > { %26282 = vmatmul.mubr.f32.gmra.mrb[8].mxu1 %v38874_v31  ;;  %v12172_v31 = vsel %vm2325_vm1, %v12128_v44, 0 }
 0x499   : > { %26284 = vmatprep.mubr.f32.mxu1 %v38875_v8  ;;  %v12129_v8 = vld [vmem:[#allocation2 + $0x52] sm:$0xff]  ;;  %v33279_v40 = vand.u32 4294901760, %v12172_v31 }
 0x49a   : > { %25242 = vmatmul.mubr.f32.gmra.mrb[38].mxu0 %v38930_v14 }
 0x49b   : > { %25244 = vmatprep.mubr.f32.mxu0 %v38931_v36  ;;  %v12178_v36 = vsel %vm2325_vm1, %v12130_v59, 0 }
 0x49c   : > { %26285 = vmatmul.mubr.f32.gmra.mrb[10].mxu1 %v38878_v25 }
 0x49d   : > { %26287 = vmatprep.mubr.f32.mxu1 %v38879_v30 }
 0x49e   : > { %25245 = vmatmul.mubr.f32.gmra.mrb[40].mxu0 %v38932_v22  ;;  %v38964_v22 = vld [vmem:[#allocation143_spill] sm:$0xff] }
 0x49f   : > { %25247 = vmatprep.mubr.f32.mxu0 %v38933_v32 }
 0x4a0   : > { %26288 = vmatmul.mubr.f32.gmra.mrb[12].mxu1 %v38882_v48  ;;  %v38939_v48 = vand.u32 4294901760, %v38893_v56  ;;  %v38943_v56 = vand.u32 4294901760, %v38901_v5  ;;  %v38946_v5 = vld [vmem:[#allocation165_spill] sm:$0xff] }
 0x4a1   : > { %26290 = vmatprep.mubr.f32.mxu1 %v38883_v2  ;;  %v38938_v2 = vand.u32 4294901760, %v38892_v35  ;;  %v38942_v35 = vand.u32 4294901760, %v38900_v39 }
 0x4a2   : > { %25248 = vmatmul.mubr.f32.gmra.mrb[42].mxu0 %v38934_v51 }
 0x4a3   : > { %25250 = vmatprep.mubr.f32.mxu0 %v38935_v6 }
 0x4a4   : > { %26291 = vmatmul.mubr.f32.gmra.mrb[14].mxu1 %v38886_v45  ;;  %v38947_v45 = vand.u32 4294901760, %v38946_v5 }
 0x4a5   : > { %26293 = vmatprep.mubr.f32.mxu1 %v38887_v52  ;;  %v12127_v52 = vld [vmem:[#allocation2 + $0x3a] sm:$0xff] }
 0x4a6   : > { %25251 = vmatmul.mubr.f32.gmra.mrb[44].mxu0 %v38936_v29  ;;  %v12169_v37 = vsel %vm2325_vm1, %v12127_v52, 0  ;;  %v12132_v29 = vld [vmem:[#allocation2 + $0x7a] sm:$0xff] }
 0x4a7   : > { %25253 = vmatprep.mubr.f32.mxu0 %v38937_v12  ;;  %v33265_v17 = vand.u32 4294901760, %v12169_v37  ;;  %v38967_v12 = vld [vmem:[#allocation136_spill] sm:$0xff] }
 0x4a8   : > { %26294 = vmatmul.mubr.f32.gmra.mrb[16].mxu1 %v38890_v55  ;;  %v12124_v55 = vld [vmem:[#allocation2 + $0x1a] sm:$0xff] }
 0x4a9   : > { %26296 = vmatprep.mubr.f32.mxu1 %v38891_v60  ;;  %v12126_v60 = vld [vmem:[#allocation2 + $0x32] sm:$0xff]  ;;  %v33286_v14 = vsub.f32 %v12169_v37, %v33265_v17  ;;  %v12135_v37 = vld [vmem:[#allocation2 + $0x9a] sm:$0xff] }
 0x4aa   : > { %25254 = vmatmul.mubr.f32.gmra.mrb[46].mxu0 %v38938_v2  ;;  %v12166_v39 = vsel %vm2325_vm1, %v12126_v60, 0  ;;  %v38968_v2 = vand.u32 4294901760, %v38967_v12  ;;  %v12134_v60 = vld [vmem:[#allocation2 + $0x92] sm:$0xff] }
 0x4ab   : > { %25256 = vmatprep.mubr.f32.mxu0 %v38939_v48  ;;  %38963 = vst [vmem:[#allocation25_spill] sm:$0xff] %v33286_v14 }
 0x4ac   : > { %26297 = vmatmul.mubr.f32.gmra.mrb[18].mxu1 %v38894_v15  ;;  %v12160_v15 = vsel %vm2325_vm1, %v12124_v55, 0  ;;  %v38970_v55 = vand.u32 4294901760, %v32912_v42 }
 0x4ad   : > { %26299 = vmatprep.mubr.f32.mxu1 %v38895_v10  ;;  %v12125_v10 = vld [vmem:[#allocation2 + $0x22] sm:$0xff] }
 0x4ae   : > { %25257 = vmatmul.mubr.f32.gmra.mrb[48].mxu0 %v38940_v58  ;;  %v33303_v58 = vsub.f32 %v12172_v31, %v33279_v40 }
 0x4af   : > { %25259 = vmatprep.mubr.f32.mxu0 %v38941_v43  ;;  %v12181_v43 = vsel %vm2325_vm1, %v12131_v38, 0 }
 0x4b0   : > { %26300 = vmatmul.mubr.f32.gmra.mrb[20].mxu1 %v38898_v19  ;;  %v33243_v19 = vand.u32 4294901760, %v12160_v15  ;;  %38969 = vst [vmem:[#allocation20_spill] sm:$0xff] %v33303_v58  ;;  %v33330_v5 = vand.u32 4294901760, %v33303_v58 }
 0x4b1   : > { %26302 = vmatprep.mubr.f32.mxu1 %v38899_v61  ;;  %v12163_v61 = vsel %vm2325_vm1, %v12125_v10, 0  ;;  %v12133_v10 = vld [vmem:[#allocation2 + $0x82] sm:$0xff] }
 0x4b2   : > { %25260 = vmatmul.mubr.f32.gmra.mrb[50].mxu0 %v38942_v35  ;;  %v33259_v23 = vsub.f32 %v12160_v15, %v33243_v19  ;;  %v33308_v35 = vand.u32 4294901760, %v12178_v36  ;;  %v12184_v15 = vsel %vm2325_vm1, %v12132_v29, 0  ;;  %38977 = vst [vmem:[#allocation52_spill] sm:$0xff] %v33330_v5  ;;  %v12187_v44 = vsel %vm2325_vm1, %v12133_v10, 0  ;;  %v38990_v10 = vld [vmem:[#allocation56_spill] sm:$0xff] }
 0x4b3   : > { %25262 = vmatprep.mubr.f32.mxu0 %v38943_v56  ;;  %v33312_v56 = vand.u32 4294901760, %v33286_v14  ;;  %v33359_v59 = vand.u32 4294901760, %v12187_v44  ;;  %v37612_v29 = vand.u32 4294901760, %v33372_v16 }
 0x4b4   : > { %26303 = vmatmul.mubr.f32.gmra.mrb[22].mxu1 %v38902_v24  ;;  %v33251_v24 = vand.u32 4294901760, %v12163_v61  ;;  %38952 = vst [vmem:[#allocation142_spill] sm:$0xff] %v33259_v23  ;;  %v33277_v7 = vand.u32 4294901760, %v33259_v23 }
 0x4b5   : > { %26305 = vmatprep.mubr.f32.mxu1 %v38903_v50  ;;  %v33253_v50 = vand.u32 4294901760, %v12166_v39  ;;  %38971 = vst [vmem:[#allocation16_spill] sm:$0xff] %v33312_v56  ;;  %v12355_v11 = vsub.f32 %v33286_v14, %v33312_v56  ;;  %v12141_v56 = vld [vmem:[#allocation2 + $0xe2] sm:$0xff] }
 0x4b6   : > { %25263 = vmatmul.mubr.f32.gmra.mrb[52].mxu0 %v38945_v20  ;;  %v33269_v25 = vsub.f32 %v12163_v61, %v33251_v24  ;;  %38959 = vst [vmem:[#allocation48_spill] sm:$0xff] %v33277_v7  ;;  %v12325_v48 = vsub.f32 %v33259_v23, %v33277_v7  ;;  %v33323_v61 = vand.u32 4294901760, %v12181_v43 }
 0x4b7   : > { %25265 = vmatprep.mubr.f32.mxu0 %v38947_v45  ;;  %v33272_v30 = vsub.f32 %v12166_v39, %v33253_v50  ;;  %v33335_v45 = vsub.f32 %v12178_v36, %v33308_v35  ;;  %v12138_v36 = vld [vmem:[#allocation2 + $0xc2] sm:$0xff]  ;;  %v33384_v12 = vand.u32 4294901760, %v12355_v11 }
 0x4b8   : > { %26306 = vmatmul.mubr.f32.gmra.mrb[24].mxu1 %v38948_v53  ;;  %38955 = vst [vmem:[#allocation44_spill] sm:$0xff] %v33269_v25  ;;  %v33291_v32 = vand.u32 4294901760, %v33269_v25  ;;  %38973 = vst [vmem:[#allocation15_spill] sm:$0xff] %v33323_v61  ;;  %v33327_v52 = vand.u32 4294901760, %v12325_v48  ;;  %v33337_v53 = vand.u32 4294901760, %v12184_v15  ;;  %v33353_v31 = vsub.f32 %v12181_v43, %v33323_v61 }
 0x4b9   : > { %26308 = vmatprep.mubr.f32.mxu1 %v38949_v41  ;;  %38956 = vst [vmem:[#allocation47_spill] sm:$0xff] %v33272_v30  ;;  %v33294_v51 = vand.u32 4294901760, %v33272_v30  ;;  %38979 = vst [vmem:[#allocation19_spill] sm:$0xff] %v33335_v45  ;;  %v12190_v41 = vsel %vm2325_vm1, %v12134_v60, 0  ;;  %v33404_v60 = vsub.f32 %v12187_v44, %v33359_v59 }
 0x4ba   : > { %25266 = vmatmul.mubr.f32.gmra.mrb[54].mxu0 %v38951_v34  ;;  %38965 = vst [vmem:[#allocation34_spill] sm:$0xff] %v33291_v32  ;;  %v12335_v18 = vsub.f32 %v33269_v25, %v33291_v32  ;;  %38976 = vst [vmem:[#allocation51_spill] sm:$0xff] %v33327_v52  ;;  %v33361_v1 = vand.u32 4294901760, %v12190_v41  ;;  %v33379_v38 = vsub.f32 %v12184_v15, %v33337_v53  ;;  %v33392_v43 = vand.u32 4294901760, %v33353_v31  ;;  %v39007_v32 = vld [vmem:[#allocation43_spill] sm:$0xff] }
 0x4bb   : > { %25268 = vmatprep.mubr.f32.mxu0 %v38953_v28  ;;  %38966 = vst [vmem:[#allocation41_spill] sm:$0xff] %v33294_v51  ;;  %v12345_v42 = vsub.f32 %v33272_v30, %v33294_v51  ;;  %38983 = vst [vmem:[#allocation39_spill] sm:$0xff] %v33353_v31 }
 0x4bc   : > { %26309 = vmatmul.mubr.f32.gmra.mrb[26].mxu1 %v38912_v4  ;;  %v12175_v4 = vsel %vm2325_vm1, %v12129_v8, 0  ;;  %v33345_v34 = vand.u32 4294901760, %v12335_v18  ;;  %v12136_v8 = vld [vmem:[#allocation2 + $0xaa] sm:$0xff]  ;;  %38987 = vst [vmem:[#allocation147_spill] sm:$0xff] %v33379_v38  ;;  %38988 = vst [vmem:[#allocation7_spill] sm:$0xff] %v33384_v12  ;;  %v12395_v11 = vsub.f32 %v33353_v31, %v33392_v43  ;;  %v12211_v31 = vsel %vm2325_vm1, %v12141_v56, 0 }
 0x4bd   : > { %26311 = vmatprep.mubr.f32.mxu1 %v38954_v54  ;;  %v33296_v6 = vand.u32 4294901760, %v12175_v4  ;;  %v38984_v54 = vand.u32 4294901760, %v32941_v26  ;;  %v38985_v26 = vld [vmem:[#allocation55_spill] sm:$0xff]  ;;  %38989 = vst [vmem:[#allocation24_spill] sm:$0xff] %v33392_v43  ;;  %38991 = vst [vmem:[#allocation149_spill] sm:$0xff] %v33404_v60 }
 0x4be   : > { %25269 = vmatmul.mubr.f32.gmra.mrb[56].mxu0 %v38958_v13  ;;  %38980 = vst [vmem:[#allocation64_spill] sm:$0xff] %v33345_v34  ;;  %v12193_v13 = vsel %vm2325_vm1, %v12135_v37, 0  ;;  %v33418_v37 = vand.u32 4294901760, %v33379_v38  ;;  %v33468_v7 = vand.u32 4294901760, %v12395_v11  ;;  %v12144_v56 = vld [vmem:[#allocation2 + $0x10a] sm:$0xff] }
 0x4bf   : > { %25271 = vmatprep.mubr.f32.mxu0 %v38961_v33  ;;  %v33321_v20 = vsub.f32 %v12175_v4, %v33296_v6  ;;  %v33367_v4 = vld [vmem:[%s36912_s3 + $0x20] sm:$0xff]  ;;  %v33376_v33 = vand.u32 4294901760, %v33335_v45 }
 0x4c0   : > { %26312 = vmatmul.mubr.f32.gmra.mrb[28].mxu1 %v38962_v9  ;;  %v12137_v9 = vld [vmem:[#allocation2 + $0xb2] sm:$0xff]  ;;  %38995 = vst [vmem:[#allocation42_spill] sm:$0xff] %v33418_v37  ;;  %39008 = vst [vmem:[#allocation32_spill] sm:$0xff] %v33468_v7 }
 0x4c1   : > { %26314 = vmatprep.mubr.f32.mxu1 %v38964_v22  ;;  %38972 = vst [vmem:[#allocation59_spill] sm:$0xff] %v33321_v20  ;;  %v33350_v28 = vand.u32 4294901760, %v33321_v20  ;;  %38986 = vst [vmem:[#allocation37_spill] sm:$0xff] %v33376_v33  ;;  %v37613_v22 = vand.u32 4294901760, %v33367_v4  ;;  %v12199_v18 = vsel %vm2325_vm1, %v12137_v9, 0  ;;  %v12140_v9 = vld [vmem:[#allocation2 + $0xda] sm:$0xff] }
 0x4c2   : > { %25272 = vmatmul.mubr.f32.gmra.mrb[58].mxu0 %v38968_v2  ;;  %v12196_v2 = vsel %vm2325_vm1, %v12136_v8, 0 }
 0x4c3   : > { %25274 = vmatprep.mubr.f32.mxu0 %v38970_v55  ;;  %38982 = vst [vmem:[#allocation28_spill] sm:$0xff] %v33350_v28  ;;  %v12375_v48 = vsub.f32 %v33321_v20, %v33350_v28  ;;  %v33394_v55 = vand.u32 4294901760, %v12193_v13  ;;  %v33400_v15 = vpack.c.bf16 %v37612_v29, %v37613_v22  ;;  %v33420_v44 = vand.u32 4294901760, %v12196_v2  ;;  %v12145_v20 = vld [vmem:[#allocation2 + $0x112] sm:$0xff] }
 0x4c4   : > { %26315 = vmatmul.mubr.f32.gmra.mrb[30].mxu1 %v38919_v47  ;;  %v38974_v47 = vld [vmem:[#allocation27_spill] sm:$0xff]  ;;  %v33439_v29 = vand.u32 4294901760, %v33404_v60  ;;  %v12405_v28 = vsub.f32 %v33379_v38, %v33418_v37 }
 0x4c5   : > { %26317 = vmatprep.mubr.f32.mxu1 %v38920_v21  ;;  %v38975_v39 = vand.u32 4294901760, %v38974_v47  ;;  %v38978_v21 = vand.u32 4294901760, %v32933_v49  ;;  %v33347_v49 = vand.u32 4294901760, %v12345_v42  ;;  %v12202_v42 = vsel %vm2325_vm1, %v12138_v36, 0  ;;  %v38993_v47 = vld [vmem:[#allocation60_spill] sm:$0xff]  ;;  %v38997_v36 = vld [vmem:[#allocation63_spill] sm:$0xff] }
 0x4c6   : > { %v33429_v8 = vsub.f32 %v12193_v13, %v33394_v55  ;;  %38999 = vst [vmem:[#allocation54_spill] sm:$0xff] %v33439_v29 }
 0x4c7   : > { %25275 = vmatmul.mubr.f32.gmra.mrb[60].mxu0 %v38975_v39  ;;  %38981 = vst [vmem:[#allocation68_spill] sm:$0xff] %v33347_v49 }
 0x4c8   : > { %25277 = vmatprep.mubr.f32.mxu0 %v38978_v21  ;;  %26318 = vmatmul.mubr.f32.gmra.mrb[0].mxu1 %v38922_v57  ;;  %v12365_v57 = vsub.f32 %v33303_v58, %v33330_v5  ;;  %v12385_v21 = vsub.f32 %v33335_v45, %v33376_v33  ;;  %38996 = vst [vmem:[#allocation10_spill] sm:$0xff] %v33429_v8  ;;  %v39001_v33 = vld [vmem:[#allocation67_spill] sm:$0xff]  ;;  %v33457_v51 = vand.u32 4294901760, %v33429_v8  ;;  %v12148_v58 = vld [vmem:[#allocation2 + $0x13a] sm:$0xff] }
 0x4c9   : > { %26324 = vmatprep.mubr.f32.mxu1 %v33327_v52  ;;  %v33451_v5 = vsub.f32 %v12196_v2, %v33420_v44  ;;  %v12142_v2 = vld [vmem:[#allocation2 + $0xf2] sm:$0xff] }
 0x4ca   : > { %v33413_v39 = vand.u32 4294901760, %v12365_v57  ;;  %v33433_v57 = vand.u32 4294901760, %v12202_v42  ;;  %v33446_v13 = vand.u32 4294901760, %v12385_v21  ;;  %39004 = vst [vmem:[#allocation70_spill] sm:$0xff] %v33457_v51  ;;  %v12214_v11 = vsel %vm2325_vm1, %v12142_v2, 0  ;;  %v39035_v52 = vld [vmem:[#allocation152_spill] sm:$0xff] }
 0x4cb   : > { %25278 = vmatmul.mubr.f32.gmra.mrb[62].mxu0 %v38984_v54  ;;  %v33431_v54 = vand.u32 4294901760, %v12199_v18  ;;  %39003 = vst [vmem:[#allocation26_spill] sm:$0xff] %v33451_v5  ;;  %v33510_v45 = vand.u32 4294901760, %v12214_v11 }
 0x4cc   : > { %25284 = vmatprep.mubr.f32.mxu0 %v38985_v26  ;;  %26325 = vmatmul.mubr.f32.vlgmr.msra.gmra.mrb[2].mxu1 %v33345_v34  ;;  %38994 = vst [vmem:[#allocation38_spill] sm:$0xff] %v33413_v39  ;;  %39002 = vst [vmem:[#allocation4_spill] sm:$0xff] %v33446_v13  ;;  %v33463_v21 = vsub.f32 %v12202_v42, %v33433_v57  ;;  %v33478_v42 = vand.u32 4294901760, %v33451_v5 }
 0x4cd   : > { %26327 = vmatprep.mubr.f32.mxu1 %v33347_v49  ;;  %28103 = vmatpush3.bf16.msra.mxu1 %v33166_v62  ;;  %v33407_v62 = vsub.f32 %v12190_v41, %v33361_v1  ;;  %v12139_v41 = vld [vmem:[#allocation2 + $0xca] sm:$0xff]  ;;  %39021 = vst [vmem:[#allocation23_spill] sm:$0xff] %v33510_v45  ;;  %v12146_v49 = vld [vmem:[#allocation2 + $0x122] sm:$0xff] }
 0x4ce   : > { %28105 = vmatprep.subr.bf16.mxu1 %v33173_v63  ;;  %v12205_v43 = vsel %vm2325_vm1, %v12139_v41, 0  ;;  %v33460_v41 = vsub.f32 %v12199_v18, %v33431_v54  ;;  %39006 = vst [vmem:[#allocation154_spill] sm:$0xff] %v33463_v21  ;;  %v33475_v18 = vand.u32 4294901760, %v12405_v28  ;;  %39011 = vst [vmem:[#allocation61_spill] sm:$0xff] %v33478_v42 }
 0x4cf   : > { %25285 = vmatmul.mubr.f32.vlgmr.msra.gmra.mrb[32].mxu0 %v38990_v10  ;;  %38992 = vst [vmem:[#allocation22_spill] sm:$0xff] %v33407_v62  ;;  %v33442_v22 = vand.u32 4294901760, %v33407_v62  ;;  %v33465_v37 = vand.u32 4294901760, %v12205_v43 }
 0x4d0   : > { %25287 = vmatprep.mubr.f32.mxu0 %v38993_v47  ;;  %28023 = vmatpush3.bf16.msra.mxu0 %v32243_v46  ;;  %v33436_v46 = vand.u32 4294901760, %v12375_v48  ;;  %v12208_v48 = vsel %vm2325_vm1, %v12140_v9, 0  ;;  %39005 = vst [vmem:[#allocation50_spill] sm:$0xff] %v33460_v41  ;;  %v12415_v9 = vsub.f32 %v33404_v60, %v33439_v29  ;;  %39010 = vst [vmem:[#allocation58_spill] sm:$0xff] %v33475_v18  ;;  %v33489_v28 = vand.u32 4294901760, %v33460_v41  ;;  %v39015_v60 = vld [vmem:[#allocation150_spill] sm:$0xff] }
 0x4d1   : > { %26328 = vmatmul.mubr.f32.gmra.mrb[4].mxu1 %v33384_v12  ;;  %28025 = vmatprep.subr.bf16.mxu0 %v33400_v15  ;;  %39000 = vst [vmem:[#allocation57_spill] sm:$0xff] %v33442_v22  ;;  %v33480_v38 = vand.u32 4294901760, %v12208_v48  ;;  %v33492_v29 = vand.u32 4294901760, %v33463_v21  ;;  %v39019_v12 = vld [vmem:[#allocation151_spill] sm:$0xff] }
 0x4d2   : > { %26330 = vmatprep.mubr.f32.mxu1 %v33413_v39  ;;  %38998 = vst [vmem:[#allocation29_spill] sm:$0xff] %v33436_v46  ;;  %v12143_v39 = vld [vmem:[#allocation2 + $0xfa] sm:$0xff]  ;;  %39012 = vst [vmem:[#allocation33_spill] sm:$0xff] %v33489_v28 }
 0x4d3   : > { %25288 = vmatmul.mubr.f32.gmra.mrb[34].mxu0 %v38997_v36  ;;  %39013 = vst [vmem:[#allocation157_spill] sm:$0xff] %v33492_v29 }
 0x4d4   : > { %25290 = vmatprep.mubr.f32.mxu0 %v39001_v33 }
 0x4d5   : > { %26331 = vmatmul.mubr.f32.gmra.mrb[6].mxu1 %v33436_v46  ;;  %v39009_v46 = vld [vmem:[#allocation148_spill] sm:$0xff] }
 0x4d6   : > { %26333 = vmatprep.mubr.f32.mxu1 %v33446_v13  ;;  %v12425_v13 = vsub.f32 %v33407_v62, %v33442_v22  ;;  %v12435_v22 = vsub.f32 %v33429_v8, %v33457_v51  ;;  %v33495_v62 = vsub.f32 %v12205_v43, %v33465_v37  ;;  %v12445_v51 = vsub.f32 %v33451_v5, %v33478_v42 }
 0x4d7   : > { %25291 = vmatmul.mubr.f32.gmra.mrb[36].mxu0 %v39007_v32  ;;  %v33508_v8 = vsub.f32 %v12208_v48, %v33480_v38  ;;  %v12217_v43 = vsel %vm2325_vm1, %v12143_v39, 0  ;;  %v12455_v42 = vsub.f32 %v33460_v41, %v33489_v28  ;;  %v12465_v48 = vsub.f32 %v33463_v21, %v33492_v29  ;;  %v39024_v39 = vld [vmem:[#allocation3_spill] sm:$0xff] }
 0x4d8   : > { %25293 = vmatprep.mubr.f32.mxu0 %v39009_v46  ;;  %39014 = vst [vmem:[#allocation9_spill] sm:$0xff] %v33495_v62  ;;  %v33500_v2 = vand.u32 4294901760, %v12425_v13  ;;  %v12220_v13 = vsel %vm2325_vm1, %v12144_v56, 0  ;;  %v33523_v5 = vand.u32 4294901760, %v33495_v62  ;;  %v12223_v56 = vsel %vm2325_vm1, %v12145_v20, 0 }
 0x4d9   : > { %26334 = vmatmul.mubr.f32.gmra.mrb[8].mxu1 %v33468_v7  ;;  %v33498_v7 = vand.u32 4294901760, %v12415_v9  ;;  %39020 = vst [vmem:[#allocation18_spill] sm:$0xff] %v33508_v8  ;;  %v33516_v9 = vand.u32 4294901760, %v12435_v22  ;;  %v12226_v22 = vsel %vm2325_vm1, %v12146_v49, 0  ;;  %v33534_v28 = vand.u32 4294901760, %v12445_v51 }
 0x4da   : > { %26336 = vmatprep.mubr.f32.mxu1 %v33475_v18  ;;  %39017 = vst [vmem:[#allocation66_spill] sm:$0xff] %v33500_v2  ;;  %v33502_v18 = vand.u32 4294901760, %v12211_v31  ;;  %39023 = vst [vmem:[#allocation62_spill] sm:$0xff] %v33523_v5  ;;  %v33537_v29 = vand.u32 4294901760, %v33508_v8  ;;  %v33540_v21 = vsub.f32 %v12214_v11, %v33510_v45  ;;  %v33542_v41 = vand.u32 4294901760, %v12220_v13 }
 0x4db   : > { %25294 = vmatmul.mubr.f32.gmra.mrb[38].mxu0 %v39015_v60  ;;  %39016 = vst [vmem:[#allocation6_spill] sm:$0xff] %v33498_v7  ;;  %39022 = vst [vmem:[#allocation53_spill] sm:$0xff] %v33516_v9  ;;  %v33546_v20 = vand.u32 4294901760, %v12455_v42  ;;  %v12475_v51 = vsub.f32 %v33495_v62, %v33523_v5  ;;  %v33550_v49 = vand.u32 4294901760, %v12223_v56  ;;  %v33552_v14 = vand.u32 4294901760, %v12226_v22 }
 0x4dc   : > { %39018 = vst [vmem:[#allocation49_spill] sm:$0xff] %v33502_v18  ;;  %25296 = vmatprep.mubr.f32.mxu0 %v39019_v12  ;;  %v33527_v34 = vsub.f32 %v12211_v31, %v33502_v18  ;;  %39028 = vst [vmem:[#allocation65_spill] sm:$0xff] %v33534_v28  ;;  %v12147_v31 = vld [vmem:[#allocation2 + $0x12a] sm:$0xff]  ;;  %v33555_v11 = vand.u32 4294901760, %v12465_v48  ;;  %v12485_v5 = vsub.f32 %v33508_v8, %v33537_v29  ;;  %v33568_v62 = vand.u32 4294901760, %v33540_v21  ;;  %v12150_v8 = vld [vmem:[#allocation2 + $0x152] sm:$0xff] }
 0x4dd   : > { %26337 = vmatmul.mubr.f32.gmra.mrb[10].mxu1 %v33498_v7  ;;  %v33529_v7 = vand.u32 4294901760, %v12217_v43  ;;  %39029 = vst [vmem:[#allocation8_spill] sm:$0xff] %v33537_v29  ;;  %39030 = vst [vmem:[#allocation134_spill] sm:$0xff] %v33540_v21  ;;  %v12229_v42 = vsel %vm2325_vm1, %v12147_v31, 0  ;;  %v33571_v25 = vsub.f32 %v12220_v13, %v33542_v41  ;;  %v12232_v48 = vsel %vm2325_vm1, %v12148_v58, 0  ;;  %v12155_v18 = vld [vmem:[#allocation2 + $0x18a] sm:$0xff] }
 0x4de   : > { %26339 = vmatprep.mubr.f32.mxu1 %v33500_v2  ;;  %39025 = vst [vmem:[#allocation31_spill] sm:$0xff] %v33527_v34  ;;  %v39027_v2 = vld [vmem:[#allocation35_spill] sm:$0xff]  ;;  %39031 = vst [vmem:[#allocation135_spill] sm:$0xff] %v33542_v41  ;;  %v33558_v30 = vand.u32 4294901760, %v33527_v34  ;;  %v33580_v31 = vsub.f32 %v12226_v22, %v33552_v14  ;;  %v33582_v29 = vand.u32 4294901760, %v12229_v42  ;;  %v33585_v13 = vand.u32 4294901760, %v12475_v51 }
 0x4df   : > { %25297 = vmatmul.mubr.f32.gmra.mrb[40].mxu0 %v39024_v39  ;;  %39026 = vst [vmem:[#allocation40_spill] sm:$0xff] %v33529_v7  ;;  %39032 = vst [vmem:[#allocation167_spill] sm:$0xff] %v33546_v20  ;;  %v33595_v23 = vand.u32 4294901760, %v12485_v5  ;;  %v12505_v22 = vsub.f32 %v33540_v21, %v33568_v62  ;;  %v12235_v51 = vsel %vm2325_vm1, %v12149_v3, 0  ;;  %v12152_v21 = vld [vmem:[#allocation2 + $0x16a] sm:$0xff] }
 0x4e0   : > { %25299 = vmatprep.mubr.f32.mxu0 %v39027_v2  ;;  %39033 = vst [vmem:[#allocation139_spill] sm:$0xff] %v33550_v49  ;;  %39034 = vst [vmem:[#allocation144_spill] sm:$0xff] %v33552_v14  ;;  %v12495_v58 = vsub.f32 %v33527_v34, %v33558_v30  ;;  %v33600_v14 = vand.u32 4294901760, %v33571_v25  ;;  %v12151_v34 = vld [vmem:[#allocation2 + $0x15a] sm:$0xff]  ;;  %v33610_v5 = vand.u32 4294901760, %v33580_v31  ;;  %v39055_v41 = vld [vmem:[#allocation158_spill] sm:$0xff] }
 0x4e1   : > { %26340 = vmatmul.mubr.f32.gmra.mrb[12].mxu1 %v33516_v9  ;;  %39036 = vst [vmem:[#allocation145_spill] sm:$0xff] %v33555_v11  ;;  %39037 = vst [vmem:[#allocation146_spill] sm:$0xff] %v33558_v30  ;;  %v33561_v9 = vsub.f32 %v12217_v43, %v33529_v7  ;;  %v33577_v43 = vsub.f32 %v12223_v56, %v33550_v49  ;;  %v39049_v56 = vld [vmem:[#allocation156_spill] sm:$0xff]  ;;  %v12238_v30 = vsel %vm2325_vm1, %v12150_v8, 0  ;;  %v39059_v7 = vld [vmem:[#allocation45_spill] sm:$0xff]  ;;  %v33626_v45 = vand.u32 4294901760, %v12505_v22 }
 0x4e2   : > { %26342 = vmatprep.mubr.f32.mxu1 %v33534_v28  ;;  %v39039_v28 = vld [vmem:[#allocation153_spill] sm:$0xff]  ;;  %39040 = vst [vmem:[#allocation165_spill] sm:$0xff] %v33568_v62  ;;  %39041 = vst [vmem:[#allocation138_spill] sm:$0xff] %v33571_v25  ;;  %v33613_v62 = vsub.f32 %v12229_v42, %v33582_v29  ;;  %v33616_v3 = vand.u32 4294901760, %v12495_v58  ;;  %v12525_v42 = vsub.f32 %v33571_v25, %v33600_v14  ;;  %v12241_v58 = vsel %vm2325_vm1, %v12151_v34, 0  ;;  %v39063_v25 = vld [vmem:[#allocation46_spill] sm:$0xff] }
 0x4e3   : > { %25300 = vmatmul.mubr.f32.gmra.mrb[42].mxu0 %v39035_v52  ;;  %39038 = vst [vmem:[#allocation164_spill] sm:$0xff] %v33561_v9  ;;  %39042 = vst [vmem:[#allocation21_spill] sm:$0xff] %v33577_v43  ;;  %v33607_v49 = vand.u32 4294901760, %v33577_v43  ;;  %v12545_v22 = vsub.f32 %v33580_v31, %v33610_v5 }
 0x4e4   : > { %25302 = vmatprep.mubr.f32.mxu0 %v39039_v28  ;;  %39043 = vst [vmem:[#allocation17_spill] sm:$0xff] %v33580_v31  ;;  %39044 = vst [vmem:[#allocation36_spill] sm:$0xff] %v33582_v29  ;;  %v33630_v29 = vand.u32 4294901760, %v12238_v30 }
 0x4e5   : > { %26343 = vmatmul.mubr.f32.gmra.mrb[14].mxu1 %v33546_v20  ;;  %39046 = vst [vmem:[#allocation170_spill] sm:$0xff] %v33585_v13  ;;  %v33590_v20 = vand.u32 4294901760, %v33561_v9  ;;  %39050 = vst [vmem:[#allocation143_spill] sm:$0xff] %v33595_v23 }
 0x4e6   : > { %26345 = vmatprep.mubr.f32.mxu1 %v33555_v11  ;;  %v33592_v11 = vand.u32 4294901760, %v12232_v48  ;;  %39051 = vst [vmem:[#allocation136_spill] sm:$0xff] %v33600_v14  ;;  %39052 = vst [vmem:[#allocation27_spill] sm:$0xff] %v33607_v49  ;;  %v12154_v14 = vld [vmem:[#allocation2 + $0x182] sm:$0xff] }
 0x4e7   : > { %25303 = vmatmul.mubr.f32.gmra.mrb[44].mxu0 %v39045_v0  ;;  %39047 = vst [vmem:[#allocation172_spill] sm:$0xff] %v33590_v20  ;;  %39053 = vst [vmem:[#allocation55_spill] sm:$0xff] %v33610_v5  ;;  %v12515_v8 = vsub.f32 %v33561_v9, %v33590_v20  ;;  %v12244_v20 = vsel %vm2325_vm1, %v12152_v21, 0  ;;  %v12153_v9 = vld [vmem:[#allocation2 + $0x172] sm:$0xff]  ;;  %v33658_v5 = vsub.f32 %v12238_v30, %v33630_v29 }
 0x4e8   : > { %39048 = vst [vmem:[#allocation141_spill] sm:$0xff] %v33592_v11  ;;  %25305 = vmatprep.mubr.f32.mxu0 %v39049_v56  ;;  %39054 = vst [vmem:[#allocation56_spill] sm:$0xff] %v33613_v62  ;;  %v33660_v31 = vand.u32 4294901760, %v12244_v20  ;;  %v39074_v30 = vld [vmem:[#allocation160_spill] sm:$0xff] }
 0x4e9   : > { %26346 = vmatmul.mubr.f32.gmra.mrb[16].mxu1 %v33585_v13  ;;  %39056 = vst [vmem:[#allocation60_spill] sm:$0xff] %v33616_v3  ;;  %v33621_v13 = vsub.f32 %v12232_v48, %v33592_v11  ;;  %39060 = vst [vmem:[#allocation43_spill] sm:$0xff] %v33626_v45  ;;  %v12535_v48 = vsub.f32 %v33577_v43, %v33607_v49  ;;  %v33641_v11 = vand.u32 4294901760, %v33613_v62  ;;  %v33644_v34 = vand.u32 4294901760, %v12515_v8  ;;  %v39068_v49 = vld [vmem:[#allocation159_spill] sm:$0xff] }
 0x4ea   : > { %26348 = vmatprep.mubr.f32.mxu1 %v33595_v23  ;;  %v33623_v23 = vand.u32 4294901760, %v12235_v51  ;;  %39061 = vst [vmem:[#allocation148_spill] sm:$0xff] %v33630_v29  ;;  %v33655_v43 = vand.u32 4294901760, %v12525_v42  ;;  %39070 = vst [vmem:[#allocation155_spill] sm:$0xff] %v33658_v5  ;;  %v12247_v8 = vsel %vm2325_vm1, %v12153_v9, 0 }
 0x4eb   : > { %25306 = vmatmul.mubr.f32.gmra.mrb[46].mxu0 %v39055_v41  ;;  %39057 = vst [vmem:[#allocation63_spill] sm:$0xff] %v33621_v13  ;;  %39062 = vst [vmem:[#allocation150_spill] sm:$0xff] %v33641_v11  ;;  %v12555_v42 = vsub.f32 %v33613_v62, %v33641_v11  ;;  %v33688_v11 = vsub.f32 %v12244_v20, %v33660_v31 }
 0x4ec   : > { %39058 = vst [vmem:[#allocation67_spill] sm:$0xff] %v33623_v23  ;;  %25308 = vmatprep.mubr.f32.mxu0 %v39059_v7  ;;  %39064 = vst [vmem:[#allocation151_spill] sm:$0xff] %v33644_v34  ;;  %v33650_v21 = vsub.f32 %v12235_v51, %v33623_v23  ;;  %v33666_v51 = vand.u32 4294901760, %v12535_v48  ;;  %v33668_v23 = vand.u32 4294901760, %v12545_v22  ;;  %v39078_v48 = vld [vmem:[#allocation161_spill] sm:$0xff]  ;;  %v33685_v22 = vand.u32 4294901760, %v33658_v5 }
 0x4ed   : > { %26349 = vmatmul.mubr.f32.gmra.mrb[18].mxu1 %v33616_v3  ;;  %v33647_v3 = vand.u32 4294901760, %v33621_v13  ;;  %39069 = vst [vmem:[#allocation153_spill] sm:$0xff] %v33655_v43  ;;  %39071 = vst [vmem:[#allocation156_spill] sm:$0xff] %v33660_v31 }
 0x4ee   : > { %26351 = vmatprep.mubr.f32.mxu1 %v33626_v45  ;;  %39066 = vst [vmem:[#allocation35_spill] sm:$0xff] %v33650_v21  ;;  %v33652_v45 = vand.u32 4294901760, %v12241_v58  ;;  %39072 = vst [vmem:[#allocation158_spill] sm:$0xff] %v33666_v51  ;;  %v33676_v9 = vand.u32 4294901760, %v33650_v21 }
 0x4ef   : > { %25309 = vmatmul.mubr.f32.gmra.mrb[48].mxu0 %v39063_v25  ;;  %39065 = vst [vmem:[#allocation3_spill] sm:$0xff] %v33647_v3  ;;  %v12250_v25 = vsel %vm2325_vm1, %v12154_v14, 0  ;;  %39073 = vst [vmem:[#allocation45_spill] sm:$0xff] %v33668_v23  ;;  %v12565_v29 = vsub.f32 %v33621_v13, %v33647_v3  ;;  %v12253_v3 = vsel %vm2325_vm1, %v12155_v18, 0  ;;  %v39083_v13 = vld [vmem:[#allocation162_spill] sm:$0xff]  ;;  %v39087_v18 = vld [vmem:[#allocation163_spill] sm:$0xff] }
 0x4f0   : > { %39067 = vst [vmem:[#allocation152_spill] sm:$0xff] %v33652_v45  ;;  %25311 = vmatprep.mubr.f32.mxu0 %v39068_v49  ;;  %39075 = vst [vmem:[#allocation159_spill] sm:$0xff] %v33676_v9  ;;  %v33679_v14 = vsub.f32 %v12241_v58, %v33652_v45  ;;  %v33690_v62 = vand.u32 4294901760, %v12250_v25  ;;  %v33695_v58 = vand.u32 4294901760, %v12555_v42  ;;  %v33706_v31 = vand.u32 4294901760, %v12253_v3 }
 0x4f1   : > { %26352 = vmatmul.mubr.f32.gmra.mrb[20].mxu1 %v33644_v34  ;;  %v33681_v34 = vand.u32 4294901760, %v12247_v8  ;;  %39079 = vst [vmem:[#allocation161_spill] sm:$0xff] %v33685_v22  ;;  %39080 = vst [vmem:[#allocation177_spill] sm:$0xff] %v33688_v11  ;;  %v12585_v42 = vsub.f32 %v33658_v5, %v33685_v22  ;;  %v39093_v5 = vld [vmem:[#allocation14_spill] sm:$0xff] }
 0x4f2   : > { %26354 = vmatprep.mubr.f32.mxu1 %v33655_v43  ;;  %39076 = vst [vmem:[#allocation160_spill] sm:$0xff] %v33679_v14  ;;  %39081 = vst [vmem:[#allocation178_spill] sm:$0xff] %v33690_v62  ;;  %v12575_v43 = vsub.f32 %v33650_v21, %v33676_v9  ;;  %v33701_v45 = vand.u32 4294901760, %v33679_v14  ;;  %v33717_v9 = vsub.f32 %v12250_v25, %v33690_v62 }
 0x4f3   : > { %25312 = vmatmul.mubr.f32.gmra.mrb[50].mxu0 %v39074_v30  ;;  %39077 = vst [vmem:[#allocation176_spill] sm:$0xff] %v33681_v34  ;;  %39082 = vst [vmem:[#allocation179_spill] sm:$0xff] %v33695_v58  ;;  %v33704_v20 = vsub.f32 %v12247_v8, %v33681_v34  ;;  %v39090_v8 = vld [vmem:[#allocation166_spill] sm:$0xff]  ;;  %v33730_v22 = vsub.f32 %v12253_v3, %v33706_v31  ;;  %v33733_v25 = vand.u32 4294901760, %v12585_v42  ;;  %v39097_v42 = vld [vmem:[#allocation169_spill] sm:$0xff] }
 0x4f4   : > { %25314 = vmatprep.mubr.f32.mxu0 %v39078_v48  ;;  %39084 = vst [vmem:[#allocation162_spill] sm:$0xff] %v33701_v45  ;;  %39086 = vst [vmem:[#allocation181_spill] sm:$0xff] %v33706_v31  ;;  %v33722_v21 = vand.u32 4294901760, %v12575_v43  ;;  %v39095_v43 = vld [vmem:[#allocation168_spill] sm:$0xff] }
 0x4f5   : > { %26355 = vmatmul.mubr.f32.gmra.mrb[22].mxu1 %v33666_v51  ;;  %39085 = vst [vmem:[#allocation180_spill] sm:$0xff] %v33704_v20  ;;  %v33709_v51 = vand.u32 4294901760, %v12565_v29  ;;  %v12595_v29 = vsub.f32 %v33679_v14, %v33701_v45  ;;  %v33727_v34 = vand.u32 4294901760, %v33704_v20  ;;  %39094 = vst [vmem:[#allocation14_spill] sm:$0xff] %v33733_v25  ;;  %v37792_v14 = vand.u32 4294901760, %v33730_v22 }
 0x4f6   : > { %26357 = vmatprep.mubr.f32.mxu1 %v33668_v23  ;;  %v33714_v23 = vand.u32 4294901760, %v33688_v11  ;;  %39091 = vst [vmem:[#allocation166_spill] sm:$0xff] %v33722_v21 }
 0x4f7   : > { %25315 = vmatmul.mubr.f32.gmra.mrb[52].mxu0 %v39083_v13  ;;  %39088 = vst [vmem:[#allocation163_spill] sm:$0xff] %v33709_v51  ;;  %39092 = vst [vmem:[#allocation183_spill] sm:$0xff] %v33727_v34  ;;  %v33741_v45 = vand.u32 4294901760, %v12595_v29  ;;  %v12615_v3 = vsub.f32 %v33704_v20, %v33727_v34  ;;  %v12635_v34 = vsub.f32 %v33730_v22, %v37792_v14  ;;  %v39101_v20 = vld [vmem:[#allocation173_spill] sm:$0xff] }
 0x4f8   : > { %25317 = vmatprep.mubr.f32.mxu0 %v39087_v18  ;;  %39089 = vst [vmem:[#allocation182_spill] sm:$0xff] %v33714_v23 }
 0x4f9   : > { %26358 = vmatmul.mubr.f32.gmra.mrb[24].mxu1 %v33695_v58  ;;  %v37789_v58 = vand.u32 4294901760, %v33717_v9  ;;  %39096 = vst [vmem:[#allocation168_spill] sm:$0xff] %v33741_v45  ;;  %v33755_v29 = vand.u32 4294901760, %v12615_v3  ;;  %v39104_v3 = vld [vmem:[#allocation175_spill] sm:$0xff] }
 0x4fa   : > { %26360 = vmatprep.mubr.f32.mxu1 %v33709_v51  ;;  %v12605_v51 = vsub.f32 %v33688_v11, %v33714_v23 }
 0x4fb   : > { %25318 = vmatmul.mubr.f32.gmra.mrb[54].mxu0 %v39090_v8  ;;  %v12625_v23 = vsub.f32 %v33717_v9, %v37789_v58  ;;  %v12636_v58 = vand.u32 4294901760, %v12635_v34 }
 0x4fc   : > { %25320 = vmatprep.mubr.f32.mxu0 %v39093_v5  ;;  %v33747_v31 = vand.u32 4294901760, %v12605_v51 }
 0x4fd   : > { %26361 = vmatmul.mubr.f32.gmra.mrb[26].mxu1 %v33722_v21  ;;  %v12626_v51 = vand.u32 4294901760, %v12625_v23  ;;  %v39102_v21 = vld [vmem:[#allocation174_spill] sm:$0xff]  ;;  %v39106_v23 = vand.u32 4294901760, %v33372_v16 }
 0x4fe   : > { %26363 = vmatprep.mubr.f32.mxu1 %v33733_v25  ;;  %39098 = vst [vmem:[#allocation169_spill] sm:$0xff] %v33747_v31  ;;  %v39099_v25 = vld [vmem:[#allocation171_spill] sm:$0xff] }
 0x4ff   : > { %25321 = vmatmul.mubr.f32.gmra.mrb[56].mxu0 %v39095_v43  ;;  %39100 = vst [vmem:[#allocation171_spill] sm:$0xff] %v33755_v29 }
 0x500   : > { %25323 = vmatprep.mubr.f32.mxu0 %v39097_v42 }
 0x501   : > { %26364 = vmatmul.mubr.f32.gmra.mrb[28].mxu1 %v33741_v45  ;;  %v39103_v45 = vld [vmem:[#allocation137_spill] sm:$0xff] }
 0x502   : > { %26366 = vmatprep.mubr.f32.mxu1 %v33747_v31  ;;  %v39105_v31 = vand.u32 4294901760, %v33367_v4 }
 0x503   : > { %25324 = vmatmul.mubr.f32.gmra.mrb[58].mxu0 %v39099_v25 }
 0x504   : > { %25326 = vmatprep.mubr.f32.mxu0 %v39101_v20  ;;  %v33769_v14 = vsub.f32 %v33367_v4, %v39105_v31 }
 0x505   : > { %26367 = vmatmul.mubr.f32.gmra.mrb[30].mxu1 %v33755_v29  ;;  %v33774_v29 = vsub.f32 %v33372_v16, %v39106_v23  ;;  %v39123_v23 = vld [vmem:[#allocation181_spill] sm:$0xff] }
 0x506   : > { %26369 = vmatprep.mubr.f32.mxu1 %v12626_v51  ;;  %v37797_v34 = vand.u32 4294901760, %v33769_v14  ;;  %v39122_v51 = vld [vmem:[#allocation176_spill] sm:$0xff] }
 0x507   : > { %25327 = vmatmul.mubr.f32.gmra.mrb[60].mxu0 %v39102_v21 }
 0x508   : > { %25329 = vmatprep.mubr.f32.mxu0 %v39103_v45  ;;  %v6781_v4 = vsub.f32 %v33769_v14, %v37797_v34  ;;  %v39151_v34 = vld [vmem:[#allocation66_spill] sm:$0xff] }
 0x509   : > { %26370 = vmatmul.mubr.f32.gmra.mrb[0].mxu1 %v12636_v58  ;;  %v37796_v58 = vand.u32 4294901760, %v33774_v29 }
 0x50a   : > { %26376 = vmatprep.mubr.f32.mxu1 %v33243_v19 }
 0x50b   : > { %25330 = vmatmul.mubr.f32.gmra.mrb[62].mxu0 %v39104_v3  ;;  %v6788_v16 = vsub.f32 %v33774_v29, %v37796_v58  ;;  %v39148_v58 = vld [vmem:[#allocation10_spill] sm:$0xff] }
 0x50c   : > { %25336 = vmatprep.mubr.f32.mxu0 %v38985_v26  ;;  %v6782_v26 = vand.u32 4294901760, %v6781_v4 }
 0x50d   : > { %26377 = vmatmul.mubr.f32.vlgmr.msra.gmra.mrb[2].mxu1 %v33251_v24 }
 0x50e   : > { %26379 = vmatprep.mubr.f32.mxu1 %v33253_v50  ;;  %28107 = vmatpush3.bf16.msra.mxu1 %v33173_v63  ;;  %v6789_v63 = vand.u32 4294901760, %v6788_v16  ;;  %v39125_v16 = vld [vmem:[#allocation30_spill] sm:$0xff] }
 0x50f   : > { %25337 = vmatmul.mubr.f32.vlgmr.msra.gmra.mrb[32].mxu0 %v38990_v10  ;;  %28109 = vmatprep.subr.bf16.mxu1 %v33076_v27 }
 0x510   : > { %25339 = vmatprep.mubr.f32.mxu0 %v38993_v47  ;;  %28027 = vmatpush3.bf16.msra.mxu0 %v33400_v15  ;;  %v33795_v10 = vpack.c.bf16 %v6789_v63, %v6782_v26  ;;  %v39112_v47 = vld [vmem:[#allocation139_spill] sm:$0xff]  ;;  %v39126_v26 = vand.u32 4294901760, %v39125_v16  ;;  %v39127_v63 = vld [vmem:[#allocation140_spill] sm:$0xff] }
 0x511   : > { %26380 = vmatmul.mubr.f32.gmra.mrb[4].mxu1 %v33265_v17  ;;  %v39137_v16 = vld [vmem:[#allocation19_spill] sm:$0xff] }
 0x512   : > { %26382 = vmatprep.mubr.f32.mxu1 %v33279_v40  ;;  %28029 = vmatprep.subr.bf16.mxu0 %v33795_v10 }
 0x513   : > { %25340 = vmatmul.mubr.f32.gmra.mrb[34].mxu0 %v38997_v36  ;;  %v6260_v36 = vld [vmem:[#allocation2 + $0xa] sm:$0xff] }
 0x514   : > { %25342 = vmatprep.mubr.f32.mxu0 %v39001_v33  ;;  %v39109_v33 = vld [vmem:[#allocation46_spill] sm:$0xff] }
 0x515   : > { %26383 = vmatmul.mubr.f32.gmra.mrb[6].mxu1 %v33296_v6 }
 0x516   : > { %26385 = vmatprep.mubr.f32.mxu1 %v33308_v35 }
 0x517   : > { %25343 = vmatmul.mubr.f32.gmra.mrb[36].mxu0 %v39007_v32  ;;  %v39107_v32 = vld [vmem:[#allocation49_spill] sm:$0xff] }
 0x518   : > { %25345 = vmatprep.mubr.f32.mxu0 %v39009_v46  ;;  %v39113_v46 = vld [vmem:[#allocation144_spill] sm:$0xff] }
 0x519   : > { %26386 = vmatmul.mubr.f32.gmra.mrb[8].mxu1 %v33323_v61 }
 0x51a   : > { %26388 = vmatprep.mubr.f32.mxu1 %v33337_v53 }
 0x51b   : > { %25346 = vmatmul.mubr.f32.gmra.mrb[38].mxu0 %v39015_v60  ;;  %v6259_v60 = vld [vmem:[#allocation2 + $0x2] sm:$0xff] }
 0x51c   : > { %25348 = vmatprep.mubr.f32.mxu0 %v39019_v12  ;;  %v39110_v12 = vld [vmem:[#allocation40_spill] sm:$0xff] }
 0x51d   : > { %26389 = vmatmul.mubr.f32.gmra.mrb[10].mxu1 %v33359_v59 }
 0x51e   : > { %26391 = vmatprep.mubr.f32.mxu1 %v33361_v1 }
 0x51f   : > { %25349 = vmatmul.mubr.f32.gmra.mrb[40].mxu0 %v39024_v39  ;;  %v39116_v39 = vld [vmem:[#allocation141_spill] sm:$0xff] }
 0x520   : > { %25351 = vmatprep.mubr.f32.mxu0 %v39027_v2  ;;  %v39115_v2 = vld [vmem:[#allocation36_spill] sm:$0xff] }
 0x521   : > { %26392 = vmatmul.mubr.f32.gmra.mrb[12].mxu1 %v33394_v55 }
 0x522   : > { %26394 = vmatprep.mubr.f32.mxu1 %v33420_v44 }
 0x523   : > { %25352 = vmatmul.mubr.f32.gmra.mrb[42].mxu0 %v39035_v52  ;;  %v39108_v52 = vld [vmem:[#allocation23_spill] sm:$0xff] }
 0x524   : > { %25354 = vmatprep.mubr.f32.mxu0 %v39039_v28  ;;  %v6298_v28 = vsel %vm2325_vm1, %v6260_v36, 0  ;;  %v39132_v36 = vld [vmem:[#allocation25_spill] sm:$0xff] }
 0x525   : > { %26395 = vmatmul.mubr.f32.gmra.mrb[14].mxu1 %v33431_v54 }
 0x526   : > { %26397 = vmatprep.mubr.f32.mxu1 %v33433_v57 }
 0x527   : > { %25355 = vmatmul.mubr.f32.gmra.mrb[44].mxu0 %v39045_v0  ;;  %v39111_v0 = vld [vmem:[#allocation135_spill] sm:$0xff] }
 0x528   : > { %25357 = vmatprep.mubr.f32.mxu0 %v39049_v56  ;;  %v39119_v56 = vld [vmem:[#allocation148_spill] sm:$0xff] }
 0x529   : > { %26398 = vmatmul.mubr.f32.gmra.mrb[16].mxu1 %v33465_v37 }
 0x52a   : > { %26400 = vmatprep.mubr.f32.mxu1 %v33480_v38 }
 0x52b   : > { %25358 = vmatmul.mubr.f32.gmra.mrb[46].mxu0 %v39055_v41 }
 0x52c   : > { %25360 = vmatprep.mubr.f32.mxu0 %v39059_v7  ;;  %v6295_v7 = vsel %vm2325_vm1, %v6259_v60, 0 }
 0x52d   : > { %26401 = vmatmul.mubr.f32.gmra.mrb[18].mxu1 %v39107_v32  ;;  %v33836_v41 = vand.u32 4294901760, %v6295_v7 }
 0x52e   : > { %26403 = vmatprep.mubr.f32.mxu1 %v39108_v52 }
 0x52f   : > { %25361 = vmatmul.mubr.f32.gmra.mrb[48].mxu0 %v39109_v33  ;;  %39114 = vst [vmem:[#allocation173_spill] sm:$0xff] %v33836_v41  ;;  %v33846_v31 = vsub.f32 %v6295_v7, %v33836_v41  ;;  %v39128_v33 = vand.u32 4294901760, %v39127_v63  ;;  %v39130_v7 = vld [vmem:[#allocation47_spill] sm:$0xff] }
 0x530   : > { %25363 = vmatprep.mubr.f32.mxu0 %v39068_v49  ;;  %v33842_v49 = vand.u32 4294901760, %v6298_v28  ;;  %v39140_v63 = vld [vmem:[#allocation39_spill] sm:$0xff] }
 0x531   : > { %26404 = vmatmul.mubr.f32.gmra.mrb[20].mxu1 %v39110_v12  ;;  %v33878_v60 = vpack.c.bf16 %v39128_v33, %v39126_v26  ;;  %v39139_v26 = vld [vmem:[#allocation38_spill] sm:$0xff]  ;;  %v39142_v33 = vld [vmem:[#allocation29_spill] sm:$0xff] }
 0x532   : > { %26406 = vmatprep.mubr.f32.mxu1 %v39111_v0  ;;  %39117 = vst [vmem:[#allocation174_spill] sm:$0xff] %v33842_v49 }
 0x533   : > { %25364 = vmatmul.mubr.f32.gmra.mrb[50].mxu0 %v39074_v30  ;;  %v33852_v30 = vsub.f32 %v6298_v28, %v33842_v49  ;;  %v39133_v28 = vld [vmem:[#allocation20_spill] sm:$0xff] }
 0x534   : > { %25366 = vmatprep.mubr.f32.mxu0 %v39078_v48  ;;  %v37795_v48 = vand.u32 4294901760, %v33846_v31 }
 0x535   : > { %26407 = vmatmul.mubr.f32.gmra.mrb[22].mxu1 %v39112_v47 }
 0x536   : > { %26409 = vmatprep.mubr.f32.mxu1 %v39113_v46 }
 0x537   : > { %25367 = vmatmul.mubr.f32.gmra.mrb[52].mxu0 %v39083_v13  ;;  %v39118_v13 = vld [vmem:[#allocation67_spill] sm:$0xff] }
 0x538   : > { %25369 = vmatprep.mubr.f32.mxu0 %v39087_v18  ;;  %v39120_v18 = vld [vmem:[#allocation152_spill] sm:$0xff] }
 0x539   : > { %26410 = vmatmul.mubr.f32.gmra.mrb[24].mxu1 %v39115_v2 }
 0x53a   : > { %26412 = vmatprep.mubr.f32.mxu1 %v39116_v39 }
 0x53b   : > { %25370 = vmatmul.mubr.f32.gmra.mrb[54].mxu0 %v39090_v8  ;;  %v39121_v8 = vld [vmem:[#allocation156_spill] sm:$0xff] }
 0x53c   : > { %25372 = vmatprep.mubr.f32.mxu0 %v39093_v5  ;;  %v37794_v5 = vand.u32 4294901760, %v33852_v30 }
 0x53d   : > { %26413 = vmatmul.mubr.f32.gmra.mrb[26].mxu1 %v39118_v13 }
 0x53e   : > { %26415 = vmatprep.mubr.f32.mxu1 %v39119_v56 }
 0x53f   : > { %25373 = vmatmul.mubr.f32.gmra.mrb[56].mxu0 %v39095_v43  ;;  %v6460_v43 = vsub.f32 %v33846_v31, %v37795_v48  ;;  %v39147_v48 = vld [vmem:[#allocation58_spill] sm:$0xff] }
 0x540   : > { %25375 = vmatprep.mubr.f32.mxu0 %v39097_v42  ;;  %v6470_v42 = vsub.f32 %v33852_v30, %v37794_v5  ;;  %v39144_v5 = vld [vmem:[#allocation149_spill] sm:$0xff] }
 0x541   : > { %26416 = vmatmul.mubr.f32.gmra.mrb[28].mxu1 %v39120_v18 }
 0x542   : > { %26418 = vmatprep.mubr.f32.mxu1 %v39121_v8  ;;  %v6471_v4 = vand.u32 4294901760, %v6470_v42  ;;  %v39135_v42 = vld [vmem:[#allocation68_spill] sm:$0xff] }
 0x543   : > { %25376 = vmatmul.mubr.f32.gmra.mrb[58].mxu0 %v39099_v25  ;;  %v6461_v25 = vand.u32 4294901760, %v6460_v43  ;;  %v39134_v43 = vld [vmem:[#allocation64_spill] sm:$0xff] }
 0x544   : > { %25378 = vmatprep.mubr.f32.mxu0 %v39101_v20  ;;  %v39124_v20 = vld [vmem:[#allocation142_spill] sm:$0xff] }
 0x545   : > { %26419 = vmatmul.mubr.f32.gmra.mrb[30].mxu1 %v39122_v51 }
 0x546   : > { %26421 = vmatprep.mubr.f32.mxu1 %v33690_v62  ;;  %v39155_v62 = vld [vmem:[#allocation65_spill] sm:$0xff] }
 0x547   : > { %25379 = vmatmul.mubr.f32.gmra.mrb[60].mxu0 %v39102_v21  ;;  %v33882_v21 = vpack.c.bf16 %v33774_v29, %v33769_v14 }
 0x548   : > { %25381 = vmatprep.mubr.f32.mxu0 %v39103_v45  ;;  %v39129_v45 = vld [vmem:[#allocation44_spill] sm:$0xff] }
 0x549   : > { %26422 = vmatmul.mubr.f32.gmra.mrb[0].mxu1 %v39123_v23  ;;  %v39152_v23 = vld [vmem:[#allocation50_spill] sm:$0xff] }
 0x54a   : > { %26428 = vmatprep.mubr.f32.mxu1 %v39124_v20 }
 0x54b   : > { %25382 = vmatmul.mubr.f32.gmra.mrb[62].mxu0 %v39104_v3  ;;  %v39131_v3 = vld [vmem:[#allocation51_spill] sm:$0xff] }
 0x54c   : > { %25388 = vmatprep.mubr.f32.mxu0 %v6461_v25  ;;  %v39136_v25 = vld [vmem:[#allocation59_spill] sm:$0xff] }
 0x54d   : > { %26429 = vmatmul.mubr.f32.vlgmr.msra.gmra.mrb[2].mxu1 %v39129_v45 }
 0x54e   : > { %26431 = vmatprep.mubr.f32.mxu1 %v39130_v7  ;;  %28111 = vmatpush3.bf16.msra.mxu1 %v33076_v27 }
 0x54f   : > { %25389 = vmatmul.mubr.f32.vlgmr.msra.gmra.mrb[32].mxu0 %v6471_v4  ;;  %28113 = vmatprep.subr.bf16.mxu1 %v33878_v60  ;;  %v39138_v4 = vld [vmem:[#allocation7_spill] sm:$0xff] }
 0x550   : > { %25391 = vmatprep.mubr.f32.mxu0 %v39131_v3  ;;  %28031 = vmatpush3.bf16.msra.mxu0 %v33795_v10  ;;  %v39141_v10 = vld [vmem:[#allocation147_spill] sm:$0xff]  ;;  %v39143_v3 = vld [vmem:[#allocation4_spill] sm:$0xff] }
 0x551   : > { %26432 = vmatmul.mubr.f32.gmra.mrb[4].mxu1 %v39132_v36  ;;  %28033 = vmatprep.subr.bf16.mxu0 %v33882_v21 }
 0x552   : > { %26434 = vmatprep.mubr.f32.mxu1 %v39133_v28 }
 0x553   : > { %25392 = vmatmul.mubr.f32.gmra.mrb[34].mxu0 %v39134_v43  ;;  %v39145_v43 = vld [vmem:[#allocation22_spill] sm:$0xff] }
 0x554   : > { %25394 = vmatprep.mubr.f32.mxu0 %v39135_v42  ;;  %v39146_v42 = vld [vmem:[#allocation32_spill] sm:$0xff] }
 0x555   : > { %26435 = vmatmul.mubr.f32.gmra.mrb[6].mxu1 %v39136_v25 }
 0x556   : > { %26437 = vmatprep.mubr.f32.mxu1 %v39137_v16 }
 0x557   : > { %25395 = vmatmul.mubr.f32.gmra.mrb[36].mxu0 %v39138_v4  ;;  %v39149_v4 = vld [vmem:[#allocation26_spill] sm:$0xff] }
 0x558   : > { %25397 = vmatprep.mubr.f32.mxu0 %v39139_v26  ;;  %v39150_v26 = vld [vmem:[#allocation6_spill] sm:$0xff] }
 0x559   : > { %26438 = vmatmul.mubr.f32.gmra.mrb[8].mxu1 %v39140_v63 }
 0x55a   : > { %26440 = vmatprep.mubr.f32.mxu1 %v39141_v10 }
 0x55b   : > { %25398 = vmatmul.mubr.f32.gmra.mrb[38].mxu0 %v39142_v33  ;;  %v39153_v33 = vld [vmem:[#allocation154_spill] sm:$0xff] }
 0x55c   : > { %25400 = vmatprep.mubr.f32.mxu0 %v39143_v3  ;;  %v39154_v3 = vld [vmem:[#allocation53_spill] sm:$0xff] }
 0x55d   : > { %26441 = vmatmul.mubr.f32.gmra.mrb[10].mxu1 %v39144_v5 }
 0x55e   : > { %26443 = vmatprep.mubr.f32.mxu1 %v39145_v43  ;;  %v39156_v43 = vld [vmem:[#allocation9_spill] sm:$0xff] }
 0x55f   : > { %25401 = vmatmul.mubr.f32.gmra.mrb[40].mxu0 %v39146_v42  ;;  %v39157_v42 = vld [vmem:[#allocation18_spill] sm:$0xff] }
 0x560   : > { %25403 = vmatprep.mubr.f32.mxu0 %v39147_v48  ;;  %v39158_v48 = vld [vmem:[#allocation167_spill] sm:$0xff] }
 0x561   : > { %26444 = vmatmul.mubr.f32.gmra.mrb[12].mxu1 %v39148_v58  ;;  %v39159_v58 = vld [vmem:[#allocation145_spill] sm:$0xff] }
 0x562   : > { %26446 = vmatprep.mubr.f32.mxu1 %v39149_v4  ;;  %v39160_v4 = vld [vmem:[#allocation31_spill] sm:$0xff] }
 0x563   : > { %25404 = vmatmul.mubr.f32.gmra.mrb[42].mxu0 %v39150_v26  ;;  %v39161_v26 = vld [vmem:[#allocation134_spill] sm:$0xff] }
 0x564   : > { %25406 = vmatprep.mubr.f32.mxu0 %v39151_v34  ;;  %v39162_v34 = vld [vmem:[#allocation170_spill] sm:$0xff] }
 0x565   : > { %26447 = vmatmul.mubr.f32.gmra.mrb[14].mxu1 %v39152_v23  ;;  %v39163_v23 = vld [vmem:[#allocation143_spill] sm:$0xff] }
 0x566   : > { %26449 = vmatprep.mubr.f32.mxu1 %v39153_v33  ;;  %v39164_v33 = vld [vmem:[#allocation164_spill] sm:$0xff] }
 0x567   : > { %25407 = vmatmul.mubr.f32.gmra.mrb[44].mxu0 %v39154_v3  ;;  %v39165_v3 = vld [vmem:[#allocation138_spill] sm:$0xff] }
 0x568   : > { %25409 = vmatprep.mubr.f32.mxu0 %v39155_v62  ;;  %v39166_v62 = vld [vmem:[#allocation60_spill] sm:$0xff] }
 0x569   : > { %26450 = vmatmul.mubr.f32.gmra.mrb[16].mxu1 %v39156_v43  ;;  %v39167_v43 = vld [vmem:[#allocation43_spill] sm:$0xff] }
 0x56a   : > { %26452 = vmatprep.mubr.f32.mxu1 %v39157_v42  ;;  %v39168_v42 = vld [vmem:[#allocation21_spill] sm:$0xff] }
 0x56b   : > { %25410 = vmatmul.mubr.f32.gmra.mrb[46].mxu0 %v39158_v48  ;;  %v39169_v48 = vld [vmem:[#allocation17_spill] sm:$0xff] }
 0x56c   : > { %25412 = vmatprep.mubr.f32.mxu0 %v39159_v58  ;;  %v39170_v58 = vld [vmem:[#allocation151_spill] sm:$0xff] }
 0x56d   : > { %26453 = vmatmul.mubr.f32.gmra.mrb[18].mxu1 %v39160_v4  ;;  %v39171_v4 = vld [vmem:[#allocation153_spill] sm:$0xff] }
 0x56e   : > { %26455 = vmatprep.mubr.f32.mxu1 %v39161_v26  ;;  %v39172_v26 = vld [vmem:[#allocation56_spill] sm:$0xff] }
 0x56f   : > { %25413 = vmatmul.mubr.f32.gmra.mrb[48].mxu0 %v39162_v34  ;;  %v39173_v34 = vld [vmem:[#allocation63_spill] sm:$0xff] }
 0x570   : > { %25415 = vmatprep.mubr.f32.mxu0 %v39163_v23  ;;  %v39174_v23 = vld [vmem:[#allocation158_spill] sm:$0xff] }
 0x571   : > { %26456 = vmatmul.mubr.f32.gmra.mrb[20].mxu1 %v39164_v33  ;;  %v39175_v33 = vld [vmem:[#allocation45_spill] sm:$0xff] }
 0x572   : > { %26458 = vmatprep.mubr.f32.mxu1 %v39165_v3  ;;  %v39176_v3 = vld [vmem:[#allocation35_spill] sm:$0xff] }
 0x573   : > { %25416 = vmatmul.mubr.f32.gmra.mrb[50].mxu0 %v39166_v62  ;;  %v39177_v62 = vld [vmem:[#allocation155_spill] sm:$0xff] }
 0x574   : > { %25418 = vmatprep.mubr.f32.mxu0 %v39167_v43  ;;  %v39178_v43 = vld [vmem:[#allocation179_spill] sm:$0xff] }
 0x575   : > { %26459 = vmatmul.mubr.f32.gmra.mrb[22].mxu1 %v39168_v42  ;;  %v39179_v42 = vld [vmem:[#allocation163_spill] sm:$0xff] }
 0x576   : > { %26461 = vmatprep.mubr.f32.mxu1 %v39169_v48  ;;  %v39180_v48 = vld [vmem:[#allocation160_spill] sm:$0xff] }
 0x577   : > { %25419 = vmatmul.mubr.f32.gmra.mrb[52].mxu0 %v39170_v58  ;;  %v39182_v58 = vld [vmem:[#allocation14_spill] sm:$0xff] }
 0x578   : > { %25421 = vmatprep.mubr.f32.mxu0 %v39171_v4  ;;  %v39181_v4 = vld [vmem:[#allocation166_spill] sm:$0xff] }
 0x579   : > { %26462 = vmatmul.mubr.f32.gmra.mrb[24].mxu1 %v39172_v26 }
 0x57a   : > { %26464 = vmatprep.mubr.f32.mxu1 %v39173_v34  ;;  %v39183_v34 = vld [vmem:[#allocation180_spill] sm:$0xff] }
 0x57b   : > { %25422 = vmatmul.mubr.f32.gmra.mrb[54].mxu0 %v39174_v23  ;;  %v39185_v23 = vld [vmem:[#allocation169_spill] sm:$0xff] }
 0x57c   : > { %25424 = vmatprep.mubr.f32.mxu0 %v39175_v33  ;;  %v39184_v33 = vld [vmem:[#allocation168_spill] sm:$0xff] }
 0x57d   : > { %26465 = vmatmul.mubr.f32.gmra.mrb[26].mxu1 %v39176_v3 }
 0x57e   : > { %26467 = vmatprep.mubr.f32.mxu1 %v39177_v62 }
 0x57f   : > { %25425 = vmatmul.mubr.f32.gmra.mrb[56].mxu0 %v39178_v43  ;;  %v39186_v43 = vld [vmem:[#allocation48_spill] sm:$0xff] }
 0x580   : > { %25427 = vmatprep.mubr.f32.mxu0 %v39179_v42  ;;  %v39187_v42 = vld [vmem:[#allocation171_spill] sm:$0xff] }
 0x581   : > { %26468 = vmatmul.mubr.f32.gmra.mrb[28].mxu1 %v39180_v48 }
 0x582   : > { %26470 = vmatprep.mubr.f32.mxu1 %v33688_v11  ;;  %v39188_v11 = vld [vmem:[#allocation34_spill] sm:$0xff] }
 0x583   : > { %25428 = vmatmul.mubr.f32.gmra.mrb[58].mxu0 %v39181_v4  ;;  %v39189_v4 = vld [vmem:[#allocation41_spill] sm:$0xff] }
 0x584   : > { %25430 = vmatprep.mubr.f32.mxu0 %v39182_v58  ;;  %v39190_v58 = vld [vmem:[#allocation16_spill] sm:$0xff] }
 0x585   : > { %26471 = vmatmul.mubr.f32.gmra.mrb[30].mxu1 %v39183_v34 }
 0x586   : > { %26473 = vmatprep.mubr.f32.mxu1 %v33717_v9 }
 0x587   : > { %25431 = vmatmul.mubr.f32.gmra.mrb[60].mxu0 %v39184_v33  ;;  %v39191_v33 = vld [vmem:[#allocation52_spill] sm:$0xff] }
 0x588   : > { %25433 = vmatprep.mubr.f32.mxu0 %v39185_v23  ;;  %v39192_v23 = vld [vmem:[#allocation28_spill] sm:$0xff] }
 0x589   : > { %26474 = vmatmul.mubr.f32.gmra.mrb[0].mxu1 %v33730_v22 }
 0x58a   : > { %26480 = vmatprep.mubr.f32.mxu1 %v39186_v43 }
 0x58b   : > { %25434 = vmatmul.mubr.f32.gmra.mrb[62].mxu0 %v39187_v42  ;;  %v39194_v42 = vld [vmem:[#allocation24_spill] sm:$0xff] }
 0x58c   : > { %25440 = vmatprep.mubr.f32.mxu0 %v33836_v41  ;;  %v39197_v41 = vld [vmem:[#allocation57_spill] sm:$0xff] }
 0x58d   : > { %26481 = vmatmul.mubr.f32.vlgmr.msra.gmra.mrb[2].mxu1 %v39188_v11 }
 0x58e   : > { %26483 = vmatprep.mubr.f32.mxu1 %v39189_v4  ;;  %28115 = vmatpush3.bf16.msra.mxu1 %v33878_v60  ;;  %v39193_v60 = vld [vmem:[#allocation37_spill] sm:$0xff] }
 0x58f   : > { %25441 = vmatmul.mubr.f32.vlgmr.msra.gmra.mrb[32].mxu0 %v33842_v49  ;;  %28117 = vmatprep.subr.bf16.mxu1 %v33076_v27  ;;  %v39196_v49 = vld [vmem:[#allocation54_spill] sm:$0xff] }
 0x590   : > { %25443 = vmatprep.mubr.f32.mxu0 %v33243_v19  ;;  %28035 = vmatpush3.bf16.msra.mxu0 %v33882_v21  ;;  %v39195_v21 = vld [vmem:[#allocation42_spill] sm:$0xff] }
 0x591   : > { %26484 = vmatmul.mubr.f32.gmra.mrb[4].mxu1 %v39190_v58  ;;  %28037 = vmatprep.subr.bf16.mxu0 %v33400_v15 }
 0x592   : > { %26486 = vmatprep.mubr.f32.mxu1 %v39191_v33  ;;  %v39218_v33 = vand.u32 4294901760, %v33730_v22  ;;  %v39223_v22 = vld [vmem:[#allocation26_spill] sm:$0xff] }
 0x593   : > { %25444 = vmatmul.mubr.f32.gmra.mrb[34].mxu0 %v33251_v24 }
 0x594   : > { %25446 = vmatprep.mubr.f32.mxu0 %v33253_v50 }
 0x595   : > { %26487 = vmatmul.mubr.f32.gmra.mrb[6].mxu1 %v39192_v23  ;;  %v39199_v23 = vld [vmem:[#allocation61_spill] sm:$0xff] }
 0x596   : > { %26489 = vmatprep.mubr.f32.mxu1 %v39193_v60  ;;  %v39198_v60 = vld [vmem:[#allocation70_spill] sm:$0xff] }
 0x597   : > { %25447 = vmatmul.mubr.f32.gmra.mrb[36].mxu0 %v33265_v17 }
 0x598   : > { %25449 = vmatprep.mubr.f32.mxu0 %v33279_v40 }
 0x599   : > { %26490 = vmatmul.mubr.f32.gmra.mrb[8].mxu1 %v39194_v42  ;;  %v39201_v42 = vld [vmem:[#allocation157_spill] sm:$0xff] }
 0x59a   : > { %26492 = vmatprep.mubr.f32.mxu1 %v39195_v21  ;;  %v39200_v21 = vld [vmem:[#allocation33_spill] sm:$0xff] }
 0x59b   : > { %25450 = vmatmul.mubr.f32.gmra.mrb[38].mxu0 %v33296_v6 }
 0x59c   : > { %25452 = vmatprep.mubr.f32.mxu0 %v33308_v35 }
 0x59d   : > { %26493 = vmatmul.mubr.f32.gmra.mrb[10].mxu1 %v39196_v49  ;;  %v39203_v49 = vld [vmem:[#allocation8_spill] sm:$0xff] }
 0x59e   : > { %26495 = vmatprep.mubr.f32.mxu1 %v39197_v41  ;;  %v39202_v41 = vld [vmem:[#allocation62_spill] sm:$0xff] }
 0x59f   : > { %25453 = vmatmul.mubr.f32.gmra.mrb[40].mxu0 %v33323_v61 }
 0x5a0   : > { %25455 = vmatprep.mubr.f32.mxu0 %v33337_v53 }
 0x5a1   : > { %26496 = vmatmul.mubr.f32.gmra.mrb[12].mxu1 %v39198_v60  ;;  %v39205_v60 = vld [vmem:[#allocation165_spill] sm:$0xff] }
 0x5a2   : > { %26498 = vmatprep.mubr.f32.mxu1 %v39199_v23  ;;  %v39204_v23 = vld [vmem:[#allocation146_spill] sm:$0xff] }
 0x5a3   : > { %25456 = vmatmul.mubr.f32.gmra.mrb[42].mxu0 %v33359_v59 }
 0x5a4   : > { %25458 = vmatprep.mubr.f32.mxu0 %v33361_v1 }
 0x5a5   : > { %26499 = vmatmul.mubr.f32.gmra.mrb[14].mxu1 %v39200_v21  ;;  %v39207_v21 = vld [vmem:[#allocation136_spill] sm:$0xff] }
 0x5a6   : > { %26501 = vmatprep.mubr.f32.mxu1 %v39201_v42  ;;  %v39206_v42 = vld [vmem:[#allocation172_spill] sm:$0xff] }
 0x5a7   : > { %25459 = vmatmul.mubr.f32.gmra.mrb[44].mxu0 %v33394_v55 }
 0x5a8   : > { %25461 = vmatprep.mubr.f32.mxu0 %v33420_v44 }
 0x5a9   : > { %26502 = vmatmul.mubr.f32.gmra.mrb[16].mxu1 %v39202_v41  ;;  %v39209_v41 = vld [vmem:[#allocation55_spill] sm:$0xff] }
 0x5aa   : > { %26504 = vmatprep.mubr.f32.mxu1 %v39203_v49  ;;  %v39208_v49 = vld [vmem:[#allocation27_spill] sm:$0xff] }
 0x5ab   : > { %25462 = vmatmul.mubr.f32.gmra.mrb[46].mxu0 %v33431_v54 }
 0x5ac   : > { %25464 = vmatprep.mubr.f32.mxu0 %v33433_v57 }
 0x5ad   : > { %26505 = vmatmul.mubr.f32.gmra.mrb[18].mxu1 %v39204_v23  ;;  %v39211_v23 = vld [vmem:[#allocation3_spill] sm:$0xff] }
 0x5ae   : > { %26507 = vmatprep.mubr.f32.mxu1 %v39205_v60  ;;  %v39210_v60 = vld [vmem:[#allocation150_spill] sm:$0xff] }
 0x5af   : > { %25465 = vmatmul.mubr.f32.gmra.mrb[48].mxu0 %v33465_v37 }
 0x5b0   : > { %25467 = vmatprep.mubr.f32.mxu0 %v33480_v38 }
 0x5b1   : > { %26508 = vmatmul.mubr.f32.gmra.mrb[20].mxu1 %v39206_v42  ;;  %v39213_v42 = vld [vmem:[#allocation161_spill] sm:$0xff] }
 0x5b2   : > { %26510 = vmatprep.mubr.f32.mxu1 %v39207_v21  ;;  %v39212_v21 = vld [vmem:[#allocation159_spill] sm:$0xff] }
 0x5b3   : > { %25468 = vmatmul.mubr.f32.gmra.mrb[50].mxu0 %v39107_v32 }
 0x5b4   : > { %25470 = vmatprep.mubr.f32.mxu0 %v39108_v52 }
 0x5b5   : > { %26511 = vmatmul.mubr.f32.gmra.mrb[22].mxu1 %v39208_v49  ;;  %v39215_v49 = vld [vmem:[#allocation182_spill] sm:$0xff] }
 0x5b6   : > { %26513 = vmatprep.mubr.f32.mxu1 %v39209_v41  ;;  %v39214_v41 = vld [vmem:[#allocation162_spill] sm:$0xff] }
 0x5b7   : > { %25471 = vmatmul.mubr.f32.gmra.mrb[52].mxu0 %v39110_v12 }
 0x5b8   : > { %25473 = vmatprep.mubr.f32.mxu0 %v39111_v0 }
 0x5b9   : > { %26514 = vmatmul.mubr.f32.gmra.mrb[24].mxu1 %v39210_v60 }
 0x5ba   : > { %26516 = vmatprep.mubr.f32.mxu1 %v39211_v23  ;;  %v34014_v23 = vld [vmem:[%s36912_s3 + $0x60] sm:$0xff] }
 0x5bb   : > { %25474 = vmatmul.mubr.f32.gmra.mrb[54].mxu0 %v39112_v47 }
 0x5bc   : > { %25476 = vmatprep.mubr.f32.mxu0 %v39113_v46 }
 0x5bd   : > { %26517 = vmatmul.mubr.f32.gmra.mrb[26].mxu1 %v39212_v21  ;;  %v39216_v21 = vld [vmem:[#allocation183_spill] sm:$0xff] }
 0x5be   : > { %26519 = vmatprep.mubr.f32.mxu1 %v39213_v42  ;;  %v34019_v42 = vld [vmem:[%s36912_s3 + $0x68] sm:$0xff] }
 0x5bf   : > { %25477 = vmatmul.mubr.f32.gmra.mrb[56].mxu0 %v39115_v2  ;;  %v14215_v60 = vand.u32 4294901760, %v34019_v42 }
 0x5c0   : > { %25479 = vmatprep.mubr.f32.mxu0 %v39116_v39 }
 0x5c1   : > { %26520 = vmatmul.mubr.f32.gmra.mrb[28].mxu1 %v39214_v41  ;;  %v39217_v41 = vand.u32 4294901760, %v33717_v9  ;;  %v39219_v9 = vand.u32 4294901760, %v33769_v14  ;;  %v39222_v14 = vld [vmem:[#allocation10_spill] sm:$0xff] }
 0x5c2   : > { %26522 = vmatprep.mubr.f32.mxu1 %v39215_v49  ;;  %v14212_v49 = vand.u32 4294901760, %v34014_v23 }
 0x5c3   : > { %25480 = vmatmul.mubr.f32.gmra.mrb[58].mxu0 %v39118_v13 }
 0x5c4   : > { %25482 = vmatprep.mubr.f32.mxu0 %v39119_v56  ;;  %v34032_v58 = vpack.c.bf16 %v14215_v60, %v14212_v49 }
 0x5c5   : > { %26523 = vmatmul.mubr.f32.gmra.mrb[30].mxu1 %v39216_v21 }
 0x5c6   : > { %26525 = vmatprep.mubr.f32.mxu1 %v39217_v41  ;;  %v39220_v41 = vand.u32 4294901760, %v33774_v29  ;;  %v39224_v29 = vld [vmem:[#allocation50_spill] sm:$0xff] }
 0x5c7   : > { %25483 = vmatmul.mubr.f32.gmra.mrb[60].mxu0 %v39120_v18 }
 0x5c8   : > { %25485 = vmatprep.mubr.f32.mxu0 %v39121_v8  ;;  %v34040_v21 = vpack.c.bf16 %v39220_v41, %v39219_v9 }
 0x5c9   : > { %26526 = vmatmul.mubr.f32.gmra.mrb[0].mxu1 %v39218_v33  ;;  %v39235_v33 = vld [vmem:[#allocation17_spill] sm:$0xff] }
 0x5ca   : > { %26532 = vmatprep.mubr.f32.mxu1 %v33243_v19 }
 0x5cb   : > { %25486 = vmatmul.mubr.f32.gmra.mrb[62].mxu0 %v39122_v51 }
 0x5cc   : > { %25492 = vmatprep.mubr.f32.mxu0 %v33846_v31 }
 0x5cd   : > { %26533 = vmatmul.mubr.f32.vlgmr.msra.gmra.mrb[2].mxu1 %v33251_v24 }
 0x5ce   : > { %26535 = vmatprep.mubr.f32.mxu1 %v33253_v50  ;;  %28119 = vmatpush3.bf16.msra.mxu1 %v33076_v27  ;;  %v39221_v27 = vld [vmem:[#allocation22_spill] sm:$0xff] }
 0x5cf   : > { %25493 = vmatmul.mubr.f32.vlgmr.msra.gmra.mrb[32].mxu0 %v33852_v30  ;;  %28121 = vmatprep.subr.bf16.mxu1 %v34032_v58 }
 0x5d0   : > { %25495 = vmatprep.mubr.f32.mxu0 %v39124_v20  ;;  %28039 = vmatpush3.bf16.msra.mxu0 %v33400_v15  ;;  %v39225_v20 = vld [vmem:[#allocation154_spill] sm:$0xff] }
 0x5d1   : > { %26536 = vmatmul.mubr.f32.gmra.mrb[4].mxu1 %v33265_v17  ;;  %28041 = vmatprep.subr.bf16.mxu0 %v34040_v21 }
 0x5d2   : > { %26538 = vmatprep.mubr.f32.mxu1 %v33279_v40 }
 0x5d3   : > { %25496 = vmatmul.mubr.f32.gmra.mrb[34].mxu0 %v39129_v45  ;;  %v39227_v45 = vld [vmem:[#allocation18_spill] sm:$0xff] }
 0x5d4   : > { %25498 = vmatprep.mubr.f32.mxu0 %v39130_v7  ;;  %v39228_v7 = vld [vmem:[#allocation31_spill] sm:$0xff] }
 0x5d5   : > { %26539 = vmatmul.mubr.f32.gmra.mrb[6].mxu1 %v33296_v6 }
 0x5d6   : > { %26541 = vmatprep.mubr.f32.mxu1 %v33308_v35 }
 0x5d7   : > { %25499 = vmatmul.mubr.f32.gmra.mrb[36].mxu0 %v39132_v36  ;;  %v39229_v36 = vld [vmem:[#allocation134_spill] sm:$0xff] }
 0x5d8   : > { %25501 = vmatprep.mubr.f32.mxu0 %v39133_v28  ;;  %v39230_v28 = vld [vmem:[#allocation164_spill] sm:$0xff] }
 0x5d9   : > { %26542 = vmatmul.mubr.f32.gmra.mrb[8].mxu1 %v33323_v61 }
 0x5da   : > { %26544 = vmatprep.mubr.f32.mxu1 %v33337_v53 }
 0x5db   : > { %25502 = vmatmul.mubr.f32.gmra.mrb[38].mxu0 %v39136_v25  ;;  %v39231_v25 = vld [vmem:[#allocation138_spill] sm:$0xff] }
 0x5dc   : > { %25504 = vmatprep.mubr.f32.mxu0 %v39137_v16  ;;  %v39232_v16 = vld [vmem:[#allocation21_spill] sm:$0xff] }
 0x5dd   : > { %26545 = vmatmul.mubr.f32.gmra.mrb[10].mxu1 %v33359_v59 }
 0x5de   : > { %26547 = vmatprep.mubr.f32.mxu1 %v33361_v1 }
 0x5df   : > { %25505 = vmatmul.mubr.f32.gmra.mrb[40].mxu0 %v39140_v63  ;;  %v34093_v63 = vsub.f32 %v34014_v23, %v14212_v49  ;;  %v39237_v23 = vld [vmem:[#allocation178_spill] sm:$0xff] }
 0x5e0   : > { %25507 = vmatprep.mubr.f32.mxu0 %v39141_v10  ;;  %v34096_v10 = vsub.f32 %v34019_v42, %v14215_v60 }
 0x5e1   : > { %26548 = vmatmul.mubr.f32.gmra.mrb[12].mxu1 %v33394_v55  ;;  %39233 = vst [vmem:[#allocation137_spill] sm:$0xff] %v34093_v63  ;;  %v37806_v9 = vand.u32 4294901760, %v34093_v63 }
 0x5e2   : > { %26550 = vmatprep.mubr.f32.mxu1 %v33420_v44  ;;  %39234 = vst [vmem:[#allocation175_spill] sm:$0xff] %v34096_v10  ;;  %v37805_v41 = vand.u32 4294901760, %v34096_v10 }
 0x5e3   : > { %25508 = vmatmul.mubr.f32.gmra.mrb[42].mxu0 %v39144_v5  ;;  %v39226_v5 = vld [vmem:[#allocation9_spill] sm:$0xff]  ;;  %v14602_v49 = vsub.f32 %v34093_v63, %v37806_v9  ;;  %v14089_v9 = vld [vmem:[#allocation2 + $0x98] sm:$0xff] }
 0x5e4   : > { %25510 = vmatprep.mubr.f32.mxu0 %v39221_v27  ;;  %v39236_v27 = vld [vmem:[#allocation63_spill] sm:$0xff] }
 0x5e5   : > { %26551 = vmatmul.mubr.f32.gmra.mrb[14].mxu1 %v33431_v54  ;;  %v14603_v60 = vand.u32 4294901760, %v14602_v49 }
 0x5e6   : > { %26553 = vmatprep.mubr.f32.mxu1 %v33433_v57 }
 0x5e7   : > { %25511 = vmatmul.mubr.f32.gmra.mrb[44].mxu0 %v39222_v14  ;;  %v39238_v14 = vld [vmem:[#allocation177_spill] sm:$0xff] }
 0x5e8   : > { %25513 = vmatprep.mubr.f32.mxu0 %v39223_v22 }
 0x5e9   : > { %26554 = vmatmul.mubr.f32.gmra.mrb[16].mxu1 %v33465_v37 }
 0x5ea   : > { %26556 = vmatprep.mubr.f32.mxu1 %v33480_v38 }
 0x5eb   : > { %25514 = vmatmul.mubr.f32.gmra.mrb[46].mxu0 %v39224_v29  ;;  %v39241_v29 = vand.u32 4294901760, %v33852_v30  ;;  %v39243_v30 = vld [vmem:[#allocation52_spill] sm:$0xff] }
 0x5ec   : > { %25516 = vmatprep.mubr.f32.mxu0 %v39225_v20  ;;  %v39249_v20 = vld [vmem:[#allocation57_spill] sm:$0xff] }
 0x5ed   : > { %26557 = vmatmul.mubr.f32.gmra.mrb[18].mxu1 %v39107_v32 }
 0x5ee   : > { %26559 = vmatprep.mubr.f32.mxu1 %v39108_v52 }
 0x5ef   : > { %25517 = vmatmul.mubr.f32.gmra.mrb[48].mxu0 %v39226_v5  ;;  %v39250_v5 = vld [vmem:[#allocation70_spill] sm:$0xff] }
 0x5f0   : > { %25519 = vmatprep.mubr.f32.mxu0 %v39227_v45  ;;  %v39251_v45 = vld [vmem:[#allocation61_spill] sm:$0xff] }
 0x5f1   : > { %26560 = vmatmul.mubr.f32.gmra.mrb[20].mxu1 %v39110_v12 }
 0x5f2   : > { %26562 = vmatprep.mubr.f32.mxu1 %v39111_v0 }
 0x5f3   : > { %25520 = vmatmul.mubr.f32.gmra.mrb[50].mxu0 %v39228_v7  ;;  %v39252_v7 = vld [vmem:[#allocation33_spill] sm:$0xff] }
 0x5f4   : > { %25522 = vmatprep.mubr.f32.mxu0 %v39229_v36  ;;  %v39253_v36 = vld [vmem:[#allocation157_spill] sm:$0xff] }
 0x5f5   : > { %26563 = vmatmul.mubr.f32.gmra.mrb[22].mxu1 %v39112_v47 }
 0x5f6   : > { %26565 = vmatprep.mubr.f32.mxu1 %v39113_v46 }
 0x5f7   : > { %25523 = vmatmul.mubr.f32.gmra.mrb[52].mxu0 %v39230_v28  ;;  %v39254_v28 = vld [vmem:[#allocation62_spill] sm:$0xff] }
 0x5f8   : > { %25525 = vmatprep.mubr.f32.mxu0 %v39231_v25  ;;  %v39255_v25 = vld [vmem:[#allocation8_spill] sm:$0xff] }
 0x5f9   : > { %26566 = vmatmul.mubr.f32.gmra.mrb[24].mxu1 %v39115_v2 }
 0x5fa   : > { %26568 = vmatprep.mubr.f32.mxu1 %v39116_v39 }
 0x5fb   : > { %25526 = vmatmul.mubr.f32.gmra.mrb[54].mxu0 %v39232_v16  ;;  %v14080_v16 = vld [vmem:[#allocation2 + $0x30] sm:$0xff] }
 0x5fc   : > { %25528 = vmatprep.mubr.f32.mxu0 %v39235_v33  ;;  %v39256_v33 = vld [vmem:[#allocation146_spill] sm:$0xff]  ;;  %v14116_v49 = vsel %vm2325_vm1, %v14080_v16, 0 }
 0x5fd   : > { %26569 = vmatmul.mubr.f32.gmra.mrb[26].mxu1 %v39118_v13  ;;  %v39264_v16 = vld [vmem:[#allocation150_spill] sm:$0xff] }
 0x5fe   : > { %26571 = vmatprep.mubr.f32.mxu1 %v39119_v56 }
 0x5ff   : > { %25529 = vmatmul.mubr.f32.gmra.mrb[56].mxu0 %v39172_v26  ;;  %v14609_v26 = vsub.f32 %v34096_v10, %v37805_v41 }
 0x600   : > { %25531 = vmatprep.mubr.f32.mxu0 %v39236_v27  ;;  %v39257_v27 = vld [vmem:[#allocation165_spill] sm:$0xff] }
 0x601   : > { %26572 = vmatmul.mubr.f32.gmra.mrb[28].mxu1 %v39120_v18  ;;  %v14610_v42 = vand.u32 4294901760, %v14609_v26  ;;  %v14081_v26 = vld [vmem:[#allocation2 + $0x38] sm:$0xff] }
 0x602   : > { %26574 = vmatprep.mubr.f32.mxu1 %v39121_v8 }
 0x603   : > { %25532 = vmatmul.mubr.f32.gmra.mrb[58].mxu0 %v39176_v3  ;;  %v39239_v3 = vld [vmem:[#allocation181_spill] sm:$0xff]  ;;  %v34122_v22 = vpack.c.bf16 %v14610_v42, %v14603_v60  ;;  %v14082_v60 = vld [vmem:[#allocation2 + $0x48] sm:$0xff]  ;;  %v39258_v42 = vld [vmem:[#allocation172_spill] sm:$0xff] }
 0x604   : > { %25534 = vmatprep.mubr.f32.mxu0 %v39177_v62  ;;  %v39240_v62 = vand.u32 4294901760, %v33846_v31  ;;  %v39242_v31 = vld [vmem:[#allocation16_spill] sm:$0xff] }
 0x605   : > { %26575 = vmatmul.mubr.f32.gmra.mrb[30].mxu1 %v39122_v51 }
 0x606   : > { %26577 = vmatprep.mubr.f32.mxu1 %v39237_v23 }
 0x607   : > { %25535 = vmatmul.mubr.f32.gmra.mrb[60].mxu0 %v39180_v48  ;;  %v34129_v48 = vpack.c.bf16 %v34096_v10, %v34093_v63  ;;  %v14143_v10 = vsel %vm2325_vm1, %v14089_v9, 0 }
 0x608   : > { %25537 = vmatprep.mubr.f32.mxu0 %v39238_v14  ;;  %v34179_v14 = vand.u32 4294901760, %v14116_v49 }
 0x609   : > { %26578 = vmatmul.mubr.f32.gmra.mrb[0].mxu1 %v39239_v3 }
 0x60a   : > { %26584 = vmatprep.mubr.f32.mxu1 %v33243_v19 }
 0x60b   : > { %25538 = vmatmul.mubr.f32.gmra.mrb[62].mxu0 %v39183_v34  ;;  %v39244_v34 = vld [vmem:[#allocation28_spill] sm:$0xff] }
 0x60c   : > { %25544 = vmatprep.mubr.f32.mxu0 %v39240_v62  ;;  %v14119_v62 = vsel %vm2325_vm1, %v14081_v26, 0  ;;  %v39266_v26 = vld [vmem:[#allocation3_spill] sm:$0xff] }
 0x60d   : > { %26585 = vmatmul.mubr.f32.vlgmr.msra.gmra.mrb[2].mxu1 %v33251_v24 }
 0x60e   : > { %26587 = vmatprep.mubr.f32.mxu1 %v33253_v50  ;;  %28123 = vmatpush3.bf16.msra.mxu1 %v34032_v58 }
 0x60f   : > { %25545 = vmatmul.mubr.f32.vlgmr.msra.gmra.mrb[32].mxu0 %v39241_v29  ;;  %28125 = vmatprep.subr.bf16.mxu1 %v34122_v22  ;;  %v39259_v29 = vld [vmem:[#allocation136_spill] sm:$0xff] }
 0x610   : > { %25547 = vmatprep.mubr.f32.mxu0 %v39186_v43  ;;  %28043 = vmatpush3.bf16.msra.mxu0 %v34040_v21  ;;  %v39245_v43 = vld [vmem:[#allocation37_spill] sm:$0xff]  ;;  %v39248_v21 = vld [vmem:[#allocation54_spill] sm:$0xff] }
 0x611   : > { %26588 = vmatmul.mubr.f32.gmra.mrb[4].mxu1 %v33265_v17  ;;  %28045 = vmatprep.subr.bf16.mxu0 %v33400_v15 }
 0x612   : > { %26590 = vmatprep.mubr.f32.mxu1 %v33279_v40 }
 0x613   : > { %25548 = vmatmul.mubr.f32.gmra.mrb[34].mxu0 %v39188_v11  ;;  %v39246_v11 = vld [vmem:[#allocation24_spill] sm:$0xff] }
 0x614   : > { %25550 = vmatprep.mubr.f32.mxu0 %v39189_v4  ;;  %v39247_v4 = vld [vmem:[#allocation42_spill] sm:$0xff] }
 0x615   : > { %26591 = vmatmul.mubr.f32.gmra.mrb[6].mxu1 %v33296_v6 }
 0x616   : > { %26593 = vmatprep.mubr.f32.mxu1 %v33308_v35 }
 0x617   : > { %25551 = vmatmul.mubr.f32.gmra.mrb[36].mxu0 %v39242_v31  ;;  %v14122_v31 = vsel %vm2325_vm1, %v14082_v60, 0 }
 0x618   : > { %25553 = vmatprep.mubr.f32.mxu0 %v39243_v30  ;;  %v14083_v30 = vld [vmem:[#allocation2 + $0x50] sm:$0xff] }
 0x619   : > { %26594 = vmatmul.mubr.f32.gmra.mrb[8].mxu1 %v33323_v61 }
 0x61a   : > { %26596 = vmatprep.mubr.f32.mxu1 %v33337_v53 }
 0x61b   : > { %25554 = vmatmul.mubr.f32.gmra.mrb[38].mxu0 %v39244_v34  ;;  %v34186_v34 = vand.u32 4294901760, %v14119_v62 }
 0x61c   : > { %25556 = vmatprep.mubr.f32.mxu0 %v39245_v43  ;;  %v14084_v43 = vld [vmem:[#allocation2 + $0x60] sm:$0xff] }
 0x61d   : > { %26597 = vmatmul.mubr.f32.gmra.mrb[10].mxu1 %v33359_v59 }
 0x61e   : > { %26599 = vmatprep.mubr.f32.mxu1 %v33361_v1 }
 0x61f   : > { %25557 = vmatmul.mubr.f32.gmra.mrb[40].mxu0 %v39246_v11  ;;  %v39260_v11 = vld [vmem:[#allocation27_spill] sm:$0xff] }
 0x620   : > { %25559 = vmatprep.mubr.f32.mxu0 %v39247_v4  ;;  %v34190_v4 = vsub.f32 %v14116_v49, %v34179_v14 }
 0x621   : > { %26600 = vmatmul.mubr.f32.gmra.mrb[12].mxu1 %v33394_v55 }
 0x622   : > { %26602 = vmatprep.mubr.f32.mxu1 %v33420_v44  ;;  %39261 = vst [vmem:[#allocation49_spill] sm:$0xff] %v34190_v4 }
 0x623   : > { %25560 = vmatmul.mubr.f32.gmra.mrb[42].mxu0 %v39248_v21  ;;  %v34192_v21 = vand.u32 4294901760, %v14122_v31 }
 0x624   : > { %25562 = vmatprep.mubr.f32.mxu0 %v39249_v20  ;;  %v14125_v20 = vsel %vm2325_vm1, %v14083_v30, 0  ;;  %v14090_v30 = vld [vmem:[#allocation2 + $0xa8] sm:$0xff] }
 0x625   : > { %26603 = vmatmul.mubr.f32.gmra.mrb[14].mxu1 %v33431_v54  ;;  %v14146_v63 = vsel %vm2325_vm1, %v14090_v30, 0  ;;  %v34261_v30 = vand.u32 4294901760, %v14143_v10 }
 0x626   : > { %26605 = vmatprep.mubr.f32.mxu1 %v33433_v57 }
 0x627   : > { %25563 = vmatmul.mubr.f32.gmra.mrb[44].mxu0 %v39250_v5  ;;  %v39262_v5 = vld [vmem:[#allocation55_spill] sm:$0xff]  ;;  %39282 = vst [vmem:[#allocation156_spill] sm:$0xff] %v34261_v30 }
 0x628   : > { %25565 = vmatprep.mubr.f32.mxu0 %v39251_v45  ;;  %v14085_v45 = vld [vmem:[#allocation2 + $0x68] sm:$0xff] }
 0x629   : > { %26606 = vmatmul.mubr.f32.gmra.mrb[16].mxu1 %v33465_v37  ;;  %v14131_v49 = vsel %vm2325_vm1, %v14085_v45, 0  ;;  %v39276_v45 = vld [vmem:[#allocation162_spill] sm:$0xff] }
 0x62a   : > { %26608 = vmatprep.mubr.f32.mxu1 %v33480_v38 }
 0x62b   : > { %25566 = vmatmul.mubr.f32.gmra.mrb[46].mxu0 %v39252_v7  ;;  %v14128_v7 = vsel %vm2325_vm1, %v14084_v43, 0 }
 0x62c   : > { %25568 = vmatprep.mubr.f32.mxu0 %v39253_v36  ;;  %v34200_v36 = vsub.f32 %v14119_v62, %v34186_v34  ;;  %v34211_v60 = vand.u32 4294901760, %v14128_v7  ;;  %v14087_v62 = vld [vmem:[#allocation2 + $0x80] sm:$0xff] }
 0x62d   : > { %26609 = vmatmul.mubr.f32.gmra.mrb[18].mxu1 %v39107_v32 }
 0x62e   : > { %26611 = vmatprep.mubr.f32.mxu1 %v39108_v52  ;;  %39263 = vst [vmem:[#allocation23_spill] sm:$0xff] %v34200_v36  ;;  %39267 = vst [vmem:[#allocation40_spill] sm:$0xff] %v34211_v60 }
 0x62f   : > { %25569 = vmatmul.mubr.f32.gmra.mrb[48].mxu0 %v39254_v28  ;;  %v34202_v28 = vand.u32 4294901760, %v14125_v20 }
 0x630   : > { %25571 = vmatprep.mubr.f32.mxu0 %v39255_v25  ;;  %v14086_v25 = vld [vmem:[#allocation2 + $0x78] sm:$0xff] }
 0x631   : > { %26612 = vmatmul.mubr.f32.gmra.mrb[20].mxu1 %v39110_v12  ;;  %v34218_v43 = vsub.f32 %v14125_v20, %v34202_v28  ;;  %v14137_v20 = vsel %vm2325_vm1, %v14087_v62, 0 }
 0x632   : > { %26614 = vmatprep.mubr.f32.mxu1 %v39111_v0  ;;  %v34245_v62 = vand.u32 4294901760, %v14137_v20 }
 0x633   : > { %25572 = vmatmul.mubr.f32.gmra.mrb[50].mxu0 %v39256_v33  ;;  %v37807_v33 = vand.u32 4294901760, %v34190_v4  ;;  %39268 = vst [vmem:[#allocation135_spill] sm:$0xff] %v34218_v43 }
 0x634   : > { %25574 = vmatprep.mubr.f32.mxu0 %v39257_v27  ;;  %v34207_v27 = vsub.f32 %v14122_v31, %v34192_v21  ;;  %v34220_v31 = vand.u32 4294901760, %v14131_v49  ;;  %39277 = vst [vmem:[#allocation67_spill] sm:$0xff] %v34245_v62 }
 0x635   : > { %26615 = vmatmul.mubr.f32.gmra.mrb[22].mxu1 %v39112_v47 }
 0x636   : > { %26617 = vmatprep.mubr.f32.mxu1 %v39113_v46  ;;  %39265 = vst [vmem:[#allocation46_spill] sm:$0xff] %v34207_v27  ;;  %39269 = vst [vmem:[#allocation139_spill] sm:$0xff] %v34220_v31 }
 0x637   : > { %25575 = vmatmul.mubr.f32.gmra.mrb[52].mxu0 %v39258_v42  ;;  %v14134_v42 = vsel %vm2325_vm1, %v14086_v25, 0  ;;  %v39271_v25 = vld [vmem:[#allocation161_spill] sm:$0xff] }
 0x638   : > { %25577 = vmatprep.mubr.f32.mxu0 %v39259_v29  ;;  %v14088_v29 = vld [vmem:[#allocation2 + $0x90] sm:$0xff] }
 0x639   : > { %26618 = vmatmul.mubr.f32.gmra.mrb[24].mxu1 %v39115_v2  ;;  %v14140_v41 = vsel %vm2325_vm1, %v14088_v29, 0 }
 0x63a   : > { %26620 = vmatprep.mubr.f32.mxu1 %v39116_v39  ;;  %v34247_v29 = vand.u32 4294901760, %v14140_v41 }
 0x63b   : > { %25578 = vmatmul.mubr.f32.gmra.mrb[54].mxu0 %v39260_v11  ;;  %v39270_v11 = vld [vmem:[#allocation159_spill] sm:$0xff] }
 0x63c   : > { %25580 = vmatprep.mubr.f32.mxu0 %v39262_v5  ;;  %v14281_v5 = vsub.f32 %v34190_v4, %v37807_v33  ;;  %39278 = vst [vmem:[#allocation148_spill] sm:$0xff] %v34247_v29 }
 0x63d   : > { %26621 = vmatmul.mubr.f32.gmra.mrb[26].mxu1 %v39118_v13 }
 0x63e   : > { %26623 = vmatprep.mubr.f32.mxu1 %v39119_v56  ;;  %v14282_v4 = vand.u32 4294901760, %v14281_v5  ;;  %v14092_v5 = vld [vmem:[#allocation2 + $0xc0] sm:$0xff] }
 0x63f   : > { %25581 = vmatmul.mubr.f32.gmra.mrb[56].mxu0 %v39264_v16  ;;  %v34229_v16 = vsub.f32 %v14128_v7, %v34211_v60  ;;  %v34242_v7 = vsub.f32 %v14131_v49, %v34220_v31  ;;  %v39284_v60 = vld [vmem:[#allocation183_spill] sm:$0xff] }
 0x640   : > { %25583 = vmatprep.mubr.f32.mxu0 %v39266_v26  ;;  %v34231_v26 = vand.u32 4294901760, %v14134_v42 }
 0x641   : > { %26624 = vmatmul.mubr.f32.gmra.mrb[28].mxu1 %v39120_v18  ;;  %39272 = vst [vmem:[#allocation144_spill] sm:$0xff] %v34229_v16  ;;  %39275 = vst [vmem:[#allocation141_spill] sm:$0xff] %v34242_v7 }
 0x642   : > { %26626 = vmatprep.mubr.f32.mxu1 %v39121_v8  ;;  %39273 = vst [vmem:[#allocation36_spill] sm:$0xff] %v34231_v26 }
 0x643   : > { %25584 = vmatmul.mubr.f32.gmra.mrb[58].mxu0 %v39270_v11  ;;  %v39274_v11 = vand.u32 4294901760, %v34200_v36 }
 0x644   : > { %25586 = vmatprep.mubr.f32.mxu0 %v39271_v25 }
 0x645   : > { %26627 = vmatmul.mubr.f32.gmra.mrb[30].mxu1 %v39122_v51  ;;  %v14291_v33 = vsub.f32 %v34200_v36, %v39274_v11  ;;  %v39280_v11 = vand.u32 4294901760, %v34207_v27  ;;  %v34257_v36 = vsub.f32 %v14134_v42, %v34231_v26  ;;  %v34270_v42 = vsub.f32 %v14137_v20, %v34245_v62 }
 0x646   : > { %26629 = vmatprep.mubr.f32.mxu1 %v39237_v23  ;;  %v39279_v23 = vld [vmem:[#allocation182_spill] sm:$0xff] }
 0x647   : > { %25587 = vmatmul.mubr.f32.gmra.mrb[60].mxu0 %v39276_v45  ;;  %v14301_v25 = vsub.f32 %v34207_v27, %v39280_v11  ;;  %39281 = vst [vmem:[#allocation152_spill] sm:$0xff] %v34257_v36  ;;  %v14091_v45 = vld [vmem:[#allocation2 + $0xb0] sm:$0xff]  ;;  %v14292_v31 = vand.u32 4294901760, %v14291_v33  ;;  %v39285_v11 = vand.u32 4294901760, %v34218_v43  ;;  %39286 = vst [vmem:[#allocation142_spill] sm:$0xff] %v34270_v42  ;;  %v39288_v33 = vld [vmem:[#allocation173_spill] sm:$0xff] }
 0x648   : > { %25589 = vmatprep.mubr.f32.mxu0 %v39279_v23  ;;  %v34263_v23 = vand.u32 4294901760, %v14146_v63  ;;  %v39289_v27 = vand.u32 4294901760, %v34229_v16 }
 0x649   : > { %26630 = vmatmul.mubr.f32.gmra.mrb[0].mxu1 %v39239_v3  ;;  %v14311_v49 = vsub.f32 %v34218_v43, %v39285_v11  ;;  %v34273_v3 = vsub.f32 %v14140_v41, %v34247_v29  ;;  %v14302_v9 = vand.u32 4294901760, %v14301_v25  ;;  %v14152_v11 = vsel %vm2325_vm1, %v14092_v5, 0  ;;  %v14093_v43 = vld [vmem:[#allocation2 + $0xc8] sm:$0xff] }
 0x64a   : > { %26636 = vmatprep.mubr.f32.mxu1 %v14282_v4  ;;  %39283 = vst [vmem:[#allocation176_spill] sm:$0xff] %v34263_v23  ;;  %v14149_v4 = vsel %vm2325_vm1, %v14091_v45, 0  ;;  %v14321_v26 = vsub.f32 %v34229_v16, %v39289_v27  ;;  %v39290_v41 = vand.u32 4294901760, %v34242_v7  ;;  %v34287_v45 = vsub.f32 %v14143_v10, %v34261_v30 }
 0x64b   : > { %25590 = vmatmul.mubr.f32.gmra.mrb[62].mxu0 %v39284_v60  ;;  %39287 = vst [vmem:[#allocation30_spill] sm:$0xff] %v34273_v3  ;;  %v34290_v25 = vsub.f32 %v14146_v63, %v34263_v23  ;;  %v34292_v27 = vand.u32 4294901760, %v14149_v4  ;;  %v14094_v60 = vld [vmem:[#allocation2 + $0xd8] sm:$0xff]  ;;  %v14312_v5 = vand.u32 4294901760, %v14311_v49  ;;  %v39295_v10 = vand.u32 4294901760, %v34257_v36  ;;  %v14095_v23 = vld [vmem:[#allocation2 + $0xe0] sm:$0xff] }
 0x64c   : > { %25596 = vmatprep.mubr.f32.mxu0 %v39288_v33  ;;  %v14331_v20 = vsub.f32 %v34242_v7, %v39290_v41  ;;  %39291 = vst [vmem:[#allocation140_spill] sm:$0xff] %v34287_v45  ;;  %v14322_v41 = vand.u32 4294901760, %v14321_v26  ;;  %v34302_v7 = vand.u32 4294901760, %v14152_v11  ;;  %v14155_v16 = vsel %vm2325_vm1, %v14093_v43, 0 }
 0x64d   : > { %26637 = vmatmul.mubr.f32.vlgmr.msra.gmra.mrb[2].mxu1 %v14292_v31  ;;  %39292 = vst [vmem:[#allocation44_spill] sm:$0xff] %v34290_v25  ;;  %39293 = vst [vmem:[#allocation47_spill] sm:$0xff] %v34292_v27  ;;  %v39294_v31 = vld [vmem:[#allocation174_spill] sm:$0xff]  ;;  %v14341_v63 = vsub.f32 %v34257_v36, %v39295_v10  ;;  %v14158_v49 = vsel %vm2325_vm1, %v14094_v60, 0  ;;  %v34311_v10 = vsub.f32 %v14149_v4, %v34292_v27  ;;  %v14096_v36 = vld [vmem:[#allocation2 + $0xf0] sm:$0xff]  ;;  %v39299_v43 = vand.u32 4294901760, %v34270_v42 }
 0x64e   : > { %26639 = vmatprep.mubr.f32.mxu1 %v14302_v9  ;;  %28127 = vmatpush3.bf16.msra.mxu1 %v34122_v22  ;;  %39296 = vst [vmem:[#allocation51_spill] sm:$0xff] %v34302_v7  ;;  %v39297_v22 = vld [vmem:[#allocation5_spill] sm:$0xff]  ;;  %v14332_v9 = vand.u32 4294901760, %v14331_v20  ;;  %v39300_v60 = vand.u32 4294901760, %v34273_v3  ;;  %v14161_v20 = vsel %vm2325_vm1, %v14095_v23, 0  ;;  %v34325_v4 = vsub.f32 %v14152_v11, %v34302_v7  ;;  %v14098_v11 = vld [vmem:[#allocation2 + $0x108] sm:$0xff] }
 0x64f   : > { %25597 = vmatmul.mubr.f32.vlgmr.msra.gmra.mrb[32].mxu0 %v39294_v31  ;;  %28129 = vmatprep.subr.bf16.mxu1 %v34129_v48  ;;  %39298 = vst [vmem:[#allocation25_spill] sm:$0xff] %v34311_v10  ;;  %v14342_v30 = vand.u32 4294901760, %v14341_v63  ;;  %v34327_v26 = vand.u32 4294901760, %v14158_v49  ;;  %v14164_v27 = vsel %vm2325_vm1, %v14096_v36, 0  ;;  %v34337_v29 = vand.u32 4294901760, %v14161_v20 }
 0x650   : > { %25599 = vmatprep.mubr.f32.mxu0 %v33243_v19  ;;  %28047 = vmatpush3.bf16.msra.mxu0 %v33400_v15  ;;  %v14351_v15 = vsub.f32 %v34270_v42, %v39299_v43  ;;  %39302 = vst [vmem:[#allocation64_spill] sm:$0xff] %v34325_v4  ;;  %v14097_v43 = vld [vmem:[#allocation2 + $0xf8] sm:$0xff]  ;;  %v39304_v42 = vand.u32 4294901760, %v34287_v45 }
 0x651   : > { %26640 = vmatmul.mubr.f32.gmra.mrb[4].mxu1 %v14312_v5  ;;  %28049 = vmatprep.subr.bf16.mxu0 %v39297_v22  ;;  %v14361_v5 = vsub.f32 %v34273_v3, %v39300_v60  ;;  %39303 = vst [vmem:[#allocation68_spill] sm:$0xff] %v34327_v26  ;;  %v39305_v3 = vand.u32 4294901760, %v34290_v25  ;;  %39306 = vst [vmem:[#allocation59_spill] sm:$0xff] %v34337_v29  ;;  %v14167_v63 = vsel %vm2325_vm1, %v14097_v43, 0 }
 0x652   : > { %26642 = vmatprep.mubr.f32.mxu1 %v14322_v41  ;;  %v34320_v41 = vand.u32 4294901760, %v14155_v16  ;;  %v14371_v60 = vsub.f32 %v34287_v45, %v39304_v42  ;;  %v34346_v42 = vsub.f32 %v14158_v49, %v34327_v26  ;;  %v14100_v45 = vld [vmem:[#allocation2 + $0x120] sm:$0xff]  ;;  %v34360_v43 = vand.u32 4294901760, %v14167_v63  ;;  %v14101_v49 = vld [vmem:[#allocation2 + $0x128] sm:$0xff] }
 0x653   : > { %25600 = vmatmul.mubr.f32.gmra.mrb[34].mxu0 %v33251_v24  ;;  %v14381_v23 = vsub.f32 %v34290_v25, %v39305_v3  ;;  %v14362_v7 = vand.u32 4294901760, %v14361_v5  ;;  %v34348_v3 = vand.u32 4294901760, %v14164_v27  ;;  %v14099_v25 = vld [vmem:[#allocation2 + $0x110] sm:$0xff] }
 0x654   : > { %39301 = vst [vmem:[#allocation20_spill] sm:$0xff] %v34320_v41  ;;  %25602 = vmatprep.mubr.f32.mxu0 %v33253_v50  ;;  %v34341_v36 = vsub.f32 %v14155_v16, %v34320_v41  ;;  %39308 = vst [vmem:[#allocation7_spill] sm:$0xff] %v34346_v42  ;;  %v14372_v5 = vand.u32 4294901760, %v14371_v60  ;;  %v39310_v41 = vand.u32 4294901760, %v34311_v10 }
 0x655   : > { %26643 = vmatmul.mubr.f32.gmra.mrb[6].mxu1 %v14332_v9  ;;  %v14352_v9 = vand.u32 4294901760, %v14351_v15  ;;  %39309 = vst [vmem:[#allocation38_spill] sm:$0xff] %v34348_v3  ;;  %v14170_v15 = vsel %vm2325_vm1, %v14098_v11, 0  ;;  %v14382_v16 = vand.u32 4294901760, %v14381_v23  ;;  %39312 = vst [vmem:[#allocation147_spill] sm:$0xff] %v34360_v43  ;;  %v14176_v11 = vsel %vm2325_vm1, %v14100_v45, 0 }
 0x656   : > { %26645 = vmatprep.mubr.f32.mxu1 %v14342_v30  ;;  %39307 = vst [vmem:[#allocation19_spill] sm:$0xff] %v34341_v36  ;;  %v14391_v62 = vsub.f32 %v34311_v10, %v39310_v41  ;;  %v34356_v30 = vsub.f32 %v14161_v20, %v34337_v29  ;;  %v34370_v20 = vsub.f32 %v14164_v27, %v34348_v3  ;;  %v34372_v23 = vand.u32 4294901760, %v14170_v15  ;;  %v14102_v10 = vld [vmem:[#allocation2 + $0x138] sm:$0xff] }
 0x657   : > { %25603 = vmatmul.mubr.f32.gmra.mrb[36].mxu0 %v33265_v17  ;;  %v34377_v26 = vand.u32 4294901760, %v14176_v11  ;;  %v34384_v41 = vsub.f32 %v14167_v63, %v34360_v43 }
 0x658   : > { %25605 = vmatprep.mubr.f32.mxu0 %v33279_v40  ;;  %39311 = vst [vmem:[#allocation39_spill] sm:$0xff] %v34356_v30  ;;  %39314 = vst [vmem:[#allocation29_spill] sm:$0xff] %v34370_v20  ;;  %v37873_v3 = vand.u32 4294901760, %v34370_v20 }
 0x659   : > { %26646 = vmatmul.mubr.f32.gmra.mrb[8].mxu1 %v14352_v9  ;;  %v14173_v9 = vsel %vm2325_vm1, %v14099_v25, 0  ;;  %39315 = vst [vmem:[#allocation4_spill] sm:$0xff] %v34372_v23  ;;  %v14392_v25 = vand.u32 4294901760, %v14391_v62  ;;  %39317 = vst [vmem:[#allocation32_spill] sm:$0xff] %v34377_v26 }
 0x65a   : > { %26648 = vmatprep.mubr.f32.mxu1 %v14362_v7  ;;  %v39313_v7 = vand.u32 4294901760, %v34325_v4  ;;  %v34375_v29 = vand.u32 4294901760, %v14173_v9  ;;  %39319 = vst [vmem:[#allocation58_spill] sm:$0xff] %v34384_v41 }
 0x65b   : > { %25606 = vmatmul.mubr.f32.gmra.mrb[38].mxu0 %v33296_v6 }
 0x65c   : > { %25608 = vmatprep.mubr.f32.mxu0 %v33308_v35  ;;  %v14401_v60 = vsub.f32 %v34325_v4, %v39313_v7  ;;  %39316 = vst [vmem:[#allocation149_spill] sm:$0xff] %v34375_v29  ;;  %v39318_v7 = vand.u32 4294901760, %v34341_v36  ;;  %v14179_v4 = vsel %vm2325_vm1, %v14101_v49, 0  ;;  %v34397_v63 = vsub.f32 %v14173_v9, %v34375_v29  ;;  %v14105_v29 = vld [vmem:[#allocation2 + $0x158] sm:$0xff] }
 0x65d   : > { %26649 = vmatmul.mubr.f32.gmra.mrb[10].mxu1 %v14372_v5  ;;  %v14182_v5 = vsel %vm2325_vm1, %v14102_v10, 0  ;;  %v34400_v10 = vsub.f32 %v14176_v11, %v34377_v26  ;;  %v34402_v49 = vand.u32 4294901760, %v14179_v4  ;;  %v14441_v11 = vsub.f32 %v34370_v20, %v37873_v3  ;;  %v14106_v3 = vld [vmem:[#allocation2 + $0x168] sm:$0xff]  ;;  %v14107_v20 = vld [vmem:[#allocation2 + $0x170] sm:$0xff] }
 0x65e   : > { %26651 = vmatprep.mubr.f32.mxu1 %v14382_v16  ;;  %v14411_v27 = vsub.f32 %v34341_v36, %v39318_v7  ;;  %v14402_v62 = vand.u32 4294901760, %v14401_v60  ;;  %v39320_v16 = vand.u32 4294901760, %v34346_v42  ;;  %v14103_v7 = vld [vmem:[#allocation2 + $0x140] sm:$0xff]  ;;  %39322 = vst [vmem:[#allocation66_spill] sm:$0xff] %v34397_v63  ;;  %v34404_v60 = vand.u32 4294901760, %v14182_v5  ;;  %v14104_v36 = vld [vmem:[#allocation2 + $0x150] sm:$0xff] }
 0x65f   : > { %25609 = vmatmul.mubr.f32.gmra.mrb[40].mxu0 %v33323_v61  ;;  %v34394_v61 = vsub.f32 %v14170_v15, %v34372_v23  ;;  %39323 = vst [vmem:[#allocation53_spill] sm:$0xff] %v34400_v10  ;;  %39324 = vst [vmem:[#allocation65_spill] sm:$0xff] %v34402_v49  ;;  %v39326_v15 = vand.u32 4294901760, %v34356_v30  ;;  %v14185_v26 = vsel %vm2325_vm1, %v14103_v7, 0  ;;  %v39329_v7 = vand.u32 4294901760, %v34384_v41 }
 0x660   : > { %25611 = vmatprep.mubr.f32.mxu0 %v33337_v53  ;;  %v14421_v45 = vsub.f32 %v34346_v42, %v39320_v16  ;;  %39325 = vst [vmem:[#allocation167_spill] sm:$0xff] %v34404_v60  ;;  %v14412_v16 = vand.u32 4294901760, %v14411_v27  ;;  %v14188_v27 = vsel %vm2325_vm1, %v14104_v36, 0 }
 0x661   : > { %39321 = vst [vmem:[#allocation6_spill] sm:$0xff] %v34394_v61  ;;  %26652 = vmatmul.mubr.f32.gmra.mrb[12].mxu1 %v14392_v25  ;;  %v14431_v25 = vsub.f32 %v34356_v30, %v39326_v15  ;;  %v34421_v30 = vsub.f32 %v14179_v4, %v34402_v49  ;;  %v14451_v36 = vsub.f32 %v34384_v41, %v39329_v7  ;;  %v34436_v15 = vand.u32 4294901760, %v14188_v27 }
 0x662   : > { %26654 = vmatprep.mubr.f32.mxu1 %v14402_v62  ;;  %v14422_v9 = vand.u32 4294901760, %v14421_v45  ;;  %v34424_v45 = vsub.f32 %v14182_v5, %v34404_v60  ;;  %v39331_v62 = vand.u32 4294901760, %v34394_v61  ;;  %v14191_v5 = vsel %vm2325_vm1, %v14105_v29, 0 }
 0x663   : > { %25612 = vmatmul.mubr.f32.gmra.mrb[42].mxu0 %v33359_v59  ;;  %39327 = vst [vmem:[#allocation145_spill] sm:$0xff] %v34421_v30  ;;  %v14432_v42 = vand.u32 4294901760, %v14431_v25  ;;  %39332 = vst [vmem:[#allocation60_spill] sm:$0xff] %v34436_v15  ;;  %v14194_v25 = vsel %vm2325_vm1, %v14106_v3, 0  ;;  %v39333_v7 = vand.u32 4294901760, %v34397_v63  ;;  %v39334_v60 = vand.u32 4294901760, %v34400_v10 }
 0x664   : > { %25614 = vmatprep.mubr.f32.mxu0 %v33361_v1  ;;  %39328 = vst [vmem:[#allocation170_spill] sm:$0xff] %v34424_v45  ;;  %v14461_v4 = vsub.f32 %v34394_v61, %v39331_v62  ;;  %v14108_v61 = vld [vmem:[#allocation2 + $0x180] sm:$0xff]  ;;  %v14452_v29 = vand.u32 4294901760, %v14451_v36  ;;  %v34452_v3 = vand.u32 4294901760, %v14191_v5  ;;  %v14197_v49 = vsel %vm2325_vm1, %v14107_v20, 0  ;;  %v14110_v62 = vld [vmem:[#allocation2 + $0x198] sm:$0xff] }
 0x665   : > { %26655 = vmatmul.mubr.f32.gmra.mrb[14].mxu1 %v14412_v16  ;;  %v34430_v16 = vand.u32 4294901760, %v14185_v26  ;;  %v14471_v41 = vsub.f32 %v34397_v63, %v39333_v7  ;;  %v34456_v7 = vsub.f32 %v14188_v27, %v34436_v15  ;;  %v14109_v36 = vld [vmem:[#allocation2 + $0x188] sm:$0xff] }
 0x666   : > { %26657 = vmatprep.mubr.f32.mxu1 %v14422_v9  ;;  %v14442_v9 = vand.u32 4294901760, %v14441_v11  ;;  %v14481_v11 = vsub.f32 %v34400_v10, %v39334_v60  ;;  %39336 = vst [vmem:[#allocation151_spill] sm:$0xff] %v34452_v3  ;;  %v34458_v60 = vand.u32 4294901760, %v14194_v25  ;;  %v14200_v10 = vsel %vm2325_vm1, %v14108_v61, 0 }
 0x667   : > { %25615 = vmatmul.mubr.f32.gmra.mrb[44].mxu0 %v33394_v55  ;;  %39330 = vst [vmem:[#allocation143_spill] sm:$0xff] %v34430_v16  ;;  %v34473_v61 = vand.u32 4294901760, %v14197_v49 }
 0x668   : > { %25617 = vmatprep.mubr.f32.mxu0 %v33420_v44  ;;  %39337 = vst [vmem:[#allocation153_spill] sm:$0xff] %v34458_v60  ;;  %v14482_v63 = vand.u32 4294901760, %v14481_v11  ;;  %v14111_v11 = vld [vmem:[#allocation2 + $0x1a0] sm:$0xff] }
 0x669   : > { %26658 = vmatmul.mubr.f32.gmra.mrb[16].mxu1 %v14432_v42  ;;  %v34450_v42 = vsub.f32 %v14185_v26, %v34430_v16  ;;  %v14472_v26 = vand.u32 4294901760, %v14471_v41  ;;  %v39338_v16 = vand.u32 4294901760, %v34421_v30  ;;  %39341 = vst [vmem:[#allocation158_spill] sm:$0xff] %v34473_v61  ;;  %v14206_v41 = vsel %vm2325_vm1, %v14110_v62, 0 }
 0x66a   : > { %26660 = vmatprep.mubr.f32.mxu1 %v14442_v9  ;;  %v14462_v9 = vand.u32 4294901760, %v14461_v4  ;;  %v39339_v4 = vand.u32 4294901760, %v34424_v45  ;;  %v34484_v20 = vand.u32 4294901760, %v14206_v41 }
 0x66b   : > { %25618 = vmatmul.mubr.f32.gmra.mrb[46].mxu0 %v33431_v54  ;;  %39335 = vst [vmem:[#allocation43_spill] sm:$0xff] %v34450_v42  ;;  %v14491_v23 = vsub.f32 %v34421_v30, %v39338_v16  ;;  %v14209_v30 = vsel %vm2325_vm1, %v14111_v11, 0  ;;  %v39344_v62 = vand.u32 4294901760, %v34450_v42 }
 0x66c   : > { %25620 = vmatprep.mubr.f32.mxu0 %v33433_v57  ;;  %v14501_v27 = vsub.f32 %v34424_v45, %v39339_v4  ;;  %v34481_v4 = vand.u32 4294901760, %v14200_v10  ;;  %v14203_v45 = vsel %vm2325_vm1, %v14109_v36, 0  ;;  %39343 = vst [vmem:[#allocation35_spill] sm:$0xff] %v34484_v20 }
 0x66d   : > { %26661 = vmatmul.mubr.f32.gmra.mrb[18].mxu1 %v14452_v29  ;;  %v34471_v29 = vsub.f32 %v14191_v5, %v34452_v3  ;;  %v14492_v5 = vand.u32 4294901760, %v14491_v23  ;;  %v14511_v16 = vsub.f32 %v34450_v42, %v39344_v62  ;;  %v34495_v3 = vand.u32 4294901760, %v14203_v45 }
 0x66e   : > { %26663 = vmatprep.mubr.f32.mxu1 %v14462_v9  ;;  %v34479_v9 = vsub.f32 %v14194_v25, %v34458_v60  ;;  %39342 = vst [vmem:[#allocation45_spill] sm:$0xff] %v34481_v4  ;;  %v34493_v60 = vsub.f32 %v14197_v49, %v34473_v61  ;;  %v14502_v23 = vand.u32 4294901760, %v14501_v27  ;;  %v34503_v11 = vsub.f32 %v14200_v10, %v34481_v4 }
 0x66f   : > { %25621 = vmatmul.mubr.f32.gmra.mrb[48].mxu0 %v33465_v37  ;;  %39340 = vst [vmem:[#allocation56_spill] sm:$0xff] %v34471_v29  ;;  %39345 = vst [vmem:[#allocation155_spill] sm:$0xff] %v34495_v3  ;;  %v34505_v62 = vand.u32 4294901760, %v14209_v30  ;;  %v34508_v49 = vsub.f32 %v14206_v41, %v34484_v20  ;;  %v14512_v25 = vand.u32 4294901760, %v14511_v16  ;;  %v39348_v27 = vand.u32 4294901760, %v34471_v29 }
 0x670   : > { %25623 = vmatprep.mubr.f32.mxu0 %v33480_v38 }
 0x671   : > { %26664 = vmatmul.mubr.f32.gmra.mrb[20].mxu1 %v14472_v26  ;;  %39347 = vst [vmem:[#allocation179_spill] sm:$0xff] %v34505_v62  ;;  %v14531_v42 = vsub.f32 %v34471_v29, %v39348_v27  ;;  %v34516_v26 = vsub.f32 %v14203_v45, %v34495_v3  ;;  %v34524_v16 = vsub.f32 %v14209_v30, %v34505_v62  ;;  %v37905_v27 = vand.u32 4294901760, %v34508_v49 }
 0x672   : > { %26666 = vmatprep.mubr.f32.mxu1 %v14482_v63  ;;  %v39346_v63 = vand.u32 4294901760, %v34456_v7 }
 0x673   : > { %25624 = vmatmul.mubr.f32.gmra.mrb[50].mxu0 %v39107_v32  ;;  %v14532_v45 = vand.u32 4294901760, %v14531_v42  ;;  %v37907_v29 = vand.u32 4294901760, %v34516_v26  ;;  %v14581_v42 = vsub.f32 %v34508_v49, %v37905_v27 }
 0x674   : > { %25626 = vmatprep.mubr.f32.mxu0 %v39108_v52  ;;  %v14521_v36 = vsub.f32 %v34456_v7, %v39346_v63  ;;  %v37904_v63 = vand.u32 4294901760, %v34493_v60 }
 0x675   : > { %26667 = vmatmul.mubr.f32.gmra.mrb[22].mxu1 %v14492_v5  ;;  %v39349_v5 = vand.u32 4294901760, %v34479_v9 }
 0x676   : > { %26669 = vmatprep.mubr.f32.mxu1 %v14502_v23  ;;  %v14522_v10 = vand.u32 4294901760, %v14521_v36  ;;  %v37908_v23 = vand.u32 4294901760, %v34503_v11  ;;  %v14551_v36 = vsub.f32 %v34493_v60, %v37904_v63  ;;  %v14571_v63 = vsub.f32 %v34516_v26, %v37907_v29 }
 0x677   : > { %25627 = vmatmul.mubr.f32.gmra.mrb[52].mxu0 %v39110_v12  ;;  %v14541_v41 = vsub.f32 %v34479_v9, %v39349_v5 }
 0x678   : > { %25629 = vmatprep.mubr.f32.mxu0 %v39111_v0  ;;  %v14561_v30 = vsub.f32 %v34503_v11, %v37908_v23  ;;  %v14572_v27 = vand.u32 4294901760, %v14571_v63  ;;  %v39398_v23 = vld [vmem:[#allocation88_spill] sm:$0xff] }
 0x679   : > { %26670 = vmatmul.mubr.f32.gmra.mrb[24].mxu1 %v14512_v25  ;;  %v14542_v5 = vand.u32 4294901760, %v14541_v41  ;;  %v37906_v25 = vand.u32 4294901760, %v34524_v16 }
 0x67a   : > { %26672 = vmatprep.mubr.f32.mxu1 %v14522_v10  ;;  %v14552_v10 = vand.u32 4294901760, %v14551_v36  ;;  %v14562_v41 = vand.u32 4294901760, %v14561_v30  ;;  %v39350_v30 = vld [vmem:[#allocation11_spill] sm:$0xff] }
 0x67b   : > { %25630 = vmatmul.mubr.f32.gmra.mrb[54].mxu0 %v39112_v47 }
 0x67c   : > { %25632 = vmatprep.mubr.f32.mxu0 %v39113_v46 }
 0x67d   : > { %26673 = vmatmul.mubr.f32.gmra.mrb[26].mxu1 %v14532_v45  ;;  %v14591_v45 = vsub.f32 %v34524_v16, %v37906_v25 }
 0x67e   : > { %26675 = vmatprep.mubr.f32.mxu1 %v14542_v5  ;;  %v14582_v5 = vand.u32 4294901760, %v14581_v42 }
 0x67f   : > { %25633 = vmatmul.mubr.f32.gmra.mrb[56].mxu0 %v39115_v2  ;;  %v14592_v36 = vand.u32 4294901760, %v14591_v45 }
 0x680   : > { %25635 = vmatprep.mubr.f32.mxu0 %v39116_v39 }
 0x681   : > { %26676 = vmatmul.mubr.f32.gmra.mrb[28].mxu1 %v14552_v10  ;;  %v39351_v10 = vand.u32 4294901760, %v39350_v30 }
 0x682   : > { %26678 = vmatprep.mubr.f32.mxu1 %v14562_v41  ;;  %v39352_v41 = vld [vmem:[#allocation12_spill] sm:$0xff] }
 0x683   : > { %25636 = vmatmul.mubr.f32.gmra.mrb[58].mxu0 %v39118_v13  ;;  %v8736_v42 = vsub.f32 %v39350_v30, %v39351_v10  ;;  %v39353_v63 = vand.u32 4294901760, %v39352_v41  ;;  %v39367_v30 = vld [vmem:[#allocation38_spill] sm:$0xff]  ;;  %v39383_v10 = vld [vmem:[#allocation137_spill] sm:$0xff] }
 0x684   : > { %25638 = vmatprep.mubr.f32.mxu0 %v39119_v56 }
 0x685   : > { %26679 = vmatmul.mubr.f32.gmra.mrb[30].mxu1 %v14572_v27  ;;  %v8743_v25 = vsub.f32 %v39352_v41, %v39353_v63  ;;  %v8737_v27 = vand.u32 4294901760, %v8736_v42  ;;  %v39384_v42 = vand.u32 4294901760, %v39383_v10 }
 0x686   : > { %26681 = vmatprep.mubr.f32.mxu1 %v14582_v5 }
 0x687   : > { %25639 = vmatmul.mubr.f32.gmra.mrb[60].mxu0 %v39120_v18  ;;  %v8744_v45 = vand.u32 4294901760, %v8743_v25  ;;  %v39359_v25 = vld [vmem:[#allocation156_spill] sm:$0xff] }
 0x688   : > { %25641 = vmatprep.mubr.f32.mxu0 %v39121_v8 }
 0x689   : > { %26682 = vmatmul.mubr.f32.gmra.mrb[0].mxu1 %v14592_v36  ;;  %v34566_v5 = vpack.c.bf16 %v8744_v45, %v8737_v27  ;;  %v39362_v36 = vld [vmem:[#allocation47_spill] sm:$0xff]  ;;  %v39388_v45 = vld [vmem:[#allocation82_spill] sm:$0xff] }
 0x68a   : > { %26688 = vmatprep.mubr.f32.mxu1 %v34179_v14  ;;  %v39387_v27 = vld [vmem:[#allocation23_spill] sm:$0xff] }
 0x68b   : > { %25642 = vmatmul.mubr.f32.gmra.mrb[62].mxu0 %v39122_v51 }
 0x68c   : > { %25648 = vmatprep.mubr.f32.mxu0 %v39288_v33  ;;  %v39354_v33 = vld [vmem:[#allocation40_spill] sm:$0xff] }
 0x68d   : > { %26689 = vmatmul.mubr.f32.vlgmr.msra.gmra.mrb[2].mxu1 %v34186_v34 }
 0x68e   : > { %26691 = vmatprep.mubr.f32.mxu1 %v34192_v21  ;;  %28131 = vmatpush3.bf16.msra.mxu1 %v34129_v48  ;;  %v39355_v48 = vld [vmem:[#allocation139_spill] sm:$0xff] }
 0x68f   : > { %25649 = vmatmul.mubr.f32.vlgmr.msra.gmra.mrb[32].mxu0 %v39294_v31  ;;  %28133 = vmatprep.subr.bf16.mxu1 %v34032_v58  ;;  %v39356_v31 = vld [vmem:[#allocation36_spill] sm:$0xff] }
 0x690   : > { %25651 = vmatprep.mubr.f32.mxu0 %v33243_v19  ;;  %28051 = vmatpush3.bf16.msra.mxu0 %v39297_v22  ;;  %v39357_v19 = vld [vmem:[#allocation67_spill] sm:$0xff]  ;;  %v39358_v22 = vld [vmem:[#allocation148_spill] sm:$0xff] }
 0x691   : > { %26692 = vmatmul.mubr.f32.gmra.mrb[4].mxu1 %v34202_v28  ;;  %28053 = vmatprep.subr.bf16.mxu0 %v34566_v5 }
 0x692   : > { %26694 = vmatprep.mubr.f32.mxu1 %v39354_v33 }
 0x693   : > { %25652 = vmatmul.mubr.f32.gmra.mrb[34].mxu0 %v33251_v24  ;;  %v39360_v24 = vld [vmem:[#allocation176_spill] sm:$0xff] }
 0x694   : > { %25654 = vmatprep.mubr.f32.mxu0 %v33253_v50  ;;  %v39361_v50 = vld [vmem:[#allocation15_spill] sm:$0xff] }
 0x695   : > { %26695 = vmatmul.mubr.f32.gmra.mrb[6].mxu1 %v39355_v48 }
 0x696   : > { %26697 = vmatprep.mubr.f32.mxu1 %v39356_v31 }
 0x697   : > { %25655 = vmatmul.mubr.f32.gmra.mrb[36].mxu0 %v33265_v17  ;;  %v39363_v17 = vld [vmem:[#allocation51_spill] sm:$0xff] }
 0x698   : > { %25657 = vmatprep.mubr.f32.mxu0 %v33279_v40  ;;  %v39364_v40 = vld [vmem:[#allocation20_spill] sm:$0xff] }
 0x699   : > { %26698 = vmatmul.mubr.f32.gmra.mrb[8].mxu1 %v39357_v19 }
 0x69a   : > { %26700 = vmatprep.mubr.f32.mxu1 %v39358_v22  ;;  %v39459_v22 = vld [vmem:[#allocation56_spill] sm:$0xff] }
 0x69b   : > { %25658 = vmatmul.mubr.f32.gmra.mrb[38].mxu0 %v33296_v6  ;;  %v39365_v6 = vld [vmem:[#allocation68_spill] sm:$0xff] }
 0x69c   : > { %25660 = vmatprep.mubr.f32.mxu0 %v33308_v35  ;;  %v39366_v35 = vld [vmem:[#allocation59_spill] sm:$0xff] }
 0x69d   : > { %26701 = vmatmul.mubr.f32.gmra.mrb[10].mxu1 %v39359_v25  ;;  %v39448_v25 = vld [vmem:[#allocation145_spill] sm:$0xff] }
 0x69e   : > { %26703 = vmatprep.mubr.f32.mxu1 %v39360_v24 }
 0x69f   : > { %25661 = vmatmul.mubr.f32.gmra.mrb[40].mxu0 %v39361_v50  ;;  %v39389_v50 = vand.u32 4294901760, %v39388_v45 }
 0x6a0   : > { %25663 = vmatprep.mubr.f32.mxu0 %v33337_v53  ;;  %v39368_v53 = vld [vmem:[#allocation4_spill] sm:$0xff] }
 0x6a1   : > { %26704 = vmatmul.mubr.f32.gmra.mrb[12].mxu1 %v39362_v36  ;;  %v39436_v36 = vld [vmem:[#allocation58_spill] sm:$0xff] }
 0x6a2   : > { %26706 = vmatprep.mubr.f32.mxu1 %v39363_v17 }
 0x6a3   : > { %25664 = vmatmul.mubr.f32.gmra.mrb[42].mxu0 %v33359_v59  ;;  %v39369_v59 = vld [vmem:[#allocation149_spill] sm:$0xff] }
 0x6a4   : > { %25666 = vmatprep.mubr.f32.mxu0 %v33361_v1  ;;  %v39370_v1 = vld [vmem:[#allocation32_spill] sm:$0xff] }
 0x6a5   : > { %26707 = vmatmul.mubr.f32.gmra.mrb[14].mxu1 %v39364_v40  ;;  %v39427_v40 = vld [vmem:[#allocation7_spill] sm:$0xff] }
 0x6a6   : > { %26709 = vmatprep.mubr.f32.mxu1 %v39365_v6  ;;  %v39424_v6 = vld [vmem:[#allocation19_spill] sm:$0xff] }
 0x6a7   : > { %25667 = vmatmul.mubr.f32.gmra.mrb[44].mxu0 %v33394_v55  ;;  %v39371_v55 = vld [vmem:[#allocation65_spill] sm:$0xff] }
 0x6a8   : > { %25669 = vmatprep.mubr.f32.mxu0 %v33420_v44  ;;  %v39372_v44 = vld [vmem:[#allocation167_spill] sm:$0xff] }
 0x6a9   : > { %26710 = vmatmul.mubr.f32.gmra.mrb[16].mxu1 %v39366_v35 }
 0x6aa   : > { %26712 = vmatprep.mubr.f32.mxu1 %v39367_v30 }
 0x6ab   : > { %25670 = vmatmul.mubr.f32.gmra.mrb[46].mxu0 %v33431_v54  ;;  %v39373_v54 = vld [vmem:[#allocation143_spill] sm:$0xff] }
 0x6ac   : > { %25672 = vmatprep.mubr.f32.mxu0 %v33433_v57  ;;  %v39376_v57 = vld [vmem:[#allocation75_spill] sm:$0xff] }
 0x6ad   : > { %26713 = vmatmul.mubr.f32.gmra.mrb[18].mxu1 %v34360_v43  ;;  %v39421_v43 = vld [vmem:[#allocation64_spill] sm:$0xff] }
 0x6ae   : > { %26715 = vmatprep.mubr.f32.mxu1 %v39368_v53  ;;  %v39418_v53 = vld [vmem:[#allocation25_spill] sm:$0xff] }
 0x6af   : > { %25673 = vmatmul.mubr.f32.gmra.mrb[48].mxu0 %v33465_v37  ;;  %v39375_v37 = vld [vmem:[#allocation153_spill] sm:$0xff] }
 0x6b0   : > { %25675 = vmatprep.mubr.f32.mxu0 %v33480_v38  ;;  %v39374_v38 = vld [vmem:[#allocation151_spill] sm:$0xff] }
 0x6b1   : > { %26716 = vmatmul.mubr.f32.gmra.mrb[20].mxu1 %v39369_v59 }
 0x6b2   : > { %26718 = vmatprep.mubr.f32.mxu1 %v39370_v1 }
 0x6b3   : > { %25676 = vmatmul.mubr.f32.gmra.mrb[50].mxu0 %v39107_v32  ;;  %v39377_v32 = vand.u32 4294901760, %v39376_v57 }
 0x6b4   : > { %25678 = vmatprep.mubr.f32.mxu0 %v39108_v52 }
 0x6b5   : > { %26719 = vmatmul.mubr.f32.gmra.mrb[22].mxu1 %v39371_v55  ;;  %v8415_v52 = vsub.f32 %v39376_v57, %v39377_v32  ;;  %v8445_v32 = vsub.f32 %v39388_v45, %v39389_v50  ;;  %v39396_v50 = vld [vmem:[#allocation13_spill] sm:$0xff]  ;;  %v39415_v55 = vld [vmem:[#allocation44_spill] sm:$0xff] }
 0x6b6   : > { %26721 = vmatprep.mubr.f32.mxu1 %v39372_v44  ;;  %v39412_v44 = vld [vmem:[#allocation140_spill] sm:$0xff] }
 0x6b7   : > { %25679 = vmatmul.mubr.f32.gmra.mrb[52].mxu0 %v39110_v12  ;;  %v39378_v12 = vld [vmem:[#allocation78_spill] sm:$0xff] }
 0x6b8   : > { %25681 = vmatprep.mubr.f32.mxu0 %v39111_v0  ;;  %v39379_v0 = vand.u32 4294901760, %v39378_v12 }
 0x6b9   : > { %26722 = vmatmul.mubr.f32.gmra.mrb[24].mxu1 %v39373_v54 }
 0x6ba   : > { %26724 = vmatprep.mubr.f32.mxu1 %v34436_v15 }
 0x6bb   : > { %25682 = vmatmul.mubr.f32.gmra.mrb[54].mxu0 %v39112_v47  ;;  %v8425_v47 = vsub.f32 %v39378_v12, %v39379_v0 }
 0x6bc   : > { %25684 = vmatprep.mubr.f32.mxu0 %v39113_v46  ;;  %v39380_v46 = vld [vmem:[#allocation49_spill] sm:$0xff] }
 0x6bd   : > { %26725 = vmatmul.mubr.f32.gmra.mrb[26].mxu1 %v39374_v38  ;;  %v8426_v63 = vand.u32 4294901760, %v8425_v47  ;;  %v39393_v47 = vld [vmem:[#allocation135_spill] sm:$0xff]  ;;  %v39409_v38 = vld [vmem:[#allocation30_spill] sm:$0xff] }
 0x6be   : > { %26727 = vmatprep.mubr.f32.mxu1 %v39375_v37  ;;  %v39406_v37 = vld [vmem:[#allocation142_spill] sm:$0xff] }
 0x6bf   : > { %25685 = vmatmul.mubr.f32.gmra.mrb[56].mxu0 %v39115_v2  ;;  %v8416_v2 = vand.u32 4294901760, %v8415_v52  ;;  %v39390_v52 = vld [vmem:[#allocation46_spill] sm:$0xff] }
 0x6c0   : > { %25687 = vmatprep.mubr.f32.mxu0 %v39116_v39  ;;  %v39381_v39 = vld [vmem:[#allocation80_spill] sm:$0xff] }
 0x6c1   : > { %26728 = vmatmul.mubr.f32.gmra.mrb[28].mxu1 %v34473_v61 }
 0x6c2   : > { %26730 = vmatprep.mubr.f32.mxu1 %v34481_v4  ;;  %v39404_v4 = vld [vmem:[#allocation92_spill] sm:$0xff] }
 0x6c3   : > { %25688 = vmatmul.mubr.f32.gmra.mrb[58].mxu0 %v39118_v13  ;;  %v39382_v13 = vand.u32 4294901760, %v39381_v39  ;;  %v39405_v61 = vand.u32 4294901760, %v39404_v4 }
 0x6c4   : > { %25690 = vmatprep.mubr.f32.mxu0 %v39119_v56 }
 0x6c5   : > { %26731 = vmatmul.mubr.f32.gmra.mrb[30].mxu1 %v34495_v3  ;;  %v8435_v56 = vsub.f32 %v39381_v39, %v39382_v13  ;;  %v39403_v3 = vld [vmem:[#allocation152_spill] sm:$0xff] }
 0x6c6   : > { %26733 = vmatprep.mubr.f32.mxu1 %v34484_v20 }
 0x6c7   : > { %25691 = vmatmul.mubr.f32.gmra.mrb[60].mxu0 %v39120_v18  ;;  %v39385_v18 = vld [vmem:[#allocation175_spill] sm:$0xff]  ;;  %v8436_v0 = vand.u32 4294901760, %v8435_v56  ;;  %v39397_v56 = vld [vmem:[#allocation144_spill] sm:$0xff] }
 0x6c8   : > { %25693 = vmatprep.mubr.f32.mxu0 %v39121_v8  ;;  %v39386_v41 = vand.u32 4294901760, %v39385_v18 }
 0x6c9   : > { %26734 = vmatmul.mubr.f32.gmra.mrb[0].mxu1 %v34505_v62  ;;  %v39401_v62 = vld [vmem:[#allocation90_spill] sm:$0xff] }
 0x6ca   : > { %26740 = vmatprep.mubr.f32.mxu1 %v39380_v46  ;;  %v34643_v8 = vpack.c.bf16 %v39386_v41, %v39384_v42  ;;  %v39394_v42 = vld [vmem:[#allocation86_spill] sm:$0xff] }
 0x6cb   : > { %25694 = vmatmul.mubr.f32.gmra.mrb[62].mxu0 %v39122_v51  ;;  %v39391_v51 = vld [vmem:[#allocation84_spill] sm:$0xff]  ;;  %v39395_v18 = vand.u32 4294901760, %v39394_v42 }
 0x6cc   : > { %25700 = vmatprep.mubr.f32.mxu0 %v8416_v2  ;;  %v39392_v13 = vand.u32 4294901760, %v39391_v51  ;;  %v8446_v2 = vand.u32 4294901760, %v8445_v32  ;;  %v39402_v32 = vand.u32 4294901760, %v39401_v62 }
 0x6cd   : > { %26741 = vmatmul.mubr.f32.vlgmr.msra.gmra.mrb[2].mxu1 %v39387_v27  ;;  %v8465_v41 = vsub.f32 %v39394_v42, %v39395_v18 }
 0x6ce   : > { %26743 = vmatprep.mubr.f32.mxu1 %v39390_v52  ;;  %28135 = vmatpush3.bf16.msra.mxu1 %v34032_v58  ;;  %v8455_v10 = vsub.f32 %v39391_v51, %v39392_v13  ;;  %v39399_v13 = vand.u32 4294901760, %v39398_v23  ;;  %v8485_v20 = vsub.f32 %v39401_v62, %v39402_v32  ;;  %v39410_v32 = vld [vmem:[#allocation97_spill] sm:$0xff]  ;;  %v39454_v62 = vld [vmem:[#allocation43_spill] sm:$0xff] }
 0x6cf   : > { %25701 = vmatmul.mubr.f32.vlgmr.msra.gmra.mrb[32].mxu0 %v8426_v63  ;;  %28137 = vmatprep.subr.bf16.mxu1 %v34643_v8  ;;  %v39411_v54 = vand.u32 4294901760, %v39410_v32 }
 0x6d0   : > { %25703 = vmatprep.mubr.f32.mxu0 %v8436_v0  ;;  %28055 = vmatpush3.bf16.msra.mxu0 %v34566_v5  ;;  %v8456_v29 = vand.u32 4294901760, %v8455_v10  ;;  %v8475_v63 = vsub.f32 %v39398_v23, %v39399_v13  ;;  %v39400_v0 = vld [vmem:[#allocation141_spill] sm:$0xff]  ;;  %v8466_v5 = vand.u32 4294901760, %v8465_v41  ;;  %v8495_v10 = vsub.f32 %v39404_v4, %v39405_v61 }
 0x6d1   : > { %26744 = vmatmul.mubr.f32.gmra.mrb[4].mxu1 %v39393_v47  ;;  %28057 = vmatprep.subr.bf16.mxu0 %v39396_v50 }
 0x6d2   : > { %26746 = vmatprep.mubr.f32.mxu1 %v39397_v56  ;;  %v8476_v18 = vand.u32 4294901760, %v8475_v63  ;;  %v8496_v15 = vand.u32 4294901760, %v8495_v10  ;;  %v8515_v63 = vsub.f32 %v39410_v32, %v39411_v54 }
 0x6d3   : > { %25704 = vmatmul.mubr.f32.gmra.mrb[34].mxu0 %v8446_v2  ;;  %v8486_v2 = vand.u32 4294901760, %v8485_v20 }
 0x6d4   : > { %25706 = vmatprep.mubr.f32.mxu0 %v8456_v29  ;;  %v39407_v29 = vld [vmem:[#allocation94_spill] sm:$0xff]  ;;  %v8516_v1 = vand.u32 4294901760, %v8515_v63 }
 0x6d5   : > { %26747 = vmatmul.mubr.f32.gmra.mrb[6].mxu1 %v39400_v0  ;;  %v39408_v13 = vand.u32 4294901760, %v39407_v29 }
 0x6d6   : > { %26749 = vmatprep.mubr.f32.mxu1 %v39403_v3 }
 0x6d7   : > { %25707 = vmatmul.mubr.f32.gmra.mrb[36].mxu0 %v8466_v5  ;;  %v8505_v41 = vsub.f32 %v39407_v29, %v39408_v13  ;;  %v39413_v5 = vld [vmem:[#allocation98_spill] sm:$0xff]  ;;  %v39416_v13 = vld [vmem:[#allocation99_spill] sm:$0xff] }
 0x6d8   : > { %25709 = vmatprep.mubr.f32.mxu0 %v8476_v18  ;;  %v39414_v18 = vand.u32 4294901760, %v39413_v5  ;;  %v39417_v59 = vand.u32 4294901760, %v39416_v13  ;;  %v39442_v29 = vld [vmem:[#allocation66_spill] sm:$0xff] }
 0x6d9   : > { %26750 = vmatmul.mubr.f32.gmra.mrb[8].mxu1 %v39406_v37  ;;  %v8506_v61 = vand.u32 4294901760, %v8505_v41 }
 0x6da   : > { %26752 = vmatprep.mubr.f32.mxu1 %v39409_v38  ;;  %v8525_v20 = vsub.f32 %v39413_v5, %v39414_v18  ;;  %v8535_v10 = vsub.f32 %v39416_v13, %v39417_v59  ;;  %v39422_v18 = vld [vmem:[#allocation104_spill] sm:$0xff]  ;;  %v39430_v5 = vld [vmem:[#allocation39_spill] sm:$0xff] }
 0x6db   : > { %25710 = vmatmul.mubr.f32.gmra.mrb[38].mxu0 %v8486_v2  ;;  %v39423_v35 = vand.u32 4294901760, %v39422_v18 }
 0x6dc   : > { %25712 = vmatprep.mubr.f32.mxu0 %v8496_v15  ;;  %v8526_v54 = vand.u32 4294901760, %v8525_v20  ;;  %v39419_v15 = vld [vmem:[#allocation102_spill] sm:$0xff]  ;;  %v8536_v30 = vand.u32 4294901760, %v8535_v10 }
 0x6dd   : > { %26753 = vmatmul.mubr.f32.gmra.mrb[10].mxu1 %v39412_v44  ;;  %v39420_v2 = vand.u32 4294901760, %v39419_v15  ;;  %v8555_v63 = vsub.f32 %v39422_v18, %v39423_v35  ;;  %v39433_v18 = vld [vmem:[#allocation29_spill] sm:$0xff] }
 0x6de   : > { %26755 = vmatprep.mubr.f32.mxu1 %v39415_v55 }
 0x6df   : > { %25713 = vmatmul.mubr.f32.gmra.mrb[40].mxu0 %v8506_v61  ;;  %v8545_v41 = vsub.f32 %v39419_v15, %v39420_v2  ;;  %v8556_v13 = vand.u32 4294901760, %v8555_v63  ;;  %v39428_v2 = vld [vmem:[#allocation108_spill] sm:$0xff] }
 0x6e0   : > { %25715 = vmatprep.mubr.f32.mxu0 %v8516_v1  ;;  %v39425_v1 = vld [vmem:[#allocation106_spill] sm:$0xff]  ;;  %v39429_v15 = vand.u32 4294901760, %v39428_v2 }
 0x6e1   : > { %26756 = vmatmul.mubr.f32.gmra.mrb[12].mxu1 %v39418_v53  ;;  %v8546_v59 = vand.u32 4294901760, %v8545_v41  ;;  %v39426_v61 = vand.u32 4294901760, %v39425_v1 }
 0x6e2   : > { %26758 = vmatprep.mubr.f32.mxu1 %v39421_v43  ;;  %v8575_v10 = vsub.f32 %v39428_v2, %v39429_v15  ;;  %v39439_v2 = vld [vmem:[#allocation6_spill] sm:$0xff] }
 0x6e3   : > { %25716 = vmatmul.mubr.f32.gmra.mrb[42].mxu0 %v8526_v54  ;;  %v8565_v20 = vsub.f32 %v39425_v1, %v39426_v61  ;;  %v39434_v61 = vld [vmem:[#allocation112_spill] sm:$0xff] }
 0x6e4   : > { %25718 = vmatprep.mubr.f32.mxu0 %v8536_v30  ;;  %v39431_v30 = vld [vmem:[#allocation110_spill] sm:$0xff]  ;;  %v8576_v17 = vand.u32 4294901760, %v8575_v10  ;;  %v39435_v1 = vand.u32 4294901760, %v39434_v61 }
 0x6e5   : > { %26759 = vmatmul.mubr.f32.gmra.mrb[14].mxu1 %v39424_v6  ;;  %v8566_v35 = vand.u32 4294901760, %v8565_v20  ;;  %v39432_v54 = vand.u32 4294901760, %v39431_v30 }
 0x6e6   : > { %26761 = vmatprep.mubr.f32.mxu1 %v39427_v40  ;;  %v8595_v63 = vsub.f32 %v39434_v61, %v39435_v1  ;;  %v39445_v61 = vld [vmem:[#allocation53_spill] sm:$0xff] }
 0x6e7   : > { %25719 = vmatmul.mubr.f32.gmra.mrb[44].mxu0 %v8546_v59  ;;  %v8585_v41 = vsub.f32 %v39431_v30, %v39432_v54  ;;  %v39440_v54 = vld [vmem:[#allocation116_spill] sm:$0xff] }
 0x6e8   : > { %25721 = vmatprep.mubr.f32.mxu0 %v8556_v13  ;;  %v39437_v13 = vld [vmem:[#allocation114_spill] sm:$0xff]  ;;  %v8596_v32 = vand.u32 4294901760, %v8595_v63  ;;  %v39441_v30 = vand.u32 4294901760, %v39440_v54 }
 0x6e9   : > { %26762 = vmatmul.mubr.f32.gmra.mrb[16].mxu1 %v39430_v5  ;;  %v8586_v15 = vand.u32 4294901760, %v8585_v41  ;;  %v39438_v59 = vand.u32 4294901760, %v39437_v13 }
 0x6ea   : > { %26764 = vmatprep.mubr.f32.mxu1 %v39433_v18  ;;  %v8615_v10 = vsub.f32 %v39440_v54, %v39441_v30  ;;  %v39451_v54 = vld [vmem:[#allocation170_spill] sm:$0xff] }
 0x6eb   : > { %25722 = vmatmul.mubr.f32.gmra.mrb[46].mxu0 %v8566_v35  ;;  %v8605_v20 = vsub.f32 %v39437_v13, %v39438_v59  ;;  %v39446_v59 = vld [vmem:[#allocation120_spill] sm:$0xff] }
 0x6ec   : > { %25724 = vmatprep.mubr.f32.mxu0 %v8576_v17  ;;  %v39443_v17 = vld [vmem:[#allocation118_spill] sm:$0xff]  ;;  %v8616_v24 = vand.u32 4294901760, %v8615_v10  ;;  %v39447_v13 = vand.u32 4294901760, %v39446_v59 }
 0x6ed   : > { %26765 = vmatmul.mubr.f32.gmra.mrb[18].mxu1 %v39436_v36  ;;  %v8606_v1 = vand.u32 4294901760, %v8605_v20  ;;  %v39444_v35 = vand.u32 4294901760, %v39443_v17 }
 0x6ee   : > { %26767 = vmatprep.mubr.f32.mxu1 %v39439_v2  ;;  %v8635_v63 = vsub.f32 %v39446_v59, %v39447_v13 }
 0x6ef   : > { %25725 = vmatmul.mubr.f32.gmra.mrb[48].mxu0 %v8586_v15  ;;  %v8625_v41 = vsub.f32 %v39443_v17, %v39444_v35  ;;  %v39452_v35 = vld [vmem:[#allocation124_spill] sm:$0xff] }
 0x6f0   : > { %25727 = vmatprep.mubr.f32.mxu0 %v8596_v32  ;;  %v39449_v32 = vld [vmem:[#allocation122_spill] sm:$0xff]  ;;  %v8636_v4 = vand.u32 4294901760, %v8635_v63  ;;  %v39453_v17 = vand.u32 4294901760, %v39452_v35 }
 0x6f1   : > { %26768 = vmatmul.mubr.f32.gmra.mrb[20].mxu1 %v39442_v29  ;;  %v8626_v30 = vand.u32 4294901760, %v8625_v41  ;;  %v39450_v15 = vand.u32 4294901760, %v39449_v32 }
 0x6f2   : > { %26770 = vmatprep.mubr.f32.mxu1 %v39445_v61  ;;  %v8655_v10 = vsub.f32 %v39452_v35, %v39453_v17 }
 0x6f3   : > { %25728 = vmatmul.mubr.f32.gmra.mrb[50].mxu0 %v8606_v1  ;;  %v8645_v20 = vsub.f32 %v39449_v32, %v39450_v15  ;;  %v39457_v15 = vld [vmem:[#allocation128_spill] sm:$0xff] }
 0x6f4   : > { %25730 = vmatprep.mubr.f32.mxu0 %v8616_v24  ;;  %v39455_v24 = vld [vmem:[#allocation126_spill] sm:$0xff]  ;;  %v8656_v59 = vand.u32 4294901760, %v8655_v10  ;;  %v39458_v32 = vand.u32 4294901760, %v39457_v15 }
 0x6f5   : > { %26771 = vmatmul.mubr.f32.gmra.mrb[22].mxu1 %v39448_v25  ;;  %v8646_v13 = vand.u32 4294901760, %v8645_v20  ;;  %v39456_v1 = vand.u32 4294901760, %v39455_v24 }
 0x6f6   : > { %26773 = vmatprep.mubr.f32.mxu1 %v39451_v54  ;;  %v8675_v63 = vsub.f32 %v39457_v15, %v39458_v32 }
 0x6f7   : > { %25731 = vmatmul.mubr.f32.gmra.mrb[52].mxu0 %v8626_v30  ;;  %v8665_v41 = vsub.f32 %v39455_v24, %v39456_v1  ;;  %v39462_v1 = vld [vmem:[#allocation132_spill] sm:$0xff] }
 0x6f8   : > { %25733 = vmatprep.mubr.f32.mxu0 %v8636_v4  ;;  %v39460_v4 = vld [vmem:[#allocation130_spill] sm:$0xff]  ;;  %v8676_v35 = vand.u32 4294901760, %v8675_v63  ;;  %v39463_v24 = vand.u32 4294901760, %v39462_v1 }
 0x6f9   : > { %26774 = vmatmul.mubr.f32.gmra.mrb[24].mxu1 %v39454_v62  ;;  %v8666_v17 = vand.u32 4294901760, %v8665_v41  ;;  %v39461_v30 = vand.u32 4294901760, %v39460_v4 }
 0x6fa   : > { %26776 = vmatprep.mubr.f32.mxu1 %v34456_v7  ;;  %v8695_v10 = vsub.f32 %v39462_v1, %v39463_v24 }
 0x6fb   : > { %25734 = vmatmul.mubr.f32.gmra.mrb[54].mxu0 %v8646_v13  ;;  %v8685_v20 = vsub.f32 %v39460_v4, %v39461_v30  ;;  %v39466_v30 = vld [vmem:[#allocation76_spill] sm:$0xff] }
 0x6fc   : > { %25736 = vmatprep.mubr.f32.mxu0 %v8656_v59  ;;  %v39464_v59 = vld [vmem:[#allocation133_spill] sm:$0xff]  ;;  %v8696_v15 = vand.u32 4294901760, %v8695_v10  ;;  %v39467_v4 = vand.u32 4294901760, %v39466_v30 }
 0x6fd   : > { %26777 = vmatmul.mubr.f32.gmra.mrb[26].mxu1 %v39459_v22  ;;  %v8686_v32 = vand.u32 4294901760, %v8685_v20  ;;  %v39465_v13 = vand.u32 4294901760, %v39464_v59 }
 0x6fe   : > { %26779 = vmatprep.mubr.f32.mxu1 %v34479_v9  ;;  %v8715_v63 = vsub.f32 %v39466_v30, %v39467_v4  ;;  %v39472_v4 = vand.u32 4294901760, %v39387_v27  ;;  %v39477_v30 = vand.u32 4294901760, %v39397_v56  ;;  %v39478_v27 = vld [vmem:[#allocation79_spill] sm:$0xff] }
 0x6ff   : > { %25737 = vmatmul.mubr.f32.gmra.mrb[56].mxu0 %v8666_v17  ;;  %v8705_v41 = vsub.f32 %v39464_v59, %v39465_v13  ;;  %v39470_v13 = vand.u32 4294901760, %v39380_v46  ;;  %v39476_v46 = vand.u32 4294901760, %v39393_v47  ;;  %v39484_v47 = vand.u32 4294901760, %v39406_v37  ;;  %v39486_v56 = vld [vmem:[#allocation87_spill] sm:$0xff] }
 0x700   : > { %25739 = vmatprep.mubr.f32.mxu0 %v8676_v35  ;;  %v39468_v35 = vld [vmem:[#allocation77_spill] sm:$0xff]  ;;  %v8716_v1 = vand.u32 4294901760, %v8715_v63  ;;  %v39481_v63 = vand.u32 4294901760, %v39403_v3  ;;  %v39489_v3 = vand.u32 4294901760, %v39415_v55  ;;  %v39492_v37 = vand.u32 4294901760, %v39418_v53 }
 0x701   : > { %26780 = vmatmul.mubr.f32.gmra.mrb[28].mxu1 %v34493_v60  ;;  %v8706_v24 = vand.u32 4294901760, %v8705_v41  ;;  %v39469_v17 = vand.u32 4294901760, %v39468_v35  ;;  %v39474_v41 = vld [vmem:[#allocation71_spill] sm:$0xff]  ;;  %v39497_v55 = vand.u32 4294901760, %v39427_v40  ;;  %v39500_v53 = vand.u32 4294901760, %v39430_v5 }
 0x702   : > { %26782 = vmatprep.mubr.f32.mxu1 %v34503_v11  ;;  %v39505_v40 = vand.u32 4294901760, %v39439_v2  ;;  %v39508_v5 = vand.u32 4294901760, %v39442_v29  ;;  %v39513_v2 = vand.u32 4294901760, %v39451_v54  ;;  %v39516_v29 = vand.u32 4294901760, %v39454_v62 }
 0x703   : > { %25740 = vmatmul.mubr.f32.gmra.mrb[58].mxu0 %v8686_v32  ;;  %v8725_v20 = vsub.f32 %v39468_v35, %v39469_v17  ;;  %v39473_v32 = vand.u32 4294901760, %v39390_v52  ;;  %v39479_v52 = vld [vmem:[#allocation81_spill] sm:$0xff]  ;;  %v39521_v54 = vand.u32 4294901760, %v34479_v9  ;;  %v39524_v62 = vand.u32 4294901760, %v34493_v60  ;;  %v22087_v9 = vld [vmem:[%s36912_s3 + $0x78] sm:$0xff] }
 0x704   : > { %25742 = vmatprep.mubr.f32.mxu0 %v8696_v15  ;;  %v39471_v15 = vld [vmem:[#allocation69_spill] sm:$0xff]  ;;  %v39529_v60 = vand.u32 4294901760, %v34508_v49 }
 0x705   : > { %26783 = vmatmul.mubr.f32.gmra.mrb[30].mxu1 %v34516_v26  ;;  %v8726_v10 = vand.u32 4294901760, %v8725_v20  ;;  %v39483_v35 = vld [vmem:[#allocation85_spill] sm:$0xff]  ;;  %v39490_v20 = vld [vmem:[#allocation91_spill] sm:$0xff] }
 0x706   : > { %26785 = vmatprep.mubr.f32.mxu1 %v34508_v49  ;;  %v39487_v17 = vld [vmem:[#allocation89_spill] sm:$0xff]  ;;  %v39536_v49 = vld [vmem:[#allocation92_spill] sm:$0xff] }
 0x707   : > { %25743 = vmatmul.mubr.f32.gmra.mrb[60].mxu0 %v8706_v24  ;;  %v39482_v24 = vld [vmem:[#allocation83_spill] sm:$0xff] }
 0x708   : > { %25745 = vmatprep.mubr.f32.mxu0 %v8716_v1  ;;  %v39475_v1 = vld [vmem:[#allocation72_spill] sm:$0xff] }
 0x709   : > { %26786 = vmatmul.mubr.f32.gmra.mrb[0].mxu1 %v34524_v16 }
 0x70a   : > { %26792 = vmatprep.mubr.f32.mxu1 %v39470_v13  ;;  %v39494_v13 = vld [vmem:[#allocation95_spill] sm:$0xff] }
 0x70b   : > { %25746 = vmatmul.mubr.f32.gmra.mrb[62].mxu0 %v8726_v10  ;;  %v39491_v10 = vld [vmem:[#allocation93_spill] sm:$0xff] }
 0x70c   : > { %25752 = vmatprep.mubr.f32.mxu0 %v39471_v15  ;;  %v39495_v15 = vld [vmem:[#allocation96_spill] sm:$0xff] }
 0x70d   : > { %26793 = vmatmul.mubr.f32.vlgmr.msra.gmra.mrb[2].mxu1 %v39472_v4  ;;  %v39498_v4 = vld [vmem:[#allocation100_spill] sm:$0xff] }
 0x70e   : > { %26795 = vmatprep.mubr.f32.mxu1 %v39473_v32  ;;  %28139 = vmatpush3.bf16.msra.mxu1 %v34643_v8  ;;  %v39480_v8 = vand.u32 4294901760, %v39400_v0  ;;  %v39488_v0 = vand.u32 4294901760, %v39412_v44  ;;  %v39496_v44 = vand.u32 4294901760, %v39424_v6  ;;  %v39499_v32 = vld [vmem:[#allocation101_spill] sm:$0xff]  ;;  %v39504_v6 = vand.u32 4294901760, %v39436_v36 }
 0x70f   : > { %25753 = vmatmul.mubr.f32.vlgmr.msra.gmra.mrb[32].mxu0 %v39474_v41  ;;  %28141 = vmatprep.subr.bf16.mxu1 %v34032_v58  ;;  %v39502_v41 = vld [vmem:[#allocation103_spill] sm:$0xff]  ;;  %v39512_v36 = vand.u32 4294901760, %v39448_v25  ;;  %v39520_v25 = vand.u32 4294901760, %v39459_v22 }
 0x710   : > { %25755 = vmatprep.mubr.f32.mxu0 %v39475_v1  ;;  %28059 = vmatpush3.bf16.msra.mxu0 %v39396_v50  ;;  %v39485_v50 = vand.u32 4294901760, %v39409_v38  ;;  %v39493_v38 = vand.u32 4294901760, %v39421_v43  ;;  %v39501_v43 = vand.u32 4294901760, %v39433_v18  ;;  %v39503_v1 = vld [vmem:[#allocation105_spill] sm:$0xff]  ;;  %v39509_v18 = vand.u32 4294901760, %v39445_v61  ;;  %v22086_v22 = vld [vmem:[%s36912_s3 + $0x70] sm:$0xff] }
 0x711   : > { %26796 = vmatmul.mubr.f32.gmra.mrb[4].mxu1 %v39476_v46  ;;  %v39506_v46 = vld [vmem:[#allocation107_spill] sm:$0xff]  ;;  %v39517_v61 = vand.u32 4294901760, %v34456_v7  ;;  %v39525_v7 = vand.u32 4294901760, %v34503_v11 }
 0x712   : > { %26798 = vmatprep.mubr.f32.mxu1 %v39477_v30  ;;  %v39507_v30 = vld [vmem:[#allocation109_spill] sm:$0xff]  ;;  %v39530_v11 = vld [vmem:[#allocation131_spill] sm:$0xff] }
 0x713   : > { %25756 = vmatmul.mubr.f32.gmra.mrb[34].mxu0 %v39478_v27  ;;  %v39510_v27 = vld [vmem:[#allocation111_spill] sm:$0xff] }
 0x714   : > { %25758 = vmatprep.mubr.f32.mxu0 %v39479_v52  ;;  %v39511_v52 = vld [vmem:[#allocation113_spill] sm:$0xff] }
 0x715   : > { %26799 = vmatmul.mubr.f32.gmra.mrb[6].mxu1 %v39480_v8  ;;  %v39514_v8 = vld [vmem:[#allocation115_spill] sm:$0xff] }
 0x716   : > { %26801 = vmatprep.mubr.f32.mxu1 %v39481_v63  ;;  %v39515_v63 = vld [vmem:[#allocation117_spill] sm:$0xff] }
 0x717   : > { %25759 = vmatmul.mubr.f32.gmra.mrb[36].mxu0 %v39482_v24  ;;  %v39518_v24 = vld [vmem:[#allocation119_spill] sm:$0xff] }
 0x718   : > { %25761 = vmatprep.mubr.f32.mxu0 %v39483_v35  ;;  %v39519_v35 = vld [vmem:[#allocation121_spill] sm:$0xff] }
 0x719   : > { %26802 = vmatmul.mubr.f32.gmra.mrb[8].mxu1 %v39484_v47  ;;  %v39522_v47 = vld [vmem:[#allocation123_spill] sm:$0xff] }
 0x71a   : > { %26804 = vmatprep.mubr.f32.mxu1 %v39485_v50  ;;  %v39523_v50 = vld [vmem:[#allocation125_spill] sm:$0xff] }
 0x71b   : > { %25762 = vmatmul.mubr.f32.gmra.mrb[38].mxu0 %v39486_v56  ;;  %v39526_v56 = vld [vmem:[#allocation127_spill] sm:$0xff] }
 0x71c   : > { %25764 = vmatprep.mubr.f32.mxu0 %v39487_v17  ;;  %v39527_v17 = vld [vmem:[#allocation129_spill] sm:$0xff] }
 0x71d   : > { %26805 = vmatmul.mubr.f32.gmra.mrb[10].mxu1 %v39488_v0  ;;  %v39528_v0 = vand.u32 4294901760, %v34516_v26  ;;  %v39535_v26 = vld [vmem:[#allocation90_spill] sm:$0xff] }
 0x71e   : > { %26807 = vmatprep.mubr.f32.mxu1 %v39489_v3  ;;  %v16167_v3 = vand.u32 4294901760, %v22086_v22 }
 0x71f   : > { %25765 = vmatmul.mubr.f32.gmra.mrb[40].mxu0 %v39490_v20  ;;  %v16170_v20 = vand.u32 4294901760, %v22087_v9 }
 0x720   : > { %25767 = vmatprep.mubr.f32.mxu0 %v39491_v10  ;;  %v39531_v10 = vld [vmem:[#allocation73_spill] sm:$0xff] }
 0x721   : > { %26808 = vmatmul.mubr.f32.gmra.mrb[12].mxu1 %v39492_v37  ;;  %v39532_v37 = vand.u32 4294901760, %v34524_v16  ;;  %v39537_v16 = vld [vmem:[#allocation156_spill] sm:$0xff] }
 0x722   : > { %26810 = vmatprep.mubr.f32.mxu1 %v39493_v38  ;;  %v39533_v38 = vld [vmem:[#allocation74_spill] sm:$0xff] }
 0x723   : > { %25768 = vmatmul.mubr.f32.gmra.mrb[42].mxu0 %v39494_v13  ;;  %v34873_v13 = vpack.c.bf16 %v16170_v20, %v16167_v3 }
 0x724   : > { %25770 = vmatprep.mubr.f32.mxu0 %v39495_v15  ;;  %v39545_v15 = vld [vmem:[#allocation20_spill] sm:$0xff] }
 0x725   : > { %26811 = vmatmul.mubr.f32.gmra.mrb[14].mxu1 %v39496_v44  ;;  %v39546_v44 = vld [vmem:[#allocation68_spill] sm:$0xff] }
 0x726   : > { %26813 = vmatprep.mubr.f32.mxu1 %v39497_v55  ;;  %v39547_v55 = vld [vmem:[#allocation102_spill] sm:$0xff] }
 0x727   : > { %25771 = vmatmul.mubr.f32.gmra.mrb[44].mxu0 %v39498_v4  ;;  %v39548_v4 = vld [vmem:[#allocation104_spill] sm:$0xff] }
 0x728   : > { %25773 = vmatprep.mubr.f32.mxu0 %v39499_v32  ;;  %v39549_v32 = vld [vmem:[#allocation59_spill] sm:$0xff] }
 0x729   : > { %26814 = vmatmul.mubr.f32.gmra.mrb[16].mxu1 %v39500_v53  ;;  %v39550_v53 = vld [vmem:[#allocation38_spill] sm:$0xff] }
 0x72a   : > { %26816 = vmatprep.mubr.f32.mxu1 %v39501_v43  ;;  %v39551_v43 = vld [vmem:[#allocation106_spill] sm:$0xff] }
 0x72b   : > { %25774 = vmatmul.mubr.f32.gmra.mrb[46].mxu0 %v39502_v41  ;;  %v39552_v41 = vld [vmem:[#allocation108_spill] sm:$0xff] }
 0x72c   : > { %25776 = vmatprep.mubr.f32.mxu0 %v39503_v1  ;;  %v39553_v1 = vld [vmem:[#allocation147_spill] sm:$0xff] }
 0x72d   : > { %26817 = vmatmul.mubr.f32.gmra.mrb[18].mxu1 %v39504_v6  ;;  %v39554_v6 = vld [vmem:[#allocation4_spill] sm:$0xff] }
 0x72e   : > { %26819 = vmatprep.mubr.f32.mxu1 %v39505_v40  ;;  %v39555_v40 = vld [vmem:[#allocation110_spill] sm:$0xff] }
 0x72f   : > { %25777 = vmatmul.mubr.f32.gmra.mrb[48].mxu0 %v39506_v46  ;;  %v39556_v46 = vld [vmem:[#allocation112_spill] sm:$0xff] }
 0x730   : > { %25779 = vmatprep.mubr.f32.mxu0 %v39507_v30  ;;  %v39557_v30 = vld [vmem:[#allocation149_spill] sm:$0xff] }
 0x731   : > { %26820 = vmatmul.mubr.f32.gmra.mrb[20].mxu1 %v39508_v5  ;;  %v39558_v5 = vld [vmem:[#allocation32_spill] sm:$0xff] }
 0x732   : > { %26822 = vmatprep.mubr.f32.mxu1 %v39509_v18  ;;  %v39559_v18 = vld [vmem:[#allocation114_spill] sm:$0xff] }
 0x733   : > { %25780 = vmatmul.mubr.f32.gmra.mrb[50].mxu0 %v39510_v27  ;;  %v39560_v27 = vld [vmem:[#allocation116_spill] sm:$0xff] }
 0x734   : > { %25782 = vmatprep.mubr.f32.mxu0 %v39511_v52  ;;  %v39561_v52 = vld [vmem:[#allocation65_spill] sm:$0xff] }
 0x735   : > { %26823 = vmatmul.mubr.f32.gmra.mrb[22].mxu1 %v39512_v36  ;;  %v39562_v36 = vld [vmem:[#allocation167_spill] sm:$0xff] }
 0x736   : > { %26825 = vmatprep.mubr.f32.mxu1 %v39513_v2  ;;  %v39563_v2 = vld [vmem:[#allocation118_spill] sm:$0xff] }
 0x737   : > { %25783 = vmatmul.mubr.f32.gmra.mrb[52].mxu0 %v39514_v8  ;;  %v39564_v8 = vld [vmem:[#allocation120_spill] sm:$0xff] }
 0x738   : > { %25785 = vmatprep.mubr.f32.mxu0 %v39515_v63  ;;  %v39565_v63 = vld [vmem:[#allocation143_spill] sm:$0xff] }
 0x739   : > { %26826 = vmatmul.mubr.f32.gmra.mrb[24].mxu1 %v39516_v29  ;;  %v39566_v29 = vld [vmem:[#allocation60_spill] sm:$0xff] }
 0x73a   : > { %26828 = vmatprep.mubr.f32.mxu1 %v39517_v61  ;;  %v39567_v61 = vld [vmem:[#allocation122_spill] sm:$0xff] }
 0x73b   : > { %25786 = vmatmul.mubr.f32.gmra.mrb[54].mxu0 %v39518_v24  ;;  %v34925_v24 = vsub.f32 %v22086_v22, %v16167_v3  ;;  %v39574_v22 = vld [vmem:[#allocation45_spill] sm:$0xff]  ;;  %v39577_v3 = vld [vmem:[#allocation155_spill] sm:$0xff] }
 0x73c   : > { %25788 = vmatprep.mubr.f32.mxu0 %v39519_v35  ;;  %v34927_v35 = vsub.f32 %v22087_v9, %v16170_v20  ;;  %v39575_v9 = vld [vmem:[#allocation130_spill] sm:$0xff]  ;;  %v39578_v20 = vld [vmem:[#allocation35_spill] sm:$0xff] }
 0x73d   : > { %26829 = vmatmul.mubr.f32.gmra.mrb[26].mxu1 %v39520_v25  ;;  %v39568_v25 = vld [vmem:[#allocation124_spill] sm:$0xff] }
 0x73e   : > { %26831 = vmatprep.mubr.f32.mxu1 %v39521_v54  ;;  %v39569_v54 = vld [vmem:[#allocation151_spill] sm:$0xff] }
 0x73f   : > { %25789 = vmatmul.mubr.f32.gmra.mrb[56].mxu0 %v39522_v47  ;;  %v39570_v47 = vld [vmem:[#allocation153_spill] sm:$0xff] }
 0x740   : > { %25791 = vmatprep.mubr.f32.mxu0 %v39523_v50  ;;  %v39571_v50 = vld [vmem:[#allocation126_spill] sm:$0xff] }
 0x741   : > { %26832 = vmatmul.mubr.f32.gmra.mrb[28].mxu1 %v39524_v62  ;;  %v37962_v62 = vand.u32 4294901760, %v34925_v24 }
 0x742   : > { %26834 = vmatprep.mubr.f32.mxu1 %v39525_v7  ;;  %v37960_v7 = vand.u32 4294901760, %v34927_v35 }
 0x743   : > { %25792 = vmatmul.mubr.f32.gmra.mrb[58].mxu0 %v39526_v56  ;;  %v39572_v56 = vld [vmem:[#allocation128_spill] sm:$0xff] }
 0x744   : > { %25794 = vmatprep.mubr.f32.mxu0 %v39527_v17  ;;  %v39573_v17 = vld [vmem:[#allocation158_spill] sm:$0xff] }
 0x745   : > { %26835 = vmatmul.mubr.f32.gmra.mrb[30].mxu1 %v39528_v0  ;;  %v16557_v0 = vsub.f32 %v34925_v24, %v37962_v62 }
 0x746   : > { %26837 = vmatprep.mubr.f32.mxu1 %v39529_v60  ;;  %v16564_v60 = vsub.f32 %v34927_v35, %v37960_v7 }
 0x747   : > { %25795 = vmatmul.mubr.f32.gmra.mrb[60].mxu0 %v39530_v11  ;;  %v39576_v11 = vld [vmem:[#allocation132_spill] sm:$0xff] }
 0x748   : > { %25797 = vmatprep.mubr.f32.mxu0 %v39531_v10  ;;  %v16558_v10 = vand.u32 4294901760, %v16557_v0 }
 0x749   : > { %26838 = vmatmul.mubr.f32.gmra.mrb[0].mxu1 %v39532_v37  ;;  %v16565_v37 = vand.u32 4294901760, %v16564_v60 }
 0x74a   : > { %26844 = vmatprep.mubr.f32.mxu1 %v34179_v14 }
 0x74b   : > { %25798 = vmatmul.mubr.f32.gmra.mrb[62].mxu0 %v39533_v38  ;;  %v39579_v38 = vld [vmem:[#allocation179_spill] sm:$0xff] }
 0x74c   : > { %25804 = vmatprep.mubr.f32.mxu0 %v39376_v57  ;;  %v39538_v57 = vld [vmem:[#allocation176_spill] sm:$0xff] }
 0x74d   : > { %26845 = vmatmul.mubr.f32.vlgmr.msra.gmra.mrb[2].mxu1 %v34186_v34 }
 0x74e   : > { %26847 = vmatprep.mubr.f32.mxu1 %v34192_v21  ;;  %28143 = vmatpush3.bf16.msra.mxu1 %v34032_v58  ;;  %v39534_v58 = vld [vmem:[#allocation148_spill] sm:$0xff] }
 0x74f   : > { %25805 = vmatmul.mubr.f32.vlgmr.msra.gmra.mrb[32].mxu0 %v39378_v12  ;;  %28145 = vmatprep.subr.bf16.mxu1 %v34873_v13  ;;  %v39539_v12 = vld [vmem:[#allocation94_spill] sm:$0xff] }
 0x750   : > { %25807 = vmatprep.mubr.f32.mxu0 %v39381_v39  ;;  %v39540_v39 = vld [vmem:[#allocation97_spill] sm:$0xff] }
 0x751   : > { %26848 = vmatmul.mubr.f32.gmra.mrb[4].mxu1 %v34202_v28 }
 0x752   : > { %26850 = vmatprep.mubr.f32.mxu1 %v39354_v33 }
 0x753   : > { %25808 = vmatmul.mubr.f32.gmra.mrb[34].mxu0 %v39388_v45  ;;  %v39541_v45 = vld [vmem:[#allocation47_spill] sm:$0xff] }
 0x754   : > { %25810 = vmatprep.mubr.f32.mxu0 %v39391_v51  ;;  %v39542_v51 = vld [vmem:[#allocation51_spill] sm:$0xff] }
 0x755   : > { %26851 = vmatmul.mubr.f32.gmra.mrb[6].mxu1 %v39355_v48 }
 0x756   : > { %26853 = vmatprep.mubr.f32.mxu1 %v39356_v31 }
 0x757   : > { %25811 = vmatmul.mubr.f32.gmra.mrb[36].mxu0 %v39394_v42  ;;  %v39544_v42 = vld [vmem:[#allocation99_spill] sm:$0xff] }
 0x758   : > { %25813 = vmatprep.mubr.f32.mxu0 %v39398_v23  ;;  %v39543_v23 = vld [vmem:[#allocation98_spill] sm:$0xff] }
 0x759   : > { %26854 = vmatmul.mubr.f32.gmra.mrb[8].mxu1 %v39357_v19 }
 0x75a   : > { %26856 = vmatprep.mubr.f32.mxu1 %v39534_v58 }
 0x75b   : > { %25814 = vmatmul.mubr.f32.gmra.mrb[38].mxu0 %v39535_v26  ;;  %v34951_v26 = vpack.c.bf16 %v16565_v37, %v16558_v10 }
 0x75c   : > { %25816 = vmatprep.mubr.f32.mxu0 %v39536_v49  ;;  %v34956_v49 = vpack.c.bf16 %v34927_v35, %v34925_v24 }
 0x75d   : > { %26857 = vmatmul.mubr.f32.gmra.mrb[10].mxu1 %v39537_v16 }
 0x75e   : > { %26859 = vmatprep.mubr.f32.mxu1 %v39538_v57 }
 0x75f   : > { %25817 = vmatmul.mubr.f32.gmra.mrb[40].mxu0 %v39539_v12 }
 0x760   : > { %25819 = vmatprep.mubr.f32.mxu0 %v39540_v39 }
 0x761   : > { %26860 = vmatmul.mubr.f32.gmra.mrb[12].mxu1 %v39541_v45 }
 0x762   : > { %26862 = vmatprep.mubr.f32.mxu1 %v39542_v51 }
 0x763   : > { %25820 = vmatmul.mubr.f32.gmra.mrb[42].mxu0 %v39543_v23 }
 0x764   : > { %25822 = vmatprep.mubr.f32.mxu0 %v39544_v42 }
 0x765   : > { %26863 = vmatmul.mubr.f32.gmra.mrb[14].mxu1 %v39545_v15 }
 0x766   : > { %26865 = vmatprep.mubr.f32.mxu1 %v39546_v44 }
 0x767   : > { %25823 = vmatmul.mubr.f32.gmra.mrb[44].mxu0 %v39547_v55 }
 0x768   : > { %25825 = vmatprep.mubr.f32.mxu0 %v39548_v4 }
 0x769   : > { %26866 = vmatmul.mubr.f32.gmra.mrb[16].mxu1 %v39549_v32 }
 0x76a   : > { %26868 = vmatprep.mubr.f32.mxu1 %v39550_v53 }
 0x76b   : > { %25826 = vmatmul.mubr.f32.gmra.mrb[46].mxu0 %v39551_v43 }
 0x76c   : > { %25828 = vmatprep.mubr.f32.mxu0 %v39552_v41 }
 0x76d   : > { %26869 = vmatmul.mubr.f32.gmra.mrb[18].mxu1 %v39553_v1 }
 0x76e   : > { %26871 = vmatprep.mubr.f32.mxu1 %v39554_v6 }
 0x76f   : > { %25829 = vmatmul.mubr.f32.gmra.mrb[48].mxu0 %v39555_v40 }
 0x770   : > { %25831 = vmatprep.mubr.f32.mxu0 %v39556_v46 }
 0x771   : > { %26872 = vmatmul.mubr.f32.gmra.mrb[20].mxu1 %v39557_v30 }
 0x772   : > { %26874 = vmatprep.mubr.f32.mxu1 %v39558_v5 }
 0x773   : > { %25832 = vmatmul.mubr.f32.gmra.mrb[50].mxu0 %v39559_v18 }
 0x774   : > { %25834 = vmatprep.mubr.f32.mxu0 %v39560_v27  ;;  %v16044_v27 = vld [vmem:[#allocation2 + $0x99] sm:$0xff] }
 0x775   : > { %26875 = vmatmul.mubr.f32.gmra.mrb[22].mxu1 %v39561_v52 }
 0x776   : > { %26877 = vmatprep.mubr.f32.mxu1 %v39562_v36 }
 0x777   : > { %25835 = vmatmul.mubr.f32.gmra.mrb[52].mxu0 %v39563_v2 }
 0x778   : > { %25837 = vmatprep.mubr.f32.mxu0 %v39564_v8 }
 0x779   : > { %26878 = vmatmul.mubr.f32.gmra.mrb[24].mxu1 %v39565_v63 }
 0x77a   : > { %26880 = vmatprep.mubr.f32.mxu1 %v39566_v29 }
 0x77b   : > { %25838 = vmatmul.mubr.f32.gmra.mrb[54].mxu0 %v39567_v61 }
 0x77c   : > { %25840 = vmatprep.mubr.f32.mxu0 %v39568_v25 }
 0x77d   : > { %26881 = vmatmul.mubr.f32.gmra.mrb[26].mxu1 %v39569_v54 }
 0x77e   : > { %26883 = vmatprep.mubr.f32.mxu1 %v39570_v47 }
 0x77f   : > { %25841 = vmatmul.mubr.f32.gmra.mrb[56].mxu0 %v39571_v50 }
 0x780   : > { %25843 = vmatprep.mubr.f32.mxu0 %v39572_v56 }
 0x781   : > { %26884 = vmatmul.mubr.f32.gmra.mrb[28].mxu1 %v39573_v17 }
 0x782   : > { %26886 = vmatprep.mubr.f32.mxu1 %v39574_v22 }
 0x783   : > { %25844 = vmatmul.mubr.f32.gmra.mrb[58].mxu0 %v39575_v9  ;;  %v16047_v9 = vld [vmem:[#allocation2 + $0xc1] sm:$0xff] }
 0x784   : > { %25846 = vmatprep.mubr.f32.mxu0 %v39576_v11 }
 0x785   : > { %26887 = vmatmul.mubr.f32.gmra.mrb[30].mxu1 %v39577_v3 }
 0x786   : > { %26889 = vmatprep.mubr.f32.mxu1 %v39578_v20 }
 0x787   : > { %25847 = vmatmul.mubr.f32.gmra.mrb[60].mxu0 %v39464_v59  ;;  %v16039_v59 = vld [vmem:[#allocation2 + $0x61] sm:$0xff] }
 0x788   : > { %v16083_v39 = vsel %vm2325_vm1, %v16039_v59, 0 }
 0x789   : > { %26890 = vmatmul.mubr.f32.gmra.mrb[0].mxu1 %v39579_v38 }
 0x78a   : > { %26896 = vmatprep.mubr.f32.mxu1 %v34179_v14  ;;  %v16035_v14 = vld [vmem:[#allocation2 + $0x31] sm:$0xff] }
 0x78d   : > { %26897 = vmatmul.mubr.f32.vlgmr.msra.gmra.mrb[2].mxu1 %v34186_v34  ;;  %v16036_v34 = vld [vmem:[#allocation2 + $0x39] sm:$0xff] }
 0x78e   : > { %26899 = vmatprep.mubr.f32.mxu1 %v34192_v21  ;;  %28147 = vmatpush3.bf16.msra.mxu1 %v34873_v13  ;;  %v16071_v21 = vsel %vm2325_vm1, %v16035_v14, 0 }
 0x78f   : > { %28149 = vmatprep.subr.bf16.mxu1 %v34951_v26 }
 0x791   : > { %26900 = vmatmul.mubr.f32.gmra.mrb[4].mxu1 %v34202_v28  ;;  %v16037_v28 = vld [vmem:[#allocation2 + $0x49] sm:$0xff] }
 0x792   : > { %26902 = vmatprep.mubr.f32.mxu1 %v39354_v33  ;;  %v16074_v33 = vsel %vm2325_vm1, %v16036_v34, 0 }
 0x795   : > { %26903 = vmatmul.mubr.f32.gmra.mrb[6].mxu1 %v39355_v48  ;;  %v34983_v48 = vand.u32 4294901760, %v16071_v21 }
 0x796   : > { %26905 = vmatprep.mubr.f32.mxu1 %v39356_v31  ;;  %v16077_v31 = vsel %vm2325_vm1, %v16037_v28, 0  ;;  %v16107_v28 = vsel %vm2325_vm1, %v16047_v9, 0 }
 0x797   : > { %v34994_v12 = vsub.f32 %v16071_v21, %v34983_v48 }
 0x799   : > { %26906 = vmatmul.mubr.f32.gmra.mrb[8].mxu1 %v39357_v19  ;;  %v16038_v19 = vld [vmem:[#allocation2 + $0x51] sm:$0xff]  ;;  %v37959_v4 = vand.u32 4294901760, %v34994_v12 }
 0x79a   : > { %26908 = vmatprep.mubr.f32.mxu1 %v39534_v58  ;;  %v34988_v58 = vand.u32 4294901760, %v16074_v33 }
 0x79b   : > { %v16236_v18 = vsub.f32 %v34994_v12, %v37959_v4  ;;  %v16059_v4 = vld [vmem:[#allocation2 + $0x151] sm:$0xff] }
 0x79c   : > { %v35000_v23 = vsub.f32 %v16074_v33, %v34988_v58  ;;  %v16048_v33 = vld [vmem:[#allocation2 + $0xc9] sm:$0xff] }
 0x79d   : > { %26909 = vmatmul.mubr.f32.gmra.mrb[10].mxu1 %v39537_v16  ;;  %v34990_v16 = vand.u32 4294901760, %v16077_v31  ;;  %v16237_v50 = vand.u32 4294901760, %v16236_v18  ;;  %v16050_v18 = vld [vmem:[#allocation2 + $0xe1] sm:$0xff] }
 0x79e   : > { %26911 = vmatprep.mubr.f32.mxu1 %v39538_v57  ;;  %v16080_v57 = vsel %vm2325_vm1, %v16038_v19, 0  ;;  %v37957_v43 = vand.u32 4294901760, %v35000_v23 }
 0x79f   : > { %v35002_v42 = vand.u32 4294901760, %v16080_v57 }
 0x7a1   : > { %26912 = vmatmul.mubr.f32.gmra.mrb[12].mxu1 %v39541_v45  ;;  %v16040_v45 = vld [vmem:[#allocation2 + $0x69] sm:$0xff]  ;;  %v35016_v41 = vsub.f32 %v16080_v57, %v35002_v42 }
 0x7a2   : > { %26914 = vmatprep.mubr.f32.mxu1 %v39542_v51  ;;  %v16041_v51 = vld [vmem:[#allocation2 + $0x79] sm:$0xff]  ;;  %v16086_v55 = vsel %vm2325_vm1, %v16040_v45, 0 }
 0x7a3   : > { %v37954_v2 = vand.u32 4294901760, %v35016_v41 }
 0x7a5   : > { %26915 = vmatmul.mubr.f32.gmra.mrb[14].mxu1 %v39545_v15  ;;  %v35005_v15 = vsub.f32 %v16077_v31, %v34990_v16  ;;  %v16266_v0 = vsub.f32 %v35016_v41, %v37954_v2  ;;  %v16049_v31 = vld [vmem:[#allocation2 + $0xd9] sm:$0xff] }
 0x7a6   : > { %26917 = vmatprep.mubr.f32.mxu1 %v39546_v44  ;;  %v35007_v44 = vand.u32 4294901760, %v16083_v39 }
 0x7a7   : > { %v37955_v40 = vand.u32 4294901760, %v35005_v15  ;;  %v16267_v19 = vand.u32 4294901760, %v16266_v0 }
 0x7a8   : > { %v35022_v46 = vsub.f32 %v16083_v39, %v35007_v44 }
 0x7a9   : > { %26918 = vmatmul.mubr.f32.gmra.mrb[16].mxu1 %v39549_v32  ;;  %v16089_v32 = vsel %vm2325_vm1, %v16041_v51, 0  ;;  %v16256_v61 = vsub.f32 %v35005_v15, %v37955_v40 }
 0x7aa   : > { %26920 = vmatprep.mubr.f32.mxu1 %v39550_v53  ;;  %v16042_v53 = vld [vmem:[#allocation2 + $0x81] sm:$0xff]  ;;  %v37951_v25 = vand.u32 4294901760, %v35022_v46 }
 0x7ab   : > { %v16257_v10 = vand.u32 4294901760, %v16256_v61  ;;  %v16051_v61 = vld [vmem:[#allocation2 + $0xf1] sm:$0xff] }
 0x7ac   : > { %v16276_v37 = vsub.f32 %v35022_v46, %v37951_v25  ;;  %v16057_v25 = vld [vmem:[#allocation2 + $0x139] sm:$0xff] }
 0x7ad   : > { %26921 = vmatmul.mubr.f32.gmra.mrb[18].mxu1 %v39553_v1  ;;  %v35018_v1 = vand.u32 4294901760, %v16086_v55 }
 0x7ae   : > { %26923 = vmatprep.mubr.f32.mxu1 %v39554_v6  ;;  %v16043_v6 = vld [vmem:[#allocation2 + $0x91] sm:$0xff]  ;;  %v16277_v45 = vand.u32 4294901760, %v16276_v37  ;;  %v16119_v37 = vsel %vm2325_vm1, %v16051_v61, 0 }
 0x7af   : > { %v35038_v8 = vsub.f32 %v16086_v55, %v35018_v1  ;;  %v35084_v55 = vand.u32 4294901760, %v16107_v28  ;;  %v35133_v61 = vand.u32 4294901760, %v16119_v37 }
 0x7b1   : > { %26924 = vmatmul.mubr.f32.gmra.mrb[20].mxu1 %v39557_v30  ;;  %v35024_v30 = vand.u32 4294901760, %v16089_v32  ;;  %v37950_v60 = vand.u32 4294901760, %v35038_v8 }
 0x7b2   : > { %26926 = vmatprep.mubr.f32.mxu1 %v39558_v5  ;;  %v16092_v5 = vsel %vm2325_vm1, %v16042_v53, 0 }
 0x7b3   : > { %v16286_v59 = vsub.f32 %v35038_v8, %v37950_v60  ;;  %v16056_v60 = vld [vmem:[#allocation2 + $0x129] sm:$0xff] }
 0x7b5   : > { %26927 = vmatmul.mubr.f32.gmra.mrb[22].mxu1 %v39561_v52  ;;  %v16095_v52 = vsel %vm2325_vm1, %v16043_v6, 0 }
 0x7b6   : > { %26929 = vmatprep.mubr.f32.mxu1 %v39562_v36  ;;  %v16246_v36 = vsub.f32 %v35000_v23, %v37957_v43  ;;  %v35050_v56 = vand.u32 4294901760, %v16095_v52  ;;  %v16058_v43 = vld [vmem:[#allocation2 + $0x141] sm:$0xff] }
 0x7b7   : > { %v16140_v62 = vsel %vm2325_vm1, %v16058_v43, 0 }
 0x7b8   : > { %v35068_v14 = vsub.f32 %v16095_v52, %v35050_v56 }
 0x7b9   : > { %26930 = vmatmul.mubr.f32.gmra.mrb[24].mxu1 %v39565_v63  ;;  %v35040_v63 = vand.u32 4294901760, %v16092_v5 }
 0x7ba   : > { %26932 = vmatprep.mubr.f32.mxu1 %v39566_v29  ;;  %v16045_v29 = vld [vmem:[#allocation2 + $0xa9] sm:$0xff]  ;;  %39580 = vst [vmem:[#allocation163_spill] sm:$0xff] %v35068_v14  ;;  %v37946_v53 = vand.u32 4294901760, %v35068_v14 }
 0x7bb   : > { %v35059_v11 = vsub.f32 %v16092_v5, %v35040_v63  ;;  %v16113_v5 = vsel %vm2325_vm1, %v16049_v31, 0 }
 0x7bc   : > { %v16316_v0 = vsub.f32 %v35068_v14, %v37946_v53 }
 0x7bd   : > { %26933 = vmatmul.mubr.f32.gmra.mrb[26].mxu1 %v39569_v54  ;;  %v35047_v54 = vsub.f32 %v16089_v32, %v35024_v30  ;;  %v37947_v57 = vand.u32 4294901760, %v35059_v11  ;;  %v16110_v32 = vsel %vm2325_vm1, %v16048_v33, 0 }
 0x7be   : > { %26935 = vmatprep.mubr.f32.mxu1 %v39570_v47  ;;  %v16098_v47 = vsel %vm2325_vm1, %v16044_v27, 0  ;;  %v16287_v27 = vand.u32 4294901760, %v16286_v59 }
 0x7bf   : > { %v16306_v52 = vsub.f32 %v35059_v11, %v37947_v57 }
 0x7c1   : > { %26936 = vmatmul.mubr.f32.gmra.mrb[28].mxu1 %v39573_v17  ;;  %v16101_v17 = vsel %vm2325_vm1, %v16045_v29, 0  ;;  %v35100_v29 = vand.u32 4294901760, %v16110_v32 }
 0x7c2   : > { %26938 = vmatprep.mubr.f32.mxu1 %v39574_v22  ;;  %v16046_v22 = vld [vmem:[#allocation2 + $0xb1] sm:$0xff]  ;;  %v35070_v34 = vand.u32 4294901760, %v16101_v17 }
 0x7c3   : > { %v16104_v21 = vsel %vm2325_vm1, %v16046_v22, 0  ;;  %v16116_v22 = vsel %vm2325_vm1, %v16050_v18, 0  ;;  %v35120_v33 = vsub.f32 %v16110_v32, %v35100_v29  ;;  %v16054_v32 = vld [vmem:[#allocation2 + $0x111] sm:$0xff] }
 0x7c4   : > { %v35082_v51 = vand.u32 4294901760, %v16104_v21  ;;  %v35093_v6 = vsub.f32 %v16101_v17, %v35070_v34  ;;  %v35108_v17 = vand.u32 4294901760, %v16113_v5  ;;  %v35122_v31 = vand.u32 4294901760, %v16116_v22 }
 0x7c5   : > { %26939 = vmatmul.mubr.f32.gmra.mrb[30].mxu1 %v39577_v3  ;;  %v35061_v3 = vand.u32 4294901760, %v16098_v47  ;;  %39585 = vst [vmem:[#allocation168_spill] sm:$0xff] %v35120_v33  ;;  %v37956_v57 = vand.u32 4294901760, %v35120_v33 }
 0x7c6   : > { %26941 = vmatprep.mubr.f32.mxu1 %v39578_v20  ;;  %v16247_v20 = vand.u32 4294901760, %v16246_v36  ;;  %39582 = vst [vmem:[#allocation166_spill] sm:$0xff] %v35093_v6 }
 0x7c7   : > { %v35080_v39 = vsub.f32 %v16098_v47, %v35061_v3  ;;  %v35103_v47 = vsub.f32 %v16104_v21, %v35082_v51  ;;  %v16307_v21 = vand.u32 4294901760, %v16306_v52 }
 0x7c9   : > { %26942 = vmatmul.mubr.f32.gmra.mrb[0].mxu1 %v39579_v38  ;;  %v37949_v38 = vand.u32 4294901760, %v35047_v54  ;;  %39581 = vst [vmem:[#allocation160_spill] sm:$0xff] %v35080_v39  ;;  %v37945_v36 = vand.u32 4294901760, %v35080_v39  ;;  %39583 = vst [vmem:[#allocation14_spill] sm:$0xff] %v35103_v47  ;;  %v37953_v59 = vand.u32 4294901760, %v35103_v47 }
 0x7ca   : > { %26948 = vmatprep.mubr.f32.mxu1 %v16237_v50  ;;  %v35106_v50 = vsub.f32 %v16107_v28, %v35084_v55 }
 0x7cb   : > { %v16326_v28 = vsub.f32 %v35080_v39, %v37945_v36  ;;  %v16055_v36 = vld [vmem:[#allocation2 + $0x121] sm:$0xff] }
 0x7cc   : > { %39584 = vst [vmem:[#allocation180_spill] sm:$0xff] %v35106_v50 }
 0x7cd   : > { %26949 = vmatmul.mubr.f32.vlgmr.msra.gmra.mrb[2].mxu1 %v16247_v20  ;;  %v37948_v20 = vand.u32 4294901760, %v35093_v6  ;;  %v16327_v53 = vand.u32 4294901760, %v16326_v28 }
 0x7ce   : > { %26951 = vmatprep.mubr.f32.mxu1 %v16257_v10  ;;  %28151 = vmatpush3.bf16.msra.mxu1 %v34951_v26  ;;  %v16296_v26 = vsub.f32 %v35047_v54, %v37949_v38  ;;  %v16052_v10 = vld [vmem:[#allocation2 + $0xf9] sm:$0xff]  ;;  %v16131_v38 = vsel %vm2325_vm1, %v16055_v36, 0  ;;  %v16134_v36 = vsel %vm2325_vm1, %v16056_v60, 0  ;;  %v16143_v60 = vsel %vm2325_vm1, %v16059_v4, 0 }
 0x7cf   : > { %28153 = vmatprep.subr.bf16.mxu1 %v34956_v49  ;;  %v16122_v18 = vsel %vm2325_vm1, %v16052_v10, 0  ;;  %v16336_v52 = vsub.f32 %v35093_v6, %v37948_v20  ;;  %v35151_v20 = vsub.f32 %v16119_v37, %v35133_v61  ;;  %v35165_v40 = vand.u32 4294901760, %v16131_v38 }
 0x7d0   : > { %v16297_v9 = vand.u32 4294901760, %v16296_v26  ;;  %v35127_v26 = vsub.f32 %v16113_v5, %v35108_v17  ;;  %v35138_v5 = vsub.f32 %v16116_v22, %v35122_v31  ;;  %v35140_v10 = vand.u32 4294901760, %v16122_v18 }
 0x7d1   : > { %26952 = vmatmul.mubr.f32.gmra.mrb[4].mxu1 %v16267_v19  ;;  %v16053_v19 = vld [vmem:[#allocation2 + $0x109] sm:$0xff]  ;;  %v16337_v28 = vand.u32 4294901760, %v16336_v52  ;;  %39588 = vst [vmem:[#allocation171_spill] sm:$0xff] %v35151_v20 }
 0x7d2   : > { %26954 = vmatprep.mubr.f32.mxu1 %v16277_v45  ;;  %v37952_v45 = vand.u32 4294901760, %v35106_v50  ;;  %39586 = vst [vmem:[#allocation169_spill] sm:$0xff] %v35127_v26  ;;  %39587 = vst [vmem:[#allocation48_spill] sm:$0xff] %v35138_v5 }
 0x7d5   : > { %26955 = vmatmul.mubr.f32.gmra.mrb[6].mxu1 %v16287_v27  ;;  %v16317_v27 = vand.u32 4294901760, %v16316_v0  ;;  %v16346_v0 = vsub.f32 %v35103_v47, %v37953_v59  ;;  %v37961_v59 = vand.u32 4294901760, %v35138_v5  ;;  %v16064_v47 = vld [vmem:[#allocation2 + $0x189] sm:$0xff] }
 0x7d6   : > { %26957 = vmatprep.mubr.f32.mxu1 %v16297_v9  ;;  %v16125_v9 = vsel %vm2325_vm1, %v16053_v19, 0  ;;  %v37958_v19 = vand.u32 4294901760, %v35127_v26 }
 0x7d7   : > { %v35153_v22 = vand.u32 4294901760, %v16125_v9  ;;  %v16347_v37 = vand.u32 4294901760, %v16346_v0  ;;  %v16386_v0 = vsub.f32 %v35138_v5, %v37961_v59 }
 0x7d9   : > { %26958 = vmatmul.mubr.f32.gmra.mrb[8].mxu1 %v16307_v21  ;;  %v16356_v21 = vsub.f32 %v35106_v50, %v37952_v45  ;;  %v16366_v45 = vsub.f32 %v35120_v33, %v37956_v57  ;;  %v35173_v57 = vsub.f32 %v16125_v9, %v35153_v22  ;;  %v35186_v9 = vsub.f32 %v16131_v38, %v35165_v40  ;;  %v16065_v33 = vld [vmem:[#allocation2 + $0x199] sm:$0xff] }
 0x7da   : > { %26960 = vmatprep.mubr.f32.mxu1 %v16317_v27  ;;  %v16128_v27 = vsel %vm2325_vm1, %v16054_v32, 0  ;;  %v35161_v32 = vsub.f32 %v16122_v18, %v35140_v10  ;;  %v16137_v18 = vsel %vm2325_vm1, %v16057_v25, 0 }
 0x7db   : > { %v35163_v52 = vand.u32 4294901760, %v16128_v27  ;;  %v16357_v2 = vand.u32 4294901760, %v16356_v21  ;;  %39590 = vst [vmem:[#allocation41_spill] sm:$0xff] %v35173_v57  ;;  %v16367_v7 = vand.u32 4294901760, %v16366_v45  ;;  %39592 = vst [vmem:[#allocation10_spill] sm:$0xff] %v35186_v9  ;;  %v35188_v25 = vand.u32 4294901760, %v16137_v18 }
 0x7dc   : > { %39589 = vst [vmem:[#allocation34_spill] sm:$0xff] %v35161_v32  ;;  %v16387_v45 = vand.u32 4294901760, %v16386_v0  ;;  %v39593_v38 = vand.u32 4294901760, %v35161_v32  ;;  %v39600_v50 = vand.u32 4294901760, %v35186_v9 }
 0x7dd   : > { %26961 = vmatmul.mubr.f32.gmra.mrb[10].mxu1 %v16327_v53  ;;  %v16376_v53 = vsub.f32 %v35127_v26, %v37958_v19  ;;  %v35181_v21 = vsub.f32 %v16128_v27, %v35163_v52  ;;  %v35183_v19 = vand.u32 4294901760, %v16134_v36  ;;  %v16060_v27 = vld [vmem:[#allocation2 + $0x159] sm:$0xff]  ;;  %v35205_v43 = vsub.f32 %v16137_v18, %v35188_v25 }
 0x7de   : > { %26963 = vmatprep.mubr.f32.mxu1 %v16337_v28  ;;  %v37967_v28 = vand.u32 4294901760, %v35151_v20  ;;  %v16406_v5 = vsub.f32 %v35161_v32, %v39593_v38  ;;  %v16146_v4 = vsel %vm2325_vm1, %v16060_v27, 0  ;;  %v35213_v32 = vand.u32 4294901760, %v16143_v60 }
 0x7df   : > { %39591 = vst [vmem:[#allocation22_spill] sm:$0xff] %v35181_v21  ;;  %v35201_v26 = vsub.f32 %v16134_v36, %v35183_v19  ;;  %39595 = vst [vmem:[#allocation50_spill] sm:$0xff] %v35205_v43  ;;  %v39598_v18 = vand.u32 4294901760, %v35181_v21  ;;  %v35220_v27 = vand.u32 4294901760, %v16146_v4 }
 0x7e0   : > { %39597 = vst [vmem:[#allocation154_spill] sm:$0xff] %v35213_v32  ;;  %v16407_v59 = vand.u32 4294901760, %v16406_v5 }
 0x7e1   : > { %26964 = vmatmul.mubr.f32.gmra.mrb[12].mxu1 %v16347_v37  ;;  %v16377_v37 = vand.u32 4294901760, %v16376_v53  ;;  %39594 = vst [vmem:[#allocation26_spill] sm:$0xff] %v35201_v26  ;;  %v16062_v53 = vld [vmem:[#allocation2 + $0x171] sm:$0xff]  ;;  %39599 = vst [vmem:[#allocation9_spill] sm:$0xff] %v35220_v27 }
 0x7e2   : > { %26966 = vmatprep.mubr.f32.mxu1 %v16357_v2  ;;  %v16396_v2 = vsub.f32 %v35151_v20, %v37967_v28  ;;  %v16061_v28 = vld [vmem:[#allocation2 + $0x169] sm:$0xff]  ;;  %v16426_v20 = vsub.f32 %v35181_v21, %v39598_v18  ;;  %v16152_v5 = vsel %vm2325_vm1, %v16062_v53, 0 }
 0x7e3   : > { %v16149_v36 = vsel %vm2325_vm1, %v16061_v28, 0  ;;  %v35242_v53 = vand.u32 4294901760, %v16152_v5 }
 0x7e4   : > { %v16397_v0 = vand.u32 4294901760, %v16396_v2  ;;  %v16063_v2 = vld [vmem:[#allocation2 + $0x181] sm:$0xff]  ;;  %v35233_v18 = vand.u32 4294901760, %v16149_v36 }
 0x7e5   : > { %26967 = vmatmul.mubr.f32.gmra.mrb[14].mxu1 %v16367_v7  ;;  %v35207_v7 = vand.u32 4294901760, %v16140_v62  ;;  %v16155_v21 = vsel %vm2325_vm1, %v16063_v2, 0  ;;  %39605 = vst [vmem:[#allocation164_spill] sm:$0xff] %v35242_v53  ;;  %v16161_v2 = vsel %vm2325_vm1, %v16065_v33, 0 }
 0x7e6   : > { %26969 = vmatprep.mubr.f32.mxu1 %v16377_v37  ;;  %v39596_v37 = vand.u32 4294901760, %v35173_v57  ;;  %39602 = vst [vmem:[#allocation31_spill] sm:$0xff] %v35233_v18  ;;  %v35251_v39 = vsub.f32 %v16149_v36, %v35233_v18  ;;  %v35264_v36 = vsub.f32 %v16152_v5, %v35242_v53 }
 0x7e8   : > { %v16416_v38 = vsub.f32 %v35173_v57, %v39596_v37  ;;  %v16436_v37 = vsub.f32 %v35186_v9, %v39600_v50  ;;  %v16427_v50 = vand.u32 4294901760, %v16426_v20  ;;  %v39603_v57 = vand.u32 4294901760, %v35201_v26 }
 0x7e9   : > { %26970 = vmatmul.mubr.f32.gmra.mrb[16].mxu1 %v16387_v45  ;;  %v35227_v45 = vsub.f32 %v16140_v62, %v35207_v7  ;;  %v35240_v9 = vsub.f32 %v16146_v4, %v35220_v27  ;;  %v16158_v4 = vsel %vm2325_vm1, %v16064_v47, 0 }
 0x7ea   : > { %26972 = vmatprep.mubr.f32.mxu1 %v16397_v0  ;;  %v16417_v28 = vand.u32 4294901760, %v16416_v38  ;;  %v35231_v0 = vsub.f32 %v16143_v60, %v35213_v32  ;;  %v16446_v62 = vsub.f32 %v35201_v26, %v39603_v57  ;;  %v16437_v60 = vand.u32 4294901760, %v16436_v37 }
 0x7eb   : > { %39601 = vst [vmem:[#allocation18_spill] sm:$0xff] %v35227_v45  ;;  %39604 = vst [vmem:[#allocation134_spill] sm:$0xff] %v35240_v9  ;;  %v39606_v38 = vand.u32 4294901760, %v35205_v43  ;;  %v35253_v57 = vand.u32 4294901760, %v16155_v21  ;;  %v35256_v26 = vand.u32 4294901760, %v16161_v2  ;;  %v37997_v20 = vand.u32 4294901760, %v35240_v9 }
 0x7ec   : > { %v16447_v37 = vand.u32 4294901760, %v16446_v62  ;;  %v39610_v47 = vand.u32 4294901760, %v35231_v0 }
 0x7ed   : > { %26973 = vmatmul.mubr.f32.gmra.mrb[18].mxu1 %v16407_v59  ;;  %v16456_v6 = vsub.f32 %v35205_v43, %v39606_v38  ;;  %v37994_v59 = vand.u32 4294901760, %v35227_v45  ;;  %39607 = vst [vmem:[#allocation138_spill] sm:$0xff] %v35253_v57  ;;  %39608 = vst [vmem:[#allocation21_spill] sm:$0xff] %v35256_v26  ;;  %v35266_v43 = vand.u32 4294901760, %v16158_v4 }
 0x7ee   : > { %26975 = vmatprep.mubr.f32.mxu1 %v16417_v28  ;;  %v16066_v28 = vld [vmem:[#allocation2 + $0x1a1] sm:$0xff] }
 0x7ef   : > { %v16164_v38 = vsel %vm2325_vm1, %v16066_v28, 0  ;;  %v16466_v33 = vsub.f32 %v35227_v45, %v37994_v59  ;;  %39609 = vst [vmem:[#allocation17_spill] sm:$0xff] %v35266_v43  ;;  %v16457_v14 = vand.u32 4294901760, %v16456_v6  ;;  %v35278_v59 = vsub.f32 %v16161_v2, %v35256_v26 }
 0x7f0   : > { %v35275_v28 = vand.u32 4294901760, %v16164_v38  ;;  %v16486_v6 = vsub.f32 %v35240_v9, %v37997_v20  ;;  %v38000_v45 = vand.u32 4294901760, %v35264_v36 }
 0x7f1   : > { %26976 = vmatmul.mubr.f32.gmra.mrb[20].mxu1 %v16427_v50  ;;  %v16476_v50 = vsub.f32 %v35231_v0, %v39610_v47  ;;  %v16467_v5 = vand.u32 4294901760, %v16466_v33  ;;  %v35285_v47 = vsub.f32 %v16158_v4, %v35266_v43  ;;  %v38003_v33 = vand.u32 4294901760, %v35278_v59 }
 0x7f2   : > { %26978 = vmatprep.mubr.f32.mxu1 %v16437_v60  ;;  %v35273_v60 = vsub.f32 %v16155_v21, %v35253_v57  ;;  %39611 = vst [vmem:[#allocation63_spill] sm:$0xff] %v35275_v28  ;;  %v39612_v21 = vand.u32 4294901760, %v35251_v39  ;;  %v35292_v2 = vsub.f32 %v16164_v38, %v35275_v28  ;;  %v16487_v20 = vand.u32 4294901760, %v16486_v6 }
 0x7f3   : > { %v16477_v62 = vand.u32 4294901760, %v16476_v50  ;;  %v16506_v4 = vsub.f32 %v35264_v36, %v38000_v45  ;;  %v38004_v50 = vand.u32 4294901760, %v35285_v47  ;;  %v16536_v38 = vsub.f32 %v35278_v59, %v38003_v33 }
 0x7f5   : > { %26979 = vmatmul.mubr.f32.gmra.mrb[22].mxu1 %v16447_v37  ;;  %v16496_v37 = vsub.f32 %v35251_v39, %v39612_v21  ;;  %v16526_v6 = vsub.f32 %v35285_v47, %v38004_v50 }
 0x7f6   : > { %26981 = vmatprep.mubr.f32.mxu1 %v16457_v14  ;;  %v38001_v14 = vand.u32 4294901760, %v35273_v60 }
 0x7f7   : > { %v16497_v9 = vand.u32 4294901760, %v16496_v37 }
 0x7f8   : > { %v16516_v21 = vsub.f32 %v35273_v60, %v38001_v14  ;;  %v16527_v14 = vand.u32 4294901760, %v16526_v6 }
 0x7f9   : > { %26982 = vmatmul.mubr.f32.gmra.mrb[24].mxu1 %v16467_v5  ;;  %v38002_v5 = vand.u32 4294901760, %v35292_v2 }
 0x7fa   : > { %26984 = vmatprep.mubr.f32.mxu1 %v16477_v62  ;;  %v16507_v62 = vand.u32 4294901760, %v16506_v4  ;;  %v16517_v45 = vand.u32 4294901760, %v16516_v21 }
 0x7fb   : > { %v16546_v37 = vsub.f32 %v35292_v2, %v38002_v5 }
 0x7fd   : > { %26985 = vmatmul.mubr.f32.gmra.mrb[26].mxu1 %v16487_v20  ;;  %v16537_v20 = vand.u32 4294901760, %v16536_v38 }
 0x7fe   : > { %26987 = vmatprep.mubr.f32.mxu1 %v16497_v9  ;;  %v16547_v9 = vand.u32 4294901760, %v16546_v37 }
 0x801   : > { %26988 = vmatmul.mubr.f32.gmra.mrb[28].mxu1 %v16507_v62 }
 0x802   : > { %26990 = vmatprep.mubr.f32.mxu1 %v16517_v45 }
 0x805   : > { %26991 = vmatmul.mubr.f32.gmra.mrb[30].mxu1 %v16527_v14 }
 0x806   : > { %26993 = vmatprep.mubr.f32.mxu1 %v16537_v20 }
 0x809   : > { %26994 = vmatmul.mubr.f32.gmra.mrb[0].mxu1 %v16547_v9 }
 0x80a   : > { %27000 = vmatprep.mubr.f32.mxu1 %v34983_v48 }
 0x80d   : > { %27001 = vmatmul.mubr.f32.vlgmr.msra.gmra.mrb[2].mxu1 %v34988_v58 }
 0x80e   : > { %27003 = vmatprep.mubr.f32.mxu1 %v34990_v16  ;;  %28155 = vmatpush3.bf16.msra.mxu1 %v34956_v49 }
 0x80f   : > { %28157 = vmatprep.subr.bf16.mxu1 %v34873_v13 }
 0x811   : > { %27004 = vmatmul.mubr.f32.gmra.mrb[4].mxu1 %v35002_v42 }
 0x812   : > { %27006 = vmatprep.mubr.f32.mxu1 %v35007_v44 }
 0x815   : > { %27007 = vmatmul.mubr.f32.gmra.mrb[6].mxu1 %v35018_v1 }
 0x816   : > { %27009 = vmatprep.mubr.f32.mxu1 %v35024_v30 }
 0x819   : > { %27010 = vmatmul.mubr.f32.gmra.mrb[8].mxu1 %v35040_v63 }
 0x81a   : > { %27012 = vmatprep.mubr.f32.mxu1 %v35050_v56 }
 0x81d   : > { %27013 = vmatmul.mubr.f32.gmra.mrb[10].mxu1 %v35061_v3 }
 0x81e   : > { %v35324_v45 = vpop.f32.mrb[62].mxu0  ;;  %27015 = vmatprep.mubr.f32.mxu1 %v35070_v34 }
 0x81f   : > { %39613 = vst [vmem:[#allocation178_spill] sm:$0xff] %v35324_v45  ;;  %v35327_v49 = vpop.f32.mrb[63].mxu0 }
 0x820   : > { %39614 = vst [vmem:[#allocation177_spill] sm:$0xff] %v35327_v49 }
 0x821   : > { %27016 = vmatmul.mubr.f32.gmra.mrb[12].mxu1 %v35082_v51 }
 0x822   : > { %v35330_v14 = vpop.f32.mrb[32].mxu0  ;;  %27018 = vmatprep.mubr.f32.mxu1 %v35084_v55 }
 0x823   : > { %39615 = vst [vmem:[#allocation181_spill] sm:$0xff] %v35330_v14  ;;  %v35333_v4 = vpop.f32.mrb[33].mxu0  ;;  %v39661_v14 = vld [vmem:[#allocation50_spill] sm:$0xff] }
 0x824   : > { %39616 = vst [vmem:[#allocation16_spill] sm:$0xff] %v35333_v4  ;;  %v39660_v4 = vld [vmem:[#allocation26_spill] sm:$0xff] }
 0x825   : > { %27019 = vmatmul.mubr.f32.gmra.mrb[14].mxu1 %v35100_v29 }
 0x826   : > { %v35336_v21 = vpop.f32.mrb[34].mxu0  ;;  %27021 = vmatprep.mubr.f32.mxu1 %v35108_v17 }
 0x827   : > { %39617 = vst [vmem:[#allocation52_spill] sm:$0xff] %v35336_v21  ;;  %v35339_v38 = vpop.f32.mrb[35].mxu0  ;;  %v39659_v21 = vld [vmem:[#allocation10_spill] sm:$0xff] }
 0x828   : > { %39618 = vst [vmem:[#allocation28_spill] sm:$0xff] %v35339_v38  ;;  %v39657_v38 = vld [vmem:[#allocation41_spill] sm:$0xff] }
 0x829   : > { %27022 = vmatmul.mubr.f32.gmra.mrb[16].mxu1 %v35122_v31 }
 0x82a   : > { %v35342_v62 = vpop.f32.mrb[36].mxu0  ;;  %27024 = vmatprep.mubr.f32.mxu1 %v35133_v61 }
 0x82b   : > { %39619 = vst [vmem:[#allocation37_spill] sm:$0xff] %v35342_v62  ;;  %v35345_v6 = vpop.f32.mrb[37].mxu0  ;;  %v39655_v62 = vld [vmem:[#allocation171_spill] sm:$0xff] }
 0x82c   : > { %39620 = vst [vmem:[#allocation24_spill] sm:$0xff] %v35345_v6  ;;  %v39653_v6 = vld [vmem:[#allocation169_spill] sm:$0xff] }
 0x82d   : > { %27025 = vmatmul.mubr.f32.gmra.mrb[18].mxu1 %v35140_v10 }
 0x82e   : > { %v35348_v37 = vpop.f32.mrb[38].mxu0  ;;  %27027 = vmatprep.mubr.f32.mxu1 %v35153_v22 }
 0x82f   : > { %39621 = vst [vmem:[#allocation42_spill] sm:$0xff] %v35348_v37  ;;  %v35351_v20 = vpop.f32.mrb[39].mxu0  ;;  %v39651_v37 = vld [vmem:[#allocation180_spill] sm:$0xff] }
 0x830   : > { %39622 = vst [vmem:[#allocation54_spill] sm:$0xff] %v35351_v20 }
 0x831   : > { %27028 = vmatmul.mubr.f32.gmra.mrb[20].mxu1 %v35163_v52 }
 0x832   : > { %v35354_v9 = vpop.f32.mrb[40].mxu0  ;;  %27030 = vmatprep.mubr.f32.mxu1 %v35165_v40 }
 0x833   : > { %39623 = vst [vmem:[#allocation57_spill] sm:$0xff] %v35354_v9  ;;  %v35357_v5 = vpop.f32.mrb[41].mxu0 }
 0x834   : > { %39624 = vst [vmem:[#allocation70_spill] sm:$0xff] %v35357_v5 }
 0x835   : > { %27031 = vmatmul.mubr.f32.gmra.mrb[22].mxu1 %v35183_v19 }
 0x836   : > { %v35360_v33 = vpop.f32.mrb[42].mxu0  ;;  %27033 = vmatprep.mubr.f32.mxu1 %v35188_v25 }
 0x837   : > { %39625 = vst [vmem:[#allocation61_spill] sm:$0xff] %v35360_v33  ;;  %v35363_v50 = vpop.f32.mrb[43].mxu0 }
 0x838   : > { %39626 = vst [vmem:[#allocation33_spill] sm:$0xff] %v35363_v50 }
 0x839   : > { %27034 = vmatmul.mubr.f32.gmra.mrb[24].mxu1 %v35207_v7 }
 0x83a   : > { %v35366_v49 = vpop.f32.mrb[44].mxu0  ;;  %27036 = vmatprep.mubr.f32.mxu1 %v35213_v32  ;;  %v39669_v32 = vand.u32 4294901760, %v35038_v8 }
 0x83b   : > { %39627 = vst [vmem:[#allocation157_spill] sm:$0xff] %v35366_v49  ;;  %v35369_v45 = vpop.f32.mrb[45].mxu0 }
 0x83c   : > { %39628 = vst [vmem:[#allocation62_spill] sm:$0xff] %v35369_v45 }
 0x83d   : > { %27037 = vmatmul.mubr.f32.gmra.mrb[26].mxu1 %v35220_v27  ;;  %v39668_v27 = vand.u32 4294901760, %v35022_v46 }
 0x83e   : > { %v35372_v9 = vpop.f32.mrb[46].mxu0  ;;  %27039 = vmatprep.mubr.f32.mxu1 %v35233_v18  ;;  %v39667_v18 = vand.u32 4294901760, %v35016_v41 }
 0x83f   : > { %39629 = vst [vmem:[#allocation8_spill] sm:$0xff] %v35372_v9  ;;  %v35375_v5 = vpop.f32.mrb[47].mxu0 }
 0x840   : > { %39630 = vst [vmem:[#allocation146_spill] sm:$0xff] %v35375_v5 }
 0x841   : > { %27040 = vmatmul.mubr.f32.gmra.mrb[28].mxu1 %v35242_v53  ;;  %v39666_v53 = vand.u32 4294901760, %v35005_v15 }
 0x842   : > { %v35378_v33 = vpop.f32.mrb[48].mxu0  ;;  %27042 = vmatprep.mubr.f32.mxu1 %v35253_v57  ;;  %v39665_v57 = vand.u32 4294901760, %v35000_v23 }
 0x843   : > { %39631 = vst [vmem:[#allocation165_spill] sm:$0xff] %v35378_v33  ;;  %v35381_v50 = vpop.f32.mrb[49].mxu0  ;;  %v39637_v33 = vand.u32 4294901760, %v34925_v24 }
 0x844   : > { %39632 = vst [vmem:[#allocation172_spill] sm:$0xff] %v35381_v50  ;;  %v39638_v50 = vand.u32 4294901760, %v34927_v35 }
 0x845   : > { %27043 = vmatmul.mubr.f32.gmra.mrb[30].mxu1 %v35266_v43  ;;  %v39664_v43 = vand.u32 4294901760, %v34994_v12 }
 0x846   : > { %v35384_v49 = vpop.f32.mrb[50].mxu0  ;;  %27045 = vmatprep.mubr.f32.mxu1 %v35256_v26  ;;  %v28160_v20 = vpack.c.bf16 %v39638_v50, %v39637_v33  ;;  %v39663_v26 = vld [vmem:[#allocation134_spill] sm:$0xff] }
 0x847   : > { %39633 = vst [vmem:[#allocation136_spill] sm:$0xff] %v35384_v49  ;;  %v35387_v45 = vpop.f32.mrb[51].mxu0 }
 0x848   : > { %39634 = vst [vmem:[#allocation27_spill] sm:$0xff] %v35387_v45 }
 0x849   : > { %27046 = vmatmul.mubr.f32.gmra.mrb[0].mxu1 %v35275_v28  ;;  %v39662_v28 = vld [vmem:[#allocation18_spill] sm:$0xff] }
 0x84a   : > { %v35390_v9 = vpop.f32.mrb[52].mxu0  ;;  %27052 = vmatprep.mubr.f32.mxu1 %v34994_v12  ;;  %v39670_v12 = vand.u32 4294901760, %v35047_v54 }
 0x84b   : > { %39635 = vst [vmem:[#allocation55_spill] sm:$0xff] %v35390_v9  ;;  %v35393_v5 = vpop.f32.mrb[53].mxu0 }
 0x84c   : > { %39636 = vst [vmem:[#allocation150_spill] sm:$0xff] %v35393_v5  ;;  %v39649_v5 = vld [vmem:[#allocation166_spill] sm:$0xff] }
 0x84d   : > { %27053 = vmatmul.mubr.f32.vlgmr.msra.gmra.mrb[2].mxu1 %v35000_v23  ;;  %v39671_v23 = vand.u32 4294901760, %v35059_v11 }
 0x84e   : > { %v35400_v49 = vpop.f32.mrb[54].mxu0  ;;  %27055 = vmatprep.mubr.f32.mxu1 %v35005_v15  ;;  %28159 = vmatpush3.bf16.msra.mxu1 %v34873_v13 }
 0x84f   : > { %39639 = vst [vmem:[#allocation3_spill] sm:$0xff] %v35400_v49  ;;  %v35404_v45 = vpop.f32.mrb[55].mxu0  ;;  %28161 = vmatprep.subr.bf16.mxu1 %v28160_v20 }
 0x850   : > { %39640 = vst [vmem:[#allocation159_spill] sm:$0xff] %v35404_v45  ;;  %v39646_v45 = vld [vmem:[#allocation163_spill] sm:$0xff] }
 0x851   : > { %27056 = vmatmul.mubr.f32.gmra.mrb[4].mxu1 %v35016_v41  ;;  %v39672_v15 = vand.u32 4294901760, %v39646_v45  ;;  %v39674_v41 = vand.u32 4294901760, %v39649_v5 }
 0x852   : > { %v35407_v9 = vpop.f32.mrb[56].mxu0  ;;  %27058 = vmatprep.mubr.f32.mxu1 %v35022_v46 }
 0x853   : > { %39641 = vst [vmem:[#allocation161_spill] sm:$0xff] %v35407_v9  ;;  %v35410_v24 = vpop.f32.mrb[57].mxu0  ;;  %v39648_v9 = vld [vmem:[#allocation160_spill] sm:$0xff] }
 0x854   : > { %39642 = vst [vmem:[#allocation162_spill] sm:$0xff] %v35410_v24  ;;  %v39650_v24 = vld [vmem:[#allocation14_spill] sm:$0xff] }
 0x855   : > { %27059 = vmatmul.mubr.f32.gmra.mrb[6].mxu1 %v35038_v8  ;;  %v39675_v46 = vand.u32 4294901760, %v39650_v24  ;;  %v39676_v8 = vand.u32 4294901760, %v39651_v37 }
 0x856   : > { %v35413_v35 = vpop.f32.mrb[58].mxu0  ;;  %27061 = vmatprep.mubr.f32.mxu1 %v35047_v54 }
 0x857   : > { %39643 = vst [vmem:[#allocation182_spill] sm:$0xff] %v35413_v35  ;;  %v35416_v33 = vpop.f32.mrb[59].mxu0  ;;  %v39652_v35 = vld [vmem:[#allocation168_spill] sm:$0xff] }
 0x858   : > { %39644 = vst [vmem:[#allocation183_spill] sm:$0xff] %v35416_v33  ;;  %v39654_v33 = vld [vmem:[#allocation48_spill] sm:$0xff]  ;;  %v39677_v54 = vand.u32 4294901760, %v39652_v35 }
 0x859   : > { %27062 = vmatmul.mubr.f32.gmra.mrb[8].mxu1 %v35059_v11  ;;  %v39678_v11 = vand.u32 4294901760, %v39653_v6 }
 0x85a   : > { %v35419_v50 = vpop.f32.mrb[60].mxu0  ;;  %27064 = vmatprep.mubr.f32.mxu1 %v39646_v45  ;;  %v39685_v45 = vand.u32 4294901760, %v39660_v4 }
 0x85b   : > { %39645 = vst [vmem:[#allocation173_spill] sm:$0xff] %v35419_v50  ;;  %v35422_v49 = vpop.f32.mrb[61].mxu0  ;;  %v39656_v50 = vld [vmem:[#allocation34_spill] sm:$0xff] }
 0x85c   : > { %39647 = vst [vmem:[#allocation174_spill] sm:$0xff] %v35422_v49  ;;  %v39658_v49 = vld [vmem:[#allocation22_spill] sm:$0xff] }
 0x85d   : > { %27065 = vmatmul.mubr.f32.gmra.mrb[10].mxu1 %v39648_v9 }
 0x85e   : > { %27067 = vmatprep.mubr.f32.mxu1 %v39649_v5  ;;  %v39684_v5 = vand.u32 4294901760, %v39659_v21 }
 0x861   : > { %27068 = vmatmul.mubr.f32.gmra.mrb[12].mxu1 %v39650_v24 }
 0x862   : > { %27070 = vmatprep.mubr.f32.mxu1 %v39651_v37  ;;  %v39688_v37 = vand.u32 4294901760, %v35231_v0 }
 0x865   : > { %27071 = vmatmul.mubr.f32.gmra.mrb[14].mxu1 %v39652_v35 }
 0x866   : > { %27073 = vmatprep.mubr.f32.mxu1 %v39653_v6  ;;  %v39686_v6 = vand.u32 4294901760, %v39661_v14 }
 0x869   : > { %27074 = vmatmul.mubr.f32.gmra.mrb[16].mxu1 %v39654_v33 }
 0x86a   : > { %27076 = vmatprep.mubr.f32.mxu1 %v39655_v62 }
 0x86d   : > { %27077 = vmatmul.mubr.f32.gmra.mrb[18].mxu1 %v39656_v50 }
 0x86e   : > { %27079 = vmatprep.mubr.f32.mxu1 %v39657_v38 }
 0x871   : > { %27080 = vmatmul.mubr.f32.gmra.mrb[20].mxu1 %v39658_v49 }
 0x872   : > { %27082 = vmatprep.mubr.f32.mxu1 %v39659_v21  ;;  %v39691_v21 = vand.u32 4294901760, %v35264_v36 }
 0x875   : > { %27083 = vmatmul.mubr.f32.gmra.mrb[22].mxu1 %v39660_v4  ;;  %v39692_v4 = vand.u32 4294901760, %v35273_v60 }
 0x876   : > { %27085 = vmatprep.mubr.f32.mxu1 %v39661_v14 }
 0x879   : > { %27086 = vmatmul.mubr.f32.gmra.mrb[24].mxu1 %v39662_v28 }
 0x87a   : > { %27088 = vmatprep.mubr.f32.mxu1 %v35231_v0  ;;  %v22089_v0 = vld [vmem:[%s36912_s3 + $0x88] sm:$0xff] }
 0x87d   : > { %27089 = vmatmul.mubr.f32.gmra.mrb[26].mxu1 %v39663_v26 }
 0x87e   : > { %27091 = vmatprep.mubr.f32.mxu1 %v35251_v39 }
 0x881   : > { %27092 = vmatmul.mubr.f32.gmra.mrb[28].mxu1 %v35264_v36  ;;  %v18125_v36 = vand.u32 4294901760, %v22089_v0 }
 0x882   : > { %27094 = vmatprep.mubr.f32.mxu1 %v35273_v60 }
 0x885   : > { %27095 = vmatmul.mubr.f32.gmra.mrb[30].mxu1 %v35285_v47 }
 0x886   : > { %27097 = vmatprep.mubr.f32.mxu1 %v35278_v59 }
 0x889   : > { %27098 = vmatmul.mubr.f32.gmra.mrb[0].mxu1 %v35292_v2 }
 0x88a   : > { %27104 = vmatprep.mubr.f32.mxu1 %v39664_v43  ;;  %v39673_v43 = vand.u32 4294901760, %v39648_v9  ;;  %v39698_v9 = vld [vmem:[#allocation31_spill] sm:$0xff] }
 0x88d   : > { %27105 = vmatmul.mubr.f32.vlgmr.msra.gmra.mrb[2].mxu1 %v39665_v57  ;;  %v39683_v57 = vand.u32 4294901760, %v39658_v49  ;;  %v39690_v49 = vand.u32 4294901760, %v35251_v39  ;;  %v39694_v39 = vand.u32 4294901760, %v35278_v59 }
 0x88e   : > { %27107 = vmatprep.mubr.f32.mxu1 %v39666_v53  ;;  %28163 = vmatpush3.bf16.msra.mxu1 %v28160_v20  ;;  %v39682_v53 = vand.u32 4294901760, %v39657_v38  ;;  %v39689_v38 = vand.u32 4294901760, %v39663_v26  ;;  %v39693_v26 = vand.u32 4294901760, %v35285_v47  ;;  %v39695_v20 = vand.u32 4294901760, %v35292_v2  ;;  %v39697_v2 = vld [vmem:[#allocation9_spill] sm:$0xff] }
 0x88f   : > { %28165 = vmatprep.subr.bf16.mxu1 %v34873_v13  ;;  %v35549_v47 = vsub.f32 %v22089_v0, %v18125_v36 }
 0x891   : > { %27108 = vmatmul.mubr.f32.gmra.mrb[4].mxu1 %v39667_v18  ;;  %v39681_v18 = vand.u32 4294901760, %v39656_v50  ;;  %v38036_v35 = vand.u32 4294901760, %v35549_v47  ;;  %v39700_v50 = vld [vmem:[#allocation138_spill] sm:$0xff] }
 0x892   : > { %27110 = vmatprep.mubr.f32.mxu1 %v39668_v27  ;;  %v39680_v27 = vand.u32 4294901760, %v39655_v62  ;;  %v39687_v62 = vand.u32 4294901760, %v39662_v28  ;;  %v22088_v28 = vld [vmem:[%s36912_s3 + $0x80] sm:$0xff] }
 0x893   : > { %v18122_v14 = vand.u32 4294901760, %v22088_v28 }
 0x895   : > { %27111 = vmatmul.mubr.f32.gmra.mrb[6].mxu1 %v39669_v32  ;;  %v39679_v32 = vand.u32 4294901760, %v39654_v33  ;;  %v35519_v60 = vpack.c.bf16 %v18125_v36, %v18122_v14  ;;  %v35547_v59 = vsub.f32 %v22088_v28, %v18122_v14  ;;  %v39699_v33 = vld [vmem:[#allocation164_spill] sm:$0xff] }
 0x896   : > { %27113 = vmatprep.mubr.f32.mxu1 %v39670_v12 }
 0x897   : > { %v38037_v24 = vand.u32 4294901760, %v35547_v59 }
 0x899   : > { %27114 = vmatmul.mubr.f32.gmra.mrb[8].mxu1 %v39671_v23  ;;  %v18512_v12 = vsub.f32 %v35547_v59, %v38037_v24  ;;  %v18519_v23 = vsub.f32 %v35549_v47, %v38036_v35 }
 0x89a   : > { %27116 = vmatprep.mubr.f32.mxu1 %v39672_v15  ;;  %v39701_v15 = vld [vmem:[#allocation17_spill] sm:$0xff] }
 0x89d   : > { %27117 = vmatmul.mubr.f32.gmra.mrb[10].mxu1 %v39673_v43  ;;  %v39702_v43 = vld [vmem:[#allocation21_spill] sm:$0xff] }
 0x89e   : > { %27119 = vmatprep.mubr.f32.mxu1 %v39674_v41  ;;  %v18513_v41 = vand.u32 4294901760, %v18512_v12 }
 0x8a1   : > { %27120 = vmatmul.mubr.f32.gmra.mrb[12].mxu1 %v39675_v46  ;;  %v18520_v46 = vand.u32 4294901760, %v18519_v23 }
 0x8a2   : > { %27122 = vmatprep.mubr.f32.mxu1 %v39676_v8  ;;  %v39703_v8 = vld [vmem:[#allocation63_spill] sm:$0xff] }
 0x8a5   : > { %27123 = vmatmul.mubr.f32.gmra.mrb[14].mxu1 %v39677_v54  ;;  %v35567_v54 = vpack.c.bf16 %v18520_v46, %v18513_v41 }
 0x8a6   : > { %27125 = vmatprep.mubr.f32.mxu1 %v39678_v11  ;;  %v35572_v11 = vpack.c.bf16 %v35549_v47, %v35547_v59 }
 0x8a9   : > { %27126 = vmatmul.mubr.f32.gmra.mrb[16].mxu1 %v39679_v32  ;;  %v17998_v32 = vld [vmem:[#allocation2 + $0x92] sm:$0xff] }
 0x8aa   : > { %27128 = vmatprep.mubr.f32.mxu1 %v39680_v27 }
 0x8ad   : > { %27129 = vmatmul.mubr.f32.gmra.mrb[18].mxu1 %v39681_v18 }
 0x8ae   : > { %27131 = vmatprep.mubr.f32.mxu1 %v39682_v53 }
 0x8b1   : > { %27132 = vmatmul.mubr.f32.gmra.mrb[20].mxu1 %v39683_v57 }
 0x8b2   : > { %27134 = vmatprep.mubr.f32.mxu1 %v39684_v5 }
 0x8b5   : > { %27135 = vmatmul.mubr.f32.gmra.mrb[22].mxu1 %v39685_v45 }
 0x8b6   : > { %27137 = vmatprep.mubr.f32.mxu1 %v39686_v6 }
 0x8b9   : > { %27138 = vmatmul.mubr.f32.gmra.mrb[24].mxu1 %v39687_v62 }
 0x8ba   : > { %27140 = vmatprep.mubr.f32.mxu1 %v39688_v37  ;;  %v18050_v37 = vsel %vm2325_vm1, %v17998_v32, 0 }
 0x8bd   : > { %27141 = vmatmul.mubr.f32.gmra.mrb[26].mxu1 %v39689_v38  ;;  %v17999_v38 = vld [vmem:[#allocation2 + $0x9a] sm:$0xff] }
 0x8be   : > { %27143 = vmatprep.mubr.f32.mxu1 %v39690_v49  ;;  %v18000_v49 = vld [vmem:[#allocation2 + $0xaa] sm:$0xff] }
 0x8bf   : > { %v18056_v14 = vsel %vm2325_vm1, %v18000_v49, 0 }
 0x8c0   : > { %v35673_v23 = vand.u32 4294901760, %v18056_v14 }
 0x8c1   : > { %27144 = vmatmul.mubr.f32.gmra.mrb[28].mxu1 %v39691_v21 }
 0x8c2   : > { %27146 = vmatprep.mubr.f32.mxu1 %v39692_v4 }
 0x8c5   : > { %27147 = vmatmul.mubr.f32.gmra.mrb[30].mxu1 %v39693_v26  ;;  %v35658_v26 = vand.u32 4294901760, %v18050_v37 }
 0x8c6   : > { %27149 = vmatprep.mubr.f32.mxu1 %v39694_v39  ;;  %v18053_v39 = vsel %vm2325_vm1, %v17999_v38, 0 }
 0x8c7   : > { %v35671_v12 = vand.u32 4294901760, %v18053_v39  ;;  %v35682_v46 = vsub.f32 %v18050_v37, %v35658_v26 }
 0x8c9   : > { %27150 = vmatmul.mubr.f32.gmra.mrb[0].mxu1 %v39695_v20  ;;  %39704 = vst [vmem:[#allocation5_spill] sm:$0xff] %v35682_v46 }
 0x8ca   : > { %27156 = vmatprep.mubr.f32.mxu1 %v34983_v48 }
 0x8cd   : > { %27157 = vmatmul.mubr.f32.vlgmr.msra.gmra.mrb[2].mxu1 %v34988_v58 }
 0x8ce   : > { %27159 = vmatprep.mubr.f32.mxu1 %v34990_v16  ;;  %28167 = vmatpush3.bf16.msra.mxu1 %v34873_v13  ;;  %v39696_v13 = vld [vmem:[#allocation154_spill] sm:$0xff] }
 0x8cf   : > { %28169 = vmatprep.subr.bf16.mxu1 %v35519_v60 }
 0x8d1   : > { %27160 = vmatmul.mubr.f32.gmra.mrb[4].mxu1 %v35002_v42 }
 0x8d2   : > { %27162 = vmatprep.mubr.f32.mxu1 %v35007_v44 }
 0x8d5   : > { %27163 = vmatmul.mubr.f32.gmra.mrb[6].mxu1 %v35018_v1 }
 0x8d6   : > { %27165 = vmatprep.mubr.f32.mxu1 %v35024_v30 }
 0x8d9   : > { %27166 = vmatmul.mubr.f32.gmra.mrb[8].mxu1 %v35040_v63 }
 0x8da   : > { %27168 = vmatprep.mubr.f32.mxu1 %v35050_v56 }
 0x8dd   : > { %27169 = vmatmul.mubr.f32.gmra.mrb[10].mxu1 %v35061_v3 }
 0x8de   : > { %27171 = vmatprep.mubr.f32.mxu1 %v35070_v34 }
 0x8e1   : > { %27172 = vmatmul.mubr.f32.gmra.mrb[12].mxu1 %v35082_v51 }
 0x8e2   : > { %27174 = vmatprep.mubr.f32.mxu1 %v35084_v55 }
 0x8e5   : > { %27175 = vmatmul.mubr.f32.gmra.mrb[14].mxu1 %v35100_v29 }
 0x8e6   : > { %27177 = vmatprep.mubr.f32.mxu1 %v35108_v17 }
 0x8e9   : > { %27178 = vmatmul.mubr.f32.gmra.mrb[16].mxu1 %v35122_v31 }
 0x8ea   : > { %27180 = vmatprep.mubr.f32.mxu1 %v35133_v61 }
 0x8ed   : > { %27181 = vmatmul.mubr.f32.gmra.mrb[18].mxu1 %v35140_v10 }
 0x8ee   : > { %27183 = vmatprep.mubr.f32.mxu1 %v35153_v22 }
 0x8f1   : > { %27184 = vmatmul.mubr.f32.gmra.mrb[20].mxu1 %v35163_v52 }
 0x8f2   : > { %27186 = vmatprep.mubr.f32.mxu1 %v35165_v40 }
 0x8f5   : > { %27187 = vmatmul.mubr.f32.gmra.mrb[22].mxu1 %v35183_v19 }
 0x8f6   : > { %27189 = vmatprep.mubr.f32.mxu1 %v35188_v25 }
 0x8f9   : > { %27190 = vmatmul.mubr.f32.gmra.mrb[24].mxu1 %v35207_v7 }
 0x8fa   : > { %27192 = vmatprep.mubr.f32.mxu1 %v39696_v13 }
 0x8fd   : > { %27193 = vmatmul.mubr.f32.gmra.mrb[26].mxu1 %v39697_v2 }
 0x8fe   : > { %27195 = vmatprep.mubr.f32.mxu1 %v39698_v9 }
 0x901   : > { %27196 = vmatmul.mubr.f32.gmra.mrb[28].mxu1 %v39699_v33 }
 0x902   : > { %27198 = vmatprep.mubr.f32.mxu1 %v39700_v50 }
 0x905   : > { %27199 = vmatmul.mubr.f32.gmra.mrb[30].mxu1 %v39701_v15 }
 0x906   : > { %27201 = vmatprep.mubr.f32.mxu1 %v39702_v43 }
 0x909   : > { %27202 = vmatmul.mubr.f32.gmra.mrb[0].mxu1 %v39703_v8 }
 0x90a   : > { %27208 = vmatprep.mubr.f32.mxu1 %v34983_v48  ;;  %v17990_v48 = vld [vmem:[#allocation2 + $0x32] sm:$0xff] }
 0x90d   : > { %27209 = vmatmul.mubr.f32.vlgmr.msra.gmra.mrb[2].mxu1 %v34988_v58  ;;  %v18026_v58 = vsel %vm2325_vm1, %v17990_v48, 0 }
 0x90e   : > { %27211 = vmatprep.mubr.f32.mxu1 %v34990_v16  ;;  %28171 = vmatpush3.bf16.msra.mxu1 %v35519_v60  ;;  %v17991_v16 = vld [vmem:[#allocation2 + $0x3a] sm:$0xff] }
 0x90f   : > { %28173 = vmatprep.subr.bf16.mxu1 %v35567_v54 }
 0x911   : > { %27212 = vmatmul.mubr.f32.gmra.mrb[4].mxu1 %v35002_v42  ;;  %v17992_v42 = vld [vmem:[#allocation2 + $0x4a] sm:$0xff] }
 0x912   : > { %27214 = vmatprep.mubr.f32.mxu1 %v35007_v44  ;;  %v35598_v44 = vand.u32 4294901760, %v18026_v58 }
 0x915   : > { %27215 = vmatmul.mubr.f32.gmra.mrb[6].mxu1 %v35018_v1  ;;  %v18029_v1 = vsel %vm2325_vm1, %v17991_v16, 0 }
 0x916   : > { %27217 = vmatprep.mubr.f32.mxu1 %v35024_v30  ;;  %v18032_v30 = vsel %vm2325_vm1, %v17992_v42, 0  ;;  %v18003_v42 = vld [vmem:[#allocation2 + $0xca] sm:$0xff] }
 0x919   : > { %27218 = vmatmul.mubr.f32.gmra.mrb[8].mxu1 %v35040_v63  ;;  %v17993_v63 = vld [vmem:[#allocation2 + $0x52] sm:$0xff] }
 0x91a   : > { %27220 = vmatprep.mubr.f32.mxu1 %v35050_v56  ;;  %v17994_v56 = vld [vmem:[#allocation2 + $0x62] sm:$0xff] }
 0x91d   : > { %27221 = vmatmul.mubr.f32.gmra.mrb[10].mxu1 %v35061_v3  ;;  %v35607_v3 = vsub.f32 %v18026_v58, %v35598_v44 }
 0x91e   : > { %27223 = vmatprep.mubr.f32.mxu1 %v35070_v34  ;;  %v35609_v34 = vand.u32 4294901760, %v18032_v30 }
 0x921   : > { %27224 = vmatmul.mubr.f32.gmra.mrb[12].mxu1 %v35082_v51  ;;  %v18035_v51 = vsel %vm2325_vm1, %v17993_v63, 0  ;;  %v35695_v63 = vsub.f32 %v18053_v39, %v35671_v12  ;;  %v18006_v39 = vld [vmem:[#allocation2 + $0xf2] sm:$0xff] }
 0x922   : > { %27226 = vmatprep.mubr.f32.mxu1 %v35084_v55  ;;  %v17995_v55 = vld [vmem:[#allocation2 + $0x6a] sm:$0xff] }
 0x923   : > { %39705 = vst [vmem:[#allocation11_spill] sm:$0xff] %v35695_v63  ;;  %v38022_v37 = vand.u32 4294901760, %v35695_v63 }
 0x925   : > { %27227 = vmatmul.mubr.f32.gmra.mrb[14].mxu1 %v35100_v29  ;;  %v18038_v29 = vsel %vm2325_vm1, %v17994_v56, 0  ;;  %v35698_v56 = vsub.f32 %v18056_v14, %v35673_v23 }
 0x926   : > { %27229 = vmatprep.mubr.f32.mxu1 %v35108_v17 }
 0x927   : > { %39706 = vst [vmem:[#allocation12_spill] sm:$0xff] %v35698_v56  ;;  %v38021_v38 = vand.u32 4294901760, %v35698_v56 }
 0x929   : > { %27230 = vmatmul.mubr.f32.gmra.mrb[16].mxu1 %v35122_v31  ;;  %v35618_v31 = vand.u32 4294901760, %v18035_v51 }
 0x92a   : > { %27232 = vmatprep.mubr.f32.mxu1 %v35133_v61  ;;  %v17996_v61 = vld [vmem:[#allocation2 + $0x7a] sm:$0xff] }
 0x92b   : > { %v35632_v18 = vsub.f32 %v18035_v51, %v35618_v31 }
 0x92d   : > { %27233 = vmatmul.mubr.f32.gmra.mrb[18].mxu1 %v35140_v10  ;;  %v38034_v10 = vand.u32 4294901760, %v35607_v3  ;;  %v38030_v4 = vand.u32 4294901760, %v35632_v18 }
 0x92e   : > { %27235 = vmatprep.mubr.f32.mxu1 %v35153_v22  ;;  %v18041_v22 = vsel %vm2325_vm1, %v17995_v55, 0  ;;  %v18004_v55 = vld [vmem:[#allocation2 + $0xda] sm:$0xff] }
 0x92f   : > { %v35634_v53 = vand.u32 4294901760, %v18041_v22  ;;  %v18191_v57 = vsub.f32 %v35607_v3, %v38034_v10  ;;  %v18014_v10 = vld [vmem:[#allocation2 + $0x152] sm:$0xff] }
 0x930   : > { %v18098_v24 = vsel %vm2325_vm1, %v18014_v10, 0 }
 0x931   : > { %27236 = vmatmul.mubr.f32.gmra.mrb[20].mxu1 %v35163_v52  ;;  %v35625_v52 = vand.u32 4294901760, %v18038_v29  ;;  %v35654_v28 = vsub.f32 %v18041_v22, %v35634_v53  ;;  %v18192_v36 = vand.u32 4294901760, %v18191_v57  ;;  %v38023_v22 = vand.u32 4294901760, %v35682_v46 }
 0x932   : > { %27238 = vmatprep.mubr.f32.mxu1 %v35165_v40  ;;  %v35604_v40 = vand.u32 4294901760, %v18029_v1  ;;  %v18068_v57 = vsel %vm2325_vm1, %v18004_v55, 0  ;;  %v18008_v55 = vld [vmem:[#allocation2 + $0x10a] sm:$0xff] }
 0x933   : > { %v35641_v45 = vsub.f32 %v18038_v29, %v35625_v52 }
 0x934   : > { %v35616_v17 = vsub.f32 %v18029_v1, %v35604_v40 }
 0x935   : > { %27239 = vmatmul.mubr.f32.gmra.mrb[22].mxu1 %v35183_v19  ;;  %v35622_v19 = vsub.f32 %v18032_v30, %v35609_v34 }
 0x936   : > { %27241 = vmatprep.mubr.f32.mxu1 %v35188_v25  ;;  %v18044_v25 = vsel %vm2325_vm1, %v17996_v61, 0  ;;  %v38033_v27 = vand.u32 4294901760, %v35616_v17 }
 0x937   : > { %v38031_v5 = vand.u32 4294901760, %v35622_v19  ;;  %v35643_v6 = vand.u32 4294901760, %v18044_v25 }
 0x938   : > { %v18201_v21 = vsub.f32 %v35616_v17, %v38033_v27  ;;  %v18013_v27 = vld [vmem:[#allocation2 + $0x142] sm:$0xff] }
 0x939   : > { %27242 = vmatmul.mubr.f32.gmra.mrb[24].mxu1 %v35207_v7  ;;  %v17997_v7 = vld [vmem:[#allocation2 + $0x82] sm:$0xff]  ;;  %v18211_v20 = vsub.f32 %v35622_v19, %v38031_v5 }
 0x93a   : > { %27244 = vmatprep.mubr.f32.mxu1 %v39696_v13  ;;  %v18047_v62 = vsel %vm2325_vm1, %v17997_v7, 0  ;;  %v38028_v13 = vand.u32 4294901760, %v35641_v45 }
 0x93b   : > { %v35656_v0 = vand.u32 4294901760, %v18047_v62  ;;  %v18212_v48 = vand.u32 4294901760, %v18211_v20  ;;  %v18271_v20 = vsub.f32 %v35682_v46, %v38023_v22 }
 0x93c   : > { %v18231_v58 = vsub.f32 %v35641_v45, %v38028_v13 }
 0x93d   : > { %27245 = vmatmul.mubr.f32.gmra.mrb[26].mxu1 %v39697_v2  ;;  %v35667_v2 = vsub.f32 %v18044_v25, %v35643_v6  ;;  %v35679_v41 = vsub.f32 %v18047_v62, %v35656_v0  ;;  %v18005_v62 = vld [vmem:[#allocation2 + $0xe2] sm:$0xff] }
 0x93e   : > { %27247 = vmatprep.mubr.f32.mxu1 %v39698_v9  ;;  %v18001_v9 = vld [vmem:[#allocation2 + $0xb2] sm:$0xff]  ;;  %v18232_v25 = vand.u32 4294901760, %v18231_v58  ;;  %v18281_v58 = vsub.f32 %v35695_v63, %v38022_v37  ;;  %v18010_v37 = vld [vmem:[#allocation2 + $0x122] sm:$0xff] }
 0x93f   : > { %v38025_v16 = vand.u32 4294901760, %v35667_v2  ;;  %v38024_v61 = vand.u32 4294901760, %v35679_v41 }
 0x940   : > { %v18282_v22 = vand.u32 4294901760, %v18281_v58 }
 0x941   : > { %27248 = vmatmul.mubr.f32.gmra.mrb[28].mxu1 %v39699_v33  ;;  %v18202_v33 = vand.u32 4294901760, %v18201_v21  ;;  %v18251_v7 = vsub.f32 %v35667_v2, %v38025_v16 }
 0x942   : > { %27250 = vmatprep.mubr.f32.mxu1 %v39700_v50  ;;  %v38027_v50 = vand.u32 4294901760, %v35654_v28 }
 0x944   : > { %v18241_v30 = vsub.f32 %v35654_v28, %v38027_v50 }
 0x945   : > { %27251 = vmatmul.mubr.f32.gmra.mrb[30].mxu1 %v39701_v15  ;;  %v18002_v15 = vld [vmem:[#allocation2 + $0xc2] sm:$0xff] }
 0x946   : > { %27253 = vmatprep.mubr.f32.mxu1 %v39702_v43  ;;  %v18221_v43 = vsub.f32 %v35632_v18, %v38030_v4  ;;  %v18062_v1 = vsel %vm2325_vm1, %v18002_v15, 0  ;;  %v18242_v14 = vand.u32 4294901760, %v18241_v30  ;;  %v35728_v15 = vand.u32 4294901760, %v18068_v57 }
 0x947   : > { %v35709_v32 = vand.u32 4294901760, %v18062_v1 }
 0x948   : > { %v18222_v29 = vand.u32 4294901760, %v18221_v43  ;;  %v18071_v43 = vsel %vm2325_vm1, %v18005_v62, 0 }
 0x949   : > { %27254 = vmatmul.mubr.f32.gmra.mrb[0].mxu1 %v39703_v8  ;;  %v18059_v8 = vsel %vm2325_vm1, %v18001_v9, 0  ;;  %v18252_v9 = vand.u32 4294901760, %v18251_v7  ;;  %v35742_v7 = vand.u32 4294901760, %v18071_v43 }
 0x94a   : > { %27260 = vmatprep.mubr.f32.mxu1 %v18192_v36  ;;  %v35700_v51 = vand.u32 4294901760, %v18059_v8  ;;  %v18261_v36 = vsub.f32 %v35679_v41, %v38024_v61 }
 0x94c   : > { %v35715_v49 = vsub.f32 %v18059_v8, %v35700_v51  ;;  %v18074_v8 = vsel %vm2325_vm1, %v18006_v39, 0  ;;  %v35746_v39 = vsub.f32 %v18068_v57, %v35728_v15  ;;  %v35757_v57 = vsub.f32 %v18071_v43, %v35742_v7  ;;  %v18012_v43 = vld [vmem:[#allocation2 + $0x13a] sm:$0xff] }
 0x94d   : > { %27261 = vmatmul.mubr.f32.vlgmr.msra.gmra.mrb[2].mxu1 %v18202_v33  ;;  %v35726_v33 = vsub.f32 %v18062_v1, %v35709_v32  ;;  %v18092_v5 = vsel %vm2325_vm1, %v18012_v43, 0 }
 0x94e   : > { %27263 = vmatprep.mubr.f32.mxu1 %v18212_v48  ;;  %28175 = vmatpush3.bf16.msra.mxu1 %v35567_v54  ;;  %v18065_v54 = vsel %vm2325_vm1, %v18003_v42, 0  ;;  %39707 = vst [vmem:[#allocation40_spill] sm:$0xff] %v35715_v49  ;;  %v18007_v48 = vld [vmem:[#allocation2 + $0xfa] sm:$0xff]  ;;  %v18291_v42 = vsub.f32 %v35698_v56, %v38021_v38  ;;  %v38026_v1 = vand.u32 4294901760, %v35715_v49  ;;  %39710 = vst [vmem:[#allocation67_spill] sm:$0xff] %v35746_v39  ;;  %v18009_v38 = vld [vmem:[#allocation2 + $0x112] sm:$0xff] }
 0x94f   : > { %28177 = vmatprep.subr.bf16.mxu1 %v35572_v11  ;;  %v35717_v21 = vand.u32 4294901760, %v18065_v54  ;;  %39708 = vst [vmem:[#allocation139_spill] sm:$0xff] %v35726_v33  ;;  %v38029_v62 = vand.u32 4294901760, %v35726_v33  ;;  %39711 = vst [vmem:[#allocation15_spill] sm:$0xff] %v35757_v57 }
 0x951   : > { %27264 = vmatmul.mubr.f32.gmra.mrb[4].mxu1 %v18222_v29  ;;  %v35740_v30 = vsub.f32 %v18065_v54, %v35717_v21  ;;  %v18262_v29 = vand.u32 4294901760, %v18261_v36  ;;  %v18080_v54 = vsel %vm2325_vm1, %v18008_v55, 0  ;;  %v18292_v36 = vand.u32 4294901760, %v18291_v42 }
 0x952   : > { %27266 = vmatprep.mubr.f32.mxu1 %v18232_v25  ;;  %v18272_v25 = vand.u32 4294901760, %v18271_v20  ;;  %v18301_v20 = vsub.f32 %v35715_v49, %v38026_v1  ;;  %v18311_v58 = vsub.f32 %v35726_v33, %v38029_v62  ;;  %v38035_v42 = vand.u32 4294901760, %v35746_v39  ;;  %v18011_v1 = vld [vmem:[#allocation2 + $0x12a] sm:$0xff] }
 0x953   : > { %39709 = vst [vmem:[#allocation36_spill] sm:$0xff] %v35740_v30  ;;  %v38032_v61 = vand.u32 4294901760, %v35740_v30  ;;  %v38040_v62 = vand.u32 4294901760, %v35757_v57  ;;  %v18089_v4 = vsel %vm2325_vm1, %v18011_v1, 0 }
 0x954   : > { %v18302_v50 = vand.u32 4294901760, %v18301_v20  ;;  %v35798_v43 = vand.u32 4294901760, %v18089_v4 }
 0x955   : > { %27267 = vmatmul.mubr.f32.gmra.mrb[6].mxu1 %v18242_v14  ;;  %v35748_v14 = vand.u32 4294901760, %v18074_v8 }
 0x956   : > { %27269 = vmatprep.mubr.f32.mxu1 %v18252_v9  ;;  %v18077_v9 = vsel %vm2325_vm1, %v18007_v48, 0  ;;  %v18083_v48 = vsel %vm2325_vm1, %v18009_v38, 0 }
 0x957   : > { %v35759_v16 = vand.u32 4294901760, %v18077_v9  ;;  %v35768_v55 = vsub.f32 %v18074_v8, %v35748_v14  ;;  %v35775_v38 = vand.u32 4294901760, %v18083_v48 }
 0x959   : > { %27270 = vmatmul.mubr.f32.gmra.mrb[8].mxu1 %v18262_v29  ;;  %v18086_v29 = vsel %vm2325_vm1, %v18010_v37, 0  ;;  %39712 = vst [vmem:[#allocation75_spill] sm:$0xff] %v35768_v55  ;;  %v18321_v37 = vsub.f32 %v35740_v30, %v38032_v61  ;;  %v35781_v8 = vsub.f32 %v18077_v9, %v35759_v16  ;;  %v38041_v20 = vand.u32 4294901760, %v35768_v55 }
 0x95a   : > { %27272 = vmatprep.mubr.f32.mxu1 %v18272_v25  ;;  %v35770_v25 = vand.u32 4294901760, %v18080_v54  ;;  %v35777_v13 = vand.u32 4294901760, %v18086_v29  ;;  %v35793_v9 = vsub.f32 %v18083_v48, %v35775_v38 }
 0x95b   : > { %39713 = vst [vmem:[#allocation78_spill] sm:$0xff] %v35781_v8  ;;  %v18351_v48 = vsub.f32 %v35768_v55, %v38041_v20  ;;  %v18016_v20 = vld [vmem:[#allocation2 + $0x16a] sm:$0xff] }
 0x95c   : > { %v35790_v61 = vsub.f32 %v18080_v54, %v35770_v25  ;;  %39715 = vst [vmem:[#allocation80_spill] sm:$0xff] %v35793_v9  ;;  %v35796_v1 = vsub.f32 %v18086_v29, %v35777_v13  ;;  %v18341_v54 = vsub.f32 %v35757_v57, %v38040_v62  ;;  %v39719_v29 = vand.u32 4294901760, %v35781_v8  ;;  %v18017_v57 = vld [vmem:[#allocation2 + $0x172] sm:$0xff] }
 0x95d   : > { %27273 = vmatmul.mubr.f32.gmra.mrb[10].mxu1 %v18282_v22  ;;  %v18312_v22 = vand.u32 4294901760, %v18311_v58  ;;  %v35800_v58 = vand.u32 4294901760, %v18092_v5  ;;  %v18352_v10 = vand.u32 4294901760, %v18351_v48  ;;  %v35828_v62 = vand.u32 4294901760, %v18098_v24 }
 0x95e   : > { %27275 = vmatprep.mubr.f32.mxu1 %v18292_v36  ;;  %v18331_v36 = vsub.f32 %v35746_v39, %v38035_v42  ;;  %39714 = vst [vmem:[#allocation49_spill] sm:$0xff] %v35790_v61  ;;  %39716 = vst [vmem:[#allocation137_spill] sm:$0xff] %v35796_v1  ;;  %v18322_v42 = vand.u32 4294901760, %v18321_v37  ;;  %v18015_v39 = vld [vmem:[#allocation2 + $0x15a] sm:$0xff]  ;;  %v18342_v55 = vand.u32 4294901760, %v18341_v54  ;;  %v39722_v54 = vand.u32 4294901760, %v35793_v9 }
 0x95f   : > { %39721 = vst [vmem:[#allocation82_spill] sm:$0xff] %v35828_v62 }
 0x960   : > { %v18332_v35 = vand.u32 4294901760, %v18331_v36  ;;  %v35818_v36 = vsub.f32 %v18092_v5, %v35800_v58  ;;  %v18104_v5 = vsel %vm2325_vm1, %v18016_v20, 0 }
 0x961   : > { %27276 = vmatmul.mubr.f32.gmra.mrb[12].mxu1 %v18302_v50  ;;  %v35815_v50 = vsub.f32 %v18089_v4, %v35798_v43  ;;  %v18101_v4 = vsel %vm2325_vm1, %v18015_v39, 0 }
 0x962   : > { %27278 = vmatprep.mubr.f32.mxu1 %v18312_v22  ;;  %v18095_v22 = vsel %vm2325_vm1, %v18013_v27, 0  ;;  %39718 = vst [vmem:[#allocation23_spill] sm:$0xff] %v35818_v36  ;;  %v18361_v27 = vsub.f32 %v35781_v8, %v39719_v29  ;;  %v18381_v29 = vsub.f32 %v35793_v9, %v39722_v54  ;;  %v39723_v8 = vand.u32 4294901760, %v35796_v1 }
 0x963   : > { %39717 = vst [vmem:[#allocation175_spill] sm:$0xff] %v35815_v50  ;;  %v35848_v54 = vand.u32 4294901760, %v18104_v5  ;;  %v18107_v9 = vsel %vm2325_vm1, %v18017_v57, 0 }
 0x964   : > { %v18391_v48 = vsub.f32 %v35796_v1, %v39723_v8  ;;  %v18362_v33 = vand.u32 4294901760, %v18361_v27  ;;  %v18020_v8 = vld [vmem:[#allocation2 + $0x19a] sm:$0xff]  ;;  %v18382_v27 = vand.u32 4294901760, %v18381_v29 }
 0x965   : > { %27279 = vmatmul.mubr.f32.gmra.mrb[14].mxu1 %v18322_v42  ;;  %v35823_v42 = vand.u32 4294901760, %v18095_v22  ;;  %39726 = vst [vmem:[#allocation135_spill] sm:$0xff] %v35848_v54 }
 0x966   : > { %27281 = vmatprep.mubr.f32.mxu1 %v18332_v35  ;;  %v39720_v35 = vand.u32 4294901760, %v35790_v61  ;;  %v18392_v1 = vand.u32 4294901760, %v18391_v48  ;;  %v35867_v48 = vsub.f32 %v18104_v5, %v35848_v54 }
 0x967   : > { %v35841_v39 = vsub.f32 %v18095_v22, %v35823_v42  ;;  %v39727_v22 = vand.u32 4294901760, %v35815_v50 }
 0x968   : > { %v18371_v37 = vsub.f32 %v35790_v61, %v39720_v35  ;;  %v18018_v61 = vld [vmem:[#allocation2 + $0x182] sm:$0xff]  ;;  %v18019_v35 = vld [vmem:[#allocation2 + $0x18a] sm:$0xff] }
 0x969   : > { %27282 = vmatmul.mubr.f32.gmra.mrb[16].mxu1 %v18342_v55  ;;  %39724 = vst [vmem:[#allocation46_spill] sm:$0xff] %v35841_v39  ;;  %v35843_v55 = vand.u32 4294901760, %v18101_v4  ;;  %v18110_v30 = vsel %vm2325_vm1, %v18018_v61, 0  ;;  %v18401_v49 = vsub.f32 %v35815_v50, %v39727_v22  ;;  %v18116_v61 = vsel %vm2325_vm1, %v18020_v8, 0 }
 0x96a   : > { %27284 = vmatprep.mubr.f32.mxu1 %v18352_v10  ;;  %v18372_v20 = vand.u32 4294901760, %v18371_v37  ;;  %v35846_v10 = vsub.f32 %v18098_v24, %v35828_v62  ;;  %v39728_v37 = vand.u32 4294901760, %v35818_v36  ;;  %v35869_v22 = vand.u32 4294901760, %v18110_v30 }
 0x96b   : > { %39725 = vst [vmem:[#allocation84_spill] sm:$0xff] %v35843_v55  ;;  %v35860_v57 = vsub.f32 %v18101_v4, %v35843_v55  ;;  %v18113_v50 = vsel %vm2325_vm1, %v18019_v35, 0  ;;  %v35872_v56 = vand.u32 4294901760, %v18116_v61 }
 0x96c   : > { %v18411_v24 = vsub.f32 %v35818_v36, %v39728_v37  ;;  %39731 = vst [vmem:[#allocation144_spill] sm:$0xff] %v35869_v22  ;;  %v18402_v37 = vand.u32 4294901760, %v18401_v49  ;;  %v39733_v36 = vand.u32 4294901760, %v35841_v39  ;;  %v35882_v63 = vand.u32 4294901760, %v18113_v50 }
 0x96d   : > { %27285 = vmatmul.mubr.f32.gmra.mrb[18].mxu1 %v18362_v33  ;;  %39729 = vst [vmem:[#allocation86_spill] sm:$0xff] %v35860_v57  ;;  %v35862_v33 = vand.u32 4294901760, %v18107_v9  ;;  %39732 = vst [vmem:[#allocation88_spill] sm:$0xff] %v35872_v56  ;;  %v38072_v29 = vand.u32 4294901760, %v35860_v57  ;;  %v39735_v35 = vand.u32 4294901760, %v35846_v10 }
 0x96e   : > { %27287 = vmatprep.mubr.f32.mxu1 %v18372_v20  ;;  %v18021_v20 = vld [vmem:[#allocation2 + $0x1a2] sm:$0xff]  ;;  %v18421_v8 = vsub.f32 %v35841_v39, %v39733_v36  ;;  %39734 = vst [vmem:[#allocation141_spill] sm:$0xff] %v35882_v63  ;;  %v18412_v46 = vand.u32 4294901760, %v18411_v24  ;;  %v35894_v36 = vsub.f32 %v18116_v61, %v35872_v56 }
 0x96f   : > { %39730 = vst [vmem:[#allocation13_spill] sm:$0xff] %v35862_v33  ;;  %v18119_v4 = vsel %vm2325_vm1, %v18021_v20, 0  ;;  %v35880_v5 = vsub.f32 %v18107_v9, %v35862_v33  ;;  %v18431_v49 = vsub.f32 %v35846_v10, %v39735_v35  ;;  %v18441_v24 = vsub.f32 %v35860_v57, %v38072_v29 }
 0x970   : > { %v35891_v20 = vand.u32 4294901760, %v18119_v4  ;;  %v18422_v9 = vand.u32 4294901760, %v18421_v8  ;;  %v35901_v35 = vsub.f32 %v18113_v50, %v35882_v63  ;;  %v38078_v8 = vand.u32 4294901760, %v35894_v36 }
 0x971   : > { %27288 = vmatmul.mubr.f32.gmra.mrb[20].mxu1 %v18382_v27  ;;  %v35889_v27 = vsub.f32 %v18110_v30, %v35869_v22  ;;  %v38075_v39 = vand.u32 4294901760, %v35880_v5  ;;  %v39737_v30 = vand.u32 4294901760, %v35867_v48  ;;  %v18442_v29 = vand.u32 4294901760, %v18441_v24 }
 0x972   : > { %27290 = vmatprep.mubr.f32.mxu1 %v18392_v1  ;;  %39736 = vst [vmem:[#allocation152_spill] sm:$0xff] %v35891_v20  ;;  %v18432_v1 = vand.u32 4294901760, %v18431_v49  ;;  %v35908_v61 = vsub.f32 %v18119_v4, %v35891_v20  ;;  %v38079_v49 = vand.u32 4294901760, %v35901_v35  ;;  %v18491_v4 = vsub.f32 %v35894_v36, %v38078_v8  ;;  %v39753_v8 = vld [vmem:[#allocation175_spill] sm:$0xff] }
 0x973   : > { %v18461_v50 = vsub.f32 %v35880_v5, %v38075_v39 }
 0x974   : > { %v18481_v24 = vsub.f32 %v35901_v35, %v38079_v49  ;;  %v39754_v49 = vld [vmem:[#allocation23_spill] sm:$0xff] }
 0x975   : > { %27291 = vmatmul.mubr.f32.gmra.mrb[22].mxu1 %v18402_v37  ;;  %v18451_v37 = vsub.f32 %v35867_v48, %v39737_v30 }
 0x976   : > { %27293 = vmatprep.mubr.f32.mxu1 %v18412_v46  ;;  %v38076_v46 = vand.u32 4294901760, %v35889_v27 }
 0x977   : > { %v18452_v57 = vand.u32 4294901760, %v18451_v37 }
 0x978   : > { %v18471_v30 = vsub.f32 %v35889_v27, %v38076_v46  ;;  %v18482_v46 = vand.u32 4294901760, %v18481_v24  ;;  %v39746_v24 = vld [vmem:[#allocation67_spill] sm:$0xff] }
 0x979   : > { %27294 = vmatmul.mubr.f32.gmra.mrb[24].mxu1 %v18422_v9  ;;  %v38077_v9 = vand.u32 4294901760, %v35908_v61 }
 0x97a   : > { %27296 = vmatprep.mubr.f32.mxu1 %v18432_v1  ;;  %v18462_v1 = vand.u32 4294901760, %v18461_v50  ;;  %v18472_v39 = vand.u32 4294901760, %v18471_v30  ;;  %v39742_v50 = vld [vmem:[#allocation12_spill] sm:$0xff] }
 0x97b   : > { %v18501_v37 = vsub.f32 %v35908_v61, %v38077_v9  ;;  %v39743_v30 = vld [vmem:[#allocation40_spill] sm:$0xff]  ;;  %v39752_v9 = vld [vmem:[#allocation137_spill] sm:$0xff] }
 0x97d   : > { %27297 = vmatmul.mubr.f32.gmra.mrb[26].mxu1 %v18442_v29  ;;  %v18492_v29 = vand.u32 4294901760, %v18491_v4  ;;  %v39744_v4 = vld [vmem:[#allocation139_spill] sm:$0xff] }
 0x97e   : > { %27299 = vmatprep.mubr.f32.mxu1 %v18452_v57  ;;  %v18502_v57 = vand.u32 4294901760, %v18501_v37  ;;  %v39747_v37 = vld [vmem:[#allocation15_spill] sm:$0xff] }
 0x981   : > { %27300 = vmatmul.mubr.f32.gmra.mrb[28].mxu1 %v18462_v1  ;;  %v39745_v1 = vld [vmem:[#allocation36_spill] sm:$0xff] }
 0x982   : > { %27302 = vmatprep.mubr.f32.mxu1 %v18472_v39  ;;  %v39739_v39 = vand.u32 4294901760, %v35549_v47  ;;  %v39741_v47 = vld [vmem:[#allocation11_spill] sm:$0xff] }
 0x985   : > { %27303 = vmatmul.mubr.f32.gmra.mrb[30].mxu1 %v18482_v46 }
 0x986   : > { %27305 = vmatprep.mubr.f32.mxu1 %v18492_v29  ;;  %v39748_v29 = vld [vmem:[#allocation75_spill] sm:$0xff] }
 0x989   : > { %27306 = vmatmul.mubr.f32.gmra.mrb[0].mxu1 %v18502_v57  ;;  %v39749_v57 = vld [vmem:[#allocation78_spill] sm:$0xff] }
 0x98a   : > { %27312 = vmatprep.mubr.f32.mxu1 %v35598_v44 }
 0x98d   : > { %27313 = vmatmul.mubr.f32.vlgmr.msra.gmra.mrb[2].mxu1 %v35604_v40 }
 0x98e   : > { %27315 = vmatprep.mubr.f32.mxu1 %v35609_v34  ;;  %28179 = vmatpush3.bf16.msra.mxu1 %v35572_v11  ;;  %v39738_v11 = vand.u32 4294901760, %v35547_v59  ;;  %v39740_v59 = vld [vmem:[#allocation5_spill] sm:$0xff] }
 0x98f   : > { %28181 = vmatprep.subr.bf16.mxu1 %v35519_v60 }
 0x990   : > { %v28184_v46 = vpack.c.bf16 %v39739_v39, %v39738_v11  ;;  %v39750_v11 = vld [vmem:[#allocation49_spill] sm:$0xff]  ;;  %v39751_v39 = vld [vmem:[#allocation80_spill] sm:$0xff] }
 0x991   : > { %27316 = vmatmul.mubr.f32.gmra.mrb[4].mxu1 %v35618_v31 }
 0x992   : > { %27318 = vmatprep.mubr.f32.mxu1 %v35625_v52 }
 0x995   : > { %27319 = vmatmul.mubr.f32.gmra.mrb[6].mxu1 %v35634_v53 }
 0x996   : > { %27321 = vmatprep.mubr.f32.mxu1 %v35643_v6 }
 0x999   : > { %27322 = vmatmul.mubr.f32.gmra.mrb[8].mxu1 %v35656_v0 }
 0x99a   : > { %27324 = vmatprep.mubr.f32.mxu1 %v35658_v26 }
 0x99d   : > { %27325 = vmatmul.mubr.f32.gmra.mrb[10].mxu1 %v35671_v12 }
 0x99e   : > { %27327 = vmatprep.mubr.f32.mxu1 %v35673_v23 }
 0x9a1   : > { %27328 = vmatmul.mubr.f32.gmra.mrb[12].mxu1 %v35700_v51 }
 0x9a2   : > { %27330 = vmatprep.mubr.f32.mxu1 %v35709_v32 }
 0x9a5   : > { %27331 = vmatmul.mubr.f32.gmra.mrb[14].mxu1 %v35717_v21 }
 0x9a6   : > { %27333 = vmatprep.mubr.f32.mxu1 %v35728_v15 }
 0x9a9   : > { %27334 = vmatmul.mubr.f32.gmra.mrb[16].mxu1 %v35742_v7 }
 0x9aa   : > { %27336 = vmatprep.mubr.f32.mxu1 %v35748_v14 }
 0x9ad   : > { %27337 = vmatmul.mubr.f32.gmra.mrb[18].mxu1 %v35759_v16 }
 0x9ae   : > { %27339 = vmatprep.mubr.f32.mxu1 %v35770_v25 }
 0x9b1   : > { %27340 = vmatmul.mubr.f32.gmra.mrb[20].mxu1 %v35775_v38 }
 0x9b2   : > { %27342 = vmatprep.mubr.f32.mxu1 %v35777_v13 }
 0x9b5   : > { %27343 = vmatmul.mubr.f32.gmra.mrb[22].mxu1 %v35798_v43 }
 0x9b6   : > { %27345 = vmatprep.mubr.f32.mxu1 %v35800_v58 }
 0x9b9   : > { %27346 = vmatmul.mubr.f32.gmra.mrb[24].mxu1 %v35823_v42 }
 0x9ba   : > { %27348 = vmatprep.mubr.f32.mxu1 %v35828_v62  ;;  %v39762_v62 = vand.u32 4294901760, %v35654_v28 }
 0x9bd   : > { %27349 = vmatmul.mubr.f32.gmra.mrb[26].mxu1 %v35843_v55  ;;  %v39761_v55 = vand.u32 4294901760, %v35641_v45 }
 0x9be   : > { %27351 = vmatprep.mubr.f32.mxu1 %v35848_v54  ;;  %v39760_v54 = vand.u32 4294901760, %v35632_v18 }
 0x9c1   : > { %27352 = vmatmul.mubr.f32.gmra.mrb[28].mxu1 %v35862_v33  ;;  %v39759_v33 = vand.u32 4294901760, %v35622_v19 }
 0x9c2   : > { %27354 = vmatprep.mubr.f32.mxu1 %v35869_v22  ;;  %v39758_v22 = vand.u32 4294901760, %v35616_v17 }
 0x9c5   : > { %27355 = vmatmul.mubr.f32.gmra.mrb[30].mxu1 %v35882_v63  ;;  %v39757_v63 = vand.u32 4294901760, %v35607_v3 }
 0x9c6   : > { %27357 = vmatprep.mubr.f32.mxu1 %v35872_v56  ;;  %v39756_v56 = vld [vmem:[#allocation86_spill] sm:$0xff] }
 0x9c9   : > { %27358 = vmatmul.mubr.f32.gmra.mrb[0].mxu1 %v35891_v20  ;;  %v39755_v20 = vld [vmem:[#allocation46_spill] sm:$0xff] }
 0x9ca   : > { %27364 = vmatprep.mubr.f32.mxu1 %v35607_v3  ;;  %v39763_v3 = vand.u32 4294901760, %v35667_v2 }
 0x9cd   : > { %27365 = vmatmul.mubr.f32.vlgmr.msra.gmra.mrb[2].mxu1 %v35616_v17  ;;  %v39764_v17 = vand.u32 4294901760, %v35679_v41 }
 0x9ce   : > { %27367 = vmatprep.mubr.f32.mxu1 %v35622_v19  ;;  %28183 = vmatpush3.bf16.msra.mxu1 %v35519_v60  ;;  %v39765_v19 = vand.u32 4294901760, %v39740_v59 }
 0x9cf   : > { %28185 = vmatprep.subr.bf16.mxu1 %v28184_v46 }
 0x9d1   : > { %27368 = vmatmul.mubr.f32.gmra.mrb[4].mxu1 %v35632_v18  ;;  %v39767_v18 = vand.u32 4294901760, %v39742_v50 }
 0x9d2   : > { %27370 = vmatprep.mubr.f32.mxu1 %v35641_v45  ;;  %v39768_v45 = vand.u32 4294901760, %v39743_v30 }
 0x9d5   : > { %27371 = vmatmul.mubr.f32.gmra.mrb[6].mxu1 %v35654_v28  ;;  %v39769_v28 = vand.u32 4294901760, %v39744_v4 }
 0x9d6   : > { %27373 = vmatprep.mubr.f32.mxu1 %v35667_v2  ;;  %v39770_v2 = vand.u32 4294901760, %v39745_v1 }
 0x9d9   : > { %27374 = vmatmul.mubr.f32.gmra.mrb[8].mxu1 %v35679_v41  ;;  %v39771_v41 = vand.u32 4294901760, %v39746_v24 }
 0x9da   : > { %27376 = vmatprep.mubr.f32.mxu1 %v39740_v59  ;;  %v39778_v59 = vand.u32 4294901760, %v39753_v8 }
 0x9dd   : > { %27377 = vmatmul.mubr.f32.gmra.mrb[10].mxu1 %v39741_v47 }
 0x9de   : > { %27379 = vmatprep.mubr.f32.mxu1 %v39742_v50  ;;  %v39780_v50 = vand.u32 4294901760, %v39755_v20 }
 0x9e1   : > { %27380 = vmatmul.mubr.f32.gmra.mrb[12].mxu1 %v39743_v30  ;;  %v39781_v30 = vand.u32 4294901760, %v35846_v10 }
 0x9e2   : > { %27382 = vmatprep.mubr.f32.mxu1 %v39744_v4  ;;  %v39782_v4 = vand.u32 4294901760, %v39756_v56 }
 0x9e5   : > { %27383 = vmatmul.mubr.f32.gmra.mrb[14].mxu1 %v39745_v1  ;;  %v39783_v1 = vand.u32 4294901760, %v35867_v48 }
 0x9e6   : > { %27385 = vmatprep.mubr.f32.mxu1 %v39746_v24  ;;  %v39792_v24 = vld [vmem:[#allocation13_spill] sm:$0xff] }
 0x9e9   : > { %27386 = vmatmul.mubr.f32.gmra.mrb[16].mxu1 %v39747_v37 }
 0x9ea   : > { %27388 = vmatprep.mubr.f32.mxu1 %v39748_v29 }
 0x9ed   : > { %27389 = vmatmul.mubr.f32.gmra.mrb[18].mxu1 %v39749_v57 }
 0x9ee   : > { %27391 = vmatprep.mubr.f32.mxu1 %v39750_v11 }
 0x9f1   : > { %27392 = vmatmul.mubr.f32.gmra.mrb[20].mxu1 %v39751_v39 }
 0x9f2   : > { %27394 = vmatprep.mubr.f32.mxu1 %v39752_v9 }
 0x9f5   : > { %27395 = vmatmul.mubr.f32.gmra.mrb[22].mxu1 %v39753_v8  ;;  %v39785_v8 = vand.u32 4294901760, %v35889_v27 }
 0x9f6   : > { %27397 = vmatprep.mubr.f32.mxu1 %v39754_v49 }
 0x9f9   : > { %27398 = vmatmul.mubr.f32.gmra.mrb[24].mxu1 %v39755_v20  ;;  %v39787_v20 = vand.u32 4294901760, %v35894_v36 }
 0x9fa   : > { %27400 = vmatprep.mubr.f32.mxu1 %v35846_v10  ;;  %v39788_v10 = vand.u32 4294901760, %v35908_v61 }
 0x9fd   : > { %27401 = vmatmul.mubr.f32.gmra.mrb[26].mxu1 %v39756_v56  ;;  %v36067_v56 = vld [vmem:[%s36914_s5] sm:$0xff] }
 0x9fe   : > { %27403 = vmatprep.mubr.f32.mxu1 %v35867_v48  ;;  %v36072_v48 = vld [vmem:[%s36914_s5 + $0x8] sm:$0xff] }
 0xa01   : > { %27404 = vmatmul.mubr.f32.gmra.mrb[28].mxu1 %v35880_v5 }
 0xa02   : > { %27406 = vmatprep.mubr.f32.mxu1 %v35889_v27  ;;  %v20125_v27 = vand.u32 4294901760, %v36072_v48 }
 0xa05   : > { %27407 = vmatmul.mubr.f32.gmra.mrb[30].mxu1 %v35901_v35 }
 0xa06   : > { %27409 = vmatprep.mubr.f32.mxu1 %v35894_v36 }
 0xa09   : > { %27410 = vmatmul.mubr.f32.gmra.mrb[0].mxu1 %v35908_v61  ;;  %v39791_v61 = vld [vmem:[#allocation135_spill] sm:$0xff] }
 0xa0a   : > { %27416 = vmatprep.mubr.f32.mxu1 %v39757_v63  ;;  %v39766_v63 = vand.u32 4294901760, %v39741_v47  ;;  %v39779_v47 = vand.u32 4294901760, %v39754_v49  ;;  %v39786_v49 = vand.u32 4294901760, %v35901_v35  ;;  %v39790_v35 = vld [vmem:[#allocation84_spill] sm:$0xff] }
 0xa0d   : > { %27417 = vmatmul.mubr.f32.vlgmr.msra.gmra.mrb[2].mxu1 %v39758_v22  ;;  %v39776_v22 = vand.u32 4294901760, %v39751_v39 }
 0xa0e   : > { %27419 = vmatprep.mubr.f32.mxu1 %v39759_v33  ;;  %28187 = vmatpush3.bf16.msra.mxu1 %v28184_v46  ;;  %v39775_v33 = vand.u32 4294901760, %v39750_v11  ;;  %v39777_v46 = vand.u32 4294901760, %v39752_v9  ;;  %v39784_v9 = vand.u32 4294901760, %v35880_v5  ;;  %v20122_v5 = vand.u32 4294901760, %v36067_v56  ;;  %v39796_v11 = vld [vmem:[#allocation152_spill] sm:$0xff] }
 0xa0f   : > { %28189 = vmatprep.subr.bf16.mxu1 %v35519_v60 }
 0xa10   : > { %v36081_v36 = vpack.c.bf16 %v20125_v27, %v20122_v5 }
 0xa11   : > { %27420 = vmatmul.mubr.f32.gmra.mrb[4].mxu1 %v39760_v54  ;;  %v39774_v54 = vand.u32 4294901760, %v39749_v57  ;;  %v39795_v57 = vld [vmem:[#allocation88_spill] sm:$0xff] }
 0xa12   : > { %27422 = vmatprep.mubr.f32.mxu1 %v39761_v55  ;;  %v39773_v55 = vand.u32 4294901760, %v39748_v29  ;;  %28193 = vmatprep.subr.bf16.mxu0 %v36081_v36  ;;  %v39794_v29 = vld [vmem:[#allocation141_spill] sm:$0xff] }
 0xa13   : > { %28195 = vmatpush3.bf16.msra.mxu0 %v36081_v36 }
 0xa15   : > { %27423 = vmatmul.mubr.f32.gmra.mrb[6].mxu1 %v39762_v62  ;;  %v39772_v62 = vand.u32 4294901760, %v39747_v37  ;;  %v39793_v37 = vld [vmem:[#allocation144_spill] sm:$0xff] }
 0xa16   : > { %27425 = vmatprep.mubr.f32.mxu1 %v39763_v3  ;;  %v39800_v3 = vld [vmem:[#allocation28_spill] sm:$0xff] }
 0xa19   : > { %27426 = vmatmul.mubr.f32.gmra.mrb[8].mxu1 %v39764_v17 }
 0xa1a   : > { %27428 = vmatprep.mubr.f32.mxu1 %v39765_v19 }
 0xa1d   : > { %27429 = vmatmul.mubr.f32.gmra.mrb[10].mxu1 %v39766_v63 }
 0xa1e   : > { %27431 = vmatprep.mubr.f32.mxu1 %v39767_v18 }
 0xa21   : > { %27432 = vmatmul.mubr.f32.gmra.mrb[12].mxu1 %v39768_v45 }
 0xa22   : > { %27434 = vmatprep.mubr.f32.mxu1 %v39769_v28 }
 0xa25   : > { %27435 = vmatmul.mubr.f32.gmra.mrb[14].mxu1 %v39770_v2 }
 0xa26   : > { %27437 = vmatprep.mubr.f32.mxu1 %v39771_v41 }
 0xa29   : > { %27438 = vmatmul.mubr.f32.gmra.mrb[16].mxu1 %v39772_v62 }
 0xa2a   : > { %27440 = vmatprep.mubr.f32.mxu1 %v39773_v55  ;;  %v39801_v55 = vld [vmem:[#allocation37_spill] sm:$0xff] }
 0xa2d   : > { %27441 = vmatmul.mubr.f32.gmra.mrb[18].mxu1 %v39774_v54 }
 0xa2e   : > { %27443 = vmatprep.mubr.f32.mxu1 %v39775_v33 }
 0xa31   : > { %27444 = vmatmul.mubr.f32.gmra.mrb[20].mxu1 %v39776_v22 }
 0xa32   : > { %27446 = vmatprep.mubr.f32.mxu1 %v39777_v46 }
 0xa35   : > { %27447 = vmatmul.mubr.f32.gmra.mrb[22].mxu1 %v39778_v59  ;;  %v39802_v59 = vld [vmem:[#allocation24_spill] sm:$0xff] }
 0xa36   : > { %27449 = vmatprep.mubr.f32.mxu1 %v39779_v47 }
 0xa39   : > { %27450 = vmatmul.mubr.f32.gmra.mrb[24].mxu1 %v39780_v50 }
 0xa3a   : > { %27452 = vmatprep.mubr.f32.mxu1 %v39781_v30 }
 0xa3d   : > { %27453 = vmatmul.mubr.f32.gmra.mrb[26].mxu1 %v39782_v4 }
 0xa3e   : > { %27455 = vmatprep.mubr.f32.mxu1 %v39783_v1 }
 0xa41   : > { %27456 = vmatmul.mubr.f32.gmra.mrb[28].mxu1 %v39784_v9 }
 0xa42   : > { %27458 = vmatprep.mubr.f32.mxu1 %v39785_v8 }
 0xa45   : > { %27459 = vmatmul.mubr.f32.gmra.mrb[30].mxu1 %v39786_v49 }
 0xa46   : > { %27461 = vmatprep.mubr.f32.mxu1 %v39787_v20 }
 0xa49   : > { %27462 = vmatmul.mubr.f32.gmra.mrb[0].mxu1 %v39788_v10 }
 0xa4a   : > { %27468 = vmatprep.mubr.f32.mxu1 %v35598_v44 }
 0xa4d   : > { %27469 = vmatmul.mubr.f32.vlgmr.msra.gmra.mrb[2].mxu1 %v35604_v40 }
 0xa4e   : > { %27471 = vmatprep.mubr.f32.mxu1 %v35609_v34  ;;  %28191 = vmatpush3.bf16.msra.mxu1 %v35519_v60  ;;  %v39789_v60 = vld [vmem:[#allocation82_spill] sm:$0xff] }
 0xa51   : > { %27472 = vmatmul.mubr.f32.gmra.mrb[4].mxu1 %v35618_v31 }
 0xa52   : > { %27474 = vmatprep.mubr.f32.mxu1 %v35625_v52 }
 0xa55   : > { %27475 = vmatmul.mubr.f32.gmra.mrb[6].mxu1 %v35634_v53 }
 0xa56   : > { %27477 = vmatprep.mubr.f32.mxu1 %v35643_v6 }
 0xa59   : > { %27478 = vmatmul.mubr.f32.gmra.mrb[8].mxu1 %v35656_v0 }
 0xa5a   : > { %27480 = vmatprep.mubr.f32.mxu1 %v35658_v26 }
 0xa5d   : > { %27481 = vmatmul.mubr.f32.gmra.mrb[10].mxu1 %v35671_v12 }
 0xa5e   : > { %27483 = vmatprep.mubr.f32.mxu1 %v35673_v23 }
 0xa61   : > { %27484 = vmatmul.mubr.f32.gmra.mrb[12].mxu1 %v35700_v51 }
 0xa62   : > { %27486 = vmatprep.mubr.f32.mxu1 %v35709_v32 }
 0xa65   : > { %27487 = vmatmul.mubr.f32.gmra.mrb[14].mxu1 %v35717_v21 }
 0xa66   : > { %27489 = vmatprep.mubr.f32.mxu1 %v35728_v15 }
 0xa69   : > { %27490 = vmatmul.mubr.f32.gmra.mrb[16].mxu1 %v35742_v7 }
 0xa6a   : > { %27492 = vmatprep.mubr.f32.mxu1 %v35748_v14 }
 0xa6d   : > { %27493 = vmatmul.mubr.f32.gmra.mrb[18].mxu1 %v35759_v16 }
 0xa6e   : > { %27495 = vmatprep.mubr.f32.mxu1 %v35770_v25 }
 0xa71   : > { %27496 = vmatmul.mubr.f32.gmra.mrb[20].mxu1 %v35775_v38 }
 0xa72   : > { %27498 = vmatprep.mubr.f32.mxu1 %v35777_v13 }
 0xa75   : > { %27499 = vmatmul.mubr.f32.gmra.mrb[22].mxu1 %v35798_v43 }
 0xa76   : > { %27501 = vmatprep.mubr.f32.mxu1 %v35800_v58 }
 0xa79   : > { %27502 = vmatmul.mubr.f32.gmra.mrb[24].mxu1 %v35823_v42 }
 0xa7a   : > { %27504 = vmatprep.mubr.f32.mxu1 %v39789_v60 }
 0xa7d   : > { %27505 = vmatmul.mubr.f32.gmra.mrb[26].mxu1 %v39790_v35 }
 0xa7e   : > { %27507 = vmatprep.mubr.f32.mxu1 %v39791_v61 }
 0xa81   : > { %27508 = vmatmul.mubr.f32.gmra.mrb[28].mxu1 %v39792_v24 }
 0xa82   : > { %27510 = vmatprep.mubr.f32.mxu1 %v39793_v37 }
 0xa85   : > { %27511 = vmatmul.mubr.f32.gmra.mrb[30].mxu1 %v39794_v29 }
 0xa86   : > { %27513 = vmatprep.mubr.f32.mxu1 %v39795_v57 }
 0xa89   : > { %27514 = vmatmul.mubr.f32.gmra.mrb[0].mxu1 %v39796_v11 }
 0xa8a   : > { %27520 = vmatprep.mubr.f32.mxu1 %v35598_v44  ;;  %v36152_v44 = vsub.f32 %v36067_v56, %v20122_v5 }
 0xa8d   : > { %27521 = vmatmul.mubr.f32.vlgmr.msra.gmra.mrb[2].mxu1 %v35604_v40  ;;  %v36157_v40 = vsub.f32 %v36072_v48, %v20125_v27  ;;  %v39803_v48 = vld [vmem:[#allocation42_spill] sm:$0xff] }
 0xa8e   : > { %27523 = vmatprep.mubr.f32.mxu1 %v35609_v34  ;;  %v38110_v34 = vand.u32 4294901760, %v36152_v44 }
 0xa91   : > { %27524 = vmatmul.mubr.f32.gmra.mrb[4].mxu1 %v35618_v31  ;;  %v38109_v31 = vand.u32 4294901760, %v36157_v40 }
 0xa92   : > { %27526 = vmatprep.mubr.f32.mxu1 %v35625_v52  ;;  %v20512_v52 = vsub.f32 %v36152_v44, %v38110_v34 }
 0xa95   : > { %27527 = vmatmul.mubr.f32.gmra.mrb[6].mxu1 %v35634_v53  ;;  %v20519_v53 = vsub.f32 %v36157_v40, %v38109_v31 }
 0xa96   : > { %27529 = vmatprep.mubr.f32.mxu1 %v35643_v6  ;;  %v20513_v6 = vand.u32 4294901760, %v20512_v52 }
 0xa99   : > { %27530 = vmatmul.mubr.f32.gmra.mrb[8].mxu1 %v35656_v0  ;;  %v20520_v0 = vand.u32 4294901760, %v20519_v53 }
 0xa9a   : > { %27532 = vmatprep.mubr.f32.mxu1 %v35658_v26 }
 0xa9b   : > { %v36167_v26 = vpack.c.bf16 %v20520_v0, %v20513_v6 }
 0xa9d   : > { %27533 = vmatmul.mubr.f32.gmra.mrb[10].mxu1 %v35671_v12  ;;  %28197 = vmatprep.subr.bf16.mxu0 %v36167_v26 }
 0xa9e   : > { %27535 = vmatprep.mubr.f32.mxu1 %v35673_v23  ;;  %v36177_v23 = vld [vmem:[%s36913_s4] ss:$0 sm:$0xff] }
 0xaa1   : > { %27536 = vmatmul.mubr.f32.gmra.mrb[12].mxu1 %v35700_v51 }
 0xaa2   : > { %27538 = vmatprep.mubr.f32.mxu1 %v35709_v32 }
 0xaa5   : > { %27539 = vmatmul.mubr.f32.gmra.mrb[14].mxu1 %v35717_v21  ;;  %v39798_v21 = vld [vmem:[#allocation16_spill] sm:$0xff] }
 0xaa6   : > { %27541 = vmatprep.mubr.f32.mxu1 %v35728_v15 }
 0xaa9   : > { %27542 = vmatmul.mubr.f32.gmra.mrb[16].mxu1 %v35742_v7 }
 0xaaa   : > { %27544 = vmatprep.mubr.f32.mxu1 %v35748_v14 }
 0xaad   : > { %27545 = vmatmul.mubr.f32.gmra.mrb[18].mxu1 %v35759_v16  ;;  %v39797_v16 = vld [vmem:[#allocation181_spill] sm:$0xff] }
 0xaae   : > { %27547 = vmatprep.mubr.f32.mxu1 %v35770_v25 }
 0xab1   : > { %27548 = vmatmul.mubr.f32.gmra.mrb[20].mxu1 %v35775_v38 }
 0xab2   : > { %27550 = vmatprep.mubr.f32.mxu1 %v35777_v13  ;;  %v36172_v13 = vpack.c.bf16 %v36157_v40, %v36152_v44 }
 0xab5   : > { %27551 = vmatmul.mubr.f32.gmra.mrb[22].mxu1 %v35798_v43  ;;  %v39799_v43 = vld [vmem:[#allocation52_spill] sm:$0xff] }
 0xab6   : > { %27553 = vmatprep.mubr.f32.mxu1 %v35800_v58 }
 0xab9   : > { %27554 = vmatmul.mubr.f32.gmra.mrb[24].mxu1 %v35823_v42 }
 0xaba   : > { %27556 = vmatprep.mubr.f32.mxu1 %v39789_v60 }
 0xabd   : > { %27557 = vmatmul.mubr.f32.gmra.mrb[26].mxu1 %v39790_v35 }
 0xabe   : > { %27559 = vmatprep.mubr.f32.mxu1 %v39791_v61 }
 0xac1   : > { %27560 = vmatmul.mubr.f32.gmra.mrb[28].mxu1 %v39792_v24 }
 0xac2   : > { %27562 = vmatprep.mubr.f32.mxu1 %v39793_v37  ;;  %v39804_v37 = vld [vmem:[#allocation54_spill] sm:$0xff] }
 0xac5   : > { %27563 = vmatmul.mubr.f32.gmra.mrb[30].mxu1 %v39794_v29 }
 0xac6   : > { %27565 = vmatprep.mubr.f32.mxu1 %v39795_v57 }
 0xac9   : > { %27566 = vmatmul.mubr.f32.gmra.mrb[0].mxu1 %v39796_v11 }
 0xb60   : > { %v27522_v12 = vpop.f32.mrb[2].mxu1 }
 0xb61   : > { %v28250_v51 = vadd.f32 %v27522_v12, %v39797_v16  ;;  %v19723_v32 = vpop.f32.mrb[3].mxu1 }
 0xb62   : > { %v28251_v15 = vadd.f32 %v19723_v32, %v39798_v21 }
 0xb63   : > { %v19953_v7 = vadd.f32 %v28250_v51, %v36177_v23 }
 0xb64   : > { %v19952_v14 = vadd.f32 %v28251_v15, %v36177_v23  ;;  %v27525_v25 = vpop.f32.mrb[4].mxu1  ;;  %v39805_v15 = vld [vmem:[#allocation57_spill] sm:$0xff] }
 0xb65   : > { %v19985_v38 = vmax.f32 %v19953_v7, 0.0  ;;  %v28252_v58 = vadd.f32 %v27525_v25, %v39799_v43  ;;  %v19735_v42 = vpop.f32.mrb[5].mxu1 }
 0xb66   : > { %v19984_v39 = vmax.f32 %v19952_v14, 0.0  ;;  %v28253_v17 = vadd.f32 %v19735_v42, %v39800_v3 }
 0xb67   : > { %v20029_v19 = vsel %vm2325_vm1, %v19985_v38, 0  ;;  %v19955_v63 = vadd.f32 %v28252_v58, %v36177_v23  ;;  %v39807_v58 = vld [vmem:[#allocation70_spill] sm:$0xff] }
 0xb68   : > { %v36187_v18 = vand.u32 4294901760, %v20029_v19  ;;  %v20026_v45 = vsel %vm2325_vm1, %v19984_v39, 0  ;;  %v19954_v28 = vadd.f32 %v28253_v17, %v36177_v23  ;;  %v27528_v2 = vpop.f32.mrb[6].mxu1 }
 0xb69   : > { %v36191_v41 = vand.u32 4294901760, %v20026_v45  ;;  %v19987_v62 = vmax.f32 %v19955_v63, 0.0  ;;  %v28254_v54 = vadd.f32 %v27528_v2, %v39801_v55  ;;  %v19747_v33 = vpop.f32.mrb[7].mxu1 }
 0xb6a   : > { %v36195_v22 = vsub.f32 %v20029_v19, %v36187_v18  ;;  %v19986_v46 = vmax.f32 %v19954_v28, 0.0  ;;  %v28255_v47 = vadd.f32 %v19747_v33, %v39802_v59 }
 0xb6b   : > { %v36199_v50 = vsub.f32 %v20026_v45, %v36191_v41  ;;  %v20035_v30 = vsel %vm2325_vm1, %v19987_v62, 0  ;;  %v19957_v4 = vadd.f32 %v28254_v54, %v36177_v23 }
 0xb6c   : > { %v38105_v1 = vand.u32 4294901760, %v36195_v22  ;;  %v36204_v9 = vand.u32 4294901760, %v20035_v30  ;;  %v20032_v8 = vsel %vm2325_vm1, %v19986_v46, 0  ;;  %v19956_v49 = vadd.f32 %v28255_v47, %v36177_v23  ;;  %v27531_v20 = vpop.f32.mrb[8].mxu1  ;;  %v39808_v46 = vld [vmem:[#allocation61_spill] sm:$0xff] }
 0xb6d   : > { %v36208_v10 = vand.u32 4294901760, %v20032_v8  ;;  %v19989_v56 = vmax.f32 %v19957_v4, 0.0  ;;  %v28256_v5 = vadd.f32 %v27531_v20, %v39803_v48  ;;  %v19759_v27 = vpop.f32.mrb[9].mxu1  ;;  %v38107_v60 = vand.u32 4294901760, %v36199_v50 }
 0xb6e   : > { %v20201_v35 = vsub.f32 %v36195_v22, %v38105_v1  ;;  %v36216_v61 = vsub.f32 %v20035_v30, %v36204_v9  ;;  %v19988_v24 = vmax.f32 %v19956_v49, 0.0  ;;  %v28257_v29 = vadd.f32 %v19759_v27, %v39804_v37  ;;  %v39810_v49 = vld [vmem:[#allocation33_spill] sm:$0xff] }
 0xb6f   : > { %v36220_v57 = vsub.f32 %v20032_v8, %v36208_v10  ;;  %v20041_v11 = vsel %vm2325_vm1, %v19989_v56, 0  ;;  %v19959_v52 = vadd.f32 %v28256_v5, %v36177_v23  ;;  %v20191_v53 = vsub.f32 %v36199_v50, %v38107_v60 }
 0xb70   : > { %v20202_v6 = vand.u32 4294901760, %v20201_v35  ;;  %v36227_v0 = vand.u32 4294901760, %v20041_v11  ;;  %v20038_v12 = vsel %vm2325_vm1, %v19988_v24, 0  ;;  %v19958_v16 = vadd.f32 %v28257_v29, %v36177_v23  ;;  %v27534_v51 = vpop.f32.mrb[10].mxu1 }
 0xb71   : > { %v36231_v32 = vand.u32 4294901760, %v20038_v12  ;;  %v19991_v21 = vmax.f32 %v19959_v52, 0.0  ;;  %v28258_v7 = vadd.f32 %v27534_v51, %v39805_v15  ;;  %v19771_v14 = vpop.f32.mrb[11].mxu1  ;;  %v20192_v25 = vand.u32 4294901760, %v20191_v53 }
 0xb72   : > { %v36235_v38 = vsub.f32 %v20041_v11, %v36227_v0  ;;  %v19990_v43 = vmax.f32 %v19958_v16, 0.0  ;;  %v28259_v42 = vadd.f32 %v19771_v14, %v39807_v58  ;;  %v38104_v39 = vand.u32 4294901760, %v36220_v57 }
 0xb73   : > { %v36240_v3 = vsub.f32 %v20038_v12, %v36231_v32  ;;  %v20047_v17 = vsel %vm2325_vm1, %v19991_v21, 0  ;;  %v19961_v19 = vadd.f32 %v28258_v7, %v36177_v23  ;;  %27572 = vmatprep.mubr.f32.mxu0 %v20192_v25  ;;  %v38103_v63 = vand.u32 4294901760, %v36216_v61  ;;  %v39814_v7 = vld [vmem:[#allocation62_spill] sm:$0xff] }
 0xb74   : > { %39806 = vst [vmem:[#allocation142_spill] sm:$0xff] %v36235_v38  ;;  %v36245_v45 = vand.u32 4294901760, %v20047_v17  ;;  %v20044_v28 = vsel %vm2325_vm1, %v19990_v43, 0  ;;  %v19960_v2 = vadd.f32 %v28259_v42, %v36177_v23  ;;  %v27537_v62 = vpop.f32.mrb[12].mxu1  ;;  %27573 = vmatmul.mubr.f32.vlgmr.msra.gmra.mrb[64].mxu0 %v20202_v6  ;;  %v20211_v55 = vsub.f32 %v36220_v57, %v38104_v39  ;;  %v39812_v6 = vld [vmem:[#allocation157_spill] sm:$0xff]  ;;  %v39833_v39 = vld [vmem:[#allocation3_spill] sm:$0xff] }
 0xb75   : > { %v36252_v54 = vand.u32 4294901760, %v20044_v28  ;;  %v19993_v33 = vmax.f32 %v19961_v19, 0.0  ;;  %v28260_v59 = vadd.f32 %v27537_v62, %v39808_v46  ;;  %v19783_v47 = vpop.f32.mrb[13].mxu1  ;;  %28199 = vmatpush3.bf16.msra.mxu0 %v36167_v26  ;;  %v20221_v30 = vsub.f32 %v36216_v61, %v38103_v63 }
 0xb76   : > { %v36260_v4 = vsub.f32 %v20047_v17, %v36245_v45  ;;  %v19992_v8 = vmax.f32 %v19960_v2, 0.0  ;;  %v28261_v20 = vadd.f32 %v19783_v47, %v39810_v49  ;;  %v20212_v56 = vand.u32 4294901760, %v20211_v55  ;;  %28201 = vmatprep.subr.bf16.mxu0 %v36172_v13 }
 0xb77   : > { %v36265_v48 = vsub.f32 %v20044_v28, %v36252_v54  ;;  %v20053_v5 = vsel %vm2325_vm1, %v19993_v33, 0  ;;  %v19963_v26 = vadd.f32 %v28260_v59, %v36177_v23  ;;  %v20222_v27 = vand.u32 4294901760, %v20221_v30  ;;  %v39816_v59 = vld [vmem:[#allocation8_spill] sm:$0xff] }
 0xb78   : > { %39809 = vst [vmem:[#allocation30_spill] sm:$0xff] %v36260_v4  ;;  %v36269_v35 = vand.u32 4294901760, %v20053_v5  ;;  %v20050_v24 = vsel %vm2325_vm1, %v19992_v8, 0  ;;  %v19962_v37 = vadd.f32 %v28261_v20, %v36177_v23  ;;  %27575 = vmatprep.mubr.f32.mxu0 %v20212_v56  ;;  %v27540_v29 = vpop.f32.mrb[14].mxu1  ;;  %v38101_v11 = vand.u32 4294901760, %v36240_v3  ;;  %v39818_v56 = vld [vmem:[#allocation146_spill] sm:$0xff] }
 0xb79   : > { %39811 = vst [vmem:[#allocation140_spill] sm:$0xff] %v36265_v48  ;;  %v36274_v52 = vand.u32 4294901760, %v20050_v24  ;;  %v19995_v53 = vmax.f32 %v19963_v26, 0.0  ;;  %v28262_v12 = vadd.f32 %v27540_v29, %v39812_v6  ;;  %27576 = vmatmul.mubr.f32.gmra.mrb[66].mxu0 %v20222_v27  ;;  %v19795_v16 = vpop.f32.mrb[15].mxu1  ;;  %v38100_v51 = vand.u32 4294901760, %v36235_v38 }
 0xb7a   : > { %v36279_v21 = vsub.f32 %v20053_v5, %v36269_v35  ;;  %v19994_v15 = vmax.f32 %v19962_v37, 0.0  ;;  %v28263_v14 = vadd.f32 %v19795_v16, %v39814_v7  ;;  %v20231_v25 = vsub.f32 %v36240_v3, %v38101_v11 }
 0xb7b   : > { %v36286_v43 = vsub.f32 %v20050_v24, %v36274_v52  ;;  %v20059_v58 = vsel %vm2325_vm1, %v19995_v53, 0  ;;  %v19965_v42 = vadd.f32 %v28262_v12, %v36177_v23  ;;  %v20241_v17 = vsub.f32 %v36235_v38, %v38100_v51 }
 0xb7c   : > { %39813 = vst [vmem:[#allocation44_spill] sm:$0xff] %v36279_v21  ;;  %v36293_v19 = vand.u32 4294901760, %v20059_v58  ;;  %v20056_v28 = vsel %vm2325_vm1, %v19994_v15, 0  ;;  %v19964_v2 = vadd.f32 %v28263_v14, %v36177_v23  ;;  %v20232_v62 = vand.u32 4294901760, %v20231_v25  ;;  %v27543_v55 = vpop.f32.mrb[16].mxu1  ;;  %v39820_v25 = vld [vmem:[#allocation165_spill] sm:$0xff] }
 0xb7d   : > { %39815 = vst [vmem:[#allocation25_spill] sm:$0xff] %v36286_v43  ;;  %v36297_v33 = vand.u32 4294901760, %v20056_v28  ;;  %v19997_v46 = vmax.f32 %v19965_v42, 0.0  ;;  %v28264_v47 = vadd.f32 %v27543_v55, %v39816_v59  ;;  %v20242_v30 = vand.u32 4294901760, %v20241_v17  ;;  %v19807_v8 = vpop.f32.mrb[17].mxu1  ;;  %v39822_v55 = vld [vmem:[#allocation172_spill] sm:$0xff] }
 0xb7e   : > { %v36301_v49 = vsub.f32 %v20059_v58, %v36293_v19  ;;  %v19996_v20 = vmax.f32 %v19964_v2, 0.0  ;;  %27578 = vmatprep.mubr.f32.mxu0 %v20232_v62  ;;  %v28265_v5 = vadd.f32 %v19807_v8, %v39818_v56  ;;  %v38099_v26 = vand.u32 4294901760, %v36265_v48 }
 0xb7f   : > { %v36306_v27 = vsub.f32 %v20056_v28, %v36297_v33  ;;  %v20065_v24 = vsel %vm2325_vm1, %v19997_v46, 0  ;;  %v19967_v37 = vadd.f32 %v28264_v47, %v36177_v23  ;;  %27579 = vmatmul.mubr.f32.gmra.mrb[68].mxu0 %v20242_v30  ;;  %v38097_v29 = vand.u32 4294901760, %v36260_v4 }
 0xb80   : > { %39817 = vst [vmem:[#allocation64_spill] sm:$0xff] %v36301_v49  ;;  %v36311_v53 = vand.u32 4294901760, %v20065_v24  ;;  %v20062_v6 = vsel %vm2325_vm1, %v19996_v20, 0  ;;  %v19966_v12 = vadd.f32 %v28265_v5, %v36177_v23  ;;  %v20251_v16 = vsub.f32 %v36265_v48, %v38099_v26  ;;  %v27546_v15 = vpop.f32.mrb[18].mxu1  ;;  %v39829_v26 = vld [vmem:[#allocation55_spill] sm:$0xff] }
 0xb81   : > { %39819 = vst [vmem:[#allocation19_spill] sm:$0xff] %v36306_v27  ;;  %v36318_v7 = vand.u32 4294901760, %v20062_v6  ;;  %v19999_v14 = vmax.f32 %v19967_v37, 0.0  ;;  %v28266_v58 = vadd.f32 %v27546_v15, %v39820_v25  ;;  %v20261_v42 = vsub.f32 %v36260_v4, %v38097_v29  ;;  %v19819_v17 = vpop.f32.mrb[19].mxu1 }
 0xb82   : > { %v36325_v28 = vsub.f32 %v20065_v24, %v36311_v53  ;;  %v19998_v2 = vmax.f32 %v19966_v12, 0.0  ;;  %v20252_v62 = vand.u32 4294901760, %v20251_v16  ;;  %v28267_v46 = vadd.f32 %v19819_v17, %v39822_v55 }
 0xb83   : > { %v36329_v59 = vsub.f32 %v20062_v6, %v36318_v7  ;;  %v20071_v47 = vsel %vm2325_vm1, %v19999_v14, 0  ;;  %v19969_v30 = vadd.f32 %v28266_v58, %v36177_v23  ;;  %v20262_v8 = vand.u32 4294901760, %v20261_v42  ;;  %v39824_v6 = vld [vmem:[#allocation136_spill] sm:$0xff] }
 0xb84   : > { %39821 = vst [vmem:[#allocation7_spill] sm:$0xff] %v36325_v28  ;;  %v36333_v20 = vand.u32 4294901760, %v20071_v47  ;;  %v20068_v56 = vsel %vm2325_vm1, %v19998_v2, 0  ;;  %27581 = vmatprep.mubr.f32.mxu0 %v20252_v62  ;;  %v19968_v5 = vadd.f32 %v28267_v46, %v36177_v23  ;;  %v38096_v24 = vand.u32 4294901760, %v36286_v43  ;;  %v27549_v37 = vpop.f32.mrb[20].mxu1  ;;  %v39826_v2 = vld [vmem:[#allocation27_spill] sm:$0xff] }
 0xb85   : > { %39823 = vst [vmem:[#allocation39_spill] sm:$0xff] %v36329_v59  ;;  %v36338_v12 = vand.u32 4294901760, %v20068_v56  ;;  %v20001_v16 = vmax.f32 %v19969_v30, 0.0  ;;  %27582 = vmatmul.mubr.f32.gmra.mrb[70].mxu0 %v20262_v8  ;;  %v28268_v15 = vadd.f32 %v27549_v37, %v39824_v6  ;;  %v38098_v14 = vand.u32 4294901760, %v36279_v21  ;;  %v19831_v25 = vpop.f32.mrb[21].mxu1 }
 0xb86   : > { %v36343_v58 = vsub.f32 %v20071_v47, %v36333_v20  ;;  %v20000_v42 = vmax.f32 %v19968_v5, 0.0  ;;  %v20271_v17 = vsub.f32 %v36286_v43, %v38096_v24  ;;  %v28269_v62 = vadd.f32 %v19831_v25, %v39826_v2 }
 0xb87   : > { %v36350_v55 = vsub.f32 %v20068_v56, %v36338_v12  ;;  %v20077_v46 = vsel %vm2325_vm1, %v20001_v16, 0  ;;  %v19971_v30 = vadd.f32 %v28268_v15, %v36177_v23  ;;  %v20281_v8 = vsub.f32 %v36279_v21, %v38098_v14 }
 0xb88   : > { %39825 = vst [vmem:[#allocation29_spill] sm:$0xff] %v36343_v58  ;;  %v36357_v47 = vand.u32 4294901760, %v20077_v46  ;;  %v20074_v5 = vsel %vm2325_vm1, %v20000_v42, 0  ;;  %v20272_v37 = vand.u32 4294901760, %v20271_v17  ;;  %v19970_v6 = vadd.f32 %v28269_v62, %v36177_v23  ;;  %v27552_v24 = vpop.f32.mrb[22].mxu1 }
 0xb89   : > { %39827 = vst [vmem:[#allocation58_spill] sm:$0xff] %v36350_v55  ;;  %v36361_v25 = vand.u32 4294901760, %v20074_v5  ;;  %v20003_v56 = vmax.f32 %v19971_v30, 0.0  ;;  %v20282_v2 = vand.u32 4294901760, %v20281_v8  ;;  %v38102_v16 = vand.u32 4294901760, %v36306_v27  ;;  %v19843_v29 = vpop.f32.mrb[23].mxu1 }
 0xb8a   : > { %v36365_v15 = vsub.f32 %v20077_v46, %v36357_v47  ;;  %27584 = vmatprep.mubr.f32.mxu0 %v20272_v37  ;;  %v20002_v14 = vmax.f32 %v19970_v6, 0.0  ;;  %v28270_v51 = vadd.f32 %v27552_v24, %v39829_v26  ;;  %v38106_v42 = vand.u32 4294901760, %v36301_v49  ;;  %v39831_v8 = vld [vmem:[#allocation150_spill] sm:$0xff] }
 0xb8b   : > { %v36370_v17 = vsub.f32 %v20074_v5, %v36361_v25  ;;  %v20083_v62 = vsel %vm2325_vm1, %v20003_v56, 0  ;;  %27585 = vmatmul.mubr.f32.gmra.mrb[72].mxu0 %v20282_v2  ;;  %v20291_v30 = vsub.f32 %v36306_v27, %v38102_v16  ;;  %v28271_v11 = vadd.f32 %v19843_v29, %v39831_v8 }
 0xb8c   : > { %39828 = vst [vmem:[#allocation6_spill] sm:$0xff] %v36365_v15  ;;  %v36377_v46 = vand.u32 4294901760, %v20083_v62  ;;  %v20080_v37 = vsel %vm2325_vm1, %v20002_v14, 0  ;;  %v19973_v26 = vadd.f32 %v28270_v51, %v36177_v23  ;;  %v20301_v24 = vsub.f32 %v36301_v49, %v38106_v42  ;;  %v27555_v5 = vpop.f32.mrb[24].mxu1 }
 0xb8d   : > { %39830 = vst [vmem:[#allocation66_spill] sm:$0xff] %v36370_v17  ;;  %v36384_v6 = vand.u32 4294901760, %v20080_v37  ;;  %v20292_v56 = vand.u32 4294901760, %v20291_v30  ;;  %v19972_v2 = vadd.f32 %v28271_v11, %v36177_v23  ;;  %v38108_v16 = vand.u32 4294901760, %v36329_v59  ;;  %v19855_v63 = vpop.f32.mrb[25].mxu1 }
 0xb8e   : > { %v36389_v29 = vsub.f32 %v20083_v62, %v36377_v46  ;;  %v20005_v8 = vmax.f32 %v19973_v26, 0.0  ;;  %v20302_v14 = vand.u32 4294901760, %v20301_v24  ;;  %v28272_v51 = vadd.f32 %v27555_v5, %v39833_v39  ;;  %v39835_v26 = vld [vmem:[#allocation159_spill] sm:$0xff] }
 0xb8f   : > { %v36393_v1 = vsub.f32 %v20080_v37, %v36384_v6  ;;  %27587 = vmatprep.mubr.f32.mxu0 %v20292_v56  ;;  %v20004_v42 = vmax.f32 %v19972_v2, 0.0  ;;  %v20311_v30 = vsub.f32 %v36329_v59, %v38108_v16  ;;  %v38113_v11 = vand.u32 4294901760, %v36325_v28 }
 0xb90   : > { %39832 = vst [vmem:[#allocation53_spill] sm:$0xff] %v36389_v29  ;;  %v20089_v60 = vsel %vm2325_vm1, %v20005_v8, 0  ;;  %27588 = vmatmul.mubr.f32.gmra.mrb[74].mxu0 %v20302_v14  ;;  %v19975_v62 = vadd.f32 %v28272_v51, %v36177_v23  ;;  %v28273_v24 = vadd.f32 %v19855_v63, %v39835_v26  ;;  %v38120_v39 = vand.u32 4294901760, %v36350_v55  ;;  %v27558_v5 = vpop.f32.mrb[26].mxu1 }
 0xb91   : > { %39834 = vst [vmem:[#allocation145_spill] sm:$0xff] %v36393_v1  ;;  %v36403_v37 = vand.u32 4294901760, %v20089_v60  ;;  %v20086_v56 = vsel %vm2325_vm1, %v20004_v42, 0  ;;  %v20312_v2 = vand.u32 4294901760, %v20311_v30  ;;  %v20321_v16 = vsub.f32 %v36325_v28, %v38113_v11  ;;  %v19867_v31 = vpop.f32.mrb[27].mxu1  ;;  %v39836_v30 = vld [vmem:[#allocation161_spill] sm:$0xff] }
 0xb92   : > { %v36409_v34 = vand.u32 4294901760, %v20086_v56  ;;  %v20007_v8 = vmax.f32 %v19975_v62, 0.0  ;;  %v19974_v14 = vadd.f32 %v28273_v24, %v36177_v23  ;;  %v20331_v63 = vsub.f32 %v36350_v55, %v38120_v39 }
 0xb93   : > { %v36416_v51 = vsub.f32 %v20089_v60, %v36403_v37  ;;  %27590 = vmatprep.mubr.f32.mxu0 %v20312_v2  ;;  %v20322_v42 = vand.u32 4294901760, %v20321_v16  ;;  %v28274_v26 = vadd.f32 %v27558_v5, %v39836_v30  ;;  %v38125_v59 = vand.u32 4294901760, %v36343_v58  ;;  %v39837_v5 = vld [vmem:[#allocation162_spill] sm:$0xff] }
 0xb94   : > { %v36421_v11 = vsub.f32 %v20086_v56, %v36409_v34  ;;  %v20095_v62 = vsel %vm2325_vm1, %v20007_v8, 0  ;;  %v20006_v28 = vmax.f32 %v19974_v14, 0.0  ;;  %v20332_v24 = vand.u32 4294901760, %v20331_v63  ;;  %v27561_v49 = vpop.f32.mrb[28].mxu1  ;;  %v39838_v14 = vld [vmem:[#allocation182_spill] sm:$0xff] }
 0xb95   : > { %v36424_v27 = vand.u32 4294901760, %v20095_v62  ;;  %27591 = vmatmul.mubr.f32.gmra.mrb[76].mxu0 %v20322_v42  ;;  %v19977_v60 = vadd.f32 %v28274_v26, %v36177_v23  ;;  %v20341_v16 = vsub.f32 %v36343_v58, %v38125_v59  ;;  %v28275_v2 = vadd.f32 %v19867_v31, %v39837_v5  ;;  %v19879_v30 = vpop.f32.mrb[29].mxu1 }
 0xb96   : > { %v20092_v56 = vsel %vm2325_vm1, %v20006_v28, 0  ;;  %27593 = vmatprep.mubr.f32.mxu0 %v20332_v24  ;;  %v38128_v8 = vand.u32 4294901760, %v36370_v17  ;;  %v28276_v63 = vadd.f32 %v27561_v49, %v39838_v14  ;;  %v38133_v39 = vand.u32 4294901760, %v36365_v15 }
 0xb97   : > { %v36436_v42 = vsub.f32 %v20095_v62, %v36424_v27  ;;  %v36438_v26 = vand.u32 4294901760, %v20092_v56  ;;  %v20009_v55 = vmax.f32 %v19977_v60, 0.0  ;;  %v20342_v21 = vand.u32 4294901760, %v20341_v16  ;;  %v39840_v60 = vld [vmem:[#allocation183_spill] sm:$0xff] }
 0xb98   : > { %v19976_v59 = vadd.f32 %v28275_v2, %v36177_v23  ;;  %v20351_v31 = vsub.f32 %v36370_v17, %v38128_v8  ;;  %v19979_v28 = vadd.f32 %v28276_v63, %v36177_v23  ;;  %v20361_v49 = vsub.f32 %v36365_v15, %v38133_v39  ;;  %v27564_v24 = vpop.f32.mrb[30].mxu1  ;;  %v39842_v15 = vld [vmem:[#allocation173_spill] sm:$0xff] }
 0xb99   : > { %39839 = vst [vmem:[#allocation170_spill] sm:$0xff] %v36436_v42  ;;  %v36449_v62 = vsub.f32 %v20092_v56, %v36438_v26  ;;  %v20101_v5 = vsel %vm2325_vm1, %v20009_v55, 0  ;;  %27594 = vmatmul.mubr.f32.gmra.mrb[78].mxu0 %v20342_v21  ;;  %v28277_v16 = vadd.f32 %v19879_v30, %v39840_v60  ;;  %v38136_v2 = vand.u32 4294901760, %v36393_v1  ;;  %v19891_v14 = vpop.f32.mrb[31].mxu1 }
 0xb9a   : > { %v36454_v58 = vand.u32 4294901760, %v20101_v5  ;;  %v20008_v8 = vmax.f32 %v19976_v59, 0.0  ;;  %v20352_v63 = vand.u32 4294901760, %v20351_v31  ;;  %v20011_v17 = vmax.f32 %v19979_v28, 0.0 }
 0xb9b   : > { %v20362_v43 = vand.u32 4294901760, %v20361_v49  ;;  %v19978_v39 = vadd.f32 %v28277_v16, %v36177_v23  ;;  %v20371_v56 = vsub.f32 %v36393_v1, %v38136_v2  ;;  %v28278_v55 = vadd.f32 %v27564_v24, %v39842_v15  ;;  %v39846_v24 = vld [vmem:[#allocation174_spill] sm:$0xff] }
 0xb9c   : > { %39841 = vst [vmem:[#allocation43_spill] sm:$0xff] %v36454_v58  ;;  %v36462_v21 = vsub.f32 %v20101_v5, %v36454_v58  ;;  %v20098_v30 = vsel %vm2325_vm1, %v20008_v8, 0  ;;  %27596 = vmatprep.mubr.f32.mxu0 %v20352_v63  ;;  %v20107_v60 = vsel %vm2325_vm1, %v20011_v17, 0  ;;  %v38145_v59 = vand.u32 4294901760, %v36389_v29  ;;  %v27567_v31 = vpop.f32.mrb[0].mxu1 }
 0xb9d   : > { %v36467_v28 = vand.u32 4294901760, %v20098_v30  ;;  %v36469_v49 = vand.u32 4294901760, %v20107_v60  ;;  %27597 = vmatmul.mubr.f32.gmra.mrb[80].mxu0 %v20362_v43  ;;  %v20010_v16 = vmax.f32 %v19978_v39, 0.0  ;;  %v20372_v2 = vand.u32 4294901760, %v20371_v56  ;;  %v19903_v1 = vpop.f32.mrb[1].mxu1  ;;  %v39847_v39 = vld [vmem:[#allocation178_spill] sm:$0xff] }
 0xb9e   : > { %39843 = vst [vmem:[#allocation56_spill] sm:$0xff] %v36462_v21  ;;  %v19981_v15 = vadd.f32 %v28278_v55, %v36177_v23  ;;  %v20381_v8 = vsub.f32 %v36389_v29, %v38145_v59  ;;  %v28279_v5 = vadd.f32 %v19891_v14, %v39846_v24  ;;  %v38148_v17 = vand.u32 4294901760, %v36421_v11  ;;  %v39849_v24 = vld [vmem:[#allocation177_spill] sm:$0xff] }
 0xb9f   : > { %39844 = vst [vmem:[#allocation133_spill] sm:$0xff] %v36467_v28  ;;  %39845 = vst [vmem:[#allocation76_spill] sm:$0xff] %v36469_v49  ;;  %v36478_v63 = vsub.f32 %v20098_v30, %v36467_v28  ;;  %v36481_v4 = vsub.f32 %v20107_v60, %v36469_v49  ;;  %v20104_v43 = vsel %vm2325_vm1, %v20010_v16, 0  ;;  %27599 = vmatprep.mubr.f32.mxu0 %v20372_v2  ;;  %v38149_v60 = vand.u32 4294901760, %v36416_v51 }
 0xba0   : > { %v28280_v56 = vadd.f32 %v27567_v31, %v39847_v39  ;;  %v36485_v55 = vand.u32 4294901760, %v20104_v43  ;;  %v20013_v48 = vmax.f32 %v19981_v15, 0.0  ;;  %v20382_v38 = vand.u32 4294901760, %v20381_v8 }
 0xba1   : > { %v19980_v59 = vadd.f32 %v28279_v5, %v36177_v23  ;;  %v20391_v14 = vsub.f32 %v36421_v11, %v38148_v17  ;;  %v28281_v29 = vadd.f32 %v19903_v1, %v39849_v24  ;;  %v38150_v15 = vand.u32 4294901760, %v36449_v62 }
 0xba2   : > { %39848 = vst [vmem:[#allocation77_spill] sm:$0xff] %v36485_v55  ;;  %v19983_v30 = vadd.f32 %v28280_v56, %v36177_v23  ;;  %v36495_v2 = vsub.f32 %v20104_v43, %v36485_v55  ;;  %v20113_v31 = vsel %vm2325_vm1, %v20013_v48, 0  ;;  %27600 = vmatmul.mubr.f32.gmra.mrb[82].mxu0 %v20382_v38  ;;  %v20401_v56 = vsub.f32 %v36416_v51, %v38149_v60 }
 0xba3   : > { %v20012_v16 = vmax.f32 %v19980_v59, 0.0  ;;  %v36499_v8 = vand.u32 4294901760, %v20113_v31  ;;  %v20392_v5 = vand.u32 4294901760, %v20391_v14  ;;  %v19982_v1 = vadd.f32 %v28281_v29, %v36177_v23 }
 0xba4   : > { %39850 = vst [vmem:[#allocation69_spill] sm:$0xff] %v36495_v2  ;;  %v20015_v39 = vmax.f32 %v19983_v30, 0.0  ;;  %v20411_v48 = vsub.f32 %v36449_v62, %v38150_v15  ;;  %v38151_v38 = vand.u32 4294901760, %v36436_v42  ;;  %v20402_v14 = vand.u32 4294901760, %v20401_v56 }
 0xba5   : > { %39851 = vst [vmem:[#allocation71_spill] sm:$0xff] %v36499_v8  ;;  %v20110_v17 = vsel %vm2325_vm1, %v20012_v16, 0  ;;  %27602 = vmatprep.mubr.f32.mxu0 %v20392_v5  ;;  %v36514_v30 = vsub.f32 %v20113_v31, %v36499_v8  ;;  %v20014_v24 = vmax.f32 %v19982_v1, 0.0  ;;  %v38154_v16 = vand.u32 4294901760, %v36478_v63 }
 0xba6   : > { %v36510_v59 = vand.u32 4294901760, %v20110_v17  ;;  %v20119_v43 = vsel %vm2325_vm1, %v20015_v39, 0  ;;  %v20412_v60 = vand.u32 4294901760, %v20411_v48  ;;  %v20421_v23 = vsub.f32 %v36436_v42, %v38151_v38  ;;  %27603 = vmatmul.mubr.f32.gmra.mrb[84].mxu0 %v20402_v14 }
 0xba7   : > { %v38155_v5 = vand.u32 4294901760, %v36462_v21  ;;  %v38158_v39 = vand.u32 4294901760, %v36495_v2  ;;  %v36525_v56 = vand.u32 4294901760, %v20119_v43  ;;  %v20116_v31 = vsel %vm2325_vm1, %v20014_v24, 0 }
 0xba8   : > { %39852 = vst [vmem:[#allocation72_spill] sm:$0xff] %v36510_v59  ;;  %v36520_v29 = vsub.f32 %v20110_v17, %v36510_v59  ;;  %27605 = vmatprep.mubr.f32.mxu0 %v20412_v60  ;;  %v20422_v1 = vand.u32 4294901760, %v20421_v23  ;;  %v36529_v15 = vand.u32 4294901760, %v20116_v31  ;;  %v20431_v17 = vsub.f32 %v36478_v63, %v38154_v16 }
 0xba9   : > { %39853 = vst [vmem:[#allocation79_spill] sm:$0xff] %v36525_v56  ;;  %v20441_v14 = vsub.f32 %v36462_v21, %v38155_v5  ;;  %v20451_v38 = vsub.f32 %v36495_v2, %v38158_v39  ;;  %v36545_v48 = vsub.f32 %v20119_v43, %v36525_v56  ;;  %v39855_v21 = vand.u32 4294901760, %v36481_v4 }
 0xbaa   : > { %39854 = vst [vmem:[#allocation81_spill] sm:$0xff] %v36529_v15  ;;  %v38164_v24 = vand.u32 4294901760, %v36520_v29  ;;  %v36542_v60 = vsub.f32 %v20116_v31, %v36529_v15  ;;  %27606 = vmatmul.mubr.f32.gmra.mrb[86].mxu0 %v20422_v1  ;;  %v20432_v23 = vand.u32 4294901760, %v20431_v17  ;;  %v38163_v2 = vand.u32 4294901760, %v36514_v30 }
 0xbab   : > { %v20452_v42 = vand.u32 4294901760, %v20451_v38  ;;  %v20442_v5 = vand.u32 4294901760, %v20441_v14  ;;  %v20461_v39 = vsub.f32 %v36481_v4, %v39855_v21  ;;  %v38161_v14 = vand.u32 4294901760, %v36545_v48 }
 0xbac   : > { %v20471_v16 = vsub.f32 %v36520_v29, %v38164_v24  ;;  %27608 = vmatprep.mubr.f32.mxu0 %v20432_v23  ;;  %v38162_v31 = vand.u32 4294901760, %v36542_v60  ;;  %v20481_v17 = vsub.f32 %v36514_v30, %v38163_v2  ;;  %v39872_v2 = vld [vmem:[#allocation53_spill] sm:$0xff]  ;;  %v39873_v24 = vld [vmem:[#allocation170_spill] sm:$0xff] }
 0xbad   : > { %v20462_v43 = vand.u32 4294901760, %v20461_v39 }
 0xbae   : > { %27609 = vmatmul.mubr.f32.gmra.mrb[88].mxu0 %v20442_v5  ;;  %v20472_v1 = vand.u32 4294901760, %v20471_v16  ;;  %v20491_v38 = vsub.f32 %v36542_v60, %v38162_v31  ;;  %v20482_v23 = vand.u32 4294901760, %v20481_v17  ;;  %v39857_v5 = vand.u32 4294901760, %v36157_v40  ;;  %v39862_v40 = vld [vmem:[#allocation44_spill] sm:$0xff]  ;;  %v39863_v17 = vld [vmem:[#allocation19_spill] sm:$0xff]  ;;  %v39871_v31 = vld [vmem:[#allocation145_spill] sm:$0xff] }
 0xbaf   : > { %27611 = vmatprep.mubr.f32.mxu0 %v20452_v42  ;;  %v20501_v42 = vsub.f32 %v36545_v48, %v38161_v14  ;;  %v39870_v14 = vld [vmem:[#allocation6_spill] sm:$0xff] }
 0xbb0   : > { %v20492_v21 = vand.u32 4294901760, %v20491_v38  ;;  %v39859_v38 = vld [vmem:[#allocation140_spill] sm:$0xff] }
 0xbb1   : > { %v20502_v16 = vand.u32 4294901760, %v20501_v42  ;;  %v39866_v42 = vld [vmem:[#allocation7_spill] sm:$0xff] }
 0xbb2   : > { %27612 = vmatmul.mubr.f32.gmra.mrb[90].mxu0 %v20462_v43  ;;  %v39860_v43 = vld [vmem:[#allocation30_spill] sm:$0xff] }
 0xbb3   : > { %27614 = vmatprep.mubr.f32.mxu0 %v20472_v1  ;;  %v39858_v1 = vld [vmem:[#allocation142_spill] sm:$0xff] }
 0xbb6   : > { %27615 = vmatmul.mubr.f32.gmra.mrb[92].mxu0 %v20482_v23  ;;  %v39865_v23 = vld [vmem:[#allocation39_spill] sm:$0xff] }
 0xbb7   : > { %27617 = vmatprep.mubr.f32.mxu0 %v20492_v21  ;;  %v39864_v21 = vld [vmem:[#allocation64_spill] sm:$0xff] }
 0xbba   : > { %27618 = vmatmul.mubr.f32.gmra.mrb[94].mxu0 %v20502_v16  ;;  %v39867_v16 = vld [vmem:[#allocation58_spill] sm:$0xff] }
 0xbbb   : > { %27624 = vmatprep.mubr.f32.mxu0 %v36191_v41 }
 0xbbe   : > { %27625 = vmatmul.mubr.f32.vlgmr.msra.gmra.mrb[64].mxu0 %v36187_v18 }
 0xbbf   : > { %27627 = vmatprep.mubr.f32.mxu0 %v36208_v10  ;;  %28203 = vmatpush3.bf16.msra.mxu0 %v36172_v13  ;;  %v39856_v13 = vand.u32 4294901760, %v36152_v44  ;;  %v39861_v44 = vld [vmem:[#allocation25_spill] sm:$0xff] }
 0xbc0   : > { %28205 = vmatprep.subr.bf16.mxu0 %v36081_v36 }
 0xbc1   : > { %v28208_v39 = vpack.c.bf16 %v39857_v5, %v39856_v13  ;;  %v39868_v13 = vld [vmem:[#allocation29_spill] sm:$0xff]  ;;  %v39869_v5 = vld [vmem:[#allocation66_spill] sm:$0xff] }
 0xbc2   : > { %27628 = vmatmul.mubr.f32.gmra.mrb[66].mxu0 %v36204_v9 }
 0xbc3   : > { %27630 = vmatprep.mubr.f32.mxu0 %v36231_v32 }
 0xbc6   : > { %27631 = vmatmul.mubr.f32.gmra.mrb[68].mxu0 %v36227_v0 }
 0xbc7   : > { %27633 = vmatprep.mubr.f32.mxu0 %v36252_v54 }
 0xbca   : > { %27634 = vmatmul.mubr.f32.gmra.mrb[70].mxu0 %v36245_v45 }
 0xbcb   : > { %27636 = vmatprep.mubr.f32.mxu0 %v36274_v52 }
 0xbce   : > { %27637 = vmatmul.mubr.f32.gmra.mrb[72].mxu0 %v36269_v35 }
 0xbcf   : > { %27639 = vmatprep.mubr.f32.mxu0 %v36297_v33 }
 0xbd2   : > { %27640 = vmatmul.mubr.f32.gmra.mrb[74].mxu0 %v36293_v19 }
 0xbd3   : > { %27642 = vmatprep.mubr.f32.mxu0 %v36318_v7 }
 0xbd6   : > { %27643 = vmatmul.mubr.f32.gmra.mrb[76].mxu0 %v36311_v53 }
 0xbd7   : > { %27645 = vmatprep.mubr.f32.mxu0 %v36338_v12 }
 0xbda   : > { %27646 = vmatmul.mubr.f32.gmra.mrb[78].mxu0 %v36333_v20 }
 0xbdb   : > { %27648 = vmatprep.mubr.f32.mxu0 %v36361_v25 }
 0xbde   : > { %27649 = vmatmul.mubr.f32.gmra.mrb[80].mxu0 %v36357_v47 }
 0xbdf   : > { %27651 = vmatprep.mubr.f32.mxu0 %v36384_v6 }
 0xbe2   : > { %27652 = vmatmul.mubr.f32.gmra.mrb[82].mxu0 %v36377_v46 }
 0xbe3   : > { %27654 = vmatprep.mubr.f32.mxu0 %v36409_v34 }
 0xbe6   : > { %27655 = vmatmul.mubr.f32.gmra.mrb[84].mxu0 %v36403_v37 }
 0xbe7   : > { %27657 = vmatprep.mubr.f32.mxu0 %v36438_v26 }
 0xbea   : > { %27658 = vmatmul.mubr.f32.gmra.mrb[86].mxu0 %v36424_v27 }
 0xbeb   : > { %27660 = vmatprep.mubr.f32.mxu0 %v36467_v28  ;;  %v39881_v28 = vand.u32 4294901760, %v39858_v1 }
 0xbee   : > { %27661 = vmatmul.mubr.f32.gmra.mrb[88].mxu0 %v36454_v58  ;;  %v39880_v58 = vand.u32 4294901760, %v36240_v3 }
 0xbef   : > { %27663 = vmatprep.mubr.f32.mxu0 %v36485_v55  ;;  %v39879_v55 = vand.u32 4294901760, %v36216_v61 }
 0xbf2   : > { %27664 = vmatmul.mubr.f32.gmra.mrb[90].mxu0 %v36469_v49  ;;  %v39878_v49 = vand.u32 4294901760, %v36220_v57 }
 0xbf3   : > { %27666 = vmatprep.mubr.f32.mxu0 %v36510_v59  ;;  %v39877_v59 = vand.u32 4294901760, %v36195_v22 }
 0xbf6   : > { %27667 = vmatmul.mubr.f32.gmra.mrb[92].mxu0 %v36499_v8  ;;  %v39876_v8 = vand.u32 4294901760, %v36199_v50 }
 0xbf7   : > { %27669 = vmatprep.mubr.f32.mxu0 %v36529_v15  ;;  %v39875_v15 = vld [vmem:[#allocation69_spill] sm:$0xff] }
 0xbfa   : > { %27670 = vmatmul.mubr.f32.gmra.mrb[94].mxu0 %v36525_v56  ;;  %v39874_v56 = vld [vmem:[#allocation56_spill] sm:$0xff] }
 0xbfb   : > { %27676 = vmatprep.mubr.f32.mxu0 %v36199_v50  ;;  %v39882_v50 = vand.u32 4294901760, %v39859_v38 }
 0xbfe   : > { %27677 = vmatmul.mubr.f32.vlgmr.msra.gmra.mrb[64].mxu0 %v36195_v22  ;;  %v39883_v22 = vand.u32 4294901760, %v39860_v43 }
 0xbff   : > { %27679 = vmatprep.mubr.f32.mxu0 %v36220_v57  ;;  %28207 = vmatpush3.bf16.msra.mxu0 %v36081_v36  ;;  %v39884_v57 = vand.u32 4294901760, %v39861_v44 }
 0xc00   : > { %28209 = vmatprep.subr.bf16.mxu0 %v28208_v39 }
 0xc02   : > { %27680 = vmatmul.mubr.f32.gmra.mrb[66].mxu0 %v36216_v61  ;;  %v39886_v61 = vand.u32 4294901760, %v39863_v17 }
 0xc03   : > { %27682 = vmatprep.mubr.f32.mxu0 %v36240_v3  ;;  %v39887_v3 = vand.u32 4294901760, %v39864_v21 }
 0xc06   : > { %27683 = vmatmul.mubr.f32.gmra.mrb[68].mxu0 %v39858_v1  ;;  %v39894_v1 = vand.u32 4294901760, %v39871_v31 }
 0xc07   : > { %27685 = vmatprep.mubr.f32.mxu0 %v39859_v38  ;;  %v39895_v38 = vand.u32 4294901760, %v39872_v2 }
 0xc0a   : > { %27686 = vmatmul.mubr.f32.gmra.mrb[70].mxu0 %v39860_v43  ;;  %v39896_v43 = vand.u32 4294901760, %v36421_v11 }
 0xc0b   : > { %27688 = vmatprep.mubr.f32.mxu0 %v39861_v44  ;;  %v39897_v44 = vand.u32 4294901760, %v36416_v51 }
 0xc0e   : > { %27689 = vmatmul.mubr.f32.gmra.mrb[72].mxu0 %v39862_v40 }
 0xc0f   : > { %27691 = vmatprep.mubr.f32.mxu0 %v39863_v17  ;;  %v39899_v17 = vand.u32 4294901760, %v39873_v24 }
 0xc12   : > { %27692 = vmatmul.mubr.f32.gmra.mrb[74].mxu0 %v39864_v21 }
 0xc13   : > { %27694 = vmatprep.mubr.f32.mxu0 %v39865_v23 }
 0xc16   : > { %27695 = vmatmul.mubr.f32.gmra.mrb[76].mxu0 %v39866_v42 }
 0xc17   : > { %27697 = vmatprep.mubr.f32.mxu0 %v39867_v16 }
 0xc1a   : > { %27698 = vmatmul.mubr.f32.gmra.mrb[78].mxu0 %v39868_v13 }
 0xc1b   : > { %27700 = vmatprep.mubr.f32.mxu0 %v39869_v5 }
 0xc1e   : > { %27701 = vmatmul.mubr.f32.gmra.mrb[80].mxu0 %v39870_v14 }
 0xc1f   : > { %27703 = vmatprep.mubr.f32.mxu0 %v39871_v31  ;;  %v39901_v31 = vand.u32 4294901760, %v39874_v56 }
 0xc22   : > { %27704 = vmatmul.mubr.f32.gmra.mrb[82].mxu0 %v39872_v2  ;;  %v39902_v2 = vand.u32 4294901760, %v39875_v15 }
 0xc23   : > { %27706 = vmatprep.mubr.f32.mxu0 %v36421_v11  ;;  %v39903_v11 = vand.u32 4294901760, %v36481_v4 }
 0xc26   : > { %27707 = vmatmul.mubr.f32.gmra.mrb[84].mxu0 %v36416_v51  ;;  %v39904_v51 = vand.u32 4294901760, %v36520_v29 }
 0xc27   : > { %27709 = vmatprep.mubr.f32.mxu0 %v36449_v62 }
 0xc2a   : > { %27710 = vmatmul.mubr.f32.gmra.mrb[86].mxu0 %v39873_v24  ;;  %v39906_v24 = vand.u32 4294901760, %v36542_v60 }
 0xc2b   : > { %27712 = vmatprep.mubr.f32.mxu0 %v36478_v63 }
 0xc2e   : > { %27713 = vmatmul.mubr.f32.gmra.mrb[88].mxu0 %v39874_v56  ;;  %v39913_v56 = vld [vmem:[#allocation71_spill] sm:$0xff] }
 0xc2f   : > { %27715 = vmatprep.mubr.f32.mxu0 %v39875_v15  ;;  %v39910_v15 = vld [vmem:[#allocation77_spill] sm:$0xff] }
 0xc32   : > { %27716 = vmatmul.mubr.f32.gmra.mrb[90].mxu0 %v36481_v4  ;;  %v39909_v4 = vld [vmem:[#allocation43_spill] sm:$0xff] }
 0xc33   : > { %27718 = vmatprep.mubr.f32.mxu0 %v36520_v29  ;;  %v39912_v29 = vld [vmem:[#allocation72_spill] sm:$0xff] }
 0xc36   : > { %27719 = vmatmul.mubr.f32.gmra.mrb[92].mxu0 %v36514_v30 }
 0xc37   : > { %27721 = vmatprep.mubr.f32.mxu0 %v36542_v60  ;;  %v39915_v60 = vld [vmem:[#allocation79_spill] sm:$0xff] }
 0xc3a   : > { %27722 = vmatmul.mubr.f32.gmra.mrb[94].mxu0 %v36545_v48 }
 0xc3b   : > { %27728 = vmatprep.mubr.f32.mxu0 %v39876_v8  ;;  %v39891_v8 = vand.u32 4294901760, %v39868_v13 }
 0xc3e   : > { %27729 = vmatmul.mubr.f32.vlgmr.msra.gmra.mrb[64].mxu0 %v39877_v59  ;;  %v39892_v59 = vand.u32 4294901760, %v39869_v5 }
 0xc3f   : > { %27731 = vmatprep.mubr.f32.mxu0 %v39878_v49  ;;  %28211 = vmatpush3.bf16.msra.mxu0 %v28208_v39  ;;  %v39885_v49 = vand.u32 4294901760, %v39862_v40  ;;  %v39893_v39 = vand.u32 4294901760, %v39870_v14  ;;  %v39898_v40 = vand.u32 4294901760, %v36449_v62  ;;  %v39900_v14 = vand.u32 4294901760, %v36478_v63 }
 0xc40   : > { %28213 = vmatprep.subr.bf16.mxu0 %v36081_v36  ;;  %v39905_v62 = vand.u32 4294901760, %v36514_v30  ;;  %v39907_v63 = vand.u32 4294901760, %v36545_v48  ;;  %v39911_v30 = vld [vmem:[#allocation76_spill] sm:$0xff]  ;;  %v39914_v48 = vld [vmem:[#allocation81_spill] sm:$0xff] }
 0xc42   : > { %27732 = vmatmul.mubr.f32.gmra.mrb[66].mxu0 %v39879_v55  ;;  %v39890_v55 = vand.u32 4294901760, %v39867_v16  ;;  %v30312_v16 = vld [vmem:[%s30457_s22 + $0x20] sm:$0xff] }
 0xc43   : > { %27734 = vmatprep.mubr.f32.mxu0 %v39880_v58  ;;  %v39888_v58 = vand.u32 4294901760, %v39865_v23  ;;  %v30311_v23 = vld [vmem:[%s30457_s22 + $0x28] sm:$0xff] }
 0xc46   : > { %27735 = vmatmul.mubr.f32.gmra.mrb[68].mxu0 %v39881_v28  ;;  %v39889_v28 = vand.u32 4294901760, %v39866_v42 }
 0xc47   : > { %27737 = vmatprep.mubr.f32.mxu0 %v39882_v50 }
 0xc4a   : > { %27738 = vmatmul.mubr.f32.gmra.mrb[70].mxu0 %v39883_v22 }
 0xc4b   : > { %27740 = vmatprep.mubr.f32.mxu0 %v39884_v57 }
 0xc4e   : > { %27741 = vmatmul.mubr.f32.gmra.mrb[72].mxu0 %v39885_v49 }
 0xc4f   : > { %27743 = vmatprep.mubr.f32.mxu0 %v39886_v61 }
 0xc52   : > { %27744 = vmatmul.mubr.f32.gmra.mrb[74].mxu0 %v39887_v3  ;;  %v30313_v3 = vld [vmem:[%s30457_s22 + $0x38] sm:$0xff] }
 0xc53   : > { %27746 = vmatprep.mubr.f32.mxu0 %v39888_v58 }
 0xc56   : > { %27747 = vmatmul.mubr.f32.gmra.mrb[76].mxu0 %v39889_v28  ;;  %v30314_v28 = vld [vmem:[%s30457_s22 + $0x30] sm:$0xff] }
 0xc57   : > { %27749 = vmatprep.mubr.f32.mxu0 %v39890_v55 }
 0xc5a   : > { %27750 = vmatmul.mubr.f32.gmra.mrb[78].mxu0 %v39891_v8 }
 0xc5b   : > { %27752 = vmatprep.mubr.f32.mxu0 %v39892_v59 }
 0xc5e   : > { %27753 = vmatmul.mubr.f32.gmra.mrb[80].mxu0 %v39893_v39 }
 0xc5f   : > { %27755 = vmatprep.mubr.f32.mxu0 %v39894_v1 }
 0xc62   : > { %27756 = vmatmul.mubr.f32.gmra.mrb[82].mxu0 %v39895_v38 }
 0xc63   : > { %27758 = vmatprep.mubr.f32.mxu0 %v39896_v43 }
 0xc66   : > { %27759 = vmatmul.mubr.f32.gmra.mrb[84].mxu0 %v39897_v44  ;;  %v30315_v44 = vld [vmem:[%s30457_s22 + $0x48] sm:$0xff] }
 0xc67   : > { %27761 = vmatprep.mubr.f32.mxu0 %v39898_v40 }
 0xc6a   : > { %27762 = vmatmul.mubr.f32.gmra.mrb[86].mxu0 %v39899_v17  ;;  %v30316_v17 = vld [vmem:[%s30457_s22 + $0x40] sm:$0xff] }
 0xc6b   : > { %27764 = vmatprep.mubr.f32.mxu0 %v39900_v14 }
 0xc6e   : > { %27765 = vmatmul.mubr.f32.gmra.mrb[88].mxu0 %v39901_v31 }
 0xc6f   : > { %27767 = vmatprep.mubr.f32.mxu0 %v39902_v2 }
 0xc72   : > { %27768 = vmatmul.mubr.f32.gmra.mrb[90].mxu0 %v39903_v11 }
 0xc73   : > { %27770 = vmatprep.mubr.f32.mxu0 %v39904_v51 }
 0xc76   : > { %27771 = vmatmul.mubr.f32.gmra.mrb[92].mxu0 %v39905_v62 }
 0xc77   : > { %27773 = vmatprep.mubr.f32.mxu0 %v39906_v24 }
 0xc7a   : > { %27774 = vmatmul.mubr.f32.gmra.mrb[94].mxu0 %v39907_v63  ;;  %v30317_v63 = vld [vmem:[%s30457_s22 + $0x58] sm:$0xff] }
 0xc7b   : > { %27780 = vmatprep.mubr.f32.mxu0 %v36191_v41 }
 0xc7e   : > { %27781 = vmatmul.mubr.f32.vlgmr.msra.gmra.mrb[64].mxu0 %v36187_v18 }
 0xc7f   : > { %27783 = vmatprep.mubr.f32.mxu0 %v36208_v10  ;;  %28215 = vmatpush3.bf16.msra.mxu0 %v36081_v36  ;;  %v39908_v36 = vld [vmem:[#allocation133_spill] sm:$0xff] }
 0xc82   : > { %27784 = vmatmul.mubr.f32.gmra.mrb[66].mxu0 %v36204_v9 }
 0xc83   : > { %27786 = vmatprep.mubr.f32.mxu0 %v36231_v32 }
 0xc86   : > { %27787 = vmatmul.mubr.f32.gmra.mrb[68].mxu0 %v36227_v0 }
 0xc87   : > { %27789 = vmatprep.mubr.f32.mxu0 %v36252_v54 }
 0xc8a   : > { %27790 = vmatmul.mubr.f32.gmra.mrb[70].mxu0 %v36245_v45 }
 0xc8b   : > { %27792 = vmatprep.mubr.f32.mxu0 %v36274_v52 }
 0xc8e   : > { %27793 = vmatmul.mubr.f32.gmra.mrb[72].mxu0 %v36269_v35 }
 0xc8f   : > { %27795 = vmatprep.mubr.f32.mxu0 %v36297_v33 }
 0xc92   : > { %27796 = vmatmul.mubr.f32.gmra.mrb[74].mxu0 %v36293_v19 }
 0xc93   : > { %27798 = vmatprep.mubr.f32.mxu0 %v36318_v7 }
 0xc96   : > { %27799 = vmatmul.mubr.f32.gmra.mrb[76].mxu0 %v36311_v53 }
 0xc97   : > { %27801 = vmatprep.mubr.f32.mxu0 %v36338_v12 }
 0xc9a   : > { %27802 = vmatmul.mubr.f32.gmra.mrb[78].mxu0 %v36333_v20 }
 0xc9b   : > { %27804 = vmatprep.mubr.f32.mxu0 %v36361_v25 }
 0xc9e   : > { %27805 = vmatmul.mubr.f32.gmra.mrb[80].mxu0 %v36357_v47 }
 0xc9f   : > { %27807 = vmatprep.mubr.f32.mxu0 %v36384_v6 }
 0xca2   : > { %27808 = vmatmul.mubr.f32.gmra.mrb[82].mxu0 %v36377_v46 }
 0xca3   : > { %27810 = vmatprep.mubr.f32.mxu0 %v36409_v34 }
 0xca6   : > { %27811 = vmatmul.mubr.f32.gmra.mrb[84].mxu0 %v36403_v37 }
 0xca7   : > { %27813 = vmatprep.mubr.f32.mxu0 %v36438_v26 }
 0xcaa   : > { %27814 = vmatmul.mubr.f32.gmra.mrb[86].mxu0 %v36424_v27 }
 0xcab   : > { %27816 = vmatprep.mubr.f32.mxu0 %v39908_v36 }
 0xcae   : > { %27817 = vmatmul.mubr.f32.gmra.mrb[88].mxu0 %v39909_v4 }
 0xcaf   : > { %27819 = vmatprep.mubr.f32.mxu0 %v39910_v15 }
 0xcb2   : > { %27820 = vmatmul.mubr.f32.gmra.mrb[90].mxu0 %v39911_v30 }
 0xcb3   : > { %27822 = vmatprep.mubr.f32.mxu0 %v39912_v29 }
 0xcb6   : > { %27823 = vmatmul.mubr.f32.gmra.mrb[92].mxu0 %v39913_v56 }
 0xcb7   : > { %27825 = vmatprep.mubr.f32.mxu0 %v39914_v48 }
 0xcba   : > { %27826 = vmatmul.mubr.f32.gmra.mrb[94].mxu0 %v39915_v60 }
 0xcbb   : > { %27832 = vmatprep.mubr.f32.mxu0 %v36191_v41 }
 0xcbe   : > { %27833 = vmatmul.mubr.f32.vlgmr.msra.gmra.mrb[64].mxu0 %v36187_v18 }
 0xcbf   : > { %27835 = vmatprep.mubr.f32.mxu0 %v36208_v10 }
 0xcc2   : > { %27836 = vmatmul.mubr.f32.gmra.mrb[66].mxu0 %v36204_v9 }
 0xcc3   : > { %27838 = vmatprep.mubr.f32.mxu0 %v36231_v32 }
 0xcc6   : > { %27839 = vmatmul.mubr.f32.gmra.mrb[68].mxu0 %v36227_v0  ;;  %v30307_v0 = vld [vmem:[%s30457_s22 + $0x8] sm:$0xff] }
 0xcc7   : > { %27841 = vmatprep.mubr.f32.mxu0 %v36252_v54 }
 0xcca   : > { %27842 = vmatmul.mubr.f32.gmra.mrb[70].mxu0 %v36245_v45  ;;  %v30308_v45 = vld [vmem:[%s30457_s22] sm:$0xff] }
 0xccb   : > { %27844 = vmatprep.mubr.f32.mxu0 %v36274_v52 }
 0xcce   : > { %27845 = vmatmul.mubr.f32.gmra.mrb[72].mxu0 %v36269_v35 }
 0xccf   : > { %27847 = vmatprep.mubr.f32.mxu0 %v36297_v33 }
 0xcd2   : > { %27848 = vmatmul.mubr.f32.gmra.mrb[74].mxu0 %v36293_v19 }
 0xcd3   : > { %27850 = vmatprep.mubr.f32.mxu0 %v36318_v7  ;;  %v30309_v7 = vld [vmem:[%s30457_s22 + $0x18] sm:$0xff] }
 0xcd6   : > { %27851 = vmatmul.mubr.f32.gmra.mrb[76].mxu0 %v36311_v53 }
 0xcd7   : > { %27853 = vmatprep.mubr.f32.mxu0 %v36338_v12  ;;  %v30310_v12 = vld [vmem:[%s30457_s22 + $0x10] sm:$0xff] }
 0xcda   : > { %27854 = vmatmul.mubr.f32.gmra.mrb[78].mxu0 %v36333_v20 }
 0xcdb   : > { %27856 = vmatprep.mubr.f32.mxu0 %v36361_v25 }
 0xcde   : > { %27857 = vmatmul.mubr.f32.gmra.mrb[80].mxu0 %v36357_v47 }
 0xcdf   : > { %27859 = vmatprep.mubr.f32.mxu0 %v36384_v6 }
 0xce2   : > { %27860 = vmatmul.mubr.f32.gmra.mrb[82].mxu0 %v36377_v46 }
 0xce3   : > { %27862 = vmatprep.mubr.f32.mxu0 %v36409_v34  ;;  %v36769_v34 = vld [vmem:[%s36915_s6] ss:$0 sm:$0xff] }
 0xce6   : > { %27863 = vmatmul.mubr.f32.gmra.mrb[84].mxu0 %v36403_v37 }
 0xce7   : > { %27865 = vmatprep.mubr.f32.mxu0 %v36438_v26 }
 0xcea   : > { %27866 = vmatmul.mubr.f32.gmra.mrb[86].mxu0 %v36424_v27 }
 0xceb   : > { %27868 = vmatprep.mubr.f32.mxu0 %v39908_v36 }
 0xcee   : > { %27869 = vmatmul.mubr.f32.gmra.mrb[88].mxu0 %v39909_v4  ;;  %v30318_v4 = vld [vmem:[%s30457_s22 + $0x50] sm:$0xff] }
 0xcef   : > { %27871 = vmatprep.mubr.f32.mxu0 %v39910_v15 }
 0xcf2   : > { %27872 = vmatmul.mubr.f32.gmra.mrb[90].mxu0 %v39911_v30 }
 0xcf3   : > { %27874 = vmatprep.mubr.f32.mxu0 %v39912_v29 }
 0xcf6   : > { %27875 = vmatmul.mubr.f32.gmra.mrb[92].mxu0 %v39913_v56 }
 0xcf7   : > { %27877 = vmatprep.mubr.f32.mxu0 %v39914_v48 }
 0xcfa   : > { %27878 = vmatmul.mubr.f32.gmra.mrb[94].mxu0 %v39915_v60 }
 0xd91   : > { %v27834_v18 = vpop.f32.mrb[64].mxu0 }
 0xd92   : > { %v28282_v41 = vadd.f32 %v27834_v18, %v36769_v34  ;;  %v21723_v9 = vpop.f32.mrb[65].mxu0 }
 0xd93   : > { %v28283_v10 = vadd.f32 %v36769_v34, %v21723_v9 }
 0xd94   : > { %v21914_v32 = vadd.f32 %v30307_v0, %v28282_v41  ;;  %v30319_v41 = vld [vmem:[%s30457_s22 + $0x68] sm:$0xff] }
 0xd95   : > { %v21913_v54 = vadd.f32 %v30308_v45, %v28283_v10  ;;  %v27837_v35 = vpop.f32.mrb[66].mxu0  ;;  %v30320_v10 = vld [vmem:[%s30457_s22 + $0x60] sm:$0xff] }
 0xd96   : > { %v21946_v52 = vmax.f32 %v21914_v32, 0.0  ;;  %v28284_v19 = vadd.f32 %v27837_v35, %v36769_v34  ;;  %v21735_v33 = vpop.f32.mrb[67].mxu0 }
 0xd97   : > { %v21945_v27 = vmax.f32 %v21913_v54, 0.0  ;;  %v28285_v53 = vadd.f32 %v36769_v34, %v21735_v33  ;;  %v30321_v33 = vld [vmem:[%s30457_s22 + $0x78] sm:$0xff] }
 0xd98   : > { %21978 = vst.msk [vmem:[%s36779_s12 + $0x8] sm:$0xff] %vm326_vm0, %v21946_v52  ;;  %v21916_v20 = vadd.f32 %v30309_v7, %v28284_v19 }
 0xd99   : > { %21977 = vst.msk [vmem:[%s36779_s12] sm:$0xff] %vm326_vm0, %v21945_v27  ;;  %v21915_v47 = vadd.f32 %v30310_v12, %v28285_v53  ;;  %v27840_v25 = vpop.f32.mrb[68].mxu0  ;;  %v30322_v53 = vld [vmem:[%s30457_s22 + $0x70] sm:$0xff] }
 0xd9a   : > { %v21948_v46 = vmax.f32 %v21916_v20, 0.0  ;;  %v28286_v6 = vadd.f32 %v27840_v25, %v36769_v34  ;;  %v21747_v37 = vpop.f32.mrb[69].mxu0 }
 0xd9b   : > { %v21947_v26 = vmax.f32 %v21915_v47, 0.0  ;;  %v28287_v21 = vadd.f32 %v36769_v34, %v21747_v37  ;;  %v30323_v37 = vld [vmem:[%s30457_s22 + $0x88] sm:$0xff] }
 0xd9c   : > { %21980 = vst.msk [vmem:[%s36779_s12 + $0x18] sm:$0xff] %vm326_vm0, %v21948_v46  ;;  %v21918_v42 = vadd.f32 %v30311_v23, %v28286_v6 }
 0xd9d   : > { %21979 = vst.msk [vmem:[%s36779_s12 + $0x10] sm:$0xff] %vm326_vm0, %v21947_v26  ;;  %v21917_v13 = vadd.f32 %v30312_v16, %v28287_v21  ;;  %v27843_v5 = vpop.f32.mrb[70].mxu0  ;;  %v30324_v21 = vld [vmem:[%s30457_s22 + $0x80] sm:$0xff] }
 0xd9e   : > { %v21950_v50 = vmax.f32 %v21918_v42, 0.0  ;;  %v28288_v22 = vadd.f32 %v27843_v5, %v36769_v34  ;;  %v21759_v57 = vpop.f32.mrb[71].mxu0 }
 0xd9f   : > { %v21949_v49 = vmax.f32 %v21917_v13, 0.0  ;;  %v28289_v61 = vadd.f32 %v36769_v34, %v21759_v57  ;;  %v30325_v57 = vld [vmem:[%s30457_s22 + $0x98] sm:$0xff] }
 0xda0   : > { %21982 = vst.msk [vmem:[%s36779_s12 + $0x28] sm:$0xff] %vm326_vm0, %v21950_v50  ;;  %v21920_v58 = vadd.f32 %v30313_v3, %v28288_v22 }
 0xda1   : > { %21981 = vst.msk [vmem:[%s36779_s12 + $0x20] sm:$0xff] %vm326_vm0, %v21949_v49  ;;  %v21919_v55 = vadd.f32 %v30314_v28, %v28289_v61  ;;  %v27846_v8 = vpop.f32.mrb[72].mxu0  ;;  %v30326_v61 = vld [vmem:[%s30457_s22 + $0x90] sm:$0xff] }
 0xda2   : > { %v21952_v59 = vmax.f32 %v21920_v58, 0.0  ;;  %v28290_v39 = vadd.f32 %v27846_v8, %v36769_v34  ;;  %v21771_v1 = vpop.f32.mrb[73].mxu0 }
 0xda3   : > { %v21951_v38 = vmax.f32 %v21919_v55, 0.0  ;;  %v28291_v43 = vadd.f32 %v36769_v34, %v21771_v1  ;;  %v30327_v1 = vld [vmem:[%s30457_s22 + $0xa8] sm:$0xff] }
 0xda4   : > { %21984 = vst.msk [vmem:[%s36779_s12 + $0x38] sm:$0xff] %vm326_vm0, %v21952_v59  ;;  %v21922_v40 = vadd.f32 %v30315_v44, %v28290_v39 }
 0xda5   : > { %21983 = vst.msk [vmem:[%s36779_s12 + $0x30] sm:$0xff] %vm326_vm0, %v21951_v38  ;;  %v21921_v14 = vadd.f32 %v30316_v17, %v28291_v43  ;;  %v27849_v31 = vpop.f32.mrb[74].mxu0  ;;  %v30328_v43 = vld [vmem:[%s30457_s22 + $0xa0] sm:$0xff] }
 0xda6   : > { %v21954_v2 = vmax.f32 %v21922_v40, 0.0  ;;  %v28292_v11 = vadd.f32 %v27849_v31, %v36769_v34  ;;  %v21783_v51 = vpop.f32.mrb[75].mxu0 }
 0xda7   : > { %v21953_v62 = vmax.f32 %v21921_v14, 0.0  ;;  %v28293_v24 = vadd.f32 %v36769_v34, %v21783_v51  ;;  %v30329_v51 = vld [vmem:[%s30457_s22 + $0xb8] sm:$0xff] }
 0xda8   : > { %21986 = vst.msk [vmem:[%s36779_s12 + $0x48] sm:$0xff] %vm326_vm0, %v21954_v2  ;;  %v21924_v36 = vadd.f32 %v30317_v63, %v28292_v11 }
 0xda9   : > { %21985 = vst.msk [vmem:[%s36779_s12 + $0x40] sm:$0xff] %vm326_vm0, %v21953_v62  ;;  %v21923_v15 = vadd.f32 %v30318_v4, %v28293_v24  ;;  %v27852_v30 = vpop.f32.mrb[76].mxu0  ;;  %v30330_v24 = vld [vmem:[%s30457_s22 + $0xb0] sm:$0xff] }
 0xdaa   : > { %v21956_v29 = vmax.f32 %v21924_v36, 0.0  ;;  %v28294_v56 = vadd.f32 %v27852_v30, %v36769_v34  ;;  %v21795_v48 = vpop.f32.mrb[77].mxu0 }
 0xdab   : > { %v21955_v60 = vmax.f32 %v21923_v15, 0.0  ;;  %v28295_v18 = vadd.f32 %v36769_v34, %v21795_v48  ;;  %v30331_v48 = vld [vmem:[%s30457_s22 + $0xc8] sm:$0xff] }
 0xdac   : > { %21988 = vst.msk [vmem:[%s36779_s12 + $0x58] sm:$0xff] %vm326_vm0, %v21956_v29  ;;  %v21926_v9 = vadd.f32 %v30319_v41, %v28294_v56 }
 0xdad   : > { %21987 = vst.msk [vmem:[%s36779_s12 + $0x50] sm:$0xff] %vm326_vm0, %v21955_v60  ;;  %v21925_v0 = vadd.f32 %v30320_v10, %v28295_v18  ;;  %v27855_v32 = vpop.f32.mrb[78].mxu0  ;;  %v30332_v18 = vld [vmem:[%s30457_s22 + $0xc0] sm:$0xff] }
 0xdae   : > { %v21958_v45 = vmax.f32 %v21926_v9, 0.0  ;;  %v28296_v54 = vadd.f32 %v27855_v32, %v36769_v34  ;;  %v21807_v35 = vpop.f32.mrb[79].mxu0 }
 0xdaf   : > { %v21957_v52 = vmax.f32 %v21925_v0, 0.0  ;;  %v28297_v19 = vadd.f32 %v36769_v34, %v21807_v35  ;;  %v30333_v35 = vld [vmem:[%s30457_s22 + $0xd8] sm:$0xff] }
 0xdb0   : > { %21990 = vst.msk [vmem:[%s36779_s12 + $0x68] sm:$0xff] %vm326_vm0, %v21958_v45  ;;  %v21928_v27 = vadd.f32 %v30321_v33, %v28296_v54 }
 0xdb1   : > { %21989 = vst.msk [vmem:[%s36779_s12 + $0x60] sm:$0xff] %vm326_vm0, %v21957_v52  ;;  %v21927_v7 = vadd.f32 %v30322_v53, %v28297_v19  ;;  %v27858_v20 = vpop.f32.mrb[80].mxu0  ;;  %v30334_v19 = vld [vmem:[%s30457_s22 + $0xd0] sm:$0xff] }
 0xdb2   : > { %v21960_v12 = vmax.f32 %v21928_v27, 0.0  ;;  %v28298_v47 = vadd.f32 %v27858_v20, %v36769_v34  ;;  %v21819_v25 = vpop.f32.mrb[81].mxu0 }
 0xdb3   : > { %v21959_v46 = vmax.f32 %v21927_v7, 0.0  ;;  %v28299_v6 = vadd.f32 %v36769_v34, %v21819_v25  ;;  %v30335_v25 = vld [vmem:[%s30457_s22 + $0xe8] sm:$0xff] }
 0xdb4   : > { %21992 = vst.msk [vmem:[%s36779_s12 + $0x78] sm:$0xff] %vm326_vm0, %v21960_v12  ;;  %v21930_v26 = vadd.f32 %v30323_v37, %v28298_v47 }
 0xdb5   : > { %21991 = vst.msk [vmem:[%s36779_s12 + $0x70] sm:$0xff] %vm326_vm0, %v21959_v46  ;;  %v21929_v23 = vadd.f32 %v30324_v21, %v28299_v6  ;;  %v27861_v42 = vpop.f32.mrb[82].mxu0  ;;  %v30336_v6 = vld [vmem:[%s30457_s22 + $0xe0] sm:$0xff] }
 0xdb6   : > { %v21962_v16 = vmax.f32 %v21930_v26, 0.0  ;;  %v28300_v13 = vadd.f32 %v27861_v42, %v36769_v34  ;;  %v21831_v5 = vpop.f32.mrb[83].mxu0 }
 0xdb7   : > { %v21961_v50 = vmax.f32 %v21929_v23, 0.0  ;;  %v28301_v22 = vadd.f32 %v36769_v34, %v21831_v5  ;;  %v30337_v5 = vld [vmem:[%s30457_s22 + $0xf8] sm:$0xff] }
 0xdb8   : > { %21994 = vst.msk [vmem:[%s36779_s12 + $0x88] sm:$0xff] %vm326_vm0, %v21962_v16  ;;  %v21932_v49 = vadd.f32 %v30325_v57, %v28300_v13 }
 0xdb9   : > { %21993 = vst.msk [vmem:[%s36779_s12 + $0x80] sm:$0xff] %vm326_vm0, %v21961_v50  ;;  %v21931_v3 = vadd.f32 %v30326_v61, %v28301_v22  ;;  %v27864_v58 = vpop.f32.mrb[84].mxu0  ;;  %v30338_v22 = vld [vmem:[%s30457_s22 + $0xf0] sm:$0xff] }
 0xdba   : > { %v21964_v28 = vmax.f32 %v21932_v49, 0.0  ;;  %v28302_v55 = vadd.f32 %v27864_v58, %v36769_v34  ;;  %v21843_v8 = vpop.f32.mrb[85].mxu0 }
 0xdbb   : > { %v21963_v59 = vmax.f32 %v21931_v3, 0.0  ;;  %v28303_v39 = vadd.f32 %v36769_v34, %v21843_v8 }
 0xdbc   : > { %21996 = vst.msk [vmem:[%s36779_s12 + $0x98] sm:$0xff] %vm326_vm0, %v21964_v28  ;;  %v21934_v38 = vadd.f32 %v30327_v1, %v28302_v55 }
 0xdbd   : > { %21995 = vst.msk [vmem:[%s36779_s12 + $0x90] sm:$0xff] %vm326_vm0, %v21963_v59  ;;  %v21933_v44 = vadd.f32 %v30328_v43, %v28303_v39  ;;  %v27867_v40 = vpop.f32.mrb[86].mxu0 }
 0xdbe   : > { %v21966_v17 = vmax.f32 %v21934_v38, 0.0  ;;  %v28304_v14 = vadd.f32 %v27867_v40, %v36769_v34  ;;  %v21855_v31 = vpop.f32.mrb[87].mxu0 }
 0xdbf   : > { %v21965_v2 = vmax.f32 %v21933_v44, 0.0  ;;  %v28305_v11 = vadd.f32 %v36769_v34, %v21855_v31 }
 0xdc0   : > { %21998 = vst.msk [vmem:[%s36779_s12 + $0xa8] sm:$0xff] %vm326_vm0, %v21966_v17  ;;  %v21936_v62 = vadd.f32 %v30329_v51, %v28304_v14 }
 0xdc1   : > { %21997 = vst.msk [vmem:[%s36779_s12 + $0xa0] sm:$0xff] %vm326_vm0, %v21965_v2  ;;  %v21935_v63 = vadd.f32 %v30330_v24, %v28305_v11  ;;  %v27870_v36 = vpop.f32.mrb[88].mxu0 }
 0xdc2   : > { %v21968_v4 = vmax.f32 %v21936_v62, 0.0  ;;  %v28306_v15 = vadd.f32 %v27870_v36, %v36769_v34  ;;  %v21867_v30 = vpop.f32.mrb[89].mxu0 }
 0xdc3   : > { %v21967_v29 = vmax.f32 %v21935_v63, 0.0  ;;  %v28307_v56 = vadd.f32 %v36769_v34, %v21867_v30 }
 0xdc4   : > { %22000 = vst.msk [vmem:[%s36779_s12 + $0xb8] sm:$0xff] %vm326_vm0, %v21968_v4  ;;  %v21938_v60 = vadd.f32 %v30331_v48, %v28306_v15 }
 0xdc5   : > { %21999 = vst.msk [vmem:[%s36779_s12 + $0xb0] sm:$0xff] %vm326_vm0, %v21967_v29  ;;  %v21937_v41 = vadd.f32 %v30332_v18, %v28307_v56  ;;  %v27873_v9 = vpop.f32.mrb[90].mxu0 }
 0xdc6   : > { %v21970_v10 = vmax.f32 %v21938_v60, 0.0  ;;  %v28308_v0 = vadd.f32 %v27873_v9, %v36769_v34  ;;  %v21879_v32 = vpop.f32.mrb[91].mxu0 }
 0xdc7   : > { %v21969_v45 = vmax.f32 %v21937_v41, 0.0  ;;  %v28309_v54 = vadd.f32 %v36769_v34, %v21879_v32 }
 0xdc8   : > { %22002 = vst.msk [vmem:[%s36779_s12 + $0xc8] sm:$0xff] %vm326_vm0, %v21970_v10  ;;  %v21940_v52 = vadd.f32 %v30333_v35, %v28308_v0 }
 0xdc9   : > { %22001 = vst.msk [vmem:[%s36779_s12 + $0xc0] sm:$0xff] %vm326_vm0, %v21969_v45  ;;  %v21939_v33 = vadd.f32 %v30334_v19, %v28309_v54  ;;  %v27876_v27 = vpop.f32.mrb[92].mxu0 }
 0xdca   : > { %v21972_v53 = vmax.f32 %v21940_v52, 0.0  ;;  %v28310_v7 = vadd.f32 %v27876_v27, %v36769_v34  ;;  %v21891_v20 = vpop.f32.mrb[93].mxu0 }
 0xdcb   : > { %v21971_v12 = vmax.f32 %v21939_v33, 0.0  ;;  %v28311_v47 = vadd.f32 %v36769_v34, %v21891_v20 }
 0xdcc   : > { %22004 = vst.msk [vmem:[%s36779_s12 + $0xd8] sm:$0xff] %vm326_vm0, %v21972_v53  ;;  %v21942_v46 = vadd.f32 %v30335_v25, %v28310_v7 }
 0xdcd   : > { %22003 = vst.msk [vmem:[%s36779_s12 + $0xd0] sm:$0xff] %vm326_vm0, %v21971_v12  ;;  %v21941_v37 = vadd.f32 %v30336_v6, %v28311_v47  ;;  %v27879_v26 = vpop.f32.mrb[94].mxu0 }
 0xdce   : > { %v21974_v21 = vmax.f32 %v21942_v46, 0.0  ;;  %v28312_v23 = vadd.f32 %v27879_v26, %v36769_v34  ;;  %v21903_v42 = vpop.f32.mrb[95].mxu0 }
 0xdcf   : > { %v21973_v16 = vmax.f32 %v21941_v37, 0.0  ;;  %v28313_v13 = vadd.f32 %v36769_v34, %v21903_v42 }
 0xdd0   : > { %22006 = vst.msk [vmem:[%s36779_s12 + $0xe8] sm:$0xff] %vm326_vm0, %v21974_v21  ;;  %v21944_v50 = vadd.f32 %v30337_v5, %v28312_v23 }
 0xdd1   : > { %22005 = vst.msk [vmem:[%s36779_s12 + $0xe0] sm:$0xff] %vm326_vm0, %v21973_v16  ;;  %v21943_v57 = vadd.f32 %v30338_v22, %v28313_v13 }
 0xdd2   : > { %v21976_v49 = vmax.f32 %v21944_v50, 0.0 }
 0xdd3   : > { %v21975_v61 = vmax.f32 %v21943_v57, 0.0 }
 0xdd4   : > { %22008 = vst.msk [vmem:[%s36779_s12 + $0xf8] sm:$0xff] %vm326_vm0, %v21976_v49 }
 0xdd5   : > { %22007 = vst.msk [vmem:[%s36779_s12 + $0xf0] sm:$0xff] %vm326_vm0, %v21975_v61 }
 0xdd6 PF: > { %s17_s24 = sadd.s32 1, %s30345_s24  }
 0xdd7   : > { %p14_p4 = scmp.ge.s32.totalorder %s17_s24, 4  }
 0xdd9   :  { %16 = sbr.rel (!%p14_p4) target bundleno = 1 (0x1), region = 88 }

</bundles_post_ra>
